<compile_context>
chip_gen: v7x
topology: tpu7x:2x2x1
jax: 0.10.0
libtpu: 0.0.40
codegen_flags: <defaults>
</compile_context>

<pallas_src>
import functools

import jax
import jax.numpy as jnp
from jax import lax
from jax.experimental import pallas as pl
from jax.experimental.pallas import tpu as pltpu

EPS = 1e-5   # nn.InstanceNorm2d default eps (affine=False, no running stats)
LANES = 128


def _reflect_pad1(a):
    # a: (H, W, C) -> (H+2, W+2, C), matches nn.ReflectionPad2d(1)
    a = jnp.concatenate([a[1:2], a, a[-2:-1]], axis=0)
    a = jnp.concatenate([a[:, 1:2], a, a[:, -2:-1]], axis=1)
    return a


def _instance_norm(h, inv_n):
    # h: (H*W, Cp) f32 -- per-channel norm over spatial positions, one pass.
    s = jnp.sum(h, axis=0, keepdims=True)
    s2 = jnp.sum(h * h, axis=0, keepdims=True)
    mean = s * inv_n
    var = jnp.maximum(s2 * inv_n - mean * mean, 0.0)
    return (h - mean) * lax.rsqrt(var + EPS)


def _conv3x3(pad_ref, w_ref, h_ref, *, rows, n_chunks):
    """3x3 VALID conv of the reflect-padded bf16 activation in `pad_ref`.

    Chunked im2col: each chunk of `rows` output rows becomes one
    (rows*W, 9*C) @ (9*C, C) MXU matmul (bf16 in, f32 accumulate) whose result
    is stored into the resident (H*W, C) f32 scratch `h_ref`.  Only one small
    im2col buffer is live at a time, bounding peak VMEM.
    """
    W = pad_ref.shape[1] - 2
    C = pad_ref.shape[2]
    cw = rows * W
    w = w_ref[...]                                    # (9*C, C) bf16, hoisted

    def body(ci, carry):
        r0 = pl.multiple_of(ci * rows, rows)          # top padded row of chunk
        taps = [
            pad_ref[pl.ds(r0 + dy, rows), pl.ds(dx, W), :].reshape(cw, C)
            for dy in range(3) for dx in range(3)
        ]
        p = jnp.concatenate(taps, axis=1)             # (cw, 9*C) bf16
        row0 = pl.multiple_of(ci * cw, cw)
        h_ref[pl.ds(row0, cw), :] = jnp.dot(
            p, w, preferred_element_type=jnp.float32)
        return carry

    lax.fori_loop(0, n_chunks, body, 0)


def residual_block_kernel(x_ref, w1_ref, w2_ref, o_ref, pad_ref, h_ref, *,
                          rows, n_chunks):
    H, W, C = x_ref.shape                    # C is the lane-padded channel count
    inv_n = 1.0 / float(H * W)

    # ---- conv1: in-kernel ReflectionPad2d(1) + chunked im2col matmul ----
    pad_ref[...] = _reflect_pad1(x_ref[...])                     # bf16 pad copy
    _conv3x3(pad_ref, w1_ref, h_ref, rows=rows, n_chunks=n_chunks)
    h = jnp.maximum(_instance_norm(h_ref[...], inv_n), 0.0)      # IN + ReLU, f32

    # ---- conv2: pad the intermediate (reuse the same pad scratch) ----
    pad_ref[...] = _reflect_pad1(h.astype(jnp.bfloat16).reshape(H, W, C))
    _conv3x3(pad_ref, w2_ref, h_ref, rows=rows, n_chunks=n_chunks)
    h = _instance_norm(h_ref[...], inv_n)

    # ---- residual add in f32 (input block upcast from bf16) ----
    x = x_ref[...].astype(jnp.float32).reshape(H * W, C)
    o_ref[...] = (x + h).reshape(H, W, C).astype(o_ref.dtype)


def _pick_rows_per_chunk(H, W, target_px=1024):
    """Largest divisor of H whose chunk (rows*W pixels) stays <= ~1K rows of
    im2col, so the transient (rows*W, 9*Cp) buffer stays small."""
    best = 1
    for d in range(1, H + 1):
        if H % d == 0 and d * W <= max(W, target_px):
            best = d
    return best


def _vmem_limit_bytes(H, W, Cp, rows):
    # Derived from actual block / scratch / transient shapes (bytes), plus
    # headroom; clamped so v5e/v6e whole-image blocks keep pipelining.
    px, ppx, cpx = H * W, (H + 2) * (W + 2), rows * W
    blocks = (2 * px * Cp * 2                # input block, bf16, double-buffered
              + 2 * px * Cp * 4              # output block, f32, double-buffered
              + 2 * 2 * 9 * Cp * Cp * 2)     # two weight blocks, bf16, 2 bufs
    scratch = ppx * Cp * 2 + px * Cp * 4     # pad_ref (bf16) + h_ref (f32)
    temps = (2 * px * Cp * 4                 # h value + normalized/residual f32
             + ppx * Cp * 2                  # padded intermediate value (bf16)
             + 2 * cpx * 9 * Cp * 2          # im2col chunk + taps (bf16)
             + cpx * Cp * 4)                 # chunk matmul result (f32)
    need = int(1.5 * (blocks + scratch + temps))
    return min(max(32 * 1024 * 1024, need), 96 * 1024 * 1024)


def residual_block(x_nchw, w1_oihw, b1, w2_oihw, b2):
    """PyTorch-facing wrapper: NCHW in, NCHW out.

    b1/b2 are accepted for API parity but are dead math: a per-channel bias
    added immediately before InstanceNorm2d(affine=False) is cancelled exactly
    by the mean subtraction, so they are not sent to the kernel at all.
    """
    del b1, b2
    B, C, H, W = x_nchw.shape
    Cp = ((C + LANES - 1) // LANES) * LANES   # lane-dense channel padding
    rows = _pick_rows_per_chunk(H, W)
    n_chunks = H // rows

    # NCHW -> NHWC, zero-pad channels to Cp lanes, bf16 for the HBM->VMEM DMA.
    x = jnp.transpose(x_nchw, (0, 2, 3, 1))
    x = jnp.pad(x, ((0, 0), (0, 0), (0, 0), (0, Cp - C))).astype(jnp.bfloat16)

    def prep_w(w_oihw):
        w = jnp.transpose(w_oihw, (2, 3, 1, 0))                     # HWIO
        w = jnp.pad(w, ((0, 0), (0, 0), (0, Cp - C), (0, Cp - C)))  # (3,3,Cp,Cp)
        return w.reshape(9 * Cp, Cp).astype(jnp.bfloat16)           # im2col layout

    kernel = functools.partial(residual_block_kernel, rows=rows,
                               n_chunks=n_chunks)

    out = pl.pallas_call(
        kernel,
        out_shape=jax.ShapeDtypeStruct((B, H, W, Cp), x_nchw.dtype),
        grid_spec=pltpu.PrefetchScalarGridSpec(
            num_scalar_prefetch=0,
            grid=(B,),
            in_specs=[
                pl.BlockSpec((None, H, W, Cp), lambda b: (b, 0, 0, 0)),
                pl.BlockSpec((9 * Cp, Cp), lambda b: (0, 0)),
                pl.BlockSpec((9 * Cp, Cp), lambda b: (0, 0)),
            ],
            out_specs=pl.BlockSpec((None, H, W, Cp), lambda b: (b, 0, 0, 0)),
            scratch_shapes=[
                pltpu.VMEM((H + 2, W + 2, Cp), jnp.bfloat16),  # shared pad buf
                pltpu.VMEM((H * W, Cp), jnp.float32),          # conv output
            ],
        ),
        compiler_params=pltpu.CompilerParams(
            dimension_semantics=("parallel",),
            vmem_limit_bytes=_vmem_limit_bytes(H, W, Cp, rows),
        ),
    )(x, prep_w(w1_oihw), prep_w(w2_oihw))

    # Strip channel padding, back to NCHW.
    return jnp.transpose(out[..., :C], (0, 3, 1, 2))


def reference(x_nchw, w1_oihw, b1, w2_oihw, b2):
    """Pure-JAX reference (matches the PyTorch module, biases included)."""
    def conv(x, w, b):
        xp = jnp.pad(x, ((0, 0), (0, 0), (1, 1), (1, 1)), mode="reflect")
        y = lax.conv_general_dilated(
            xp, w, (1, 1), "VALID",
            dimension_numbers=("NCHW", "OIHW", "NCHW"),
            precision=lax.Precision.HIGHEST)
        return y + b[None, :, None, None]

    def inorm(x):
        m = x.mean(axis=(2, 3), keepdims=True)
        v = ((x - m) ** 2).mean(axis=(2, 3), keepdims=True)
        return (x - m) / jnp.sqrt(v + EPS)

    h = jax.nn.relu(inorm(conv(x_nchw, w1_oihw, b1)))
    h = inorm(conv(h, w2_oihw, b2))
    return x_nchw + h


if __name__ == "__main__":
    B, C, H, W = 2, 4, 16, 16
    key = jax.random.PRNGKey(0)
    kx, kw1, kb1, kw2, kb2 = jax.random.split(key, 5)

    x = jax.random.normal(kx, (B, C, H, W), dtype=jnp.float32)
    # Synthetic parameters with nn.Conv2d(C, C, 3) shapes (OIHW weights).
    w1 = 0.1 * jax.random.normal(kw1, (C, C, 3, 3), dtype=jnp.float32)
    b1 = 0.1 * jax.random.normal(kb1, (C,), dtype=jnp.float32)
    w2 = 0.1 * jax.random.normal(kw2, (C, C, 3, 3), dtype=jnp.float32)
    b2 = 0.1 * jax.random.normal(kb2, (C,), dtype=jnp.float32)

    out = jax.block_until_ready(jax.jit(residual_block)(x, w1, b1, w2, b2))
    ref = jax.block_until_ready(reference(x, w1, b1, w2, b2))

    assert out.shape == (B, C, H, W)
    # Kernel feeds the MXU bf16 operands (f32 accumulate) and carries the
    # residual input as bf16; the reference is full-f32 HIGHEST-precision,
    # hence the relaxed tolerance.
    assert jnp.allclose(out, ref, atol=3e-2, rtol=3e-2)

    print("KERNEL_OK")
</pallas_src>

<mosaic_0001>
module attributes {stable_mosaic.version = 11 : i64} {
  func.func @residual_block_kernel(%arg0: i32, %arg1: memref<1x16x16x128xbf16, #tpu.memory_space<vmem>>, %arg2: memref<1152x128xbf16, #tpu.memory_space<vmem>>, %arg3: memref<1152x128xbf16, #tpu.memory_space<vmem>>, %arg4: memref<1x16x16x128xf32, #tpu.memory_space<vmem>>, %arg5: memref<18x18x128xbf16, #tpu.memory_space<vmem>>, %arg6: memref<256x128xf32, #tpu.memory_space<vmem>>) attributes {dimension_semantics = [#tpu.dimension_semantics<parallel>], iteration_bounds = array<i64: 2>, scalar_prefetch = 0 : i64, scratch_operands = 2 : i64, tpu.core_type = #tpu.core_type<tc>, window_params = [{transform_indices = @transform_0, window_bounds = array<i64: 1, 16, 16, 128>}, {pipeline_mode = #tpu.pipeline_mode<synchronous>, transform_indices = @transform_1, window_bounds = array<i64: 1152, 128>}, {pipeline_mode = #tpu.pipeline_mode<synchronous>, transform_indices = @transform_2, window_bounds = array<i64: 1152, 128>}, {transform_indices = @transform_3, window_bounds = array<i64: 1, 16, 16, 128>}]} {
    %c0 = arith.constant 0 : index
    %c0_0 = arith.constant 0 : index
    %c0_1 = arith.constant 0 : index
    %c0_2 = arith.constant 0 : index
    %0 = vector.load %arg1[%c0, %c0_0, %c0_1, %c0_2] : memref<1x16x16x128xbf16, #tpu.memory_space<vmem>>, vector<1x16x16x128xbf16>
    %1 = vector.shape_cast %0 : vector<1x16x16x128xbf16> to vector<16x16x128xbf16>
    %2 = vector.extract_strided_slice %1 {offsets = [1, 0, 0], sizes = [1, 16, 128], strides = [1, 1, 1]} : vector<16x16x128xbf16> to vector<1x16x128xbf16>
    %3 = vector.extract_strided_slice %1 {offsets = [14, 0, 0], sizes = [1, 16, 128], strides = [1, 1, 1]} : vector<16x16x128xbf16> to vector<1x16x128xbf16>
    %4 = tpu.concatenate %2, %1, %3 in 0 : vector<1x16x128xbf16>, vector<16x16x128xbf16>, vector<1x16x128xbf16> -> vector<18x16x128xbf16>
    %5 = vector.extract_strided_slice %4 {offsets = [0, 1, 0], sizes = [18, 1, 128], strides = [1, 1, 1]} : vector<18x16x128xbf16> to vector<18x1x128xbf16>
    %6 = vector.extract_strided_slice %4 {offsets = [0, 14, 0], sizes = [18, 1, 128], strides = [1, 1, 1]} : vector<18x16x128xbf16> to vector<18x1x128xbf16>
    %7 = tpu.concatenate %5, %4, %6 in 1 : vector<18x1x128xbf16>, vector<18x16x128xbf16>, vector<18x1x128xbf16> -> vector<18x18x128xbf16>
    %c0_3 = arith.constant 0 : index
    %c0_4 = arith.constant 0 : index
    %c0_5 = arith.constant 0 : index
    %8 = vector.load %arg5[%c0_3, %c0_4, %c0_5] : memref<18x18x128xbf16, #tpu.memory_space<vmem>>, vector<18x18x128xbf16>
    tpu.vector_store %arg5[%c0_3, %c0_4, %c0_5], %7 {strides = array<i32>} : memref<18x18x128xbf16, #tpu.memory_space<vmem>>, vector<18x18x128xbf16>,
    %c0_6 = arith.constant 0 : index
    %c0_7 = arith.constant 0 : index
    %9 = vector.load %arg2[%c0_6, %c0_7] : memref<1152x128xbf16, #tpu.memory_space<vmem>>, vector<1152x128xbf16>
    %c0_i32 = arith.constant 0 : i32
    %c16_i32 = arith.constant 16 : i32
    %10 = arith.muli %c0_i32, %c16_i32 : i32
    %11 = tpu.assume_multiple %10, 16 : i32
    %c0_i32_8 = arith.constant 0 : i32
    %12 = arith.addi %11, %c0_i32_8 : i32
    %13 = arith.index_cast %12 : i32 to index
    %c0_9 = arith.constant 0 : index
    %c0_10 = arith.constant 0 : index
    %14 = vector.load %arg5[%13, %c0_9, %c0_10] : memref<18x18x128xbf16, #tpu.memory_space<vmem>>, vector<16x16x128xbf16>
    %15 = vector.shape_cast %14 : vector<16x16x128xbf16> to vector<256x128xbf16>
    %c0_i32_11 = arith.constant 0 : i32
    %16 = arith.addi %11, %c0_i32_11 : i32
    %17 = arith.index_cast %16 : i32 to index
    %c1 = arith.constant 1 : index
    %c0_12 = arith.constant 0 : index
    %18 = vector.load %arg5[%17, %c1, %c0_12] : memref<18x18x128xbf16, #tpu.memory_space<vmem>>, vector<16x16x128xbf16>
    %19 = vector.shape_cast %18 : vector<16x16x128xbf16> to vector<256x128xbf16>
    %c0_i32_13 = arith.constant 0 : i32
    %20 = arith.addi %11, %c0_i32_13 : i32
    %21 = arith.index_cast %20 : i32 to index
    %c2 = arith.constant 2 : index
    %c0_14 = arith.constant 0 : index
    %22 = vector.load %arg5[%21, %c2, %c0_14] : memref<18x18x128xbf16, #tpu.memory_space<vmem>>, vector<16x16x128xbf16>
    %23 = vector.shape_cast %22 : vector<16x16x128xbf16> to vector<256x128xbf16>
    %c1_i32 = arith.constant 1 : i32
    %24 = arith.addi %11, %c1_i32 : i32
    %25 = arith.index_cast %24 : i32 to index
    %c0_15 = arith.constant 0 : index
    %c0_16 = arith.constant 0 : index
    %26 = vector.load %arg5[%25, %c0_15, %c0_16] : memref<18x18x128xbf16, #tpu.memory_space<vmem>>, vector<16x16x128xbf16>
    %27 = vector.shape_cast %26 : vector<16x16x128xbf16> to vector<256x128xbf16>
    %c1_i32_17 = arith.constant 1 : i32
    %28 = arith.addi %11, %c1_i32_17 : i32
    %29 = arith.index_cast %28 : i32 to index
    %c1_18 = arith.constant 1 : index
    %c0_19 = arith.constant 0 : index
    %30 = vector.load %arg5[%29, %c1_18, %c0_19] : memref<18x18x128xbf16, #tpu.memory_space<vmem>>, vector<16x16x128xbf16>
    %31 = vector.shape_cast %30 : vector<16x16x128xbf16> to vector<256x128xbf16>
    %c1_i32_20 = arith.constant 1 : i32
    %32 = arith.addi %11, %c1_i32_20 : i32
    %33 = arith.index_cast %32 : i32 to index
    %c2_21 = arith.constant 2 : index
    %c0_22 = arith.constant 0 : index
    %34 = vector.load %arg5[%33, %c2_21, %c0_22] : memref<18x18x128xbf16, #tpu.memory_space<vmem>>, vector<16x16x128xbf16>
    %35 = vector.shape_cast %34 : vector<16x16x128xbf16> to vector<256x128xbf16>
    %c2_i32 = arith.constant 2 : i32
    %36 = arith.addi %11, %c2_i32 : i32
    %37 = arith.index_cast %36 : i32 to index
    %c0_23 = arith.constant 0 : index
    %c0_24 = arith.constant 0 : index
    %38 = vector.load %arg5[%37, %c0_23, %c0_24] : memref<18x18x128xbf16, #tpu.memory_space<vmem>>, vector<16x16x128xbf16>
    %39 = vector.shape_cast %38 : vector<16x16x128xbf16> to vector<256x128xbf16>
    %c2_i32_25 = arith.constant 2 : i32
    %40 = arith.addi %11, %c2_i32_25 : i32
    %41 = arith.index_cast %40 : i32 to index
    %c1_26 = arith.constant 1 : index
    %c0_27 = arith.constant 0 : index
    %42 = vector.load %arg5[%41, %c1_26, %c0_27] : memref<18x18x128xbf16, #tpu.memory_space<vmem>>, vector<16x16x128xbf16>
    %43 = vector.shape_cast %42 : vector<16x16x128xbf16> to vector<256x128xbf16>
    %c2_i32_28 = arith.constant 2 : i32
    %44 = arith.addi %11, %c2_i32_28 : i32
    %45 = arith.index_cast %44 : i32 to index
    %c2_29 = arith.constant 2 : index
    %c0_30 = arith.constant 0 : index
    %46 = vector.load %arg5[%45, %c2_29, %c0_30] : memref<18x18x128xbf16, #tpu.memory_space<vmem>>, vector<16x16x128xbf16>
    %47 = vector.shape_cast %46 : vector<16x16x128xbf16> to vector<256x128xbf16>
    %48 = tpu.concatenate %15, %19, %23, %27, %31, %35, %39, %43, %47 in 1 : vector<256x128xbf16>, vector<256x128xbf16>, vector<256x128xbf16>, vector<256x128xbf16>, vector<256x128xbf16>, vector<256x128xbf16>, vector<256x128xbf16>, vector<256x128xbf16>, vector<256x128xbf16> -> vector<256x1152xbf16>
    %c256_i32 = arith.constant 256 : i32
    %49 = arith.muli %c0_i32, %c256_i32 : i32
    %50 = tpu.assume_multiple %49, 256 : i32
    %cst = arith.constant dense<0.000000e+00> : vector<256x128xf32>
    %51 = tpu.matmul %48, %9, %cst {dimension_numbers = #tpu.dot_dimension_numbers<[1], [0], [0], [1], [0, 0, 1, 1], [], []>} : vector<256x1152xbf16>, vector<1152x128xbf16>, vector<256x128xf32> -> vector<256x128xf32>
    %52 = arith.index_cast %50 : i32 to index
    %c0_31 = arith.constant 0 : index
    %53 = vector.load %arg6[%52, %c0_31] : memref<256x128xf32, #tpu.memory_space<vmem>>, vector<256x128xf32>
    tpu.vector_store %arg6[%52, %c0_31], %51 {strides = array<i32>} : memref<256x128xf32, #tpu.memory_space<vmem>>, vector<256x128xf32>,
    %c1_i32_32 = arith.constant 1 : i32
    %c0_33 = arith.constant 0 : index
    %c0_34 = arith.constant 0 : index
    %54 = vector.load %arg6[%c0_33, %c0_34] : memref<256x128xf32, #tpu.memory_space<vmem>>, vector<256x128xf32>
    %cst_35 = arith.constant dense<0.000000e+00> : vector<128xf32>
    %55 = vector.multi_reduction <add>, %54, %cst_35 [0] : vector<256x128xf32> to vector<128xf32>
    %56 = vector.shape_cast %55 : vector<128xf32> to vector<1x128xf32>
    %57 = arith.mulf %54, %54 : vector<256x128xf32>
    %cst_36 = arith.constant dense<0.000000e+00> : vector<128xf32>
    %58 = vector.multi_reduction <add>, %57, %cst_36 [0] : vector<256x128xf32> to vector<128xf32>
    %59 = vector.shape_cast %58 : vector<128xf32> to vector<1x128xf32>
    %cst_37 = arith.constant 3.906250e-03 : f32
    %60 = vector.broadcast %cst_37 : f32 to vector<1x128xf32>
    %61 = arith.mulf %56, %60 : vector<1x128xf32>
    %cst_38 = arith.constant 3.906250e-03 : f32
    %62 = vector.broadcast %cst_38 : f32 to vector<1x128xf32>
    %63 = arith.mulf %59, %62 : vector<1x128xf32>
    %64 = arith.mulf %61, %61 : vector<1x128xf32>
    %65 = arith.subf %63, %64 : vector<1x128xf32>
    %cst_39 = arith.constant 0.000000e+00 : f32
    %66 = vector.broadcast %cst_39 : f32 to vector<1x128xf32>
    %67 = arith.maximumf %65, %66 : vector<1x128xf32>
    %68 = vector.broadcast %61 : vector<1x128xf32> to vector<256x128xf32>
    %69 = arith.subf %54, %68 : vector<256x128xf32>
    %cst_40 = arith.constant 9.99999974E-6 : f32
    %70 = vector.broadcast %cst_40 : f32 to vector<1x128xf32>
    %71 = arith.addf %67, %70 : vector<1x128xf32>
    %72 = math.rsqrt %71 : vector<1x128xf32>
    %73 = vector.broadcast %72 : vector<1x128xf32> to vector<256x128xf32>
    %74 = arith.mulf %69, %73 : vector<256x128xf32>
    %cst_41 = arith.constant 0.000000e+00 : f32
    %75 = vector.broadcast %cst_41 : f32 to vector<256x128xf32>
    %76 = arith.maximumf %74, %75 : vector<256x128xf32>
    %77 = arith.truncf %76 : vector<256x128xf32> to vector<256x128xbf16>
    %78 = vector.shape_cast %77 : vector<256x128xbf16> to vector<16x16x128xbf16>
    %79 = vector.extract_strided_slice %78 {offsets = [1, 0, 0], sizes = [1, 16, 128], strides = [1, 1, 1]} : vector<16x16x128xbf16> to vector<1x16x128xbf16>
    %80 = vector.extract_strided_slice %78 {offsets = [14, 0, 0], sizes = [1, 16, 128], strides = [1, 1, 1]} : vector<16x16x128xbf16> to vector<1x16x128xbf16>
    %81 = tpu.concatenate %79, %78, %80 in 0 : vector<1x16x128xbf16>, vector<16x16x128xbf16>, vector<1x16x128xbf16> -> vector<18x16x128xbf16>
    %82 = vector.extract_strided_slice %81 {offsets = [0, 1, 0], sizes = [18, 1, 128], strides = [1, 1, 1]} : vector<18x16x128xbf16> to vector<18x1x128xbf16>
    %83 = vector.extract_strided_slice %81 {offsets = [0, 14, 0], sizes = [18, 1, 128], strides = [1, 1, 1]} : vector<18x16x128xbf16> to vector<18x1x128xbf16>
    %84 = tpu.concatenate %82, %81, %83 in 1 : vector<18x1x128xbf16>, vector<18x16x128xbf16>, vector<18x1x128xbf16> -> vector<18x18x128xbf16>
    %c0_42 = arith.constant 0 : index
    %c0_43 = arith.constant 0 : index
    %c0_44 = arith.constant 0 : index
    %85 = vector.load %arg5[%c0_42, %c0_43, %c0_44] : memref<18x18x128xbf16, #tpu.memory_space<vmem>>, vector<18x18x128xbf16>
    tpu.vector_store %arg5[%c0_42, %c0_43, %c0_44], %84 {strides = array<i32>} : memref<18x18x128xbf16, #tpu.memory_space<vmem>>, vector<18x18x128xbf16>,
    %c0_45 = arith.constant 0 : index
    %c0_46 = arith.constant 0 : index
    %86 = vector.load %arg3[%c0_45, %c0_46] : memref<1152x128xbf16, #tpu.memory_space<vmem>>, vector<1152x128xbf16>
    %c0_i32_47 = arith.constant 0 : i32
    %c16_i32_48 = arith.constant 16 : i32
    %87 = arith.muli %c0_i32_47, %c16_i32_48 : i32
    %88 = tpu.assume_multiple %87, 16 : i32
    %c0_i32_49 = arith.constant 0 : i32
    %89 = arith.addi %88, %c0_i32_49 : i32
    %90 = arith.index_cast %89 : i32 to index
    %c0_50 = arith.constant 0 : index
    %c0_51 = arith.constant 0 : index
    %91 = vector.load %arg5[%90, %c0_50, %c0_51] : memref<18x18x128xbf16, #tpu.memory_space<vmem>>, vector<16x16x128xbf16>
    %92 = vector.shape_cast %91 : vector<16x16x128xbf16> to vector<256x128xbf16>
    %c0_i32_52 = arith.constant 0 : i32
    %93 = arith.addi %88, %c0_i32_52 : i32
    %94 = arith.index_cast %93 : i32 to index
    %c1_53 = arith.constant 1 : index
    %c0_54 = arith.constant 0 : index
    %95 = vector.load %arg5[%94, %c1_53, %c0_54] : memref<18x18x128xbf16, #tpu.memory_space<vmem>>, vector<16x16x128xbf16>
    %96 = vector.shape_cast %95 : vector<16x16x128xbf16> to vector<256x128xbf16>
    %c0_i32_55 = arith.constant 0 : i32
    %97 = arith.addi %88, %c0_i32_55 : i32
    %98 = arith.index_cast %97 : i32 to index
    %c2_56 = arith.constant 2 : index
    %c0_57 = arith.constant 0 : index
    %99 = vector.load %arg5[%98, %c2_56, %c0_57] : memref<18x18x128xbf16, #tpu.memory_space<vmem>>, vector<16x16x128xbf16>
    %100 = vector.shape_cast %99 : vector<16x16x128xbf16> to vector<256x128xbf16>
    %c1_i32_58 = arith.constant 1 : i32
    %101 = arith.addi %88, %c1_i32_58 : i32
    %102 = arith.index_cast %101 : i32 to index
    %c0_59 = arith.constant 0 : index
    %c0_60 = arith.constant 0 : index
    %103 = vector.load %arg5[%102, %c0_59, %c0_60] : memref<18x18x128xbf16, #tpu.memory_space<vmem>>, vector<16x16x128xbf16>
    %104 = vector.shape_cast %103 : vector<16x16x128xbf16> to vector<256x128xbf16>
    %c1_i32_61 = arith.constant 1 : i32
    %105 = arith.addi %88, %c1_i32_61 : i32
    %106 = arith.index_cast %105 : i32 to index
    %c1_62 = arith.constant 1 : index
    %c0_63 = arith.constant 0 : index
    %107 = vector.load %arg5[%106, %c1_62, %c0_63] : memref<18x18x128xbf16, #tpu.memory_space<vmem>>, vector<16x16x128xbf16>
    %108 = vector.shape_cast %107 : vector<16x16x128xbf16> to vector<256x128xbf16>
    %c1_i32_64 = arith.constant 1 : i32
    %109 = arith.addi %88, %c1_i32_64 : i32
    %110 = arith.index_cast %109 : i32 to index
    %c2_65 = arith.constant 2 : index
    %c0_66 = arith.constant 0 : index
    %111 = vector.load %arg5[%110, %c2_65, %c0_66] : memref<18x18x128xbf16, #tpu.memory_space<vmem>>, vector<16x16x128xbf16>
    %112 = vector.shape_cast %111 : vector<16x16x128xbf16> to vector<256x128xbf16>
    %c2_i32_67 = arith.constant 2 : i32
    %113 = arith.addi %88, %c2_i32_67 : i32
    %114 = arith.index_cast %113 : i32 to index
    %c0_68 = arith.constant 0 : index
    %c0_69 = arith.constant 0 : index
    %115 = vector.load %arg5[%114, %c0_68, %c0_69] : memref<18x18x128xbf16, #tpu.memory_space<vmem>>, vector<16x16x128xbf16>
    %116 = vector.shape_cast %115 : vector<16x16x128xbf16> to vector<256x128xbf16>
    %c2_i32_70 = arith.constant 2 : i32
    %117 = arith.addi %88, %c2_i32_70 : i32
    %118 = arith.index_cast %117 : i32 to index
    %c1_71 = arith.constant 1 : index
    %c0_72 = arith.constant 0 : index
    %119 = vector.load %arg5[%118, %c1_71, %c0_72] : memref<18x18x128xbf16, #tpu.memory_space<vmem>>, vector<16x16x128xbf16>
    %120 = vector.shape_cast %119 : vector<16x16x128xbf16> to vector<256x128xbf16>
    %c2_i32_73 = arith.constant 2 : i32
    %121 = arith.addi %88, %c2_i32_73 : i32
    %122 = arith.index_cast %121 : i32 to index
    %c2_74 = arith.constant 2 : index
    %c0_75 = arith.constant 0 : index
    %123 = vector.load %arg5[%122, %c2_74, %c0_75] : memref<18x18x128xbf16, #tpu.memory_space<vmem>>, vector<16x16x128xbf16>
    %124 = vector.shape_cast %123 : vector<16x16x128xbf16> to vector<256x128xbf16>
    %125 = tpu.concatenate %92, %96, %100, %104, %108, %112, %116, %120, %124 in 1 : vector<256x128xbf16>, vector<256x128xbf16>, vector<256x128xbf16>, vector<256x128xbf16>, vector<256x128xbf16>, vector<256x128xbf16>, vector<256x128xbf16>, vector<256x128xbf16>, vector<256x128xbf16> -> vector<256x1152xbf16>
    %c256_i32_76 = arith.constant 256 : i32
    %126 = arith.muli %c0_i32_47, %c256_i32_76 : i32
    %127 = tpu.assume_multiple %126, 256 : i32
    %cst_77 = arith.constant dense<0.000000e+00> : vector<256x128xf32>
    %128 = tpu.matmul %125, %86, %cst_77 {dimension_numbers = #tpu.dot_dimension_numbers<[1], [0], [0], [1], [0, 0, 1, 1], [], []>} : vector<256x1152xbf16>, vector<1152x128xbf16>, vector<256x128xf32> -> vector<256x128xf32>
    %129 = arith.index_cast %127 : i32 to index
    %c0_78 = arith.constant 0 : index
    %130 = vector.load %arg6[%129, %c0_78] : memref<256x128xf32, #tpu.memory_space<vmem>>, vector<256x128xf32>
    tpu.vector_store %arg6[%129, %c0_78], %128 {strides = array<i32>} : memref<256x128xf32, #tpu.memory_space<vmem>>, vector<256x128xf32>,
    %c1_i32_79 = arith.constant 1 : i32
    %c0_80 = arith.constant 0 : index
    %c0_81 = arith.constant 0 : index
    %131 = vector.load %arg6[%c0_80, %c0_81] : memref<256x128xf32, #tpu.memory_space<vmem>>, vector<256x128xf32>
    %cst_82 = arith.constant dense<0.000000e+00> : vector<128xf32>
    %132 = vector.multi_reduction <add>, %131, %cst_82 [0] : vector<256x128xf32> to vector<128xf32>
    %133 = vector.shape_cast %132 : vector<128xf32> to vector<1x128xf32>
    %134 = arith.mulf %131, %131 : vector<256x128xf32>
    %cst_83 = arith.constant dense<0.000000e+00> : vector<128xf32>
    %135 = vector.multi_reduction <add>, %134, %cst_83 [0] : vector<256x128xf32> to vector<128xf32>
    %136 = vector.shape_cast %135 : vector<128xf32> to vector<1x128xf32>
    %cst_84 = arith.constant 3.906250e-03 : f32
    %137 = vector.broadcast %cst_84 : f32 to vector<1x128xf32>
    %138 = arith.mulf %133, %137 : vector<1x128xf32>
    %cst_85 = arith.constant 3.906250e-03 : f32
    %139 = vector.broadcast %cst_85 : f32 to vector<1x128xf32>
    %140 = arith.mulf %136, %139 : vector<1x128xf32>
    %141 = arith.mulf %138, %138 : vector<1x128xf32>
    %142 = arith.subf %140, %141 : vector<1x128xf32>
    %cst_86 = arith.constant 0.000000e+00 : f32
    %143 = vector.broadcast %cst_86 : f32 to vector<1x128xf32>
    %144 = arith.maximumf %142, %143 : vector<1x128xf32>
    %145 = vector.broadcast %138 : vector<1x128xf32> to vector<256x128xf32>
    %146 = arith.subf %131, %145 : vector<256x128xf32>
    %cst_87 = arith.constant 9.99999974E-6 : f32
    %147 = vector.broadcast %cst_87 : f32 to vector<1x128xf32>
    %148 = arith.addf %144, %147 : vector<1x128xf32>
    %149 = math.rsqrt %148 : vector<1x128xf32>
    %150 = vector.broadcast %149 : vector<1x128xf32> to vector<256x128xf32>
    %151 = arith.mulf %146, %150 : vector<256x128xf32>
    %c0_88 = arith.constant 0 : index
    %c0_89 = arith.constant 0 : index
    %c0_90 = arith.constant 0 : index
    %c0_91 = arith.constant 0 : index
    %152 = vector.load %arg1[%c0_88, %c0_89, %c0_90, %c0_91] : memref<1x16x16x128xbf16, #tpu.memory_space<vmem>>, vector<1x16x16x128xbf16>
    %153 = vector.shape_cast %152 : vector<1x16x16x128xbf16> to vector<16x16x128xbf16>
    %154 = arith.extf %153 : vector<16x16x128xbf16> to vector<16x16x128xf32>
    %155 = vector.shape_cast %154 : vector<16x16x128xf32> to vector<256x128xf32>
    %156 = arith.addf %155, %151 : vector<256x128xf32>
    %157 = vector.shape_cast %156 : vector<256x128xf32> to vector<16x16x128xf32>
    %c0_92 = arith.constant 0 : index
    %c0_93 = arith.constant 0 : index
    %c0_94 = arith.constant 0 : index
    %c0_95 = arith.constant 0 : index
    %158 = vector.load %arg4[%c0_92, %c0_93, %c0_94, %c0_95] : memref<1x16x16x128xf32, #tpu.memory_space<vmem>>, vector<1x16x16x128xf32>
    %159 = vector.shape_cast %158 : vector<1x16x16x128xf32> to vector<16x16x128xf32>
    %160 = vector.shape_cast %157 : vector<16x16x128xf32> to vector<1x16x16x128xf32>
    tpu.vector_store %arg4[%c0_92, %c0_93, %c0_94, %c0_95], %160 {strides = array<i32>} : memref<1x16x16x128xf32, #tpu.memory_space<vmem>>, vector<1x16x16x128xf32>,
    return
  }
  func.func @transform_0(%arg0: i32) -> (i32, i32, i32, i32) {
    %c0_i32 = arith.constant 0 : i32
    %c0_i32_0 = arith.constant 0 : i32
    %c0_i32_1 = arith.constant 0 : i32
    %c0_i32_2 = arith.constant 0 : i32
    return %arg0, %c0_i32, %c0_i32_0, %c0_i32_1 : i32, i32, i32, i32
  }
  func.func @transform_1(%arg0: i32) -> (i32, i32) {
    %c0_i32 = arith.constant 0 : i32
    %c0_i32_0 = arith.constant 0 : i32
    %c0_i32_1 = arith.constant 0 : i32
    return %c0_i32, %c0_i32_0 : i32, i32
  }
  func.func @transform_2(%arg0: i32) -> (i32, i32) {
    %c0_i32 = arith.constant 0 : i32
    %c0_i32_0 = arith.constant 0 : i32
    %c0_i32_1 = arith.constant 0 : i32
    return %c0_i32, %c0_i32_0 : i32, i32
  }
  func.func @transform_3(%arg0: i32) -> (i32, i32, i32, i32) {
    %c0_i32 = arith.constant 0 : i32
    %c0_i32_0 = arith.constant 0 : i32
    %c0_i32_1 = arith.constant 0 : i32
    %c0_i32_2 = arith.constant 0 : i32
    return %arg0, %c0_i32, %c0_i32_0, %c0_i32_1 : i32, i32, i32, i32
  }
}

</mosaic_0001>

<bundles_post_ra>
// kernel: residual_block.1
= control target key start
LH: loop header
LB: loop body
LE: loop exit
PB: predicated region body
PF: predicated region fallthrough
CT: control target
= control target key end

     0   :  { %s11914_s12 = smov 0   ;;  %s16889_s0 = inlined_call_operand.vmem [shape: bf16[2,16,16,128], index: 0, kind: input, shape index: {}]   ;;  %s16890_s1 = inlined_call_operand.vmem [shape: bf16[1152,128], index: 1, kind: input, shape index: {}]   ;;  %s16891_s2 = inlined_call_operand.vmem [shape: bf16[1152,128], index: 2, kind: input, shape index: {}]   ;;  %s16892_s3 = inlined_call_operand.vmem [shape: f32[2,16,16,128], index: 3, kind: output, shape index: {}]  }
   0x1 LB: > { %s9713_s13 = sadd.s32 4294967295, %s11892_s12   ;;  %p9717_p0 = scmp.ge.s32.totalorder %s11892_s12, 1  ;;  %s11892_s12 = sphi %s11914_s12, %s13_s12  }
   0x2   : > { %p137_p1 = scmp.lt.s32.totalorder %s11892_s12, 3 }
   0x4   : > { %p138_p2 = pnand %p9717_p0, %p137_p1 }
   0x6   : > { %141 = sbr.rel (%p138_p2) target bundleno = 1412 (0x584), region = 32 }
   0xd   : > { %v11525_v0 = vld [vmem:[%s16890_s1 + $0x40] sm:$0xff]   ;;  %v11529_v4 = vld [vmem:[%s16890_s1 + $0x48] sm:$0xff]   ;;  %v11533_v8 = vld [vmem:[%s16890_s1 + $0x50] sm:$0xff]   ;;  %p161_p3 = scmp.lt.s32.totalorder %s9713_s13, 1  ;;  %vm604_vm0 = vcmask 1040384   ;;  %v16957_v54 = vmov 0 }
   0xe   : > { %v11526_v1 = vld [vmem:[%s16890_s1] sm:$0xff]   ;;  %10477 = vmatprep.subr.bf16.mxu0 %v11525_v0  ;;  %v11530_v5 = vld [vmem:[%s16890_s1 + $0x8] sm:$0xff]   ;;  %v11534_v9 = vld [vmem:[%s16890_s1 + $0x10] sm:$0xff]   ;;  %vm605_vm1 = vsmask.f32 256  ;;  %vm1515_vm3 = vcmask 1042432  }
   0xf   : > { %v11527_v2 = vld [vmem:[%s16890_s1 + $0xc0] sm:$0xff]   ;;  %10478 = vmatpush3.bf16.msra.mxu0 %v11526_v1  ;;  %v11531_v6 = vld [vmem:[%s16890_s1 + $0xc8] sm:$0xff]   ;;  %v11535_v10 = vld [vmem:[%s16890_s1 + $0xd0] sm:$0xff]   ;;  %s17264_s13 = smov (!%p161_p3, %s9713_s13), 1  ;;  %vm1516_vm4 = vcmask 1046532  }
  0x10   : > { %v11528_v3 = vld [vmem:[%s16890_s1 + $0x80] sm:$0xff]   ;;  %10589 = vmatprep.subr.bf16.mxu1 %v11527_v2  ;;  %10479 = vmatprep.subr.bf16.mxu0 %v11529_v4  ;;  %v11532_v7 = vld [vmem:[%s16890_s1 + $0x88] sm:$0xff]   ;;  %v11536_v11 = vld [vmem:[%s16890_s1 + $0x90] sm:$0xff]   ;;  %s10396_s18 = sshll.u32 %s17264_s13, 7  ;;  %vm1064_vm5 = vsmask.f32 3328 }
  0x11   : > { %10590 = vmatpush3.bf16.msra.mxu1 %v11528_v3  ;;  %v11537_v12 = vld [vmem:[%s16890_s1 + $0x58] sm:$0xff]   ;;  %v11541_v16 = vld [vmem:[%s16890_s1 + $0x60] sm:$0xff]   ;;  %v11545_v20 = vld [vmem:[%s16890_s1 + $0x68] sm:$0xff]   ;;  %s12022_s27 = scalar_lea.vmem %s16889_s0, %s10396_s18  ;;  %vm1065_vm6 = vsmask.f32 7440 }
  0x12   : > { %10591 = vmatprep.subr.bf16.mxu1 %v11531_v6  ;;  %v11538_v13 = vld [vmem:[%s16890_s1 + $0x18] sm:$0xff]   ;;  %v11542_v17 = vld [vmem:[%s16890_s1 + $0x20] sm:$0xff]   ;;  %v11546_v21 = vld [vmem:[%s16890_s1 + $0x28] sm:$0xff]  }
  0x13   : > { %10480 = vmatpush3.bf16.msra.mxu0 %v11530_v5  ;;  %v11539_v14 = vld [vmem:[%s16890_s1 + $0xd8] sm:$0xff]   ;;  %v11543_v18 = vld [vmem:[%s16890_s1 + $0xe0] sm:$0xff]   ;;  %v11547_v22 = vld [vmem:[%s16890_s1 + $0xe8] sm:$0xff]  }
  0x14   : > { %10481 = vmatprep.subr.bf16.mxu0 %v11533_v8  ;;  %v11540_v15 = vld [vmem:[%s16890_s1 + $0x98] sm:$0xff]   ;;  %v11544_v19 = vld [vmem:[%s16890_s1 + $0xa0] sm:$0xff]   ;;  %v11548_v23 = vld [vmem:[%s16890_s1 + $0xa8] sm:$0xff]  }
  0x15   : > { %10592 = vmatpush3.bf16.msra.mxu1 %v11532_v7  ;;  %v11549_v24 = vld [vmem:[%s16890_s1 + $0x70] sm:$0xff]   ;;  %v11553_v28 = vld [vmem:[%s16890_s1 + $0x78] sm:$0xff]   ;;  %v174_v32 = vld [vmem:[%s12022_s27 + $0x8] sm:$0xf] }
  0x16   : > { %10593 = vmatprep.subr.bf16.mxu1 %v11535_v10  ;;  %v11550_v25 = vld [vmem:[%s16890_s1 + $0x30] sm:$0xff]   ;;  %v11554_v29 = vld [vmem:[%s16890_s1 + $0x38] sm:$0xff]   ;;  %v175_v33 = vld [vmem:[%s12022_s27 + $0xc] sm:$0xf]  ;;  %v9722_v34 = vcombine.low %v174_v32, %v174_v32 }
  0x17   : > { %10482 = vmatpush3.bf16.msra.mxu0 %v11534_v9  ;;  %v11551_v26 = vld [vmem:[%s16890_s1 + $0xf0] sm:$0xff]   ;;  %v11555_v30 = vld [vmem:[%s16890_s1 + $0xf8] sm:$0xff]   ;;  %v9738_v35 = vcombine.low %v174_v32, %v175_v33  ;;  %v9754_v36 = vcombine.low %v175_v33, %v175_v33  ;;  %v172_v37 = vld [vmem:[%s12022_s27] sm:$0xf] }
  0x18   : > { %10483 = vmatprep.subr.bf16.mxu0 %v11537_v12  ;;  %v11552_v27 = vld [vmem:[%s16890_s1 + $0xb0] sm:$0xff]   ;;  %v11556_v31 = vld [vmem:[%s16890_s1 + $0xb8] sm:$0xff]   ;;  %v173_v38 = vld [vmem:[%s12022_s27 + $0x4] sm:$0xf]  ;;  %v9723_v39 = vcombine.low %v172_v37, %v172_v37  ;;  %v253_v42 = vshrl.u32 %v9722_v34, 16 }
  0x19   : > { %10594 = vmatpush3.bf16.msra.mxu1 %v11536_v11  ;;  %v9739_v40 = vcombine.low %v172_v37, %v173_v38  ;;  %v9755_v41 = vcombine.low %v173_v38, %v173_v38  ;;  %v365_v43 = vshrl.u32 %v9738_v35, 16  ;;  %v368_v44 = vshll.u32 %v9738_v35, 16  ;;  %v11564_v46 = vld [vmem:[%s16890_s1 + $0x140] sm:$0xff]   ;;  %v176_v53 = vld [vmem:[%s12022_s27 + $0x10] sm:$0xf]  ;;  %vm12040_vm2 = vmand %vm604_vm0, %vm605_vm1 }
  0x1a   : > { %10595 = vmatprep.subr.bf16.mxu1 %v11539_v14  ;;  %v525_v45 = vshll.u32 %v9754_v36, 16  ;;  %v256_v47 = vshrl.u32 %v9723_v39, 16  ;;  %v16958_v54 = vsel %vm12040_vm2, 4294967295, %v16957_v54  ;;  %v177_v57 = vld [vmem:[%s12022_s27 + $0x14] sm:$0xf]  ;;  %v9724_v58 = vcombine.low %v176_v53, %v176_v53  ;;  %vm12118_vm7 = vmor %vm1515_vm3, %vm1516_vm4 }
  0x1b   : > { %10484 = vmatpush3.bf16.msra.mxu0 %v11538_v13  ;;  %v372_v48 = vshrl.u32 %v9739_v40, 16  ;;  %v375_v49 = vshll.u32 %v9739_v40, 16  ;;  %v529_v50 = vshll.u32 %v9755_v41, 16  ;;  %v367_v51 = vrot.slane %v365_v43, 7  ;;  %16959 = vst [vmem:[#allocation4_spill] sm:$0xff] %v16958_v54  ;;  %vm12124_vm8 = vmor %vm1064_vm5, %vm1065_vm6 }
  0x1c   : > { %10485 = vmatprep.subr.bf16.mxu0 %v11541_v16  ;;  %v527_v52 = vrot.slane %v525_v45, 3  ;;  %v9740_v61 = vcombine.low %v176_v53, %v177_v57  ;;  %v9756_v62 = vcombine.low %v177_v57, %v177_v57  ;;  %v259_v2 = vshrl.u32 %v9724_v58, 16  ;;  %v178_v3 = vld [vmem:[%s12022_s27 + $0x18] sm:$0xf]  ;;  %v179_v8 = vld [vmem:[%s12022_s27 + $0x1c] sm:$0xf] }
  0x1d   : > { %10596 = vmatpush3.bf16.msra.mxu1 %v11540_v15  ;;  %v374_v55 = vrot.slane %v372_v48, 7  ;;  %v531_v56 = vrot.slane %v529_v50, 3  ;;  %v370_v59 = vor.u32 %v368_v44, %v367_v51  ;;  %v180_v9 = vld [vmem:[%s12022_s27 + $0x20] sm:$0xf]  ;;  %v12057_v14 = vld [vmem:[%s12022_s27 + $0x24] sm:$0xf] }
  0x1e   : > { %10597 = vmatprep.subr.bf16.mxu1 %v11543_v18  ;;  %v623_v60 = vsel %vm12040_vm2, %v367_v51, %v527_v52  ;;  %v379_v6 = vshrl.u32 %v9740_v61, 16  ;;  %v382_v7 = vshll.u32 %v9740_v61, 16  ;;  %v533_v13 = vshll.u32 %v9756_v62, 16 }
  0x1f   : > { %10486 = vmatpush3.bf16.msra.mxu0 %v11542_v17  ;;  %v9772_v63 = vcombine.low %v623_v60, %v623_v60  ;;  %v377_v0 = vor.u32 %v375_v49, %v374_v55  ;;  %v624_v1 = vsel %vm12040_vm2, %v374_v55, %v531_v56  ;;  %v607_v4 = vsel %vm12040_vm2, %v253_v42, %v370_v59 }
  0x20   : > { %10487 = vmatprep.subr.bf16.mxu0 %v11545_v20  ;;  %v9775_v5 = vcombine.low %v624_v1, %v624_v1  ;;  %v9770_v10 = vcombine.low %v607_v4, %v607_v4  ;;  %v9771_v11 = vcombine.high %v607_v4, %v607_v4  ;;  %v381_v17 = vrot.slane %v379_v6, 7  ;;  %v11609_v4 = vld [vmem:[%s16890_s1 + $0x1c0] sm:$0xff]  }
  0x21   : > { %10598 = vmatpush3.bf16.msra.mxu1 %v11544_v19  ;;  %817 = vst [vmem:[#allocation2 + $0x8] sm:$0x1] %v9772_v63  ;;  %823 = vst [vmem:[#allocation2 + $0x20] sm:$0x1] %v9772_v63  ;;  %v608_v12 = vsel %vm12040_vm2, %v256_v47, %v377_v0  ;;  %v9725_v18 = vcombine.low %v178_v3, %v178_v3  ;;  %v535_v19 = vrot.slane %v533_v13, 3 }
  0x22   : > { %10599 = vmatprep.subr.bf16.mxu1 %v11547_v22  ;;  %v9773_v15 = vcombine.low %v608_v12, %v608_v12  ;;  %v9774_v16 = vcombine.high %v608_v12, %v608_v12  ;;  %820 = vst [vmem:[#allocation2 + $0x14] sm:$0x1] %v9775_v5  ;;  %815 = vst [vmem:[#allocation2] sm:$0xf] %v9770_v10  ;;  %v9741_v20 = vcombine.low %v178_v3, %v179_v8 }
  0x23   : > { %10488 = vmatpush3.bf16.msra.mxu0 %v11546_v21  ;;  %816 = vst [vmem:[#allocation2 + $0x4] sm:$0xf] %v9771_v11  ;;  %821 = vst [vmem:[#allocation2 + $0x18] sm:$0xf] %v9770_v10  ;;  %v9757_v21 = vcombine.low %v179_v8, %v179_v8  ;;  %v9726_v22 = vcombine.low %v180_v9, %v180_v9  ;;  %v9758_v44 = vcombine.low %v12057_v14, %v12057_v14 }
  0x24   : > { %10489 = vmatprep.subr.bf16.mxu0 %v11549_v24  ;;  %822 = vst [vmem:[#allocation2 + $0x1c] sm:$0xf] %v9771_v11  ;;  %818 = vst [vmem:[#allocation2 + $0xc] sm:$0xf] %v9773_v15  ;;  %v12059_v24 = vshrl.u32 %v9725_v18, 16  ;;  %v16960_v18 = vmov 0 }
  0x25   : > { %10600 = vmatpush3.bf16.msra.mxu1 %v11548_v23  ;;  %819 = vst [vmem:[#allocation2 + $0x10] sm:$0xf] %v9774_v16  ;;  %v384_v23 = vor.u32 %v382_v7, %v381_v17  ;;  %v12072_v34 = vshrl.u32 %v9726_v22, 16  ;;  %v16961_v18 = vsel %vm12118_vm7, 4294967295, %v16960_v18 }
  0x26   : > { %10601 = vmatprep.subr.bf16.mxu1 %v11551_v26  ;;  %v625_v26 = vsel %vm12040_vm2, %v381_v17, %v535_v19  ;;  %16962 = vst [vmem:[#allocation5_spill] sm:$0xff] %v16961_v18 }
  0x27   : > { %10490 = vmatpush3.bf16.msra.mxu0 %v11550_v25  ;;  %v9742_v25 = vcombine.low %v180_v9, %v12057_v14  ;;  %v609_v32 = vsel %vm12040_vm2, %v259_v2, %v384_v23  ;;  %v9778_v33 = vcombine.low %v625_v26, %v625_v26  ;;  %v12291_v14 = vld [vmem:[%s12022_s27 + $0x3c] sm:$0xf] }
  0x28   : > { %10491 = vmatprep.subr.bf16.mxu0 %v11553_v28  ;;  %v389_v28 = vshll.u32 %v9741_v20, 16  ;;  %v9776_v36 = vcombine.low %v609_v32, %v609_v32  ;;  %v9777_v37 = vcombine.high %v609_v32, %v609_v32  ;;  %v12074_v40 = vld [vmem:[#allocation2 + $0x8] sm:$0x1]  ;;  %v12076_v41 = vld [vmem:[#allocation2 + $0x20] sm:$0x1] }
  0x29   : > { %10602 = vmatpush3.bf16.msra.mxu1 %v11552_v27  ;;  %v386_v27 = vshrl.u32 %v9741_v20, 16  ;;  %v393_v35 = vshrl.u32 %v9742_v25, 16  ;;  %826 = vst [vmem:[#allocation2 + $0x2c] sm:$0x1] %v9778_v33  ;;  %v396_v43 = vshll.u32 %v9742_v25, 16  ;;  %v1523_v47 = vrot.slane %v12074_v40, 5 }
  0x2a   : > { %10603 = vmatprep.subr.bf16.mxu1 %v11555_v30  ;;  %v12065_v30 = vld [vmem:[%s12022_s27 + $0x28] sm:$0xf]  ;;  %v1135_v48 = vshll.u32 %v12076_v41, 16  ;;  %824 = vst [vmem:[#allocation2 + $0x24] sm:$0xf] %v9776_v36  ;;  %v1537_v49 = vrot.slane %v12076_v41, 5 }
  0x2b   : > { %10492 = vmatpush3.bf16.msra.mxu0 %v11554_v29  ;;  %v537_v29 = vshll.u32 %v9757_v21, 16  ;;  %v388_v38 = vrot.slane %v386_v27, 7  ;;  %v12078_v42 = vrot.slane %v393_v35, 7  ;;  %v9727_v45 = vcombine.low %v12065_v30, %v12065_v30  ;;  %825 = vst [vmem:[#allocation2 + $0x28] sm:$0xf] %v9777_v37 }
  0x2c   : > { %10701 = vmatprep.subr.bf16.mxu0 %v11564_v46  ;;  %v1087_v46 = vshll.u32 %v12074_v40, 16  ;;  %v12088_v50 = vld [vmem:[#allocation2] sm:$0xf]  ;;  %v12090_v51 = vld [vmem:[#allocation2 + $0x4] sm:$0xf]  ;;  %v16963_v20 = vmov 0 }
  0x2d   : > { %10604 = vmatpush3.bf16.msra.mxu1 %v11556_v31  ;;  %v12068_v31 = vld [vmem:[%s12022_s27 + $0x2c] sm:$0xf]  ;;  %v539_v39 = vrot.slane %v537_v29, 3  ;;  %v1451_v52 = vld [vmem:[#allocation2] sm:$0xe]  ;;  %v12092_v53 = vor.u32 %v389_v28, %v388_v38  ;;  %v12099_v56 = vor.u32 %v396_v43, %v12078_v42  ;;  %v1068_v58 = vshrl.u32 %v12088_v50, 16 }
  0x2e   : > { %v12103_v57 = vcombine.low %v12065_v30, %v12068_v31  ;;  %v1071_v59 = vshll.u32 %v12088_v50, 16  ;;  %v1077_v60 = vshll.u32 %v12090_v51, 16  ;;  %v1081_v61 = vshrl.u32 %v12090_v51, 16  ;;  %v1634_v62 = vld [vmem:[#allocation2 + $0xc] sm:$0xf]  ;;  %10813 = vmatprep.subr.bf16.mxu1 %v11609_v4  ;;  %v11646_v30 = vld [vmem:[%s16890_s1 + $0x1d8] sm:$0xff]  }
  0x2f   : > { %v12096_v55 = vsel %vm12040_vm2, %v388_v38, %v539_v39  ;;  %v1089_v63 = vrot.slane %v1087_v46, 5  ;;  %v1635_v0 = vld [vmem:[#allocation2 + $0x10] sm:$0xf]  ;;  %v1683_v1 = vshrl.u32 %v1634_v62, 16  ;;  %v1686_v2 = vshll.u32 %v1634_v62, 16  ;;  %v11572_v40 = vld [vmem:[%s16890_s1 + $0x148] sm:$0xff]  }
  0x30   : > { %v9759_v3 = vcombine.low %v12068_v31, %v12068_v31  ;;  %v1070_v5 = vrot.slane %v1068_v58, 4  ;;  %v1073_v6 = vrot.slane %v1071_v59, 5  ;;  %v1079_v7 = vrot.slane %v1077_v60, 5  ;;  %v12114_v13 = vld [vmem:[#allocation2 + $0xc] sm:$0xf] }
  0x31   : > { %v1083_v8 = vrot.slane %v1081_v61, 4  ;;  %v1685_v9 = vrot.slane %v1683_v1, 4  ;;  %v1688_v10 = vrot.slane %v1686_v2, 5  ;;  %v1692_v11 = vshll.u32 %v1635_v0, 16  ;;  %v12131_v28 = vld [vmem:[#allocation2 + $0x10] sm:$0xf] }
  0x32   : > { %v1696_v12 = vshrl.u32 %v1635_v0, 16  ;;  %v1074_v15 = vor.u32 %v1073_v6, %v1070_v5  ;;  %v9914_v17 = vcombine.low %v1634_v62, %v1635_v0  ;;  %v9818_v19 = vrot.slane %v1451_v52, 9  ;;  %v12140_v38 = vld [vmem:[#allocation2 + $0x14] sm:$0x1]  ;;  %v12146_v58 = vld [vmem:[#allocation2 + $0x18] sm:$0xf] }
  0x33   : > { %v1084_v16 = vor.u32 %v1083_v8, %v1079_v7  ;;  %v16964_v20 = vsel %vm12124_vm8, 4294967295, %v16963_v20  ;;  %v1689_v21 = vor.u32 %v1688_v10, %v1685_v9  ;;  %v12128_v22 = vrot.slane %v1692_v11, 5  ;;  %v1637_v59 = vld [vmem:[#allocation2 + $0x1c] sm:$0xf]  ;;  %v12160_v5 = vld [vmem:[#allocation2 + $0x18] sm:$0xf] }
  0x34   : > { %16965 = vst [vmem:[#allocation6_spill] sm:$0xff] %v16964_v20  ;;  %v1698_v23 = vrot.slane %v1696_v12, 4  ;;  %v1520_v25 = vrot.slane %v12090_v51, 5  ;;  %v1075_v26 = vrot.slane %v1074_v15, 4  ;;  %4103 = vmatprep.mubr.bf16.mxu1 %v9914_v17  ;;  %v1092_v29 = vshrl.u32 %v12114_v13, 16  ;;  %v11574_v11 = vld [vmem:[%s16890_s1 + $0x108] sm:$0xff]  }
  0x35   : > { %v1085_v27 = vrot.slane %v1084_v16, 4  ;;  %v1095_v32 = vshll.u32 %v12114_v13, 16  ;;  %v9866_v35 = vcombine.low %v12088_v50, %v12090_v51  ;;  %v12148_v61 = vrot.slane %v1689_v21, 4  ;;  %v11566_v51 = vld [vmem:[%s16890_s1 + $0x100] sm:$0xff]   ;;  %v12172_v10 = vld [vmem:[#allocation2 + $0x1c] sm:$0xf] }
  0x36   : > { %v1699_v33 = vor.u32 %v1698_v23, %v12128_v22  ;;  %v1521_v36 = vsel %vm12118_vm7, %v9818_v19, %v1520_v25  ;;  %v1522_v37 = vrot.slane %v1520_v25, 4  ;;  %v1080_v39 = vsel %vm12124_vm8, %v1075_v26, %v1079_v7  ;;  %v11584_v19 = vld [vmem:[%s16890_s1 + $0x150] sm:$0xff]   ;;  %v11623_v21 = vld [vmem:[%s16890_s1 + $0x1c8] sm:$0xff]  }
  0x37   : > { %v1090_v43 = vsel %vm12124_vm8, %v1085_v27, %v1089_v63  ;;  %v1094_v46 = vrot.slane %v1092_v29, 4  ;;  %v1097_v52 = vrot.slane %v1095_v32, 5  ;;  %v1101_v62 = vshll.u32 %v12131_v28, 16  ;;  %v1452_v63 = vld [vmem:[#allocation2 + $0xc] sm:$0xe] }
  0x38   : > { %v9882_v60 = vcombine.low %v1080_v39, %v1090_v43  ;;  %v1524_v50 = vsel %vm12118_vm7, %v1522_v37, %v1523_v47  ;;  %v1105_v2 = vshrl.u32 %v12131_v28, 16  ;;  %v1111_v4 = vshll.u32 %v12140_v38, 16  ;;  %v11612_v47 = vld [vmem:[%s16890_s1 + $0x180] sm:$0xff]   ;;  %v1639_v32 = vld [vmem:[#allocation2 + $0x28] sm:$0xf] }
  0x39   : > { %v9898_v0 = vcombine.low %v1521_v36, %v1524_v50  ;;  %v1098_v1 = vor.u32 %v1097_v52, %v1094_v46  ;;  %v12168_v6 = vrot.slane %v1699_v33, 4  ;;  %v1103_v7 = vrot.slane %v1101_v62, 5  ;;  %v12187_v29 = vld [vmem:[#allocation2 + $0x24] sm:$0xf]  ;;  %v1453_v39 = vld [vmem:[#allocation2 + $0x18] sm:$0xe] }
  0x3a   : > { %3942 = vmatprep.mubr.bf16.mxu0 %v9882_v60  ;;  %v1707_v8 = vshrl.u32 %v12146_v58, 16  ;;  %v9915_v9 = vcombine.low %v12146_v58, %v1637_v59  ;;  %v1107_v15 = vrot.slane %v1105_v2, 4  ;;  %v1113_v16 = vrot.slane %v1111_v4, 5  ;;  %v12196_v59 = vld [vmem:[#allocation2 + $0x24] sm:$0xf]  ;;  %v11626_v4 = vld [vmem:[%s16890_s1 + $0x188] sm:$0xff]  }
  0x3b   : > { %3943 = vmatmul.mubr.bf16.vlgmr.msra.gmra.mrb[0].mxu0 %v9866_v35  ;;  %4104 = vmatmul.mubr.bf16.vlgmr.msra.gmra.mrb[0].mxu1 %v9898_v0  ;;  %v1099_v12 = vrot.slane %v1098_v1, 4  ;;  %v1710_v17 = vshll.u32 %v12146_v58, 16  ;;  %v9819_v23 = vrot.slane %v1452_v63, 9  ;;  %v1527_v25 = vrot.slane %v12131_v28, 5  ;;  %v12202_v62 = vld [vmem:[#allocation2 + $0x2c] sm:$0x1] }
  0x3c   : > { %10702 = vmatpush3.bf16.msra.mxu0 %v11566_v51  ;;  %4111 = vmatprep.mubr.bf16.mxu1 %v9915_v9  ;;  %v1530_v26 = vrot.slane %v12140_v38, 5  ;;  %v1116_v27 = vshrl.u32 %v12160_v5, 16  ;;  %v1108_v33 = vor.u32 %v1107_v15, %v1103_v7  ;;  %v9867_v35 = vcombine.low %v12114_v13, %v12131_v28  ;;  %v12200_v51 = vld [vmem:[#allocation2 + $0x28] sm:$0xf] }
  0x3d   : > { %v1119_v36 = vshll.u32 %v12160_v5, 16  ;;  %v1125_v37 = vshll.u32 %v12172_v10, 16  ;;  %10703 = vmatprep.subr.bf16.mxu0 %v11572_v40  ;;  %10814 = vmatpush3.bf16.msra.mxu1 %v11612_v47  ;;  %v1528_v43 = vsel %vm12118_vm7, %v9819_v23, %v1527_v25  ;;  %v1529_v38 = vrot.slane %v1527_v25, 4 }
  0x3e   : > { %v1118_v46 = vrot.slane %v1116_v27, 4  ;;  %v1129_v52 = vshrl.u32 %v12172_v10, 16  ;;  %10815 = vmatprep.subr.bf16.mxu1 %v11623_v21  ;;  %v1104_v13 = vsel %vm12124_vm8, %v1099_v12, %v1103_v7  ;;  %v1109_v28 = vrot.slane %v1108_v33, 4 }
  0x3f   : > { %v1121_v60 = vrot.slane %v1119_v36, 5  ;;  %v1127_v50 = vrot.slane %v1125_v37, 5  ;;  %v1531_v63 = vsel %vm12118_vm7, %v1529_v38, %v1530_v26  ;;  %v1137_v1 = vrot.slane %v1135_v48, 5  ;;  %v11598_v37 = vld [vmem:[%s16890_s1 + $0x118] sm:$0xff]  }
  0x40   : > { %v1131_v0 = vrot.slane %v1129_v52, 4  ;;  %10704 = vmatpush3.bf16.msra.mxu0 %v11574_v11  ;;  %v1114_v40 = vsel %vm12124_vm8, %v1109_v28, %v1113_v16  ;;  %v9899_v47 = vcombine.low %v1528_v43, %v1531_v63  ;;  %v9916_v9 = vcombine.low %v12187_v29, %v1639_v32  ;;  %v11586_v11 = vld [vmem:[%s16890_s1 + $0x110] sm:$0xff]   ;;  %v1454_v52 = vld [vmem:[#allocation2 + $0x24] sm:$0xe] }
  0x41   : > { %v1122_v7 = vor.u32 %v1121_v60, %v1118_v46  ;;  %10705 = vmatprep.subr.bf16.mxu0 %v11584_v19  ;;  %v9883_v12 = vcombine.low %v1104_v13, %v1114_v40  ;;  %v9820_v48 = vrot.slane %v1453_v39, 9  ;;  %10816 = vmatpush3.bf16.msra.mxu1 %v11626_v4  ;;  %v1534_v25 = vrot.slane %v12172_v10, 5  ;;  %v11596_v19 = vld [vmem:[%s16890_s1 + $0x158] sm:$0xff]   ;;  %v11608_v40 = vld [vmem:[%s16890_s1 + $0x160] sm:$0xff]  }
  0x42   : > { %v1132_v15 = vor.u32 %v1131_v0, %v1127_v50  ;;  %v1140_v16 = vshrl.u32 %v12196_v59, 16  ;;  %v1143_v26 = vshll.u32 %v12196_v59, 16  ;;  %v1149_v32 = vshll.u32 %v12200_v51, 16 }
  0x43   : > { %4112 = vmatmul.mubr.bf16.gmra.mrb[4].mxu1 %v9899_v47  ;;  %v1123_v23 = vrot.slane %v1122_v7, 4  ;;  %3950 = vmatprep.mubr.bf16.mxu0 %v9883_v12  ;;  %v1153_v33 = vshrl.u32 %v12200_v51, 16  ;;  %v1159_v36 = vshll.u32 %v12202_v62, 16  ;;  %v1535_v43 = vsel %vm12118_vm7, %v9820_v48, %v1534_v25 }
  0x44   : > { %v1133_v27 = vrot.slane %v1132_v15, 4  ;;  %4119 = vmatprep.mubr.bf16.mxu1 %v9916_v9  ;;  %3951 = vmatmul.mubr.bf16.gmra.mrb[4].mxu0 %v9867_v35  ;;  %v1536_v38 = vrot.slane %v1534_v25, 4  ;;  %v1142_v46 = vrot.slane %v1140_v16, 4  ;;  %v1145_v28 = vrot.slane %v1143_v26, 5  ;;  %v11637_v35 = vld [vmem:[%s16890_s1 + $0x1d0] sm:$0xff]  }
  0x45   : > { %v1128_v39 = vsel %vm12124_vm8, %v1123_v23, %v1127_v50  ;;  %v1151_v60 = vrot.slane %v1149_v32, 5  ;;  %v1155_v63 = vrot.slane %v1153_v33, 4  ;;  %10706 = vmatpush3.bf16.msra.mxu0 %v11586_v11  ;;  %v1161_v4 = vrot.slane %v1159_v36, 5  ;;  %10817 = vmatprep.subr.bf16.mxu1 %v11637_v35  ;;  %v12258_v25 = vld [vmem:[%s12022_s27 + $0x30] sm:$0xf] }
  0x46   : > { %v1138_v13 = vsel %vm12124_vm8, %v1133_v27, %v1137_v1  ;;  %v1538_v50 = vsel %vm12118_vm7, %v1536_v38, %v1537_v49  ;;  %v610_v1 = vsel %vm12040_vm2, %v12059_v24, %v12092_v53  ;;  %10707 = vmatprep.subr.bf16.mxu0 %v11596_v19  ;;  %v1146_v7 = vor.u32 %v1145_v28, %v1142_v46  ;;  %v12278_v19 = vld [vmem:[%s12022_s27 + $0x34] sm:$0xf]  ;;  %v11622_v27 = vld [vmem:[%s16890_s1 + $0x168] sm:$0xff]  }
  0x47   : > { %v9884_v0 = vcombine.low %v1128_v39, %v1138_v13  ;;  %v9900_v47 = vcombine.low %v1535_v43, %v1538_v50  ;;  %v1156_v9 = vor.u32 %v1155_v63, %v1151_v60  ;;  %v9779_v12 = vcombine.low %v610_v1, %v610_v1 }
  0x48   : > { %v9868_v41 = vcombine.low %v12160_v5, %v12172_v10  ;;  %v9780_v49 = vcombine.high %v610_v1, %v610_v1  ;;  %v9821_v15 = vrot.slane %v1454_v52, 9  ;;  %v1541_v48 = vrot.slane %v12200_v51, 5  ;;  %v11611_v5 = vld [vmem:[%s16890_s1 + $0x120] sm:$0xff]   ;;  %v11640_v10 = vld [vmem:[%s16890_s1 + $0x190] sm:$0xff]  }
  0x49   : > { %3958 = vmatprep.mubr.bf16.mxu0 %v9884_v0  ;;  %v1147_v24 = vrot.slane %v1146_v7, 4  ;;  %v1157_v53 = vrot.slane %v1156_v9, 4  ;;  %827 = vst [vmem:[#allocation2 + $0x30] sm:$0xf] %v9779_v12  ;;  %v1544_v11 = vrot.slane %v12202_v62, 5  ;;  %v9781_v23 = vcombine.low %v12096_v55, %v12096_v55  ;;  %10708 = vmatpush3.bf16.msra.mxu0 %v11598_v37 }
  0x4a   : > { %828 = vst [vmem:[#allocation2 + $0x34] sm:$0xf] %v9780_v49  ;;  %v12268_v62 = vsel %vm12118_vm7, %v9821_v15, %v1541_v48  ;;  %v1543_v55 = vrot.slane %v1541_v48, 4  ;;  %v611_v16 = vsel %vm12040_vm2, %v12072_v34, %v12099_v56  ;;  %v541_v26 = vshll.u32 %v9758_v44, 16  ;;  %10709 = vmatprep.subr.bf16.mxu0 %v11608_v40  ;;  %v12288_v56 = vld [vmem:[%s12022_s27 + $0x38] sm:$0xf]  ;;  %10818 = vmatpush3.bf16.msra.mxu1 %v11640_v10 }
  0x4b   : > { %4120 = vmatmul.mubr.bf16.gmra.mrb[8].mxu1 %v9900_v47  ;;  %v1152_v32 = vsel %vm12124_vm8, %v1147_v24, %v1151_v60  ;;  %v1162_v33 = vsel %vm12124_vm8, %v1157_v53, %v1161_v4  ;;  %829 = vst [vmem:[#allocation2 + $0x38] sm:$0x1] %v9781_v23  ;;  %v9782_v36 = vcombine.low %v611_v16, %v611_v16  ;;  %v11625_v44 = vld [vmem:[%s16890_s1 + $0x128] sm:$0xff]   ;;  %v12301_v38 = vshrl.u32 %v9727_v45, 16  ;;  %v12311_v60 = vld [vmem:[%s12022_s27 + $0x40] sm:$0xf] }
  0x4c   : > { %v9783_v34 = vcombine.high %v611_v16, %v611_v16  ;;  %3959 = vmatmul.mubr.bf16.gmra.mrb[8].mxu0 %v9868_v41  ;;  %v9885_v37 = vcombine.low %v1152_v32, %v1162_v33  ;;  %v1545_v39 = vsel %vm12118_vm7, %v1543_v55, %v1544_v11  ;;  %v543_v43 = vrot.slane %v541_v26, 3  ;;  %10819 = vmatprep.subr.bf16.mxu1 %v11646_v30  ;;  %v11652_v32 = vld [vmem:[%s16890_s1 + $0x198] sm:$0xff]  }
  0x4d   : > { %v9869_v46 = vcombine.low %v12196_v59, %v12200_v51  ;;  %830 = vst [vmem:[#allocation2 + $0x3c] sm:$0xf] %v9782_v36  ;;  %v400_v52 = vshrl.u32 %v12103_v57, 16  ;;  %v403_v13 = vshll.u32 %v12103_v57, 16  ;;  %v545_v28 = vshll.u32 %v9759_v3, 16  ;;  %10710 = vmatpush3.bf16.msra.mxu0 %v11611_v5  ;;  %v11636_v3 = vld [vmem:[%s16890_s1 + $0x170] sm:$0xff]  }
  0x4e   : > { %831 = vst [vmem:[#allocation2 + $0x40] sm:$0xf] %v9783_v34  ;;  %3966 = vmatprep.mubr.bf16.mxu0 %v9885_v37  ;;  %v9901_v45 = vcombine.low %v12268_v62, %v1545_v39  ;;  %v627_v59 = vsel %vm12040_vm2, %v12078_v42, %v543_v43  ;;  %v9728_v57 = vcombine.low %v12258_v25, %v12258_v25  ;;  %v11639_v42 = vld [vmem:[%s16890_s1 + $0x130] sm:$0xff]   ;;  %v11651_v62 = vld [vmem:[%s16890_s1 + $0x178] sm:$0xff]  }
  0x4f   : > { %v12324_v31 = vcombine.low %v12258_v25, %v12278_v19  ;;  %v9784_v51 = vcombine.low %v627_v59, %v627_v59  ;;  %v402_v63 = vrot.slane %v400_v52, 7  ;;  %v547_v35 = vrot.slane %v545_v28, 3  ;;  %10711 = vmatprep.subr.bf16.mxu0 %v11622_v27  ;;  %10820 = vmatpush3.bf16.msra.mxu1 %v11652_v32 }
  0x50   : > { %v9760_v0 = vcombine.low %v12278_v19, %v12278_v19  ;;  %v12334_v50 = vld [vmem:[#allocation2 + $0x30] sm:$0xf]  ;;  %v9729_v40 = vcombine.low %v12288_v56, %v12288_v56  ;;  %v12342_v47 = vcombine.low %v12288_v56, %v12291_v14  ;;  %v9761_v7 = vcombine.low %v12291_v14, %v12291_v14  ;;  %v11667_v14 = vld [vmem:[%s16890_s1 + $0x1b8] sm:$0xff]  }
  0x51   : > { %v12336_v4 = vld [vmem:[#allocation2 + $0x30] sm:$0xf]  ;;  %v9730_v9 = vcombine.low %v12311_v60, %v12311_v60  ;;  %v1641_v12 = vld [vmem:[#allocation2 + $0x34] sm:$0xf]  ;;  %832 = vst [vmem:[#allocation2 + $0x44] sm:$0x1] %v9784_v51  ;;  %v405_v48 = vor.u32 %v403_v13, %v402_v63  ;;  %v12354_v24 = vsel %vm12040_vm2, %v402_v63, %v547_v35  ;;  %10712 = vmatpush3.bf16.msra.mxu0 %v11625_v44 }
  0x52   : > { %v1455_v1 = vld [vmem:[#allocation2 + $0x30] sm:$0xe]  ;;  %v12350_v15 = vld [vmem:[#allocation2 + $0x34] sm:$0xf]  ;;  %v9917_v53 = vcombine.low %v12334_v50, %v1641_v12  ;;  %v1052_v11 = vld [vmem:[#allocation2 + $0x38] sm:$0x1]  ;;  %10713 = vmatprep.subr.bf16.mxu0 %v11636_v3 }
  0x53   : > { %v1164_v23 = vshrl.u32 %v12336_v4, 16  ;;  %v1167_v5 = vshll.u32 %v12336_v4, 16  ;;  %v1173_v10 = vshll.u32 %v12350_v15, 16  ;;  %v1177_v55 = vshrl.u32 %v12350_v15, 16 }
  0x54   : > { %v1183_v16 = vshll.u32 %v1052_v11, 16  ;;  %v9870_v26 = vcombine.low %v12336_v4, %v12350_v15  ;;  %v9822_v27 = vrot.slane %v1455_v1, 9  ;;  %4127 = vmatprep.mubr.bf16.mxu1 %v9917_v53  ;;  %3967 = vmatmul.mubr.bf16.gmra.mrb[12].mxu0 %v9869_v46  ;;  %v12369_v44 = vld [vmem:[#allocation2 + $0x3c] sm:$0xf]  ;;  %v1548_v37 = vrot.slane %v12350_v15, 5  ;;  %v11655_v53 = vld [vmem:[%s16890_s1 + $0x1e0] sm:$0xff]  }
  0x55   : > { %v1166_v33 = vrot.slane %v1164_v23, 4  ;;  %v1169_v36 = vrot.slane %v1167_v5, 5  ;;  %v1175_v34 = vrot.slane %v1173_v10, 5  ;;  %4128 = vmatmul.mubr.bf16.gmra.mrb[12].mxu1 %v9901_v45  ;;  %v1179_v39 = vrot.slane %v1177_v55, 4  ;;  %v1643_v52 = vld [vmem:[#allocation2 + $0x40] sm:$0xf]  ;;  %10714 = vmatpush3.bf16.msra.mxu0 %v11639_v42 }
  0x56   : > { %v1185_v43 = vrot.slane %v1183_v16, 5  ;;  %v9918_v59 = vcombine.low %v12369_v44, %v1643_v52  ;;  %v1549_v46 = vsel %vm12118_vm7, %v9822_v27, %v1548_v37  ;;  %v1550_v3 = vrot.slane %v1548_v37, 4  ;;  %v12377_v51 = vld [vmem:[#allocation2 + $0x3c] sm:$0xf]  ;;  %v12379_v63 = vld [vmem:[#allocation2 + $0x40] sm:$0xf]  ;;  %10715 = vmatprep.subr.bf16.mxu0 %v11651_v62  ;;  %10821 = vmatprep.subr.bf16.mxu1 %v11655_v53 }
  0x57   : > { %v1170_v30 = vor.u32 %v1169_v36, %v1166_v33  ;;  %v11654_v45 = vld [vmem:[%s16890_s1 + $0x138] sm:$0xff]   ;;  %v1180_v35 = vor.u32 %v1179_v39, %v1175_v34  ;;  %v1551_v42 = vrot.slane %v1052_v11, 5  ;;  %v1188_v1 = vshrl.u32 %v12377_v51, 16  ;;  %v11656_v11 = vld [vmem:[%s16890_s1 + $0x1a0] sm:$0xff]   ;;  %v11657_v37 = vld [vmem:[%s16890_s1 + $0x1e8] sm:$0xff]  }
  0x58   : > { %v1191_v12 = vshll.u32 %v12377_v51, 16  ;;  %4135 = vmatprep.mubr.bf16.mxu1 %v9918_v59  ;;  %v1053_v5 = vld [vmem:[#allocation2 + $0x44] sm:$0x1]  ;;  %v1197_v10 = vshll.u32 %v12379_v63, 16  ;;  %v1201_v62 = vshrl.u32 %v12379_v63, 16  ;;  %v612_v55 = vsel %vm12040_vm2, %v12301_v38, %v405_v48  ;;  %10822 = vmatpush3.bf16.msra.mxu1 %v11656_v11 }
  0x59   : > { %v1171_v23 = vrot.slane %v1170_v30, 4  ;;  %v1181_v16 = vrot.slane %v1180_v35, 4  ;;  %v1552_v27 = vsel %vm12118_vm7, %v1550_v3, %v1551_v42  ;;  %v1190_v32 = vrot.slane %v1188_v1, 4  ;;  %v12400_v36 = vld [vmem:[%s12022_s27 + $0x44] sm:$0xf]  ;;  %10716 = vmatpush3.bf16.msra.mxu0 %v11654_v45  ;;  %10823 = vmatprep.subr.bf16.mxu1 %v11657_v37  ;;  %v11662_v45 = vld [vmem:[%s16890_s1 + $0x1a8] sm:$0xff]  }
  0x5a   : > { %v1193_v33 = vrot.slane %v1191_v12, 5  ;;  %v9902_v48 = vcombine.low %v1549_v46, %v1552_v27  ;;  %v1199_v39 = vrot.slane %v1197_v10, 5  ;;  %v1203_v52 = vrot.slane %v1201_v62, 4  ;;  %v1456_v30 = vld [vmem:[#allocation2 + $0x3c] sm:$0xe]  ;;  %v11664_v27 = vld [vmem:[%s16890_s1 + $0x1f0] sm:$0xff]  }
  0x5b   : > { %v1176_v38 = vsel %vm12124_vm8, %v1171_v23, %v1175_v34  ;;  %v1186_v59 = vsel %vm12124_vm8, %v1181_v16, %v1185_v43  ;;  %v1207_v35 = vshll.u32 %v1053_v5, 16  ;;  %v9785_v42 = vcombine.low %v612_v55, %v612_v55 }
  0x5c   : > { %v1194_v3 = vor.u32 %v1193_v33, %v1190_v32  ;;  %v9886_v1 = vcombine.low %v1176_v38, %v1186_v59  ;;  %v1204_v12 = vor.u32 %v1203_v52, %v1199_v39  ;;  %v9786_v53 = vcombine.high %v612_v55, %v612_v55  ;;  %10824 = vmatpush3.bf16.msra.mxu1 %v11662_v45 }
  0x5d   : > { %v12414_v34 = vcombine.low %v12311_v60, %v12400_v36  ;;  %4136 = vmatmul.mubr.bf16.gmra.mrb[16].mxu1 %v9902_v48  ;;  %v1209_v23 = vrot.slane %v1207_v35, 5  ;;  %833 = vst [vmem:[#allocation2 + $0x48] sm:$0xf] %v9785_v42  ;;  %v9823_v43 = vrot.slane %v1456_v30, 9  ;;  %v1555_v10 = vrot.slane %v12379_v63, 5  ;;  %10825 = vmatprep.subr.bf16.mxu1 %v11664_v27  ;;  %v11666_v30 = vld [vmem:[%s16890_s1 + $0x1f8] sm:$0xff]  }
  0x5e   : > { %v1195_v46 = vrot.slane %v1194_v3, 4  ;;  %3974 = vmatprep.mubr.bf16.mxu0 %v9886_v1  ;;  %v1205_v62 = vrot.slane %v1204_v12, 4  ;;  %834 = vst [vmem:[#allocation2 + $0x4c] sm:$0xf] %v9786_v53  ;;  %v1558_v11 = vrot.slane %v1053_v5, 5  ;;  %v9787_v16 = vcombine.low %v12354_v24, %v12354_v24 }
  0x5f   : > { %v271_v55 = vshrl.u32 %v9728_v57, 16  ;;  %3975 = vmatmul.mubr.bf16.gmra.mrb[16].mxu0 %v9870_v26  ;;  %v9871_v24 = vcombine.low %v12377_v51, %v12379_v63  ;;  %v1557_v5 = vrot.slane %v1555_v10, 4  ;;  %v407_v25 = vshrl.u32 %v12324_v31, 16  ;;  %v12442_v26 = vld [vmem:[%s12022_s27 + $0x48] sm:$0xf]  ;;  %v11665_v51 = vld [vmem:[%s16890_s1 + $0x1b0] sm:$0xff]  }
  0x60   : > { %v1200_v32 = vsel %vm12124_vm8, %v1195_v46, %v1199_v39  ;;  %v1210_v57 = vsel %vm12124_vm8, %v1205_v62, %v1209_v23  ;;  %v1556_v33 = vsel %vm12118_vm7, %v9823_v43, %v1555_v10  ;;  %835 = vst [vmem:[#allocation2 + $0x50] sm:$0x1] %v9787_v16  ;;  %v410_v4 = vshll.u32 %v12324_v31, 16  ;;  %v12451_v39 = vld [vmem:[%s12022_s27 + $0x4c] sm:$0xf]  ;;  %10826 = vmatpush3.bf16.msra.mxu1 %v11665_v51  ;;  %v11668_v16 = vld [vmem:[%s16890_s1 + $0x200] sm:$0xff]  }
  0x61   : > { %v549_v15 = vshll.u32 %v9760_v0, 16  ;;  %v9887_v63 = vcombine.low %v1200_v32, %v1210_v57  ;;  %v1559_v37 = vsel %vm12118_vm7, %v1557_v5, %v1558_v11  ;;  %v409_v38 = vrot.slane %v407_v25, 7  ;;  %10827 = vmatprep.subr.bf16.mxu1 %v11666_v30  ;;  %11421 = vmatprep.subr.bf16.mxu0 %v11668_v16 }
  0x62   : > { %v414_v48 = vshrl.u32 %v12342_v47, 16  ;;  %v274_v19 = vshrl.u32 %v9729_v40, 16  ;;  %v417_v0 = vshll.u32 %v12342_v47, 16  ;;  %v553_v52 = vshll.u32 %v9761_v7, 16 }
  0x63   : > { %v551_v31 = vrot.slane %v549_v15, 3  ;;  %3982 = vmatprep.mubr.bf16.mxu0 %v9887_v63  ;;  %v412_v59 = vor.u32 %v410_v4, %v409_v38  ;;  %v12466_v35 = vshrl.u32 %v9730_v9, 16  ;;  %v421_v56 = vshrl.u32 %v12414_v34, 16 }
  0x64   : > { %v416_v3 = vrot.slane %v414_v48, 7  ;;  %v12472_v40 = vld [vmem:[#allocation2 + $0x48] sm:$0xf]  ;;  %v9903_v47 = vcombine.low %v1556_v33, %v1559_v37  ;;  %v9762_v60 = vcombine.low %v12400_v36, %v12400_v36  ;;  %v9731_v9 = vcombine.low %v12442_v26, %v12442_v26  ;;  %10828 = vmatpush3.bf16.msra.mxu1 %v11667_v14 }
  0x65   : > { %v12474_v7 = vld [vmem:[#allocation2 + $0x48] sm:$0xf]  ;;  %v629_v45 = vsel %vm12040_vm2, %v409_v38, %v551_v31  ;;  %v1645_v1 = vld [vmem:[#allocation2 + $0x4c] sm:$0xf]  ;;  %v613_v46 = vsel %vm12040_vm2, %v271_v55, %v412_v59  ;;  %v12489_v43 = vcombine.low %v12442_v26, %v12451_v39  ;;  %v555_v30 = vrot.slane %v553_v52, 3 }
  0x66   : > { %v1457_v42 = vld [vmem:[#allocation2 + $0x48] sm:$0xe]  ;;  %v12483_v53 = vld [vmem:[#allocation2 + $0x4c] sm:$0xf]  ;;  %v9790_v23 = vcombine.low %v629_v45, %v629_v45  ;;  %v9919_v10 = vcombine.low %v12472_v40, %v1645_v1  ;;  %v1212_v36 = vshrl.u32 %v12474_v7, 16  ;;  %v1215_v62 = vshll.u32 %v12474_v7, 16 }
  0x67   : > { %v1221_v11 = vshll.u32 %v12483_v53, 16  ;;  %3983 = vmatmul.mubr.bf16.gmra.mrb[20].mxu0 %v9871_v24  ;;  %v1054_v27 = vld [vmem:[#allocation2 + $0x50] sm:$0x1]  ;;  %v1225_v32 = vshrl.u32 %v12483_v53, 16  ;;  %v9788_v5 = vcombine.low %v613_v46, %v613_v46  ;;  %v9789_v25 = vcombine.high %v613_v46, %v613_v46 }
  0x68   : > { %838 = vst [vmem:[#allocation2 + $0x5c] sm:$0x1] %v9790_v23  ;;  %4143 = vmatprep.mubr.bf16.mxu1 %v9919_v10  ;;  %v1214_v57 = vrot.slane %v1212_v36, 4  ;;  %v1217_v33 = vrot.slane %v1215_v62, 5  ;;  %v1231_v15 = vshll.u32 %v1054_v27, 16  ;;  %v9824_v63 = vrot.slane %v1457_v42, 9 }
  0x69   : > { %v1223_v4 = vrot.slane %v1221_v11, 5  ;;  %4144 = vmatmul.mubr.bf16.gmra.mrb[20].mxu1 %v9903_v47  ;;  %v1227_v51 = vrot.slane %v1225_v32, 4  ;;  %836 = vst [vmem:[#allocation2 + $0x54] sm:$0xf] %v9788_v5  ;;  %837 = vst [vmem:[#allocation2 + $0x58] sm:$0xf] %v9789_v25  ;;  %v419_v31 = vor.u32 %v417_v0, %v416_v3  ;;  %v630_v42 = vsel %vm12040_vm2, %v416_v3, %v555_v30 }
  0x6a   : > { %v1562_v37 = vrot.slane %v12483_v53, 5  ;;  %v1565_v24 = vrot.slane %v1054_v27, 5  ;;  %v1218_v38 = vor.u32 %v1217_v33, %v1214_v57  ;;  %v1233_v48 = vrot.slane %v1231_v15, 5  ;;  %v12522_v5 = vld [vmem:[%s12022_s27 + $0x50] sm:$0xf] }
  0x6b   : > { %v1228_v59 = vor.u32 %v1227_v51, %v1223_v4  ;;  %v12503_v1 = vrot.slane %v421_v56, 7  ;;  %v614_v47 = vsel %vm12040_vm2, %v274_v19, %v419_v31  ;;  %v424_v23 = vshll.u32 %v12414_v34, 16 }
  0x6c   : > { %v1563_v14 = vsel %vm12118_vm7, %v9824_v63, %v1562_v37  ;;  %v1564_v45 = vrot.slane %v1562_v37, 4  ;;  %v1219_v46 = vrot.slane %v1218_v38, 4  ;;  %v9791_v52 = vcombine.low %v614_v47, %v614_v47 }
  0x6d   : > { %v1229_v10 = vrot.slane %v1228_v59, 4  ;;  %v9792_v36 = vcombine.high %v614_v47, %v614_v47  ;;  %v9872_v62 = vcombine.low %v12474_v7, %v12483_v53  ;;  %v9793_v19 = vcombine.low %v630_v42, %v630_v42  ;;  %v12546_v47 = vld [vmem:[%s12022_s27 + $0x54] sm:$0xf] }
  0x6e   : > { %v1566_v0 = vsel %vm12118_vm7, %v1564_v45, %v1565_v24  ;;  %v1224_v56 = vsel %vm12124_vm8, %v1219_v46, %v1223_v4  ;;  %v426_v16 = vor.u32 %v424_v23, %v12503_v1  ;;  %839 = vst [vmem:[#allocation2 + $0x60] sm:$0xf] %v9791_v52  ;;  %v12519_v32 = vshll.u32 %v9762_v60, 16 }
  0x6f   : > { %v1055_v11 = vld [vmem:[#allocation2 + $0x5c] sm:$0x1]  ;;  %v1234_v34 = vsel %vm12124_vm8, %v1229_v10, %v1233_v48  ;;  %840 = vst [vmem:[#allocation2 + $0x64] sm:$0xf] %v9792_v36  ;;  %v9904_v7 = vcombine.low %v1563_v14, %v1566_v0  ;;  %841 = vst [vmem:[#allocation2 + $0x68] sm:$0x1] %v9793_v19  ;;  %v9763_v15 = vcombine.low %v12451_v39, %v12451_v39 }
  0x70   : > { %v1255_v3 = vshll.u32 %v1055_v11, 16  ;;  %v1572_v27 = vrot.slane %v1055_v11, 5  ;;  %v9888_v25 = vcombine.low %v1224_v56, %v1234_v34  ;;  %v12524_v57 = vld [vmem:[#allocation2 + $0x54] sm:$0xf]  ;;  %v1647_v33 = vld [vmem:[#allocation2 + $0x58] sm:$0xf]  ;;  %v615_v4 = vsel %vm12040_vm2, %v12466_v35, %v426_v16 }
  0x71   : > { %v12526_v53 = vld [vmem:[#allocation2 + $0x54] sm:$0xf]  ;;  %v9920_v51 = vcombine.low %v12524_v57, %v1647_v33  ;;  %v12535_v63 = vld [vmem:[#allocation2 + $0x58] sm:$0xf]  ;;  %v9732_v24 = vcombine.low %v12522_v5, %v12522_v5  ;;  %v9794_v0 = vcombine.low %v615_v4, %v615_v4  ;;  %v9795_v56 = vcombine.high %v615_v4, %v615_v4 }
  0x72   : > { %v1236_v37 = vshrl.u32 %v12526_v53, 16  ;;  %3990 = vmatprep.mubr.bf16.mxu0 %v9888_v25  ;;  %v1239_v35 = vshll.u32 %v12526_v53, 16  ;;  %v1245_v48 = vshll.u32 %v12535_v63, 16  ;;  %v1249_v31 = vshrl.u32 %v12535_v63, 16  ;;  %v1458_v30 = vld [vmem:[#allocation2 + $0x54] sm:$0xe] }
  0x73   : > { %4151 = vmatprep.mubr.bf16.mxu1 %v9920_v51  ;;  %3991 = vmatmul.mubr.bf16.gmra.mrb[24].mxu0 %v9872_v62  ;;  %v1257_v14 = vrot.slane %v1255_v3, 5  ;;  %v9825_v45 = vrot.slane %v1458_v30, 9  ;;  %v1569_v46 = vrot.slane %v12535_v63, 5  ;;  %v559_v11 = vrot.slane %v12519_v32, 3  ;;  %842 = vst [vmem:[#allocation2 + $0x6c] sm:$0xf] %v9794_v0 }
  0x74   : > { %v1238_v59 = vrot.slane %v1236_v37, 4  ;;  %4152 = vmatmul.mubr.bf16.gmra.mrb[24].mxu1 %v9904_v7  ;;  %v1241_v42 = vrot.slane %v1239_v35, 5  ;;  %v1247_v23 = vrot.slane %v1245_v48, 5  ;;  %v1251_v10 = vrot.slane %v1249_v31, 4  ;;  %843 = vst [vmem:[#allocation2 + $0x70] sm:$0xf] %v9795_v56 }
  0x75   : > { %v1570_v52 = vsel %vm12118_vm7, %v9825_v45, %v1569_v46  ;;  %v1571_v36 = vrot.slane %v1569_v46, 4  ;;  %v12551_v16 = vld [vmem:[#allocation2 + $0x60] sm:$0xf]  ;;  %v9873_v3 = vcombine.low %v12526_v53, %v12535_v63  ;;  %v12559_v33 = vcombine.low %v12522_v5, %v12546_v47 }
  0x76   : > { %v1242_v62 = vor.u32 %v1241_v42, %v1238_v59  ;;  %v1252_v19 = vor.u32 %v1251_v10, %v1247_v23  ;;  %v1649_v34 = vld [vmem:[#allocation2 + $0x64] sm:$0xf]  ;;  %v12555_v25 = vld [vmem:[#allocation2 + $0x60] sm:$0xf]  ;;  %v1056_v37 = vld [vmem:[#allocation2 + $0x68] sm:$0x1]  ;;  %v9764_v53 = vcombine.low %v12546_v47, %v12546_v47 }
  0x77   : > { %v9921_v4 = vcombine.low %v12551_v16, %v1649_v34  ;;  %v1573_v32 = vsel %vm12118_vm7, %v1571_v36, %v1572_v27  ;;  %v12565_v51 = vld [vmem:[#allocation2 + $0x64] sm:$0xf]  ;;  %v1260_v31 = vshrl.u32 %v12555_v25, 16  ;;  %v1263_v30 = vshll.u32 %v12555_v25, 16  ;;  %v1459_v46 = vld [vmem:[#allocation2 + $0x60] sm:$0xe] }
  0x78   : > { %v1243_v63 = vrot.slane %v1242_v62, 4  ;;  %v1253_v35 = vrot.slane %v1252_v19, 4  ;;  %v9905_v48 = vcombine.low %v1570_v52, %v1573_v32  ;;  %v1269_v59 = vshll.u32 %v12565_v51, 16 }
  0x79   : > { %4159 = vmatprep.mubr.bf16.mxu1 %v9921_v4  ;;  %v1273_v45 = vshrl.u32 %v12565_v51, 16  ;;  %v1279_v27 = vshll.u32 %v1056_v37, 16  ;;  %v1262_v52 = vrot.slane %v1260_v31, 4  ;;  %v1265_v56 = vrot.slane %v1263_v30, 5 }
  0x7a   : > { %v1248_v42 = vsel %vm12124_vm8, %v1243_v63, %v1247_v23  ;;  %v1258_v10 = vsel %vm12124_vm8, %v1253_v35, %v1257_v14  ;;  %v1271_v62 = vrot.slane %v1269_v59, 5  ;;  %v9874_v34 = vcombine.low %v12555_v25, %v12565_v51  ;;  %v12581_v14 = vld [vmem:[#allocation2 + $0x6c] sm:$0xf] }
  0x7b   : > { %v9889_v36 = vcombine.low %v1248_v42, %v1258_v10  ;;  %v1275_v19 = vrot.slane %v1273_v45, 4  ;;  %v9826_v4 = vrot.slane %v1459_v46, 9  ;;  %v1576_v32 = vrot.slane %v12565_v51, 5  ;;  %v12586_v31 = vld [vmem:[#allocation2 + $0x6c] sm:$0xf] }
  0x7c   : > { %4160 = vmatmul.mubr.bf16.gmra.mrb[28].mxu1 %v9905_v48  ;;  %v1579_v7 = vrot.slane %v1056_v37, 5  ;;  %v1266_v23 = vor.u32 %v1265_v56, %v1262_v52  ;;  %v1281_v38 = vrot.slane %v1279_v27, 5  ;;  %v631_v35 = vsel %vm12040_vm2, %v12503_v1, %v559_v11  ;;  %v1651_v48 = vld [vmem:[#allocation2 + $0x70] sm:$0xf]  ;;  %v1460_v56 = vld [vmem:[#allocation2 + $0x6c] sm:$0xe] }
  0x7d   : > { %3998 = vmatprep.mubr.bf16.mxu0 %v9889_v36  ;;  %v1276_v63 = vor.u32 %v1275_v19, %v1271_v62  ;;  %v1577_v51 = vsel %vm12118_vm7, %v9826_v4, %v1576_v32  ;;  %v1578_v37 = vrot.slane %v1576_v32, 4  ;;  %v280_v30 = vshrl.u32 %v9731_v9, 16  ;;  %v12595_v1 = vld [vmem:[#allocation2 + $0x70] sm:$0xf] }
  0x7e   : > { %3999 = vmatmul.mubr.bf16.gmra.mrb[28].mxu0 %v9873_v3  ;;  %v1267_v59 = vrot.slane %v1266_v23, 4  ;;  %v9922_v27 = vcombine.low %v12581_v14, %v1651_v48  ;;  %v9796_v46 = vcombine.low %v631_v35, %v631_v35  ;;  %v1284_v3 = vshrl.u32 %v12586_v31, 16 }
  0x7f   : > { %v1277_v45 = vrot.slane %v1276_v63, 4  ;;  %v1580_v11 = vsel %vm12118_vm7, %v1578_v37, %v1579_v7  ;;  %v1287_v42 = vshll.u32 %v12586_v31, 16  ;;  %v1293_v10 = vshll.u32 %v12595_v1, 16 }
  0x80   : > { %v1272_v26 = vsel %vm12124_vm8, %v1267_v59, %v1271_v62  ;;  %4167 = vmatprep.mubr.bf16.mxu1 %v9922_v27  ;;  %v9906_v52 = vcombine.low %v1577_v51, %v1580_v11  ;;  %844 = vst [vmem:[#allocation2 + $0x74] sm:$0x1] %v9796_v46  ;;  %v1297_v36 = vshrl.u32 %v12595_v1, 16  ;;  %v1286_v7 = vrot.slane %v1284_v3, 4 }
  0x81   : > { %v1282_v9 = vsel %vm12124_vm8, %v1277_v45, %v1281_v38  ;;  %v1289_v4 = vrot.slane %v1287_v42, 5  ;;  %v1295_v32 = vrot.slane %v1293_v10, 5  ;;  %v428_v35 = vshrl.u32 %v12489_v43, 16 }
  0x82   : > { %v9890_v19 = vcombine.low %v1272_v26, %v1282_v9  ;;  %v1299_v63 = vrot.slane %v1297_v36, 4  ;;  %v431_v62 = vshll.u32 %v12489_v43, 16  ;;  %v9827_v48 = vrot.slane %v1460_v56, 9  ;;  %v195_v36 = vld [vmem:[%s12022_s27 + $0x5c] sm:$0xf] }
  0x83   : > { %v1290_v38 = vor.u32 %v1289_v4, %v1286_v7  ;;  %v1583_v51 = vrot.slane %v12595_v1, 5  ;;  %v561_v37 = vshll.u32 %v9763_v15, 16  ;;  %v430_v45 = vrot.slane %v428_v35, 7 }
  0x84   : > { %4006 = vmatprep.mubr.bf16.mxu0 %v9890_v19  ;;  %4168 = vmatmul.mubr.bf16.gmra.mrb[32].mxu1 %v9906_v52  ;;  %v1300_v59 = vor.u32 %v1299_v63, %v1295_v32  ;;  %v9875_v27 = vcombine.low %v12586_v31, %v12595_v1  ;;  %v435_v46 = vshrl.u32 %v12559_v33, 16  ;;  %v283_v39 = vshrl.u32 %v9732_v24, 16  ;;  %v194_v31 = vld [vmem:[%s12022_s27 + $0x58] sm:$0xf] }
  0x85   : > { %v1291_v43 = vrot.slane %v1290_v38, 4  ;;  %v12619_v11 = vsel %vm12118_vm7, %v9827_v48, %v1583_v51  ;;  %v563_v3 = vrot.slane %v561_v37, 3  ;;  %v433_v15 = vor.u32 %v431_v62, %v430_v45  ;;  %v196_v37 = vld [vmem:[%s12022_s27 + $0x60] sm:$0xf] }
  0x86   : > { %4007 = vmatmul.mubr.bf16.gmra.mrb[32].mxu0 %v9874_v34  ;;  %v1585_v42 = vrot.slane %v1583_v51, 4  ;;  %v437_v10 = vrot.slane %v435_v46, 7  ;;  %v438_v26 = vshll.u32 %v12559_v33, 16  ;;  %v1301_v9 = vrot.slane %v1300_v59, 4  ;;  %v197_v59 = vld [vmem:[%s12022_s27 + $0x64] sm:$0xf] }
  0x87   : > { %v1057_v1 = vld [vmem:[#allocation2 + $0x74] sm:$0x1]  ;;  %v632_v34 = vsel %vm12040_vm2, %v430_v45, %v563_v3  ;;  %v565_v52 = vshll.u32 %v9764_v53, 16  ;;  %v9733_v56 = vcombine.low %v194_v31, %v194_v31  ;;  %v616_v5 = vsel %vm12040_vm2, %v280_v30, %v433_v15  ;;  %v198_v15 = vld [vmem:[%s12022_s27 + $0x68] sm:$0xf] }
  0x88   : > { %v1303_v19 = vshll.u32 %v1057_v1, 16  ;;  %v1586_v24 = vrot.slane %v1057_v1, 5  ;;  %v9799_v7 = vcombine.low %v632_v34, %v632_v34  ;;  %v9797_v33 = vcombine.low %v616_v5, %v616_v5 }
  0x89   : > { %v9798_v4 = vcombine.high %v616_v5, %v616_v5  ;;  %v440_v63 = vor.u32 %v438_v26, %v437_v10  ;;  %v567_v35 = vrot.slane %v565_v52, 3  ;;  %v1296_v62 = vsel %vm12124_vm8, %v1291_v43, %v1295_v32 }
  0x8a   : > { %v1305_v38 = vrot.slane %v1303_v19, 5  ;;  %v12638_v47 = vsel %vm12118_vm7, %v1585_v42, %v1586_v24  ;;  %847 = vst [vmem:[#allocation2 + $0x80] sm:$0x1] %v9799_v7  ;;  %v9749_v53 = vcombine.low %v194_v31, %v195_v36  ;;  %845 = vst [vmem:[#allocation2 + $0x78] sm:$0xf] %v9797_v33  ;;  %v12644_v51 = vshrl.u32 %v9733_v56, 16 }
  0x8b   : > { %846 = vst [vmem:[#allocation2 + $0x7c] sm:$0xf] %v9798_v4  ;;  %v617_v30 = vsel %vm12040_vm2, %v283_v39, %v440_v63  ;;  %v633_v48 = vsel %vm12040_vm2, %v437_v10, %v567_v35  ;;  %v9765_v32 = vcombine.low %v195_v36, %v195_v36  ;;  %v12652_v42 = vld [vmem:[%s12022_s27 + $0x6c] sm:$0xf]  ;;  %v9734_v1 = vcombine.low %v196_v37, %v196_v37  ;;  %v12662_v24 = vld [vmem:[%s12022_s27 + $0x70] sm:$0xf] }
  0x8c   : > { %v1306_v45 = vsel %vm12124_vm8, %v1301_v9, %v1305_v38  ;;  %v9800_v46 = vcombine.low %v617_v30, %v617_v30  ;;  %v9801_v43 = vcombine.high %v617_v30, %v617_v30  ;;  %v9802_v3 = vcombine.low %v633_v48, %v633_v48  ;;  %v12665_v7 = vld [vmem:[%s12022_s27 + $0x74] sm:$0xf] }
  0x8d   : > { %v9891_v26 = vcombine.low %v1296_v62, %v1306_v45  ;;  %v442_v39 = vshrl.u32 %v9749_v53, 16  ;;  %v445_v31 = vshll.u32 %v9749_v53, 16  ;;  %v569_v10 = vshll.u32 %v9765_v32, 16 }
  0x8e   : > { %848 = vst [vmem:[#allocation2 + $0x84] sm:$0xf] %v9800_v46  ;;  %849 = vst [vmem:[#allocation2 + $0x88] sm:$0xf] %v9801_v43  ;;  %v12654_v34 = vcombine.low %v196_v37, %v197_v59  ;;  %v9766_v52 = vcombine.low %v197_v59, %v197_v59  ;;  %v9735_v9 = vcombine.low %v198_v15, %v198_v15  ;;  %v12667_v33 = vshrl.u32 %v9734_v1, 16 }
  0x8f   : > { %850 = vst [vmem:[#allocation2 + $0x8c] sm:$0x1] %v9802_v3  ;;  %4014 = vmatprep.mubr.bf16.mxu0 %v9891_v26  ;;  %v9907_v36 = vcombine.low %v12619_v11, %v12638_v47  ;;  %v444_v56 = vrot.slane %v442_v39, 7  ;;  %v571_v19 = vrot.slane %v569_v10, 3  ;;  %v12659_v5 = vcombine.low %v198_v15, %v12652_v42 }
  0x90   : > { %4015 = vmatmul.mubr.bf16.gmra.mrb[36].mxu0 %v9875_v27  ;;  %v449_v4 = vshrl.u32 %v12654_v34, 16  ;;  %v452_v63 = vshll.u32 %v12654_v34, 16  ;;  %v9767_v35 = vcombine.low %v12652_v42, %v12652_v42  ;;  %v12675_v38 = vshll.u32 %v9766_v52, 16 }
  0x91   : > { %v1058_v11 = vld [vmem:[#allocation2 + $0x80] sm:$0x1]  ;;  %v634_v62 = vsel %vm12040_vm2, %v444_v56, %v571_v19  ;;  %v12677_v47 = vshrl.u32 %v9735_v9, 16  ;;  %v456_v53 = vshrl.u32 %v12659_v5, 16  ;;  %v12680_v27 = vld [vmem:[#allocation2 + $0x78] sm:$0xf]  ;;  %v447_v32 = vor.u32 %v445_v31, %v444_v56 }
  0x92   : > { %v1653_v30 = vld [vmem:[#allocation2 + $0x7c] sm:$0xf]  ;;  %v12682_v48 = vld [vmem:[#allocation2 + $0x78] sm:$0xf]  ;;  %v9805_v37 = vcombine.low %v634_v62, %v634_v62  ;;  %v9736_v59 = vcombine.low %v12662_v24, %v12662_v24  ;;  %v12688_v45 = vcombine.low %v12662_v24, %v12665_v7  ;;  %v1327_v1 = vshll.u32 %v1058_v11, 16 }
  0x93   : > { %v9923_v3 = vcombine.low %v12680_v27, %v1653_v30  ;;  %v12693_v15 = vld [vmem:[#allocation2 + $0x7c] sm:$0xf]  ;;  %v1308_v26 = vshrl.u32 %v12682_v48, 16  ;;  %v1311_v39 = vshll.u32 %v12682_v48, 16  ;;  %v1461_v52 = vld [vmem:[#allocation2 + $0x78] sm:$0xe]  ;;  %v9768_v43 = vcombine.low %v12665_v7, %v12665_v7 }
  0x94   : > { %v1317_v31 = vshll.u32 %v12693_v15, 16  ;;  %v1321_v10 = vshrl.u32 %v12693_v15, 16  ;;  %853 = vst [vmem:[#allocation2 + $0x98] sm:$0x1] %v9805_v37  ;;  %v9876_v62 = vcombine.low %v12682_v48, %v12693_v15  ;;  %v9828_v30 = vrot.slane %v1461_v52, 9 }
  0x95   : > { %4175 = vmatprep.mubr.bf16.mxu1 %v9923_v3  ;;  %v1310_v9 = vrot.slane %v1308_v26, 4  ;;  %v12699_v56 = vld [vmem:[#allocation2 + $0x84] sm:$0xf]  ;;  %v1655_v19 = vld [vmem:[#allocation2 + $0x88] sm:$0xf]  ;;  %v1313_v46 = vrot.slane %v1311_v39, 5  ;;  %v618_v37 = vsel %vm12040_vm2, %v12644_v51, %v447_v32 }
  0x96   : > { %4176 = vmatmul.mubr.bf16.gmra.mrb[36].mxu1 %v9907_v36  ;;  %v1319_v23 = vrot.slane %v1317_v31, 5  ;;  %v1323_v25 = vrot.slane %v1321_v10, 4  ;;  %v12705_v0 = vld [vmem:[#allocation2 + $0x84] sm:$0xf]  ;;  %v1329_v3 = vrot.slane %v1327_v1, 5  ;;  %v9924_v60 = vcombine.low %v12699_v56, %v1655_v19 }
  0x97   : > { %v1590_v48 = vrot.slane %v12693_v15, 5  ;;  %v12713_v52 = vld [vmem:[#allocation2 + $0x88] sm:$0xf]  ;;  %v1314_v55 = vor.u32 %v1313_v46, %v1310_v9  ;;  %v1593_v39 = vrot.slane %v1058_v11, 5  ;;  %v1059_v31 = vld [vmem:[#allocation2 + $0x8c] sm:$0x1]  ;;  %v9803_v21 = vcombine.low %v618_v37, %v618_v37 }
  0x98   : > { %v1324_v36 = vor.u32 %v1323_v25, %v1319_v23  ;;  %v1332_v10 = vshrl.u32 %v12705_v0, 16  ;;  %4183 = vmatprep.mubr.bf16.mxu1 %v9924_v60  ;;  %v1335_v32 = vshll.u32 %v12705_v0, 16  ;;  %v1341_v1 = vshll.u32 %v12713_v52, 16  ;;  %v1462_v60 = vld [vmem:[#allocation2 + $0x84] sm:$0xe] }
  0x99   : > { %v1591_v12 = vsel %vm12118_vm7, %v9828_v30, %v1590_v48  ;;  %v1592_v51 = vrot.slane %v1590_v48, 4  ;;  %v1315_v19 = vrot.slane %v1314_v55, 4  ;;  %v1345_v28 = vshrl.u32 %v12713_v52, 16  ;;  %851 = vst [vmem:[#allocation2 + $0x90] sm:$0xf] %v9803_v21 }
  0x9a   : > { %v1325_v26 = vrot.slane %v1324_v36, 4  ;;  %v1334_v15 = vrot.slane %v1332_v10, 4  ;;  %v1337_v11 = vrot.slane %v1335_v32, 5  ;;  %v1343_v46 = vrot.slane %v1341_v1, 5 }
  0x9b   : > { %v1594_v25 = vsel %vm12118_vm7, %v1592_v51, %v1593_v39  ;;  %v1351_v9 = vshll.u32 %v1059_v31, 16  ;;  %v1320_v30 = vsel %vm12124_vm8, %v1315_v19, %v1319_v23  ;;  %v1347_v49 = vrot.slane %v1345_v28, 4  ;;  %v12727_v55 = vld [vmem:[#allocation2 + $0x98] sm:$0x1] }
  0x9c   : > { %v1330_v48 = vsel %vm12124_vm8, %v1325_v26, %v1329_v3  ;;  %v9908_v13 = vcombine.low %v1591_v12, %v1594_v25  ;;  %v1338_v41 = vor.u32 %v1337_v11, %v1334_v15  ;;  %v9804_v32 = vcombine.high %v618_v37, %v618_v37  ;;  %v203_v15 = vld [vmem:[%s12022_s27 + $0x7c] sm:$0xf] }
  0x9d   : > { %v9892_v36 = vcombine.low %v1320_v30, %v1330_v48  ;;  %v1348_v39 = vor.u32 %v1347_v49, %v1343_v46  ;;  %v1353_v51 = vrot.slane %v1351_v9, 5  ;;  %v9829_v1 = vrot.slane %v1462_v60, 9  ;;  %v12774_v30 = vld [vmem:[#allocation2 + $0x18] sm:$0xf] }
  0x9e   : > { %4184 = vmatmul.mubr.bf16.gmra.mrb[40].mxu1 %v9908_v13  ;;  %v1339_v2 = vrot.slane %v1338_v41, 4  ;;  %v1597_v23 = vrot.slane %v12713_v52, 5  ;;  %v1600_v3 = vrot.slane %v1059_v31, 5  ;;  %v1375_v28 = vshll.u32 %v12727_v55, 16  ;;  %852 = vst [vmem:[#allocation2 + $0x94] sm:$0xf] %v9804_v32 }
  0x9f   : > { %4022 = vmatprep.mubr.bf16.mxu0 %v9892_v36  ;;  %v1349_v12 = vrot.slane %v1348_v39, 4  ;;  %v451_v13 = vrot.slane %v449_v4, 7  ;;  %v1607_v49 = vrot.slane %v12727_v55, 5  ;;  %v575_v37 = vrot.slane %v12675_v38, 3  ;;  %v12793_v32 = vld [vmem:[#allocation2 + $0x24] sm:$0xf] }
  0xa0   : > { %4023 = vmatmul.mubr.bf16.gmra.mrb[40].mxu0 %v9876_v62  ;;  %v1344_v21 = vsel %vm12124_vm8, %v1339_v2, %v1343_v46  ;;  %v1598_v41 = vsel %vm12118_vm7, %v9829_v1, %v1597_v23  ;;  %v1599_v26 = vrot.slane %v1597_v23, 4  ;;  %v12740_v31 = vrot.slane %v1375_v28, 5  ;;  %v12753_v2 = vld [vmem:[%s12022_s27 + $0x78] sm:$0xf]  ;;  %v12780_v42 = vld [vmem:[#allocation2 + $0x90] sm:$0xf] }
  0xa1   : > { %v1354_v62 = vsel %vm12124_vm8, %v1349_v12, %v1353_v51  ;;  %v454_v19 = vor.u32 %v452_v63, %v451_v13  ;;  %v635_v4 = vsel %vm12040_vm2, %v451_v13, %v575_v37  ;;  %v12750_v38 = vrot.slane %v456_v53, 7  ;;  %v12782_v36 = vld [vmem:[#allocation2 + $0x90] sm:$0xf] }
  0xa2   : > { %v9893_v25 = vcombine.low %v1344_v21, %v1354_v62  ;;  %v1601_v11 = vsel %vm12118_vm7, %v1599_v26, %v1600_v3  ;;  %v9808_v46 = vcombine.low %v635_v4, %v635_v4  ;;  %v459_v9 = vshll.u32 %v12659_v5, 16  ;;  %v1463_v24 = vld [vmem:[#allocation2 + $0x90] sm:$0xe]  ;;  %v12808_v62 = vld [vmem:[#allocation2 + $0x28] sm:$0xf] }
  0xa3   : > { %v9877_v34 = vcombine.low %v12705_v0, %v12713_v52  ;;  %v619_v63 = vsel %vm12040_vm2, %v12667_v33, %v454_v19  ;;  %v12767_v53 = vshll.u32 %v9767_v35, 16  ;;  %v12772_v60 = vshrl.u32 %v9736_v59, 16  ;;  %v12778_v52 = vld [vmem:[#allocation2 + $0x1c] sm:$0xf] }
  0xa4   : > { %4030 = vmatprep.mubr.bf16.mxu0 %v9893_v25  ;;  %v9806_v5 = vcombine.low %v619_v63, %v619_v63  ;;  %v9807_v48 = vcombine.high %v619_v63, %v619_v63  ;;  %856 = vst [vmem:[#allocation2 + $0xa4] sm:$0x1] %v9808_v46  ;;  %v461_v0 = vor.u32 %v459_v9, %v12750_v38  ;;  %v463_v33 = vshrl.u32 %v12688_v45, 16 }
  0xa5   : > { %v9909_v35 = vcombine.low %v1598_v41, %v1601_v11  ;;  %v9737_v59 = vcombine.low %v12753_v2, %v12753_v2  ;;  %v12787_v39 = vcombine.low %v12753_v2, %v203_v15  ;;  %v1695_v51 = vsel %vm12124_vm8, %v12148_v61, %v12128_v22  ;;  %v1657_v1 = vld [vmem:[#allocation2 + $0x94] sm:$0xf]  ;;  %v11818_v61 = vld [vmem:[#allocation2 + $0x1c] sm:$0xf] }
  0xa6   : > { %v12797_v28 = vld [vmem:[#allocation2 + $0x94] sm:$0xf]  ;;  %854 = vst [vmem:[#allocation2 + $0x9c] sm:$0xf] %v9806_v5  ;;  %855 = vst [vmem:[#allocation2 + $0xa0] sm:$0xf] %v9807_v48  ;;  %v620_v12 = vsel %vm12040_vm2, %v12677_v47, %v461_v0  ;;  %v9962_v13 = vcombine.low %v12774_v30, %v12778_v52  ;;  %v9925_v37 = vcombine.low %v12780_v42, %v1657_v1 }
  0xa7   : > { %v1356_v21 = vshrl.u32 %v12782_v36, 16  ;;  %v1359_v41 = vshll.u32 %v12782_v36, 16  ;;  %v1365_v26 = vshll.u32 %v12797_v28, 16  ;;  %v1369_v19 = vshrl.u32 %v12797_v28, 16 }
  0xa8   : > { %4031 = vmatmul.mubr.bf16.gmra.mrb[44].mxu0 %v9877_v34  ;;  %v9830_v4 = vrot.slane %v1463_v24, 9  ;;  %v1604_v15 = vrot.slane %v12797_v28, 5  ;;  %v9963_v47 = vcombine.low %v12793_v32, %v12808_v62  ;;  %4191 = vmatprep.mubr.bf16.mxu1 %v9925_v37  ;;  %v9809_v9 = vcombine.low %v620_v12, %v620_v12 }
  0xa9   : > { %v1358_v25 = vrot.slane %v1356_v21, 4  ;;  %v1361_v11 = vrot.slane %v1359_v41, 5  ;;  %v1367_v46 = vrot.slane %v1365_v26, 5  ;;  %4192 = vmatmul.mubr.bf16.gmra.mrb[44].mxu1 %v9909_v35  ;;  %v1371_v34 = vrot.slane %v1369_v19, 4 }
  0xaa   : > { %v1605_v63 = vsel %vm12118_vm7, %v9830_v4, %v1604_v15  ;;  %v1606_v5 = vrot.slane %v1604_v15, 4  ;;  %v9810_v48 = vcombine.high %v620_v12, %v620_v12  ;;  %857 = vst [vmem:[#allocation2 + $0xa8] sm:$0xf] %v9809_v9  ;;  %v579_v24 = vrot.slane %v12767_v53, 3 }
  0xab   : > { %v1362_v0 = vor.u32 %v1361_v11, %v1358_v25  ;;  %v12816_v1 = vld [vmem:[#allocation2 + $0xa4] sm:$0x1]  ;;  %v12819_v3 = vrot.slane %v463_v33, 7  ;;  %v466_v37 = vshll.u32 %v12688_v45, 16  ;;  %v1372_v21 = vor.u32 %v1371_v34, %v1367_v46 }
  0xac   : > { %v9878_v35 = vcombine.low %v12782_v36, %v12797_v28  ;;  %v1608_v41 = vsel %vm12118_vm7, %v1606_v5, %v1607_v49  ;;  %v1399_v12 = vshll.u32 %v12816_v1, 16  ;;  %858 = vst [vmem:[#allocation2 + $0xac] sm:$0xf] %v9810_v48  ;;  %v1614_v4 = vrot.slane %v12816_v1, 5 }
  0xad   : > { %v1363_v26 = vrot.slane %v1362_v0, 4  ;;  %v12829_v19 = vld [vmem:[#allocation2 + $0x9c] sm:$0xf]  ;;  %v1659_v53 = vld [vmem:[#allocation2 + $0xa0] sm:$0xf]  ;;  %v9910_v33 = vcombine.low %v1605_v63, %v1608_v41  ;;  %v636_v45 = vsel %vm12040_vm2, %v12750_v38, %v579_v24  ;;  %v1373_v36 = vrot.slane %v1372_v21, 4 }
  0xae   : > { %v9926_v28 = vcombine.low %v12829_v19, %v1659_v53  ;;  %v12837_v49 = vld [vmem:[#allocation2 + $0x9c] sm:$0xf]  ;;  %v468_v15 = vor.u32 %v466_v37, %v12819_v3  ;;  %v12843_v9 = vld [vmem:[#allocation2 + $0xa0] sm:$0xf]  ;;  %v1401_v0 = vrot.slane %v1399_v12, 5  ;;  %v9811_v55 = vcombine.low %v636_v45, %v636_v45 }
  0xaf   : > { %v1368_v25 = vsel %vm12124_vm8, %v1363_v26, %v1367_v46  ;;  %v1380_v34 = vshrl.u32 %v12837_v49, 16  ;;  %v1383_v38 = vshll.u32 %v12837_v49, 16  ;;  %v1378_v63 = vsel %vm12124_vm8, %v1373_v36, %v12740_v31  ;;  %v1464_v1 = vld [vmem:[#allocation2 + $0x9c] sm:$0xe] }
  0xb0   : > { %4199 = vmatprep.mubr.bf16.mxu1 %v9926_v28  ;;  %v1389_v5 = vshll.u32 %v12843_v9, 16  ;;  %v1393_v48 = vshrl.u32 %v12843_v9, 16  ;;  %v9894_v46 = vcombine.low %v1368_v25, %v1378_v63  ;;  %v9831_v21 = vrot.slane %v1464_v1, 9  ;;  %859 = vst [vmem:[#allocation2 + $0xb0] sm:$0x1] %v9811_v55 }
  0xb1   : > { %v1382_v24 = vrot.slane %v1380_v34, 4  ;;  %v1385_v37 = vrot.slane %v1383_v38, 5  ;;  %4200 = vmatmul.mubr.bf16.gmra.mrb[48].mxu1 %v9910_v33  ;;  %v12852_v53 = vld [vmem:[#allocation2 + $0xa8] sm:$0xf]  ;;  %v1611_v11 = vrot.slane %v12843_v9, 5  ;;  %v9879_v12 = vcombine.low %v12837_v49, %v12843_v9 }
  0xb2   : > { %v1391_v41 = vrot.slane %v1389_v5, 5  ;;  %v1395_v26 = vrot.slane %v1393_v48, 4  ;;  %4038 = vmatprep.mubr.bf16.mxu0 %v9894_v46  ;;  %v12858_v25 = vld [vmem:[#allocation2 + $0xa8] sm:$0xf]  ;;  %v621_v33 = vsel %vm12040_vm2, %v12772_v60, %v468_v15 }
  0xb3   : > { %v1386_v31 = vor.u32 %v1385_v37, %v1382_v24  ;;  %v1661_v36 = vld [vmem:[#allocation2 + $0xac] sm:$0xf]  ;;  %4039 = vmatmul.mubr.bf16.gmra.mrb[48].mxu0 %v9878_v35  ;;  %v1612_v45 = vsel %vm12118_vm7, %v9831_v21, %v1611_v11  ;;  %v1613_v63 = vrot.slane %v1611_v11, 4  ;;  %v1404_v49 = vshrl.u32 %v12858_v25, 16  ;;  %v1465_v24 = vld [vmem:[#allocation2 + $0xa8] sm:$0xe] }
  0xb4   : > { %v1396_v34 = vor.u32 %v1395_v26, %v1391_v41  ;;  %v9927_v38 = vcombine.low %v12852_v53, %v1661_v36  ;;  %v12866_v5 = vld [vmem:[#allocation2 + $0xac] sm:$0xf]  ;;  %v1407_v9 = vshll.u32 %v12858_v25, 16  ;;  %v9812_v15 = vcombine.low %v621_v33, %v621_v33 }
  0xb5   : > { %v1387_v48 = vrot.slane %v1386_v31, 4  ;;  %v1413_v1 = vshll.u32 %v12866_v5, 16  ;;  %v1615_v60 = vsel %vm12118_vm7, %v1613_v63, %v1614_v4  ;;  %v1417_v35 = vshrl.u32 %v12866_v5, 16 }
  0xb6   : > { %v1397_v46 = vrot.slane %v1396_v34, 4  ;;  %4207 = vmatprep.mubr.bf16.mxu1 %v9927_v38  ;;  %v9911_v11 = vcombine.low %v1612_v45, %v1615_v60  ;;  %v1406_v37 = vrot.slane %v1404_v49, 4  ;;  %v1409_v21 = vrot.slane %v1407_v9, 5  ;;  %860 = vst [vmem:[#allocation2 + $0xb4] sm:$0xf] %v9812_v15 }
  0xb7   : > { %v1392_v55 = vsel %vm12124_vm8, %v1387_v48, %v1391_v41  ;;  %v1415_v31 = vrot.slane %v1413_v1, 5  ;;  %v1419_v36 = vrot.slane %v1417_v35, 4  ;;  %v9813_v34 = vcombine.high %v621_v33, %v621_v33  ;;  %866 = vst [vmem:[#allocation2 + $0xcc] sm:$0xf] %v9812_v15  ;;  %v12878_v38 = vld [vmem:[#allocation2 + $0x14] sm:$0x1] }
  0xb8   : > { %v1402_v26 = vsel %vm12124_vm8, %v1397_v46, %v1401_v0  ;;  %v1410_v28 = vor.u32 %v1409_v21, %v1406_v37  ;;  %v9832_v23 = vrot.slane %v1465_v24, 9  ;;  %v1618_v45 = vrot.slane %v12866_v5, 5  ;;  %v12888_v48 = vld [vmem:[#allocation2 + $0xc] sm:$0xe]  ;;  %v1062_v49 = vld [vmem:[#allocation2 + $0xb0] sm:$0x1] }
  0xb9   : > { %v9895_v4 = vcombine.low %v1392_v55, %v1402_v26  ;;  %4208 = vmatmul.mubr.bf16.gmra.mrb[52].mxu1 %v9911_v11  ;;  %v1420_v41 = vor.u32 %v1419_v36, %v1415_v31  ;;  %861 = vst [vmem:[#allocation2 + $0xb8] sm:$0xf] %v9813_v34  ;;  %867 = vst [vmem:[#allocation2 + $0xd0] sm:$0xf] %v9813_v34  ;;  %v581_v0 = vshll.u32 %v9768_v43, 16  ;;  %v298_v33 = vshrl.u32 %v9737_v59, 16 }
  0xba   : > { %v1411_v9 = vrot.slane %v1410_v28, 4  ;;  %v470_v1 = vshrl.u32 %v12787_v39, 16  ;;  %v473_v46 = vshll.u32 %v12787_v39, 16  ;;  %v1702_v60 = vshll.u32 %v12878_v38, 16  ;;  %v12899_v28 = vld [vmem:[#allocation2 + $0x30] sm:$0xf] }
  0xbb   : > { %4046 = vmatprep.mubr.bf16.mxu0 %v9895_v4  ;;  %v1421_v35 = vrot.slane %v1420_v41, 4  ;;  %v1423_v15 = vshll.u32 %v1062_v49, 16  ;;  %v1619_v7 = vsel %vm12118_vm7, %v9832_v23, %v1618_v45  ;;  %v1620_v43 = vrot.slane %v1618_v45, 4  ;;  %v12901_v11 = vld [vmem:[#allocation2 + $0x34] sm:$0xf] }
  0xbc   : > { %4047 = vmatmul.mubr.bf16.gmra.mrb[52].mxu0 %v9879_v12  ;;  %v1416_v2 = vsel %vm12124_vm8, %v1411_v9, %v1415_v31  ;;  %v1621_v59 = vrot.slane %v1062_v49, 5  ;;  %v583_v24 = vrot.slane %v581_v0, 3  ;;  %v12897_v55 = vrot.slane %v470_v1, 7  ;;  %v11817_v21 = vld [vmem:[#allocation2 + $0x10] sm:$0xf] }
  0xbd   : > { %v1425_v39 = vrot.slane %v1423_v15, 5  ;;  %v1704_v37 = vrot.slane %v1702_v60, 5  ;;  %v9834_v12 = vrot.slane %v12888_v48, 9  ;;  %v2132_v26 = vrot.slane %v11817_v21, 5  ;;  %v12904_v36 = vld [vmem:[#allocation2 + $0xb4] sm:$0xf] }
  0xbe   : > { %16966 = vst [vmem:[#allocation7_spill] sm:$0xff] %v12897_v55  ;;  %16967 = vst [vmem:[#allocation8_spill] sm:$0xff] %v12904_v36  ;;  %v9880_v23 = vcombine.low %v12858_v25, %v12866_v5  ;;  %v1622_v31 = vsel %vm12118_vm7, %v1620_v43, %v1621_v59  ;;  %v637_v34 = vsel %vm12040_vm2, %v12819_v3, %v583_v24  ;;  %v12913_v4 = vld [vmem:[#allocation2 + $0xb4] sm:$0xf] }
  0xbf   : > { %v475_v41 = vor.u32 %v473_v46, %v12897_v55  ;;  %v1466_v45 = vld [vmem:[#allocation2 + $0xb4] sm:$0xe]  ;;  %v1426_v0 = vsel %vm12124_vm8, %v1421_v35, %v1425_v39  ;;  %v9912_v49 = vcombine.low %v1619_v7, %v1622_v31  ;;  %v9964_v25 = vcombine.low %v12899_v28, %v12901_v11 }
  0xc0   : > { %v9896_v5 = vcombine.low %v1416_v2, %v1426_v0  ;;  %v1663_v9 = vld [vmem:[#allocation2 + $0xb8] sm:$0xf]  ;;  %v9814_v1 = vcombine.low %v637_v34, %v637_v34  ;;  %v1428_v3 = vshrl.u32 %v12913_v4, 16  ;;  %v1431_v15 = vshll.u32 %v12913_v4, 16  ;;  %v13306_v55 = vld [vmem:[#allocation2 + $0x94] sm:$0xf] }
  0xc1   : > { %v12921_v60 = vld [vmem:[#allocation2 + $0xb8] sm:$0xf]  ;;  %v9928_v46 = vcombine.low %v12904_v36, %v1663_v9  ;;  %v622_v7 = vsel %vm12040_vm2, %v298_v33, %v475_v41  ;;  %v9833_v0 = vrot.slane %v1466_v45, 9  ;;  %v2295_v45 = vshrl.u32 %v12774_v30, 16 }
  0xc2   : > { %v1437_v43 = vshll.u32 %v12921_v60, 16  ;;  %v1441_v35 = vshrl.u32 %v12921_v60, 16  ;;  %4054 = vmatprep.mubr.bf16.mxu0 %v9896_v5  ;;  %862 = vst [vmem:[#allocation2 + $0xbc] sm:$0x1] %v9814_v1  ;;  %v1430_v2 = vrot.slane %v1428_v3, 4  ;;  %v1433_v59 = vrot.slane %v1431_v15, 5 }
  0xc3   : > { %868 = vst [vmem:[#allocation2 + $0xd4] sm:$0x1] %v9814_v1  ;;  %v9815_v24 = vcombine.low %v622_v7, %v622_v7  ;;  %v9816_v39 = vcombine.high %v622_v7, %v622_v7  ;;  %4215 = vmatprep.mubr.bf16.mxu1 %v9928_v46  ;;  %v9881_v33 = vcombine.low %v12913_v4, %v12921_v60  ;;  %v1625_v41 = vrot.slane %v12921_v60, 5  ;;  %v2278_v1 = vld [vmem:[#allocation2 + $0x20] sm:$0x1] }
  0xc4   : > { %4055 = vmatmul.mubr.bf16.gmra.mrb[56].mxu0 %v9880_v23  ;;  %v1439_v31 = vrot.slane %v1437_v43, 5  ;;  %v1443_v34 = vrot.slane %v1441_v35, 4  ;;  %4216 = vmatmul.mubr.bf16.gmra.mrb[56].mxu1 %v9912_v49  ;;  %v1434_v9 = vor.u32 %v1433_v59, %v1430_v2  ;;  %v2134_v5 = vrot.slane %v2132_v26, 4  ;;  %v2067_v3 = vld [vmem:[#allocation2 + $0x18] sm:$0xe] }
  0xc5   : > { %863 = vst [vmem:[#allocation2 + $0xc0] sm:$0xf] %v9815_v24  ;;  %864 = vst [vmem:[#allocation2 + $0xc4] sm:$0xf] %v9816_v39  ;;  %v2135_v7 = vrot.slane %v12878_v38, 5  ;;  %v1705_v23 = vsel %vm12124_vm8, %v12168_v6, %v1704_v37  ;;  %v1626_v46 = vsel %vm12118_vm7, %v9833_v0, %v1625_v41  ;;  %v1627_v43 = vrot.slane %v1625_v41, 4 }
  0xc6   : > { %v1444_v15 = vor.u32 %v1443_v34, %v1439_v31  ;;  %v1435_v49 = vrot.slane %v1434_v9, 4  ;;  %v2133_v35 = vsel %vm12118_vm7, %v9834_v12, %v2132_v26  ;;  %v12948_v38 = vcombine.low %v1695_v51, %v1705_v23  ;;  %v1667_v26 = vld [vmem:[#allocation2 + $0x20] sm:$0x1] }
  0xc7   : > { %v2297_v59 = vrot.slane %v2295_v45, 4  ;;  %v2298_v6 = vshll.u32 %v12774_v30, 16  ;;  %v2136_v24 = vsel %vm12118_vm7, %v2134_v5, %v2135_v7  ;;  %v2304_v39 = vshll.u32 %v12778_v52, 16  ;;  %v2280_v30 = vld [vmem:[#allocation2 + $0x38] sm:$0x1] }
  0xc8   : > { %v1445_v2 = vrot.slane %v1444_v15, 4  ;;  %v1440_v37 = vsel %vm12124_vm8, %v1435_v49, %v1439_v31  ;;  %v2308_v12 = vshrl.u32 %v12778_v52, 16  ;;  %v2314_v9 = vshll.u32 %v2278_v1, 16 }
  0xc9   : > { %v1063_v34 = vld [vmem:[#allocation2 + $0xbc] sm:$0x1]  ;;  %v2300_v0 = vrot.slane %v2298_v6, 5  ;;  %v9835_v22 = vrot.slane %v2067_v3, 9  ;;  %v2139_v51 = vrot.slane %v11818_v61, 5  ;;  %v2306_v23 = vrot.slane %v2304_v39, 5 }
  0xca   : > { %v1447_v41 = vshll.u32 %v1063_v34, 16  ;;  %v1628_v15 = vrot.slane %v1063_v34, 5  ;;  %v2310_v45 = vrot.slane %v2308_v12, 4  ;;  %v9946_v49 = vcombine.low %v2133_v35, %v2136_v24 }
  0xcb   : > { %v2301_v5 = vor.u32 %v2300_v0, %v2297_v59  ;;  %v2316_v7 = vrot.slane %v2314_v9, 5  ;;  %v12961_v48 = vsel %vm12118_vm7, %v9835_v22, %v2139_v51  ;;  %v2141_v6 = vrot.slane %v2139_v51, 4 }
  0xcc   : > { %v12957_v21 = vld [vmem:[#allocation2 + $0xc0] sm:$0xf]  ;;  %v1665_v31 = vld [vmem:[#allocation2 + $0xc4] sm:$0xf]  ;;  %v1449_v63 = vrot.slane %v1447_v41, 5  ;;  %v1629_v39 = vsel %vm12118_vm7, %v1627_v43, %v1628_v15  ;;  %v2311_v34 = vor.u32 %v2310_v45, %v2306_v23  ;;  %v2142_v10 = vrot.slane %v1667_v26, 5 }
  0xcd   : > { %16968 = vst [vmem:[#allocation9_spill] sm:$0xff] %v12957_v21  ;;  %v9929_v3 = vcombine.low %v12957_v21, %v1665_v31  ;;  %v2302_v12 = vrot.slane %v2301_v5, 4  ;;  %v9913_v59 = vcombine.low %v1626_v46, %v1629_v39  ;;  %v1709_v24 = vrot.slane %v1707_v8, 4  ;;  %v2279_v41 = vld [vmem:[#allocation2 + $0x2c] sm:$0x1] }
  0xce   : > { %v1450_v35 = vsel %vm12124_vm8, %v1445_v2, %v1449_v63  ;;  %v1712_v0 = vrot.slane %v1710_v17, 5  ;;  %v2312_v51 = vrot.slane %v2311_v34, 4  ;;  %v2143_v63 = vsel %vm12118_vm7, %v2141_v6, %v2142_v10  ;;  %v2068_v45 = vld [vmem:[#allocation2 + $0x24] sm:$0xe] }
  0xcf   : > { %4223 = vmatprep.mubr.bf16.mxu1 %v9929_v3  ;;  %v9897_v9 = vcombine.low %v1440_v37, %v1450_v35  ;;  %v2307_v43 = vsel %vm12124_vm8, %v2302_v12, %v2306_v23  ;;  %v1716_v46 = vshll.u32 %v11818_v61, 16  ;;  %v1720_v15 = vshrl.u32 %v11818_v61, 16  ;;  %v1668_v3 = vld [vmem:[#allocation2 + $0x2c] sm:$0x1] }
  0xd0   : > { %4224 = vmatmul.mubr.bf16.gmra.mrb[60].mxu1 %v9913_v59  ;;  %v1713_v2 = vor.u32 %v1712_v0, %v1709_v24  ;;  %v2317_v58 = vsel %vm12124_vm8, %v2312_v51, %v2316_v7  ;;  %v1726_v8 = vshll.u32 %v1667_v26, 16  ;;  %v2319_v17 = vshrl.u32 %v12793_v32, 16 }
  0xd1   : > { %4062 = vmatprep.mubr.bf16.mxu0 %v9897_v9  ;;  %v2322_v37 = vshll.u32 %v12793_v32, 16  ;;  %v9978_v23 = vcombine.low %v2307_v43, %v2317_v58  ;;  %v1718_v10 = vrot.slane %v1716_v46, 5  ;;  %v1722_v5 = vrot.slane %v1720_v15, 4  ;;  %v11819_v9 = vld [vmem:[#allocation2 + $0x28] sm:$0xf] }
  0xd2   : > { %4063 = vmatmul.mubr.bf16.gmra.mrb[60].mxu0 %v9881_v33  ;;  %v1714_v31 = vrot.slane %v1713_v2, 4  ;;  %v1728_v61 = vrot.slane %v1726_v8, 5  ;;  %v2321_v6 = vrot.slane %v2319_v17, 4  ;;  %v2328_v7 = vshll.u32 %v12808_v62, 16  ;;  %v11671_v17 = vld [vmem:[%s16890_s1 + $0x208] sm:$0xff]  }
  0xd3   : > { %4264 = vmatprep.mubr.bf16.mxu0 %v9946_v49  ;;  %v2324_v39 = vrot.slane %v2322_v37, 5  ;;  %4425 = vmatprep.mubr.bf16.mxu1 %v9978_v23  ;;  %v9947_v26 = vcombine.low %v12961_v48, %v2143_v63  ;;  %v1723_v12 = vor.u32 %v1722_v5, %v1718_v10  ;;  %v2332_v34 = vshrl.u32 %v12808_v62, 16  ;;  %v13038_v62 = vld [vmem:[#allocation2 + $0x3c] sm:$0xf] }
  0xd4   : > { %v2338_v35 = vshll.u32 %v2279_v41, 16  ;;  %v1719_v4 = vsel %vm12124_vm8, %v1714_v31, %v1718_v10  ;;  %v2330_v33 = vrot.slane %v2328_v7, 5  ;;  %v9836_v59 = vrot.slane %v2068_v45, 9 }
  0xd5   : > { %v2325_v60 = vor.u32 %v2324_v39, %v2321_v6  ;;  %v1724_v24 = vrot.slane %v1723_v12, 4  ;;  %v2334_v49 = vrot.slane %v2332_v34, 4  ;;  %v2146_v43 = vrot.slane %v11819_v9, 5  ;;  %v2069_v6 = vld [vmem:[#allocation2 + $0x30] sm:$0xe]  ;;  %v11820_v39 = vld [vmem:[%s16890_s1 + $0x200] sm:$0xff]  }
  0xd6   : > { %v2340_v0 = vrot.slane %v2338_v35, 5  ;;  %v2149_v2 = vrot.slane %v1668_v3, 5  ;;  %v16969_v46 = vshrl.u32 %v12187_v29, 16  ;;  %v16970_v63 = vshll.u32 %v12187_v29, 16 }
  0xd7   : > { %v2326_v51 = vrot.slane %v2325_v60, 4  ;;  %v1729_v41 = vsel %vm12124_vm8, %v1724_v24, %v1728_v61  ;;  %v2335_v45 = vor.u32 %v2334_v49, %v2330_v33  ;;  %v2147_v58 = vsel %vm12118_vm7, %v9836_v59, %v2146_v43  ;;  %v13009_v61 = vld [vmem:[#allocation2 + $0x38] sm:$0x1] }
  0xd8   : > { %v1733_v48 = vrot.slane %v16969_v46, 4  ;;  %v1736_v15 = vrot.slane %v16970_v63, 5  ;;  %4426 = vmatmul.mubr.bf16.vlgmr.msra.gmra.mrb[64].mxu1 %v9962_v13  ;;  %v2148_v8 = vrot.slane %v2146_v43, 4  ;;  %v9931_v37 = vcombine.low %v1719_v4, %v1729_v41 }
  0xd9   : > { %v2331_v29 = vsel %vm12124_vm8, %v2326_v51, %v2330_v33  ;;  %v1740_v31 = vshll.u32 %v11819_v9, 16  ;;  %v2336_v52 = vrot.slane %v2335_v45, 4  ;;  %v1744_v10 = vshrl.u32 %v11819_v9, 16  ;;  %v11674_v33 = vld [vmem:[%s16890_s1 + $0x210] sm:$0xff]  }
  0xda   : > { %v1737_v23 = vor.u32 %v1736_v15, %v1733_v48  ;;  %4265 = vmatmul.mubr.bf16.vlgmr.msra.gmra.mrb[64].mxu0 %v12948_v38  ;;  %v2150_v13 = vsel %vm12118_vm7, %v2148_v8, %v2149_v2  ;;  %v1750_v5 = vshll.u32 %v1668_v3, 16  ;;  %v2343_v38 = vshrl.u32 %v12899_v28, 16  ;;  %v11821_v48 = vld [vmem:[#allocation2 + $0x34] sm:$0xf] }
  0xdb   : > { %11422 = vmatpush3.bf16.msra.mxu0 %v11820_v39  ;;  %4272 = vmatprep.mubr.bf16.mxu0 %v9947_v26  ;;  %v9948_v7 = vcombine.low %v2147_v58, %v2150_v13  ;;  %v1742_v34 = vrot.slane %v1740_v31, 5  ;;  %v2341_v35 = vsel %vm12124_vm8, %v2336_v52, %v2340_v0  ;;  %v1746_v4 = vrot.slane %v1744_v10, 4 }
  0xdc   : > { %v1738_v12 = vrot.slane %v1737_v23, 4  ;;  %11423 = vmatprep.subr.bf16.mxu0 %v11671_v17  ;;  %v1752_v3 = vrot.slane %v1750_v5, 5  ;;  %v2346_v60 = vshll.u32 %v12899_v28, 16  ;;  %v9979_v59 = vcombine.low %v2331_v29, %v2341_v35  ;;  %v11677_v29 = vld [vmem:[%s16890_s1 + $0x218] sm:$0xff]   ;;  %v11686_v28 = vld [vmem:[%s16890_s1 + $0x230] sm:$0xff]  }
  0xdd   : > { %v2345_v24 = vrot.slane %v2343_v38, 4  ;;  %v2352_v49 = vshll.u32 %v12901_v11, 16  ;;  %v1747_v9 = vor.u32 %v1746_v4, %v1742_v34  ;;  %v2356_v0 = vshrl.u32 %v12901_v11, 16 }
  0xde   : > { %v1743_v26 = vsel %vm12124_vm8, %v1738_v12, %v1742_v34  ;;  %v2348_v43 = vrot.slane %v2346_v60, 5  ;;  %v2362_v51 = vshll.u32 %v2280_v30, 16  ;;  %4433 = vmatprep.mubr.bf16.mxu1 %v9979_v59  ;;  %v9837_v46 = vrot.slane %v2069_v6, 9  ;;  %v13042_v6 = vld [vmem:[#allocation2 + $0x40] sm:$0xf] }
  0xdf   : > { %11424 = vmatpush3.bf16.msra.mxu0 %v11671_v17  ;;  %v2354_v2 = vrot.slane %v2352_v49, 5  ;;  %v2153_v63 = vrot.slane %v11821_v48, 5  ;;  %v2156_v15 = vrot.slane %v13009_v61, 5  ;;  %v1748_v41 = vrot.slane %v1747_v9, 4  ;;  %v2281_v60 = vld [vmem:[#allocation2 + $0x44] sm:$0x1] }
  0xe0   : > { %4434 = vmatmul.mubr.bf16.gmra.mrb[68].mxu1 %v9963_v47  ;;  %v2349_v45 = vor.u32 %v2348_v43, %v2345_v24  ;;  %v2358_v58 = vrot.slane %v2356_v0, 4  ;;  %v2364_v8 = vrot.slane %v2362_v51, 5  ;;  %11425 = vmatprep.subr.bf16.mxu0 %v11674_v33  ;;  %v16971_v31 = vshrl.u32 %v12334_v50, 16  ;;  %v2070_v59 = vld [vmem:[#allocation2 + $0x3c] sm:$0xe] }
  0xe1   : > { %v2154_v17 = vsel %vm12118_vm7, %v9837_v46, %v2153_v63  ;;  %v2155_v23 = vrot.slane %v2153_v63, 4  ;;  %v16972_v52 = vshll.u32 %v12334_v50, 16  ;;  %v1753_v47 = vsel %vm12124_vm8, %v1748_v41, %v1752_v3  ;;  %v11680_v50 = vld [vmem:[%s16890_s1 + $0x220] sm:$0xff]  }
  0xe2   : > { %v1757_v30 = vrot.slane %v16971_v31, 4  ;;  %4273 = vmatmul.mubr.bf16.gmra.mrb[68].mxu0 %v9931_v37  ;;  %v2350_v13 = vrot.slane %v2349_v45, 4  ;;  %v2359_v10 = vor.u32 %v2358_v58, %v2354_v2  ;;  %v1764_v5 = vshll.u32 %v11821_v48, 16 }
  0xe3   : > { %v1760_v32 = vrot.slane %v16972_v52, 5  ;;  %4280 = vmatprep.mubr.bf16.mxu0 %v9948_v7  ;;  %v9932_v39 = vcombine.low %v1743_v26, %v1753_v47  ;;  %v2157_v12 = vsel %vm12118_vm7, %v2155_v23, %v2156_v15  ;;  %v1768_v38 = vshrl.u32 %v11821_v48, 16  ;;  %11426 = vmatpush3.bf16.msra.mxu0 %v11674_v33  ;;  %v1670_v33 = vld [vmem:[#allocation2 + $0x44] sm:$0x1]  ;;  %v11822_v52 = vld [vmem:[#allocation2 + $0x40] sm:$0xf] }
  0xe4   : > { %v2355_v37 = vsel %vm12124_vm8, %v2350_v13, %v2354_v2  ;;  %v2360_v35 = vrot.slane %v2359_v10, 4  ;;  %v9949_v4 = vcombine.low %v2154_v17, %v2157_v12  ;;  %v1766_v3 = vrot.slane %v1764_v5, 5  ;;  %11427 = vmatprep.subr.bf16.mxu0 %v11677_v29  ;;  %v13068_v13 = vld [vmem:[#allocation2 + $0x48] sm:$0xf] }
  0xe5   : > { %v1761_v34 = vor.u32 %v1760_v32, %v1757_v30  ;;  %v1770_v26 = vrot.slane %v1768_v38, 4  ;;  %v1774_v24 = vshll.u32 %v13009_v61, 16  ;;  %v2367_v49 = vshrl.u32 %v13038_v62, 16  ;;  %v11683_v61 = vld [vmem:[%s16890_s1 + $0x228] sm:$0xff]  }
  0xe6   : > { %v2365_v9 = vsel %vm12124_vm8, %v2360_v35, %v2364_v8  ;;  %v2370_v43 = vshll.u32 %v13038_v62, 16  ;;  %v2376_v0 = vshll.u32 %v13042_v6, 16  ;;  %v2380_v51 = vshrl.u32 %v13042_v6, 16 }
  0xe7   : > { %v1762_v7 = vrot.slane %v1761_v34, 4  ;;  %v9980_v2 = vcombine.low %v2355_v37, %v2365_v9  ;;  %v1771_v48 = vor.u32 %v1770_v26, %v1766_v3  ;;  %v1776_v63 = vrot.slane %v1774_v24, 5  ;;  %11428 = vmatpush3.bf16.msra.mxu0 %v11677_v29  ;;  %v13081_v37 = vld [vmem:[#allocation2 + $0x4c] sm:$0xf]  ;;  %v2071_v24 = vld [vmem:[#allocation2 + $0x48] sm:$0xe] }
  0xe8   : > { %v2369_v15 = vrot.slane %v2367_v49, 4  ;;  %v2372_v41 = vrot.slane %v2370_v43, 5  ;;  %v2378_v45 = vrot.slane %v2376_v0, 5  ;;  %v2382_v58 = vrot.slane %v2380_v51, 4  ;;  %11429 = vmatprep.subr.bf16.mxu0 %v11680_v50  ;;  %v13090_v51 = vld [vmem:[#allocation2 + $0x50] sm:$0x1] }
  0xe9   : > { %v1767_v46 = vsel %vm12124_vm8, %v1762_v7, %v1766_v3  ;;  %4441 = vmatprep.mubr.bf16.mxu1 %v9980_v2  ;;  %v1772_v8 = vrot.slane %v1771_v48, 4  ;;  %v2386_v17 = vshll.u32 %v2281_v60, 16  ;;  %v9965_v23 = vcombine.low %v13038_v62, %v13042_v6  ;;  %v2282_v7 = vld [vmem:[#allocation2 + $0x50] sm:$0x1] }
  0xea   : > { %v9838_v31 = vrot.slane %v2070_v59, 9  ;;  %4281 = vmatmul.mubr.bf16.gmra.mrb[72].mxu0 %v9932_v39  ;;  %4442 = vmatmul.mubr.bf16.gmra.mrb[72].mxu1 %v9964_v25  ;;  %v2373_v29 = vor.u32 %v2372_v41, %v2369_v15  ;;  %v2383_v30 = vor.u32 %v2382_v58, %v2378_v45  ;;  %v2160_v32 = vrot.slane %v11822_v52, 5 }
  0xeb   : > { %v2163_v47 = vrot.slane %v1670_v33, 5  ;;  %4288 = vmatprep.mubr.bf16.mxu0 %v9949_v4  ;;  %v1777_v10 = vsel %vm12124_vm8, %v1772_v8, %v1776_v63  ;;  %v2388_v5 = vrot.slane %v2386_v17, 5  ;;  %v16973_v62 = vshrl.u32 %v12369_v44, 16  ;;  %11430 = vmatpush3.bf16.msra.mxu0 %v11680_v50 }
  0xec   : > { %v16974_v39 = vshll.u32 %v12369_v44, 16  ;;  %v9933_v11 = vcombine.low %v1767_v46, %v1777_v10  ;;  %v2374_v25 = vrot.slane %v2373_v29, 4  ;;  %v2384_v34 = vrot.slane %v2383_v30, 4  ;;  %11431 = vmatprep.subr.bf16.mxu0 %v11683_v61 }
  0xed   : > { %v1781_v6 = vrot.slane %v16973_v62, 4  ;;  %v2161_v38 = vsel %vm12118_vm7, %v9838_v31, %v2160_v32  ;;  %v2162_v35 = vrot.slane %v2160_v32, 4  ;;  %v1788_v3 = vshll.u32 %v11822_v52, 16  ;;  %v11823_v32 = vld [vmem:[#allocation2 + $0x4c] sm:$0xf] }
  0xee   : > { %v1784_v12 = vrot.slane %v16974_v39, 5  ;;  %v1792_v60 = vshrl.u32 %v11822_v52, 16  ;;  %v2379_v44 = vsel %vm12124_vm8, %v2374_v25, %v2378_v45  ;;  %v2389_v50 = vsel %vm12124_vm8, %v2384_v34, %v2388_v5 }
  0xef   : > { %v1798_v59 = vshll.u32 %v1670_v33, 16  ;;  %v2391_v26 = vshrl.u32 %v13068_v13, 16  ;;  %v9981_v49 = vcombine.low %v2379_v44, %v2389_v50  ;;  %v2164_v9 = vsel %vm12118_vm7, %v2162_v35, %v2163_v47  ;;  %11432 = vmatpush3.bf16.msra.mxu0 %v11683_v61  ;;  %v11689_v33 = vld [vmem:[%s16890_s1 + $0x238] sm:$0xff]   ;;  %v13111_v35 = vld [vmem:[#allocation2 + $0x54] sm:$0xf] }
  0xf0   : > { %v1785_v4 = vor.u32 %v1784_v12, %v1781_v6  ;;  %v1790_v0 = vrot.slane %v1788_v3, 5  ;;  %v9950_v2 = vcombine.low %v2161_v38, %v2164_v9  ;;  %v1794_v46 = vrot.slane %v1792_v60, 4  ;;  %11433 = vmatprep.subr.bf16.mxu0 %v11686_v28  ;;  %v13115_v50 = vld [vmem:[#allocation2 + $0x58] sm:$0xf] }
  0xf1   : > { %v1800_v48 = vrot.slane %v1798_v59, 5  ;;  %v2393_v63 = vrot.slane %v2391_v26, 4  ;;  %4449 = vmatprep.mubr.bf16.mxu1 %v9981_v49  ;;  %v2394_v41 = vshll.u32 %v13068_v13, 16  ;;  %v2400_v45 = vshll.u32 %v13081_v37, 16  ;;  %v2283_v59 = vld [vmem:[#allocation2 + $0x5c] sm:$0x1] }
  0xf2   : > { %v1786_v43 = vrot.slane %v1785_v4, 4  ;;  %v2404_v58 = vshrl.u32 %v13081_v37, 16  ;;  %4289 = vmatmul.mubr.bf16.gmra.mrb[76].mxu0 %v9933_v11  ;;  %4450 = vmatmul.mubr.bf16.gmra.mrb[76].mxu1 %v9965_v23  ;;  %v1795_v61 = vor.u32 %v1794_v46, %v1790_v0  ;;  %v2410_v8 = vshll.u32 %v2282_v7, 16 }
  0xf3   : > { %v9966_v17 = vcombine.low %v13068_v13, %v13081_v37  ;;  %v9839_v31 = vrot.slane %v2071_v24, 9  ;;  %4296 = vmatprep.mubr.bf16.mxu0 %v9950_v2  ;;  %v2396_v29 = vrot.slane %v2394_v41, 5  ;;  %v2402_v30 = vrot.slane %v2400_v45, 5  ;;  %11434 = vmatpush3.bf16.msra.mxu0 %v11686_v28 }
  0xf4   : > { %v1791_v15 = vsel %vm12124_vm8, %v1786_v43, %v1790_v0  ;;  %v2406_v52 = vrot.slane %v2404_v58, 4  ;;  %v2167_v47 = vrot.slane %v11823_v32, 5  ;;  %v1796_v10 = vrot.slane %v1795_v61, 4  ;;  %11435 = vmatprep.subr.bf16.mxu0 %v11689_v33 }
  0xf5   : > { %v2412_v5 = vrot.slane %v2410_v8, 5  ;;  %v2170_v62 = vrot.slane %v13090_v51, 5  ;;  %v16975_v6 = vshrl.u32 %v12472_v40, 16  ;;  %v2397_v39 = vor.u32 %v2396_v29, %v2393_v63 }
  0xf6   : > { %v2407_v12 = vor.u32 %v2406_v52, %v2402_v30  ;;  %v2168_v13 = vsel %vm12118_vm7, %v9839_v31, %v2167_v47  ;;  %v2169_v11 = vrot.slane %v2167_v47, 4  ;;  %v1801_v25 = vsel %vm12124_vm8, %v1796_v10, %v1800_v48 }
  0xf7   : > { %v1805_v23 = vrot.slane %v16975_v6, 4  ;;  %v16976_v34 = vshll.u32 %v12472_v40, 16  ;;  %v1812_v38 = vshll.u32 %v11823_v32, 16  ;;  %v1816_v37 = vshrl.u32 %v11823_v32, 16  ;;  %11436 = vmatpush3.bf16.msra.mxu0 %v11689_v33  ;;  %v2072_v40 = vld [vmem:[#allocation2 + $0x54] sm:$0xe] }
  0xf8   : > { %v9934_v4 = vcombine.low %v1791_v15, %v1801_v25  ;;  %v2398_v3 = vrot.slane %v2397_v39, 4  ;;  %v2408_v60 = vrot.slane %v2407_v12, 4  ;;  %v2171_v44 = vsel %vm12118_vm7, %v2169_v11, %v2170_v62  ;;  %v1672_v15 = vld [vmem:[#allocation2 + $0x5c] sm:$0x1]  ;;  %v11824_v6 = vld [vmem:[#allocation2 + $0x58] sm:$0xf] }
  0xf9   : > { %v1808_v28 = vrot.slane %v16976_v34, 5  ;;  %v9951_v7 = vcombine.low %v2168_v13, %v2171_v44  ;;  %v1814_v24 = vrot.slane %v1812_v38, 5  ;;  %v1818_v49 = vrot.slane %v1816_v37, 4 }
  0xfa   : > { %v2403_v9 = vsel %vm12124_vm8, %v2398_v3, %v2402_v30  ;;  %v2413_v43 = vsel %vm12124_vm8, %v2408_v60, %v2412_v5  ;;  %v1822_v0 = vshll.u32 %v13090_v51, 16  ;;  %v2415_v2 = vshrl.u32 %v13111_v35, 16  ;;  %4297 = vmatmul.mubr.bf16.gmra.mrb[80].mxu0 %v9934_v4  ;;  %v13140_v4 = vld [vmem:[#allocation2 + $0x64] sm:$0xf] }
  0xfb   : > { %v1809_v26 = vor.u32 %v1808_v28, %v1805_v23  ;;  %v9982_v46 = vcombine.low %v2403_v9, %v2413_v43  ;;  %v1819_v63 = vor.u32 %v1818_v49, %v1814_v24  ;;  %v2418_v33 = vshll.u32 %v13111_v35, 16  ;;  %4304 = vmatprep.mubr.bf16.mxu0 %v9951_v7  ;;  %v2073_v7 = vld [vmem:[#allocation2 + $0x60] sm:$0xe] }
  0xfc   : > { %v1824_v41 = vrot.slane %v1822_v0, 5  ;;  %v2417_v45 = vrot.slane %v2415_v2, 4  ;;  %v2424_v58 = vshll.u32 %v13115_v50, 16  ;;  %v2428_v61 = vshrl.u32 %v13115_v50, 16  ;;  %v1673_v2 = vld [vmem:[#allocation2 + $0x68] sm:$0x1] }
  0xfd   : > { %v1810_v48 = vrot.slane %v1809_v26, 4  ;;  %4457 = vmatprep.mubr.bf16.mxu1 %v9982_v46  ;;  %v1820_v8 = vrot.slane %v1819_v63, 4  ;;  %v2420_v31 = vrot.slane %v2418_v33, 5  ;;  %v2434_v29 = vshll.u32 %v2283_v59, 16  ;;  %v2284_v59 = vld [vmem:[#allocation2 + $0x68] sm:$0x1] }
  0xfe   : > { %4458 = vmatmul.mubr.bf16.gmra.mrb[80].mxu1 %v9966_v17  ;;  %v2426_v30 = vrot.slane %v2424_v58, 5  ;;  %v2430_v52 = vrot.slane %v2428_v61, 4  ;;  %v9967_v32 = vcombine.low %v13111_v35, %v13115_v50  ;;  %v9840_v47 = vrot.slane %v2072_v40, 9  ;;  %v13134_v17 = vld [vmem:[#allocation2 + $0x60] sm:$0xf] }
  0xff   : > { %v1815_v51 = vsel %vm12124_vm8, %v1810_v48, %v1814_v24  ;;  %v1825_v10 = vsel %vm12124_vm8, %v1820_v8, %v1824_v41  ;;  %v2421_v5 = vor.u32 %v2420_v31, %v2417_v45  ;;  %v2436_v62 = vrot.slane %v2434_v29, 5 }
 0x100   : > { %v2174_v23 = vrot.slane %v11824_v6, 5  ;;  %v9935_v39 = vcombine.low %v1815_v51, %v1825_v10  ;;  %v2431_v12 = vor.u32 %v2430_v52, %v2426_v30  ;;  %v2177_v13 = vrot.slane %v1672_v15, 5  ;;  %v13156_v10 = vld [vmem:[#allocation2 + $0x6c] sm:$0xf] }
 0x101   : > { %v16977_v11 = vshrl.u32 %v12524_v57, 16  ;;  %v2422_v34 = vrot.slane %v2421_v5, 4  ;;  %v16978_v37 = vshll.u32 %v12524_v57, 16  ;;  %v1836_v60 = vshll.u32 %v11824_v6, 16 }
 0x102   : > { %v2175_v28 = vsel %vm12118_vm7, %v9840_v47, %v2174_v23  ;;  %v2176_v38 = vrot.slane %v2174_v23, 4  ;;  %v2432_v3 = vrot.slane %v2431_v12, 4  ;;  %v1840_v44 = vshrl.u32 %v11824_v6, 16  ;;  %4305 = vmatmul.mubr.bf16.gmra.mrb[84].mxu0 %v9935_v39 }
 0x103   : > { %v1829_v25 = vrot.slane %v16977_v11, 4  ;;  %v1832_v35 = vrot.slane %v16978_v37, 5  ;;  %v1846_v50 = vshll.u32 %v1672_v15, 16  ;;  %v2427_v26 = vsel %vm12124_vm8, %v2422_v34, %v2426_v30 }
 0x104   : > { %v2178_v24 = vsel %vm12118_vm7, %v2176_v38, %v2177_v13  ;;  %v2439_v40 = vshrl.u32 %v13134_v17, 16  ;;  %v2437_v57 = vsel %vm12124_vm8, %v2432_v3, %v2436_v62  ;;  %v1838_v43 = vrot.slane %v1836_v60, 5  ;;  %v11825_v62 = vld [vmem:[#allocation2 + $0x64] sm:$0xf] }
 0x105   : > { %v1833_v49 = vor.u32 %v1832_v35, %v1829_v25  ;;  %v9952_v9 = vcombine.low %v2175_v28, %v2178_v24  ;;  %v1842_v0 = vrot.slane %v1840_v44, 4  ;;  %v9983_v46 = vcombine.low %v2427_v26, %v2437_v57  ;;  %v13166_v35 = vld [vmem:[#allocation2 + $0x70] sm:$0xf]  ;;  %v2074_v26 = vld [vmem:[#allocation2 + $0x6c] sm:$0xe] }
 0x106   : > { %v1848_v63 = vrot.slane %v1846_v50, 5  ;;  %v2441_v33 = vrot.slane %v2439_v40, 4  ;;  %v2442_v41 = vshll.u32 %v13134_v17, 16  ;;  %v2448_v45 = vshll.u32 %v13140_v4, 16 }
 0x107   : > { %v1834_v48 = vrot.slane %v1833_v49, 4  ;;  %4312 = vmatprep.mubr.bf16.mxu0 %v9952_v9  ;;  %v1843_v15 = vor.u32 %v1842_v0, %v1838_v43  ;;  %v2452_v58 = vshrl.u32 %v13140_v4, 16  ;;  %4465 = vmatprep.mubr.bf16.mxu1 %v9983_v46  ;;  %v2458_v51 = vshll.u32 %v2284_v59, 16 }
 0x108   : > { %v9968_v8 = vcombine.low %v13134_v17, %v13140_v4  ;;  %v9841_v31 = vrot.slane %v2073_v7, 9  ;;  %4466 = vmatmul.mubr.bf16.gmra.mrb[84].mxu1 %v9967_v32  ;;  %v2444_v30 = vrot.slane %v2442_v41, 5  ;;  %v2450_v52 = vrot.slane %v2448_v45, 5  ;;  %v2285_v7 = vld [vmem:[#allocation2 + $0x74] sm:$0x1] }
 0x109   : > { %v1839_v61 = vsel %vm12124_vm8, %v1834_v48, %v1838_v43  ;;  %v1844_v29 = vrot.slane %v1843_v15, 4  ;;  %v2454_v47 = vrot.slane %v2452_v58, 4  ;;  %v2460_v5 = vrot.slane %v2458_v51, 5 }
 0x10a   : > { %v2181_v6 = vrot.slane %v11825_v62, 5  ;;  %v2184_v23 = vrot.slane %v1673_v2, 5  ;;  %v16979_v39 = vshrl.u32 %v12551_v16, 16  ;;  %v2445_v11 = vor.u32 %v2444_v30, %v2441_v33 }
 0x10b   : > { %v1849_v13 = vsel %vm12124_vm8, %v1844_v29, %v1848_v63  ;;  %v2455_v25 = vor.u32 %v2454_v47, %v2450_v52  ;;  %v16980_v32 = vshll.u32 %v12551_v16, 16  ;;  %v1860_v37 = vshll.u32 %v11825_v62, 16 }
 0x10c   : > { %v1853_v12 = vrot.slane %v16979_v39, 4  ;;  %v9936_v34 = vcombine.low %v1839_v61, %v1849_v13  ;;  %v2182_v28 = vsel %vm12118_vm7, %v9841_v31, %v2181_v6  ;;  %v2183_v38 = vrot.slane %v2181_v6, 4  ;;  %v11826_v13 = vld [vmem:[#allocation2 + $0x70] sm:$0xf] }
 0x10d   : > { %v1856_v17 = vrot.slane %v16980_v32, 5  ;;  %v2446_v60 = vrot.slane %v2445_v11, 4  ;;  %v2456_v44 = vrot.slane %v2455_v25, 4  ;;  %v1864_v59 = vshrl.u32 %v11825_v62, 16 }
 0x10e   : > { %v13168_v4 = vpop.f32.mrb[0].mxu0  ;;  %v13170_v3 = vpop.f32.mrb[0].mxu1  ;;  %4313 = vmatmul.mubr.bf16.gmra.mrb[88].mxu0 %v9936_v34  ;;  %v2185_v49 = vsel %vm12118_vm7, %v2183_v38, %v2184_v23  ;;  %v1862_v40 = vrot.slane %v1860_v37, 5  ;;  %v1870_v57 = vshll.u32 %v1673_v2, 16  ;;  %v2463_v9 = vshrl.u32 %v13156_v10, 16 }
 0x10f   : > { %v1857_v50 = vor.u32 %v1856_v17, %v1853_v12  ;;  %v13172_v16 = vpop.f32.mrb[1].mxu0  ;;  %v13174_v24 = vpop.f32.mrb[1].mxu1  ;;  %v2451_v46 = vsel %vm12124_vm8, %v2446_v60, %v2450_v52  ;;  %v2461_v48 = vsel %vm12124_vm8, %v2456_v44, %v2460_v5  ;;  %v9953_v63 = vcombine.low %v2182_v28, %v2185_v49  ;;  %v1674_v52 = vld [vmem:[#allocation2 + $0x74] sm:$0x1]  ;;  %v13200_v38 = vld [vmem:[#allocation2 + $0x78] sm:$0xf] }
 0x110   : > { %v13179_v43 = vpop.f32.mrb[2].mxu0  ;;  %v13181_v0 = vpop.f32.mrb[2].mxu1  ;;  %v9984_v45 = vcombine.low %v2451_v46, %v2461_v48  ;;  %v1866_v2 = vrot.slane %v1864_v59, 4  ;;  %v1872_v58 = vrot.slane %v1870_v57, 5  ;;  %v2465_v61 = vrot.slane %v2463_v9, 4 }
 0x111   : > { %v1858_v33 = vrot.slane %v1857_v50, 4  ;;  %v13187_v15 = vpop.f32.mrb[3].mxu0  ;;  %v13189_v41 = vpop.f32.mrb[3].mxu1  ;;  %4320 = vmatprep.mubr.bf16.mxu0 %v9953_v63  ;;  %v2466_v31 = vshll.u32 %v13156_v10, 16  ;;  %v2472_v29 = vshll.u32 %v13166_v35, 16  ;;  %v2476_v30 = vshrl.u32 %v13166_v35, 16 }
 0x112   : > { %4473 = vmatprep.mubr.bf16.mxu1 %v9984_v45  ;;  %v1867_v47 = vor.u32 %v1866_v2, %v1862_v40  ;;  %v2482_v5 = vshll.u32 %v2285_v7, 16  ;;  %v9969_v62 = vcombine.low %v13156_v10, %v13166_v35  ;;  %v9842_v6 = vrot.slane %v2074_v26, 9 }
 0x113   : > { %v1863_v51 = vsel %vm12124_vm8, %v1858_v33, %v1862_v40  ;;  %4474 = vmatmul.mubr.bf16.gmra.mrb[88].mxu1 %v9968_v8  ;;  %v2468_v23 = vrot.slane %v2466_v31, 5  ;;  %v2474_v39 = vrot.slane %v2472_v29, 5  ;;  %v2478_v12 = vrot.slane %v2476_v30, 4  ;;  %v13212_v40 = vld [vmem:[#allocation2 + $0x7c] sm:$0xf] }
 0x114   : > { %v2188_v11 = vrot.slane %v11826_v13, 5  ;;  %v1868_v25 = vrot.slane %v1867_v47, 4  ;;  %v2484_v32 = vrot.slane %v2482_v5, 5  ;;  %v2191_v17 = vrot.slane %v1674_v52, 5  ;;  %v2286_v29 = vld [vmem:[#allocation2 + $0x80] sm:$0x1] }
 0x115   : > { %v16981_v34 = vshrl.u32 %v12581_v14, 16  ;;  %v2469_v60 = vor.u32 %v2468_v23, %v2465_v61  ;;  %v2479_v44 = vor.u32 %v2478_v12, %v2474_v39  ;;  %v16982_v59 = vshll.u32 %v12581_v14, 16  ;;  %v2075_v23 = vld [vmem:[#allocation2 + $0x78] sm:$0xe] }
 0x116   : > { %v13202_v37 = vpop.f32.mrb[4].mxu1  ;;  %v2189_v8 = vsel %vm12118_vm7, %v9842_v6, %v2188_v11  ;;  %v2190_v10 = vrot.slane %v2188_v11, 4  ;;  %v1873_v50 = vsel %vm12124_vm8, %v1868_v25, %v1872_v58  ;;  %v1884_v26 = vshll.u32 %v11826_v13, 16 }
 0x117   : > { %v1877_v28 = vrot.slane %v16981_v34, 4  ;;  %v13206_v35 = vpop.f32.mrb[5].mxu1  ;;  %v1880_v7 = vrot.slane %v16982_v59, 5  ;;  %v1888_v49 = vshrl.u32 %v11826_v13, 16  ;;  %v13214_v57 = vpop.f32.mrb[4].mxu0  ;;  %v9937_v46 = vcombine.low %v1863_v51, %v1873_v50 }
 0x118   : > { %v13216_v9 = vpop.f32.mrb[6].mxu1  ;;  %v2470_v48 = vrot.slane %v2469_v60, 4  ;;  %v2480_v63 = vrot.slane %v2479_v44, 4  ;;  %v2192_v33 = vsel %vm12118_vm7, %v2190_v10, %v2191_v17  ;;  %v13220_v45 = vpop.f32.mrb[5].mxu0  ;;  %v1886_v61 = vrot.slane %v1884_v26, 5 }
 0x119   : > { %v13222_v2 = vpop.f32.mrb[7].mxu1  ;;  %v9954_v14 = vcombine.low %v2189_v8, %v2192_v33  ;;  %v1881_v58 = vor.u32 %v1880_v7, %v1877_v28  ;;  %v1890_v31 = vrot.slane %v1888_v49, 4  ;;  %v13224_v30 = vpop.f32.mrb[6].mxu0  ;;  %4321 = vmatmul.mubr.bf16.gmra.mrb[92].mxu0 %v9937_v46  ;;  %v1894_v5 = vshll.u32 %v1674_v52, 16  ;;  %v1675_v34 = vld [vmem:[#allocation2 + $0x80] sm:$0x1] }
 0x11a   : > { %v2475_v51 = vsel %vm12124_vm8, %v2470_v48, %v2474_v39  ;;  %v2485_v47 = vsel %vm12124_vm8, %v2480_v63, %v2484_v32  ;;  %v2487_v6 = vshrl.u32 %v13200_v38, 16  ;;  %v13231_v12 = vpop.f32.mrb[7].mxu0  ;;  %v2490_v17 = vshll.u32 %v13200_v38, 16  ;;  %v13242_v46 = vld [vmem:[#allocation2 + $0x84] sm:$0xf] }
 0x11b   : > { %v9985_v13 = vcombine.low %v2475_v51, %v2485_v47  ;;  %4328 = vmatprep.mubr.bf16.mxu0 %v9954_v14  ;;  %v1882_v11 = vrot.slane %v1881_v58, 4  ;;  %v1891_v25 = vor.u32 %v1890_v31, %v1886_v61  ;;  %v1896_v28 = vrot.slane %v1894_v5, 5  ;;  %v11827_v58 = vld [vmem:[#allocation2 + $0x7c] sm:$0xf] }
 0x11c   : > { %v2489_v60 = vrot.slane %v2487_v6, 4  ;;  %v2496_v39 = vshll.u32 %v13212_v40, 16  ;;  %v2500_v44 = vshrl.u32 %v13212_v40, 16  ;;  %v2492_v8 = vrot.slane %v2490_v17, 5 }
 0x11d   : > { %4481 = vmatprep.mubr.bf16.mxu1 %v9985_v13  ;;  %v1887_v52 = vsel %vm12124_vm8, %v1882_v11, %v1886_v61  ;;  %v1892_v32 = vrot.slane %v1891_v25, 4  ;;  %v2506_v10 = vshll.u32 %v2286_v29, 16  ;;  %v9970_v26 = vcombine.low %v13200_v38, %v13212_v40 }
 0x11e   : > { %v13238_v50 = vpop.f32.mrb[8].mxu1  ;;  %4482 = vmatmul.mubr.bf16.gmra.mrb[92].mxu1 %v9969_v62  ;;  %v2498_v59 = vrot.slane %v2496_v39, 5  ;;  %v2502_v7 = vrot.slane %v2500_v44, 4  ;;  %v9843_v49 = vrot.slane %v2075_v23, 9  ;;  %v2493_v33 = vor.u32 %v2492_v8, %v2489_v60  ;;  %v2287_v8 = vld [vmem:[#allocation2 + $0x8c] sm:$0x1] }
 0x11f   : > { %v13244_v48 = vpop.f32.mrb[9].mxu1  ;;  %v1897_v63 = vsel %vm12124_vm8, %v1892_v32, %v1896_v28  ;;  %v2508_v14 = vrot.slane %v2506_v10, 5  ;;  %v2195_v61 = vrot.slane %v11827_v58, 5  ;;  %v13248_v31 = vpop.f32.mrb[8].mxu0  ;;  %v2198_v47 = vrot.slane %v1675_v34, 5 }
 0x120   : > { %v13250_v62 = vpop.f32.mrb[10].mxu1  ;;  %v9938_v29 = vcombine.low %v1887_v52, %v1897_v63  ;;  %v2503_v51 = vor.u32 %v2502_v7, %v2498_v59  ;;  %v16983_v38 = vshrl.u32 %v12680_v27, 16  ;;  %v13254_v5 = vpop.f32.mrb[9].mxu0  ;;  %v2494_v23 = vrot.slane %v2493_v33, 4  ;;  %v13262_v28 = vld [vmem:[#allocation2 + $0x88] sm:$0xf] }
 0x121   : > { %v13256_v6 = vpop.f32.mrb[11].mxu1  ;;  %v2196_v13 = vsel %vm12118_vm7, %v9843_v49, %v2195_v61  ;;  %v2197_v11 = vrot.slane %v2195_v61, 4  ;;  %v16984_v25 = vshll.u32 %v12680_v27, 16  ;;  %v13264_v60 = vpop.f32.mrb[10].mxu0  ;;  %v1908_v44 = vshll.u32 %v11827_v58, 16 }
 0x122   : > { %v1901_v40 = vrot.slane %v16983_v38, 4  ;;  %4329 = vmatmul.mubr.bf16.gmra.mrb[96].mxu0 %v9938_v29  ;;  %v2504_v39 = vrot.slane %v2503_v51, 4  ;;  %v1912_v52 = vshrl.u32 %v11827_v58, 16  ;;  %v1918_v32 = vshll.u32 %v1675_v34, 16  ;;  %v13266_v10 = vpop.f32.mrb[11].mxu0 }
 0x123   : > { %v1904_v17 = vrot.slane %v16984_v25, 5  ;;  %v2499_v7 = vsel %vm12124_vm8, %v2494_v23, %v2498_v59  ;;  %v2199_v49 = vsel %vm12118_vm7, %v2197_v11, %v2198_v47  ;;  %v2511_v63 = vshrl.u32 %v13242_v46, 16  ;;  %v2076_v33 = vld [vmem:[#allocation2 + $0x84] sm:$0xe]  ;;  %v1676_v34 = vld [vmem:[#allocation2 + $0x8c] sm:$0x1] }
 0x124   : > { %v2509_v61 = vsel %vm12124_vm8, %v2504_v39, %v2508_v14  ;;  %v9955_v29 = vcombine.low %v2196_v13, %v2199_v49  ;;  %v1910_v51 = vrot.slane %v1908_v44, 5  ;;  %v1914_v58 = vrot.slane %v1912_v52, 4 }
 0x125   : > { %v1905_v27 = vor.u32 %v1904_v17, %v1901_v40  ;;  %v9986_v38 = vcombine.low %v2499_v7, %v2509_v61  ;;  %v1920_v22 = vrot.slane %v1918_v32, 5  ;;  %v2513_v1 = vrot.slane %v2511_v63, 4  ;;  %v11828_v61 = vld [vmem:[#allocation2 + $0x88] sm:$0xf] }
 0x126   : > { %4336 = vmatprep.mubr.bf16.mxu0 %v9955_v29  ;;  %v1915_v59 = vor.u32 %v1914_v58, %v1910_v51  ;;  %v2514_v23 = vshll.u32 %v13242_v46, 16  ;;  %v2520_v47 = vshll.u32 %v13262_v28, 16  ;;  %v2524_v40 = vshrl.u32 %v13262_v28, 16 }
 0x127   : > { %v1906_v25 = vrot.slane %v1905_v27, 4  ;;  %4489 = vmatprep.mubr.bf16.mxu1 %v9986_v38  ;;  %v2530_v13 = vshll.u32 %v2287_v8, 16  ;;  %v9971_v11 = vcombine.low %v13242_v46, %v13262_v28  ;;  %v9844_v17 = vrot.slane %v2076_v33, 9  ;;  %v13282_v39 = vpop.f32.mrb[12].mxu0 }
 0x128   : > { %4490 = vmatmul.mubr.bf16.gmra.mrb[96].mxu1 %v9970_v26  ;;  %v1916_v44 = vrot.slane %v1915_v59, 4  ;;  %v2516_v52 = vrot.slane %v2514_v23, 5  ;;  %v2522_v32 = vrot.slane %v2520_v47, 5  ;;  %v2526_v7 = vrot.slane %v2524_v40, 4  ;;  %v13284_v49 = vpop.f32.mrb[12].mxu1  ;;  %v13286_v27 = vpop.f32.mrb[13].mxu0 }
 0x129   : > { %v1911_v14 = vsel %vm12124_vm8, %v1906_v25, %v1910_v51  ;;  %v2532_v63 = vrot.slane %v2530_v13, 5  ;;  %v2202_v29 = vrot.slane %v11828_v61, 5  ;;  %v2205_v51 = vrot.slane %v1676_v34, 5  ;;  %v13290_v46 = vpop.f32.mrb[13].mxu1  ;;  %v13292_v28 = vpop.f32.mrb[14].mxu0 }
 0x12a   : > { %v16985_v8 = vshrl.u32 %v12699_v56, 16  ;;  %v1921_v26 = vsel %vm12124_vm8, %v1916_v44, %v1920_v22  ;;  %v2517_v33 = vor.u32 %v2516_v52, %v2513_v1  ;;  %v2527_v38 = vor.u32 %v2526_v7, %v2522_v32  ;;  %v13298_v23 = vld [vmem:[#allocation2 + $0x90] sm:$0xf]  ;;  %v13300_v47 = vpop.f32.mrb[14].mxu1  ;;  %v13302_v40 = vpop.f32.mrb[15].mxu0 }
 0x12b   : > { %v16986_v25 = vshll.u32 %v12699_v56, 16  ;;  %v9939_v13 = vcombine.low %v1911_v14, %v1921_v26  ;;  %v2204_v21 = vrot.slane %v2202_v29, 4  ;;  %v1932_v54 = vshll.u32 %v11828_v61, 16  ;;  %v13308_v22 = vpop.f32.mrb[15].mxu1  ;;  %v2288_v7 = vld [vmem:[#allocation2 + $0x98] sm:$0x1] }
 0x12c   : > { %v1925_v58 = vrot.slane %v16985_v8, 4  ;;  %v2203_v8 = vsel %vm12118_vm7, %v9844_v17, %v2202_v29  ;;  %16987 = vst [vmem:[#allocation10_spill] sm:$0xff] %v13308_v22  ;;  %v2518_v1 = vrot.slane %v2517_v33, 4  ;;  %v2528_v44 = vrot.slane %v2527_v38, 4 }
 0x12d   : > { %v1928_v59 = vrot.slane %v16986_v25, 5  ;;  %v1936_v52 = vshrl.u32 %v11828_v61, 16  ;;  %4337 = vmatmul.mubr.bf16.gmra.mrb[100].mxu0 %v9939_v13  ;;  %v2206_v25 = vsel %vm12118_vm7, %v2204_v21, %v2205_v51  ;;  %v1934_v36 = vrot.slane %v1932_v54, 5  ;;  %v2077_v13 = vld [vmem:[#allocation2 + $0x90] sm:$0xe] }
 0x12e   : > { %v1942_v14 = vshll.u32 %v1676_v34, 16  ;;  %v2535_v26 = vshrl.u32 %v13298_v23, 16  ;;  %v2523_v17 = vsel %vm12124_vm8, %v2518_v1, %v2522_v32  ;;  %v2533_v29 = vsel %vm12124_vm8, %v2528_v44, %v2532_v63  ;;  %v1677_v51 = vld [vmem:[#allocation2 + $0x98] sm:$0x1] }
 0x12f   : > { %v1929_v56 = vor.u32 %v1928_v59, %v1925_v58  ;;  %v9956_v22 = vcombine.low %v2203_v8, %v2206_v25  ;;  %v9987_v38 = vcombine.low %v2523_v17, %v2533_v29  ;;  %v1938_v58 = vrot.slane %v1936_v52, 4 }
 0x130   : > { %v1944_v61 = vrot.slane %v1942_v14, 5  ;;  %v2537_v59 = vrot.slane %v2535_v26, 4  ;;  %v2538_v21 = vshll.u32 %v13298_v23, 16  ;;  %v2544_v34 = vshll.u32 %v13306_v55, 16  ;;  %v13322_v1 = vpop.f32.mrb[16].mxu1 }
 0x131   : > { %v1930_v33 = vrot.slane %v1929_v56, 4  ;;  %4344 = vmatprep.mubr.bf16.mxu0 %v9956_v22  ;;  %v2548_v32 = vshrl.u32 %v13306_v55, 16  ;;  %4497 = vmatprep.mubr.bf16.mxu1 %v9987_v38  ;;  %v1939_v63 = vor.u32 %v1938_v58, %v1934_v36  ;;  %v2554_v8 = vshll.u32 %v2288_v7, 16  ;;  %v13330_v56 = vpop.f32.mrb[17].mxu1  ;;  %v11829_v38 = vld [vmem:[#allocation2 + $0x94] sm:$0xf] }
 0x132   : > { %v9972_v44 = vcombine.low %v13298_v23, %v13306_v55  ;;  %v13328_v22 = vadd.f32 %v13172_v16, %v13168_v4  ;;  %4498 = vmatmul.mubr.bf16.gmra.mrb[100].mxu1 %v9971_v11  ;;  %v2540_v52 = vrot.slane %v2538_v21, 5  ;;  %v2546_v25 = vrot.slane %v2544_v34, 5  ;;  %v13336_v17 = vpop.f32.mrb[16].mxu0  ;;  %v13348_v11 = vld [vmem:[#allocation2 + $0x9c] sm:$0xf] }
 0x133   : > { %v1935_v54 = vsel %vm12124_vm8, %v1930_v33, %v1934_v36  ;;  %v2550_v14 = vrot.slane %v2548_v32, 4  ;;  %v13334_v26 = vadd.f32 %v13174_v24, %v13170_v3  ;;  %v13338_v36 = vpop.f32.mrb[18].mxu1  ;;  %v1940_v7 = vrot.slane %v1939_v63, 4  ;;  %v13350_v23 = vpop.f32.mrb[17].mxu0 }
 0x134   : > { %16988 = vst [vmem:[#allocation11_spill] sm:$0xff] %v13328_v22  ;;  %v2556_v55 = vrot.slane %v2554_v8, 5  ;;  %v13342_v4 = vadd.f32 %v13187_v15, %v13179_v43  ;;  %v13346_v16 = vadd.f32 %v13189_v41, %v13181_v0  ;;  %v13352_v3 = vpop.f32.mrb[19].mxu1  ;;  %v2541_v24 = vor.u32 %v2540_v52, %v2537_v59  ;;  %v13354_v21 = vpop.f32.mrb[18].mxu0 }
 0x135   : > { %16989 = vst [vmem:[#allocation12_spill] sm:$0xff] %v13334_v26  ;;  %v2551_v29 = vor.u32 %v2550_v14, %v2546_v25  ;;  %v9845_v33 = vrot.slane %v2077_v13, 9  ;;  %v2209_v58 = vrot.slane %v11829_v38, 5  ;;  %v1945_v43 = vsel %vm12124_vm8, %v1940_v7, %v1944_v61  ;;  %v13362_v63 = vpop.f32.mrb[19].mxu0  ;;  %v13366_v14 = vld [vmem:[#allocation2 + $0xa0] sm:$0xf] }
 0x136   : > { %16990 = vst [vmem:[#allocation13_spill] sm:$0xff] %v13342_v4  ;;  %16991 = vst [vmem:[#allocation14_spill] sm:$0xff] %v13346_v16  ;;  %v2212_v15 = vrot.slane %v1677_v51, 5  ;;  %v16992_v0 = vshrl.u32 %v12780_v42, 16  ;;  %v16993_v34 = vshll.u32 %v12780_v42, 16  ;;  %v9940_v8 = vcombine.low %v1935_v54, %v1945_v43 }
 0x137   : > { %v2542_v59 = vrot.slane %v2541_v24, 4  ;;  %v2552_v52 = vrot.slane %v2551_v29, 4  ;;  %v2210_v13 = vsel %vm12118_vm7, %v9845_v33, %v2209_v58  ;;  %16994 = vst [vmem:[#allocation15_spill] sm:$0xff] %v13366_v14  ;;  %v2211_v16 = vrot.slane %v2209_v58, 4  ;;  %v13368_v26 = vld [vmem:[#allocation2 + $0xa4] sm:$0x1] }
 0x138   : > { %v1949_v41 = vrot.slane %v16992_v0, 4  ;;  %v1952_v32 = vrot.slane %v16993_v34, 5  ;;  %v1956_v61 = vshll.u32 %v11829_v38, 16  ;;  %v1960_v7 = vshrl.u32 %v11829_v38, 16  ;;  %16995 = vst [vmem:[#allocation16_spill] sm:$0xff] %v13368_v26  ;;  %4345 = vmatmul.mubr.bf16.gmra.mrb[104].mxu0 %v9940_v8 }
 0x139   : > { %v2547_v42 = vsel %vm12124_vm8, %v2542_v59, %v2546_v25  ;;  %v2557_v54 = vsel %vm12124_vm8, %v2552_v52, %v2556_v55  ;;  %v1966_v24 = vshll.u32 %v1677_v51, 16  ;;  %v2559_v29 = vshrl.u32 %v13348_v11, 16  ;;  %v2078_v8 = vld [vmem:[#allocation2 + $0x9c] sm:$0xe] }
 0x13a   : > { %v1953_v4 = vor.u32 %v1952_v32, %v1949_v41  ;;  %v9988_v43 = vcombine.low %v2547_v42, %v2557_v54  ;;  %v2213_v33 = vsel %vm12118_vm7, %v2211_v16, %v2212_v15  ;;  %v1958_v0 = vrot.slane %v1956_v61, 5  ;;  %v13377_v22 = vpop.f32.mrb[20].mxu0  ;;  %v1678_v16 = vld [vmem:[#allocation2 + $0xa4] sm:$0x1] }
 0x13b   : > { %v9957_v41 = vcombine.low %v2210_v13, %v2213_v33  ;;  %v1962_v38 = vrot.slane %v1960_v7, 4  ;;  %v1968_v34 = vrot.slane %v1966_v24, 5  ;;  %v2561_v32 = vrot.slane %v2559_v29, 4 }
 0x13c   : > { %v1954_v58 = vrot.slane %v1953_v4, 4  ;;  %4505 = vmatprep.mubr.bf16.mxu1 %v9988_v43  ;;  %v2562_v51 = vshll.u32 %v13348_v11, 16  ;;  %v2568_v55 = vshll.u32 %v13366_v14, 16  ;;  %v2572_v59 = vshrl.u32 %v13366_v14, 16  ;;  %v13384_v4 = vpop.f32.mrb[21].mxu0  ;;  %v13393_v7 = vpop.f32.mrb[20].mxu1 }
 0x13d   : > { %4506 = vmatmul.mubr.bf16.gmra.mrb[104].mxu1 %v9972_v44  ;;  %4352 = vmatprep.mubr.bf16.mxu0 %v9957_v41  ;;  %v1963_v15 = vor.u32 %v1962_v38, %v1958_v0  ;;  %v2578_v52 = vshll.u32 %v13368_v26, 16  ;;  %v9973_v13 = vcombine.low %v13348_v11, %v13366_v14  ;;  %v13391_v61 = vadd.f32 %v13220_v45, %v13214_v57  ;;  %v13395_v42 = vpop.f32.mrb[22].mxu0  ;;  %v13401_v43 = vpop.f32.mrb[21].mxu1  ;;  %v2081_v14 = vld [vmem:[#allocation2 + $0xc0] sm:$0xe] }
 0x13e   : > { %v1959_v25 = vsel %vm12124_vm8, %v1954_v58, %v1958_v0  ;;  %v2564_v54 = vrot.slane %v2562_v51, 5  ;;  %v2570_v24 = vrot.slane %v2568_v55, 5  ;;  %v2574_v29 = vrot.slane %v2572_v59, 4  ;;  %v13403_v33 = vpop.f32.mrb[23].mxu0  ;;  %v13413_v0 = vld [vmem:[#allocation2 + $0xa8] sm:$0xf] }
 0x13f   : > { %16996 = vst [vmem:[#allocation17_spill] sm:$0xff] %v13391_v61  ;;  %v13399_v44 = vadd.f32 %v13206_v35, %v13202_v37  ;;  %v1964_v11 = vrot.slane %v1963_v15, 4  ;;  %v2580_v58 = vrot.slane %v2578_v52, 5  ;;  %v13407_v57 = vadd.f32 %v13231_v12, %v13224_v30  ;;  %v13415_v41 = vpop.f32.mrb[22].mxu1  ;;  %v11830_v51 = vld [vmem:[#allocation2 + $0xa0] sm:$0xf] }
 0x140   : > { %v13411_v45 = vadd.f32 %v13222_v2, %v13216_v9  ;;  %v2565_v37 = vor.u32 %v2564_v54, %v2561_v32  ;;  %v2575_v35 = vor.u32 %v2574_v29, %v2570_v24  ;;  %v9846_v38 = vrot.slane %v2078_v8, 9  ;;  %v13417_v59 = vpop.f32.mrb[23].mxu1  ;;  %v13427_v8 = vld [vmem:[#allocation2 + $0xac] sm:$0xf] }
 0x141   : > { %16997 = vst [vmem:[#allocation18_spill] sm:$0xff] %v13399_v44  ;;  %16998 = vst [vmem:[#allocation19_spill] sm:$0xff] %v13407_v57  ;;  %v2216_v55 = vrot.slane %v11830_v51, 5  ;;  %v1969_v15 = vsel %vm12124_vm8, %v1964_v11, %v1968_v34  ;;  %v2219_v30 = vrot.slane %v1678_v16, 5  ;;  %v17000_v12 = vshrl.u32 %v12829_v19, 16 }
 0x142   : > { %16999 = vst [vmem:[#allocation20_spill] sm:$0xff] %v13411_v45  ;;  %v17001_v9 = vshll.u32 %v12829_v19, 16  ;;  %v9941_v45 = vcombine.low %v1959_v25, %v1969_v15  ;;  %v2566_v57 = vrot.slane %v2565_v37, 4  ;;  %v2576_v44 = vrot.slane %v2575_v35, 4  ;;  %17002 = vst [vmem:[#allocation21_spill] sm:$0xff] %v13427_v8 }
 0x143   : > { %v1973_v52 = vrot.slane %v17000_v12, 4  ;;  %v2217_v32 = vsel %vm12118_vm7, %v9846_v38, %v2216_v55  ;;  %v2218_v54 = vrot.slane %v2216_v55, 4  ;;  %v1980_v61 = vshll.u32 %v11830_v51, 16  ;;  %v13429_v34 = vld [vmem:[#allocation2 + $0xb0] sm:$0x1] }
 0x144   : > { %v1976_v2 = vrot.slane %v17001_v9, 5  ;;  %v1984_v26 = vshrl.u32 %v11830_v51, 16  ;;  %17003 = vst [vmem:[#allocation22_spill] sm:$0xff] %v13429_v34  ;;  %4353 = vmatmul.mubr.bf16.gmra.mrb[108].mxu0 %v9941_v45  ;;  %v2571_v11 = vsel %vm12124_vm8, %v2566_v57, %v2570_v24  ;;  %v2581_v19 = vsel %vm12124_vm8, %v2576_v44, %v2580_v58  ;;  %v1679_v58 = vld [vmem:[#allocation2 + $0xb0] sm:$0x1] }
 0x145   : > { %v1990_v25 = vshll.u32 %v1678_v16, 16  ;;  %v2583_v37 = vshrl.u32 %v13413_v0, 16  ;;  %v9989_v35 = vcombine.low %v2571_v11, %v2581_v19  ;;  %v2220_v38 = vsel %vm12118_vm7, %v2218_v54, %v2219_v30 }
 0x146   : > { %v1977_v29 = vor.u32 %v1976_v2, %v1973_v52  ;;  %v1982_v15 = vrot.slane %v1980_v61, 5  ;;  %v9958_v12 = vcombine.low %v2217_v32, %v2220_v38  ;;  %v1986_v51 = vrot.slane %v1984_v26, 4  ;;  %v13443_v45 = vpop.f32.mrb[24].mxu0  ;;  %v2079_v32 = vld [vmem:[#allocation2 + $0xa8] sm:$0xe] }
 0x147   : > { %v1992_v52 = vrot.slane %v1990_v25, 5  ;;  %v2585_v9 = vrot.slane %v2583_v37, 4  ;;  %4513 = vmatprep.mubr.bf16.mxu1 %v9989_v35  ;;  %v2586_v57 = vshll.u32 %v13413_v0, 16  ;;  %v2592_v16 = vshll.u32 %v13427_v8, 16  ;;  %v13452_v54 = vpop.f32.mrb[24].mxu1 }
 0x148   : > { %v1978_v55 = vrot.slane %v1977_v29, 4  ;;  %v2596_v44 = vshrl.u32 %v13427_v8, 16  ;;  %4514 = vmatmul.mubr.bf16.gmra.mrb[108].mxu1 %v9973_v13  ;;  %4360 = vmatprep.mubr.bf16.mxu0 %v9958_v12  ;;  %v1987_v61 = vor.u32 %v1986_v51, %v1982_v15  ;;  %v2602_v26 = vshll.u32 %v13429_v34, 16  ;;  %v13454_v29 = vpop.f32.mrb[25].mxu0  ;;  %v13460_v37 = vpop.f32.mrb[25].mxu1 }
 0x149   : > { %v9974_v30 = vcombine.low %v13413_v0, %v13427_v8  ;;  %v13450_v2 = vadd.f32 %v13254_v5, %v13248_v31  ;;  %v2588_v11 = vrot.slane %v2586_v57, 5  ;;  %v2594_v19 = vrot.slane %v2592_v16, 5  ;;  %v13462_v35 = vpop.f32.mrb[26].mxu0  ;;  %v11831_v51 = vld [vmem:[#allocation2 + $0xac] sm:$0xf] }
 0x14a   : > { %v1983_v24 = vsel %vm12124_vm8, %v1978_v55, %v1982_v15  ;;  %v2598_v25 = vrot.slane %v2596_v44, 4  ;;  %v13458_v13 = vadd.f32 %v13244_v48, %v13238_v50  ;;  %v1988_v0 = vrot.slane %v1987_v61, 4  ;;  %v13472_v55 = vpop.f32.mrb[26].mxu1  ;;  %v13474_v15 = vpop.f32.mrb[27].mxu0 }
 0x14b   : > { %17004 = vst [vmem:[#allocation23_spill] sm:$0xff] %v13450_v2  ;;  %v2604_v38 = vrot.slane %v2602_v26, 5  ;;  %v13466_v31 = vadd.f32 %v13266_v10, %v13264_v60  ;;  %v13470_v5 = vadd.f32 %v13256_v6, %v13250_v62  ;;  %v2589_v50 = vor.u32 %v2588_v11, %v2585_v9  ;;  %v13476_v16 = vpop.f32.mrb[27].mxu1  ;;  %v13484_v26 = vld [vmem:[#allocation2 + $0xb4] sm:$0xf] }
 0x14c   : > { %17005 = vst [vmem:[#allocation24_spill] sm:$0xff] %v13458_v13  ;;  %v2599_v48 = vor.u32 %v2598_v25, %v2594_v19  ;;  %v9847_v12 = vrot.slane %v2079_v32, 9  ;;  %v2223_v57 = vrot.slane %v11831_v51, 5  ;;  %v1993_v44 = vsel %vm12124_vm8, %v1988_v0, %v1992_v52 }
 0x14d   : > { %17006 = vst [vmem:[#allocation25_spill] sm:$0xff] %v13466_v31  ;;  %17007 = vst [vmem:[#allocation26_spill] sm:$0xff] %v13470_v5  ;;  %v2226_v60 = vrot.slane %v1679_v58, 5  ;;  %v17008_v10 = vshrl.u32 %v12852_v53, 16  ;;  %v17009_v62 = vshll.u32 %v12852_v53, 16  ;;  %v9942_v5 = vcombine.low %v1983_v24, %v1993_v44 }
 0x14e   : > { %v2590_v9 = vrot.slane %v2589_v50, 4  ;;  %v2600_v11 = vrot.slane %v2599_v48, 4  ;;  %v2224_v32 = vsel %vm12118_vm7, %v9847_v12, %v2223_v57  ;;  %v2225_v25 = vrot.slane %v2223_v57, 4  ;;  %v13497_v44 = vld [vmem:[#allocation2 + $0xbc] sm:$0x1] }
 0x14f   : > { %v1997_v61 = vrot.slane %v17008_v10, 4  ;;  %v2000_v6 = vrot.slane %v17009_v62, 5  ;;  %v2004_v13 = vshll.u32 %v11831_v51, 16  ;;  %v2008_v2 = vshrl.u32 %v11831_v51, 16  ;;  %4361 = vmatmul.mubr.bf16.gmra.mrb[112].mxu0 %v9942_v5  ;;  %v13492_v10 = vld [vmem:[#allocation2 + $0xb8] sm:$0xf] }
 0x150   : > { %v2595_v52 = vsel %vm12124_vm8, %v2590_v9, %v2594_v19  ;;  %v2605_v53 = vsel %vm12124_vm8, %v2600_v11, %v2604_v38  ;;  %v2014_v0 = vshll.u32 %v1679_v58, 16  ;;  %17010 = vst [vmem:[#allocation27_spill] sm:$0xff] %v13492_v10  ;;  %v2607_v24 = vshrl.u32 %v13484_v26, 16  ;;  %17011 = vst [vmem:[#allocation28_spill] sm:$0xff] %v13497_v44  ;;  %v13499_v5 = vpop.f32.mrb[28].mxu1 }
 0x151   : > { %v2001_v31 = vor.u32 %v2000_v6, %v1997_v61  ;;  %v9990_v50 = vcombine.low %v2595_v52, %v2605_v53  ;;  %v2227_v48 = vsel %vm12118_vm7, %v2225_v25, %v2226_v60  ;;  %v2006_v57 = vrot.slane %v2004_v13, 5  ;;  %v13501_v38 = vpop.f32.mrb[29].mxu1  ;;  %v2080_v52 = vld [vmem:[#allocation2 + $0xb4] sm:$0xe] }
 0x152   : > { %v9959_v51 = vcombine.low %v2224_v32, %v2227_v48  ;;  %v2010_v19 = vrot.slane %v2008_v2, 4  ;;  %v2016_v61 = vrot.slane %v2014_v0, 5  ;;  %v2609_v62 = vrot.slane %v2607_v24, 4  ;;  %v13510_v9 = vpop.f32.mrb[30].mxu1 }
 0x153   : > { %v2002_v12 = vrot.slane %v2001_v31, 4  ;;  %4521 = vmatprep.mubr.bf16.mxu1 %v9990_v50  ;;  %v2610_v6 = vshll.u32 %v13484_v26, 16  ;;  %v2616_v60 = vshll.u32 %v13492_v10, 16  ;;  %v2620_v13 = vshrl.u32 %v13492_v10, 16  ;;  %v13508_v31 = vpop.f32.mrb[28].mxu0  ;;  %v13521_v0 = vpop.f32.mrb[31].mxu1 }
 0x154   : > { %4522 = vmatmul.mubr.bf16.gmra.mrb[112].mxu1 %v9974_v30  ;;  %4368 = vmatprep.mubr.bf16.mxu0 %v9959_v51  ;;  %v2011_v2 = vor.u32 %v2010_v19, %v2006_v57  ;;  %v2626_v11 = vshll.u32 %v13497_v44, 16  ;;  %v9975_v32 = vcombine.low %v13484_v26, %v13492_v10  ;;  %v13517_v25 = vadd.f32 %v13286_v27, %v13282_v39  ;;  %v13519_v53 = vpop.f32.mrb[29].mxu0  ;;  %v17015_v27 = vld [vmem:[#allocation10_spill] sm:$0xff] }
 0x155   : > { %v2007_v58 = vsel %vm12124_vm8, %v2002_v12, %v2006_v57  ;;  %v2612_v24 = vrot.slane %v2610_v6, 5  ;;  %v2618_v50 = vrot.slane %v2616_v60, 5  ;;  %v2622_v48 = vrot.slane %v2620_v13, 4  ;;  %v1680_v12 = vld [vmem:[#allocation2 + $0xbc] sm:$0x1]  ;;  %v13527_v57 = vpop.f32.mrb[30].mxu0 }
 0x156   : > { %17012 = vst [vmem:[#allocation29_spill] sm:$0xff] %v13517_v25  ;;  %v13525_v30 = vadd.f32 %v13290_v46, %v13284_v49  ;;  %v2012_v26 = vrot.slane %v2011_v2, 4  ;;  %v2628_v51 = vrot.slane %v2626_v11, 5  ;;  %v13531_v39 = vadd.f32 %v13302_v40, %v13292_v28  ;;  %v13537_v6 = vpop.f32.mrb[31].mxu0  ;;  %v11832_v49 = vld [vmem:[#allocation2 + $0xb8] sm:$0xf] }
 0x157   : > { %v13535_v19 = vadd.f32 %v17015_v27, %v13300_v47  ;;  %v2613_v60 = vor.u32 %v2612_v24, %v2609_v62  ;;  %v2623_v13 = vor.u32 %v2622_v48, %v2618_v50  ;;  %v9848_v44 = vrot.slane %v2080_v52, 9  ;;  %v17017_v11 = vld [vmem:[#allocation8_spill] sm:$0xff]  ;;  %v13547_v52 = vpop.f32.mrb[32].mxu1 }
 0x158   : > { %17013 = vst [vmem:[#allocation30_spill] sm:$0xff] %v13525_v30  ;;  %17014 = vst [vmem:[#allocation31_spill] sm:$0xff] %v13531_v39  ;;  %v2230_v46 = vrot.slane %v11832_v49, 5  ;;  %v2017_v10 = vsel %vm12124_vm8, %v2012_v26, %v2016_v61  ;;  %v2233_v2 = vrot.slane %v1680_v12, 5  ;;  %v17018_v30 = vshrl.u32 %v17017_v11, 16  ;;  %v13551_v34 = vpop.f32.mrb[33].mxu1 }
 0x159   : > { %17016 = vst [vmem:[#allocation10_spill] sm:$0xff] %v13535_v19  ;;  %v17019_v28 = vshll.u32 %v17017_v11, 16  ;;  %v9943_v47 = vcombine.low %v2007_v58, %v2017_v10  ;;  %v2614_v27 = vrot.slane %v2613_v60, 4  ;;  %v2624_v19 = vrot.slane %v2623_v13, 4  ;;  %v13549_v26 = vld [vmem:[#allocation2 + $0xc0] sm:$0xf] }
 0x15a   : > { %v2021_v25 = vrot.slane %v17018_v30, 4  ;;  %v2231_v62 = vsel %vm12118_vm7, %v9848_v44, %v2230_v46  ;;  %v2232_v24 = vrot.slane %v2230_v46, 4  ;;  %v2028_v39 = vshll.u32 %v11832_v49, 16  ;;  %v11833_v60 = vld [vmem:[%s12022_s27 + $0x7c] sm:$0xf]  ;;  %v13560_v46 = vpop.f32.mrb[32].mxu0 }
 0x15b   : > { %v2024_v40 = vrot.slane %v17019_v28, 5  ;;  %v2032_v61 = vshrl.u32 %v11832_v49, 16  ;;  %4369 = vmatmul.mubr.bf16.gmra.mrb[116].mxu0 %v9943_v47  ;;  %v2619_v30 = vsel %vm12124_vm8, %v2614_v27, %v2618_v50  ;;  %v2629_v10 = vsel %vm12124_vm8, %v2624_v19, %v2628_v51  ;;  %v13558_v13 = vld [vmem:[#allocation2 + $0xc4] sm:$0xf]  ;;  %v13566_v47 = vpop.f32.mrb[33].mxu0 }
 0x15c   : > { %v2038_v58 = vshll.u32 %v1680_v12, 16  ;;  %v9769_v44 = vcombine.low %v11833_v60, %v11833_v60  ;;  %v9991_v49 = vcombine.low %v2619_v30, %v2629_v10  ;;  %v2234_v11 = vsel %vm12118_vm7, %v2232_v24, %v2233_v2  ;;  %v13570_v51 = vld [vmem:[#allocation2 + $0x2c] sm:$0x1]  ;;  %v13573_v8 = vpop.f32.mrb[34].mxu0 }
 0x15d   : > { %v2025_v48 = vor.u32 %v2024_v40, %v2021_v25  ;;  %v13562_v25 = vpop.f32.mrb[34].mxu1  ;;  %v2030_v40 = vrot.slane %v2028_v39, 5  ;;  %v9960_v19 = vcombine.low %v2231_v62, %v2234_v11  ;;  %v2034_v27 = vrot.slane %v2032_v61, 4  ;;  %v13578_v24 = vpop.f32.mrb[35].mxu0 }
 0x15e   : > { %17020 = vst [vmem:[#allocation8_spill] sm:$0xff] %v13562_v25  ;;  %v13568_v50 = vpop.f32.mrb[35].mxu1  ;;  %v585_v60 = vshll.u32 %v9769_v44, 16  ;;  %4529 = vmatprep.mubr.bf16.mxu1 %v9991_v49  ;;  %v2040_v30 = vrot.slane %v2038_v58, 5  ;;  %v2631_v10 = vshrl.u32 %v13549_v26, 16  ;;  %v2634_v2 = vshll.u32 %v13549_v26, 16 }
 0x15f   : > { %v2026_v28 = vrot.slane %v2025_v48, 4  ;;  %17021 = vst [vmem:[#allocation32_spill] sm:$0xff] %v13568_v50  ;;  %v2640_v39 = vshll.u32 %v13558_v13, 16  ;;  %17022 = vst [vmem:[#allocation33_spill] sm:$0xff] %v13578_v24  ;;  %4530 = vmatmul.mubr.bf16.gmra.mrb[116].mxu1 %v9975_v32  ;;  %4376 = vmatprep.mubr.bf16.mxu0 %v9960_v19  ;;  %v2035_v62 = vor.u32 %v2034_v27, %v2030_v40  ;;  %v2644_v44 = vshrl.u32 %v13558_v13, 16  ;;  %v17024_v25 = vld [vmem:[#allocation7_spill] sm:$0xff] }
 0x160   : > { %v587_v61 = vrot.slane %v585_v60, 3  ;;  %v2633_v11 = vrot.slane %v2631_v10, 4  ;;  %v2636_v49 = vrot.slane %v2634_v2, 5  ;;  %v13587_v12 = vadd.f32 %v13350_v23, %v13336_v17  ;;  %v11835_v2 = vld [vmem:[#allocation2 + $0xc4] sm:$0xf] }
 0x161   : > { %v2031_v48 = vsel %vm12124_vm8, %v2026_v28, %v2030_v40  ;;  %v13583_v58 = vrot.slane %v2640_v39, 5  ;;  %v2036_v50 = vrot.slane %v2035_v62, 4  ;;  %v2646_v24 = vrot.slane %v2644_v44, 4  ;;  %v13615_v44 = vld [vmem:[#allocation2 + $0xd0] sm:$0xf] }
 0x162   : > { %17023 = vst [vmem:[#allocation34_spill] sm:$0xff] %v13587_v12  ;;  %v638_v19 = vsel %vm12040_vm2, %v17024_v25, %v587_v61  ;;  %v13594_v28 = vadd.f32 %v13330_v56, %v13322_v1  ;;  %v2637_v27 = vor.u32 %v2636_v49, %v2633_v11  ;;  %v13598_v60 = vadd.f32 %v13362_v63, %v13354_v21  ;;  %v13607_v1 = vld [vmem:[#allocation2 + $0xcc] sm:$0xf]  ;;  %v17029_v63 = vld [vmem:[#allocation9_spill] sm:$0xff] }
 0x163   : > { %v9817_v40 = vcombine.low %v638_v19, %v638_v19  ;;  %v13602_v17 = vadd.f32 %v13352_v3, %v13338_v36  ;;  %v2041_v23 = vsel %vm12124_vm8, %v2036_v50, %v2040_v30  ;;  %v2647_v25 = vor.u32 %v2646_v24, %v13583_v58 }
 0x164   : > { %17026 = vst [vmem:[#allocation7_spill] sm:$0xff] %v13594_v28  ;;  %17027 = vst [vmem:[#allocation35_spill] sm:$0xff] %v13598_v60  ;;  %v9849_v10 = vrot.slane %v2081_v14, 9  ;;  %v2237_v39 = vrot.slane %v11835_v2, 5  ;;  %v9944_v56 = vcombine.low %v2031_v48, %v2041_v23  ;;  %v17030_v62 = vshrl.u32 %v17029_v63, 16  ;;  %v13628_v23 = vpop.f32.mrb[36].mxu0 }
 0x165   : > { %17028 = vst [vmem:[#allocation36_spill] sm:$0xff] %v13602_v17  ;;  %865 = vst [vmem:[#allocation2 + $0xc8] sm:$0x1] %v9817_v40  ;;  %v17031_v36 = vshll.u32 %v17029_v63, 16  ;;  %v13617_v50 = vrot.slane %v2637_v27, 4  ;;  %v13619_v14 = vrot.slane %v2647_v25, 4 }
 0x166   : > { %v2045_v61 = vrot.slane %v17030_v62, 4  ;;  %v13623_v30 = vsel %vm12118_vm7, %v9849_v10, %v2237_v39  ;;  %v2052_v24 = vshll.u32 %v11835_v2, 16  ;;  %v13625_v48 = vld [vmem:[#allocation2 + $0xd4] sm:$0x1]  ;;  %4377 = vmatmul.mubr.bf16.gmra.mrb[120].mxu0 %v9944_v56  ;;  %v2239_v11 = vrot.slane %v2237_v39, 4  ;;  %v13633_v10 = vpop.f32.mrb[37].mxu0 }
 0x167   : > { %v2048_v3 = vrot.slane %v17031_v36, 5  ;;  %17032 = vst [vmem:[#allocation9_spill] sm:$0xff] %v13625_v48  ;;  %v2056_v19 = vshrl.u32 %v11835_v2, 16  ;;  %v2655_v40 = vshrl.u32 %v13607_v1, 16  ;;  %v2658_v27 = vshll.u32 %v13607_v1, 16  ;;  %v13636_v56 = vpop.f32.mrb[38].mxu0 }
 0x168   : > { %v2054_v63 = vrot.slane %v2052_v24, 5  ;;  %v2664_v25 = vshll.u32 %v13615_v44, 16  ;;  %v2668_v62 = vshrl.u32 %v13615_v44, 16  ;;  %v2674_v39 = vshll.u32 %v13625_v48, 16  ;;  %17033 = vst [vmem:[#allocation37_spill] sm:$0xff] %v13636_v56  ;;  %v13642_v17 = vpop.f32.mrb[39].mxu0 }
 0x169   : > { %v2049_v49 = vor.u32 %v2048_v3, %v2045_v61  ;;  %v2058_v21 = vrot.slane %v2056_v19, 4  ;;  %v2657_v32 = vrot.slane %v2655_v40, 4  ;;  %v2643_v2 = vsel %vm12124_vm8, %v13617_v50, %v13583_v58  ;;  %v2678_v48 = vld [vmem:[#allocation2 + $0x18] sm:$0xe] }
 0x16a   : > { %v2660_v61 = vrot.slane %v2658_v27, 5  ;;  %v2666_v3 = vrot.slane %v2664_v25, 5  ;;  %v2670_v24 = vrot.slane %v2668_v62, 4  ;;  %v2676_v19 = vrot.slane %v2674_v39, 5 }
 0x16b   : > { %v2050_v36 = vrot.slane %v2049_v49, 4  ;;  %v2059_v49 = vor.u32 %v2058_v21, %v2054_v63  ;;  %v13648_v40 = vadd.f32 %v13384_v4, %v13377_v22  ;;  %v13654_v50 = vadd.f32 %v13401_v43, %v13393_v7  ;;  %v13661_v4 = vpop.f32.mrb[36].mxu1 }
 0x16c   : > { %v13650_v28 = vld [vmem:[#allocation2 + $0xc8] sm:$0x1]  ;;  %v2661_v56 = vor.u32 %v2660_v61, %v2657_v32  ;;  %v2671_v58 = vor.u32 %v2670_v24, %v2666_v3  ;;  %v13658_v27 = vadd.f32 %v13403_v33, %v13395_v42  ;;  %v13665_v32 = vadd.f32 %v13417_v59, %v13415_v41  ;;  %v13667_v7 = vpop.f32.mrb[37].mxu1  ;;  %v11836_v61 = vld [vmem:[#allocation2 + $0x1c] sm:$0xf] }
 0x16d   : > { %v2055_v60 = vsel %vm12124_vm8, %v2050_v36, %v2054_v63  ;;  %17034 = vst [vmem:[#allocation38_spill] sm:$0xff] %v13650_v28  ;;  %v1681_v12 = vld [vmem:[#allocation2 + $0xc8] sm:$0x1]  ;;  %v2650_v21 = vshll.u32 %v13650_v28, 16  ;;  %v2060_v25 = vrot.slane %v2059_v49, 4  ;;  %v9850_v39 = vrot.slane %v2678_v48, 9 }
 0x16e   : > { %v2240_v63 = vrot.slane %v1681_v12, 5  ;;  %v2062_v22 = vshll.u32 %v1681_v12, 16  ;;  %v2662_v62 = vrot.slane %v2661_v56, 4  ;;  %v2672_v36 = vrot.slane %v2671_v58, 4  ;;  %v2679_v49 = vld [vmem:[#allocation2 + $0x24] sm:$0xe] }
 0x16f   : > { %v2652_v43 = vrot.slane %v2650_v21, 5  ;;  %v2744_v24 = vrot.slane %v11836_v61, 5  ;;  %v13671_v12 = vpop.f32.mrb[38].mxu1  ;;  %v11837_v59 = vld [vmem:[#allocation2 + $0x20] sm:$0x1]  ;;  %v13689_v28 = vadd.f32 %v13454_v29, %v13443_v45 }
 0x170   : > { %v2241_v42 = vsel %vm12118_vm7, %v2239_v11, %v2240_v63  ;;  %v2064_v33 = vrot.slane %v2062_v22, 5  ;;  %v2667_v58 = vsel %vm12124_vm8, %v2662_v62, %v2666_v3  ;;  %v2677_v41 = vsel %vm12124_vm8, %v2672_v36, %v2676_v19  ;;  %v13678_v21 = vpop.f32.mrb[39].mxu1  ;;  %v11838_v61 = vld [vmem:[#allocation2 + $0x28] sm:$0xf]  ;;  %v11839_v29 = vld [vmem:[#allocation2 + $0x34] sm:$0xf] }
 0x171   : > { %v9961_v56 = vcombine.low %v13623_v30, %v2241_v42  ;;  %v2747_v48 = vrot.slane %v11837_v59, 5  ;;  %v2653_v11 = vsel %vm12124_vm8, %v13619_v14, %v2652_v43  ;;  %v9993_v22 = vcombine.low %v2667_v58, %v2677_v41  ;;  %v2680_v42 = vld [vmem:[#allocation2 + $0x30] sm:$0xe]  ;;  %v11841_v58 = vld [vmem:[#allocation2 + $0x40] sm:$0xf] }
 0x172   : > { %v2065_v63 = vsel %vm12124_vm8, %v2060_v25, %v2064_v33  ;;  %v2745_v30 = vsel %vm12118_vm7, %v9850_v39, %v2744_v24  ;;  %v9992_v3 = vcombine.low %v2643_v2, %v2653_v11  ;;  %v2746_v19 = vrot.slane %v2744_v24, 4  ;;  %v2681_v39 = vld [vmem:[#allocation2 + $0x3c] sm:$0xe]  ;;  %v11840_v33 = vld [vmem:[#allocation2 + $0x38] sm:$0x1] }
 0x173   : > { %4384 = vmatprep.mubr.bf16.mxu0 %v9961_v56  ;;  %v9945_v62 = vcombine.low %v2055_v60, %v2065_v63  ;;  %v9851_v36 = vrot.slane %v2679_v49, 9  ;;  %v2751_v59 = vrot.slane %v11838_v61, 5  ;;  %v13693_v14 = vadd.f32 %v13460_v37, %v13452_v54  ;;  %v13710_v49 = vpop.f32.mrb[40].mxu1 }
 0x174   : > { %v13697_v25 = vadd.f32 %v13474_v15, %v13462_v35  ;;  %4537 = vmatprep.mubr.bf16.mxu1 %v9992_v3  ;;  %v2748_v60 = vsel %vm12118_vm7, %v2746_v19, %v2747_v48  ;;  %v13703_v2 = vadd.f32 %v13476_v16, %v13472_v55  ;;  %v9852_v45 = vrot.slane %v2680_v42, 9  ;;  %v2682_v48 = vld [vmem:[#allocation2 + $0x48] sm:$0xe] }
 0x175   : > { %4385 = vmatmul.mubr.bf16.gmra.mrb[124].mxu0 %v9945_v62  ;;  %v2758_v43 = vrot.slane %v11839_v29, 5  ;;  %v17035_v54 = vcombine.low %v13549_v26, %v13558_v13  ;;  %v9994_v37 = vcombine.low %v2745_v30, %v2748_v60  ;;  %v2752_v35 = vsel %vm12118_vm7, %v9851_v36, %v2751_v59  ;;  %v13714_v26 = vpop.f32.mrb[41].mxu1  ;;  %v11842_v30 = vld [vmem:[#allocation2 + $0x44] sm:$0x1]  ;;  %v13728_v62 = vpop.f32.mrb[40].mxu0 }
 0x176   : > { %v2753_v15 = vrot.slane %v2751_v59, 4  ;;  %v2761_v24 = vrot.slane %v11840_v33, 5  ;;  %v9853_v56 = vrot.slane %v2681_v39, 9  ;;  %v2765_v41 = vrot.slane %v11841_v58, 5  ;;  %v13730_v19 = vpop.f32.mrb[42].mxu1  ;;  %v13736_v39 = vpop.f32.mrb[41].mxu0 }
 0x177   : > { %4538 = vmatmul.mubr.bf16.gmra.mrb[120].mxu1 %v17035_v54  ;;  %v2759_v55 = vsel %vm12118_vm7, %v9852_v45, %v2758_v43  ;;  %v2760_v16 = vrot.slane %v2758_v43, 4  ;;  %11437 = vmatprep.mubr.bf16.mxu0 %v9994_v37  ;;  %v17036_v11 = vrot.slane %v13570_v51, 5  ;;  %v2768_v42 = vrot.slane %v11842_v30, 5  ;;  %v11843_v45 = vld [vmem:[#allocation2 + $0x4c] sm:$0xf]  ;;  %v17038_v58 = vld [vmem:[#allocation8_spill] sm:$0xff] }
 0x178   : > { %4545 = vmatprep.mubr.bf16.mxu1 %v9993_v22  ;;  %v13722_v22 = vadd.f32 %v13519_v53, %v13508_v31  ;;  %v13726_v3 = vadd.f32 %v13501_v38, %v13499_v5  ;;  %v9977_v51 = vcombine.low %v13607_v1, %v13615_v44  ;;  %v2767_v59 = vrot.slane %v2765_v41, 4  ;;  %v13738_v31 = vpop.f32.mrb[43].mxu1  ;;  %v13748_v1 = vpop.f32.mrb[42].mxu0  ;;  %v11844_v43 = vld [vmem:[#allocation2 + $0x50] sm:$0x1] }
 0x179   : > { %v2755_v63 = vsel %vm12118_vm7, %v2753_v15, %v17036_v11  ;;  %v2762_v61 = vsel %vm12118_vm7, %v2760_v16, %v2761_v24  ;;  %v13742_v5 = vadd.f32 %v13537_v6, %v13527_v57  ;;  %v13746_v38 = vadd.f32 %v13521_v0, %v13510_v9  ;;  %v10557_v37 = vpop.f32.mrb[43].mxu0  ;;  %v2683_v0 = vld [vmem:[#allocation2 + $0x54] sm:$0xe]  ;;  %v11845_v6 = vld [vmem:[#allocation2 + $0x58] sm:$0xf] }
 0x17a   : > { %v9995_v36 = vcombine.low %v2752_v35, %v2755_v63  ;;  %v9996_v53 = vcombine.low %v2759_v55, %v2762_v61  ;;  %v9854_v60 = vrot.slane %v2682_v48, 9  ;;  %v2772_v29 = vrot.slane %v11843_v45, 5  ;;  %v17037_v55 = vld [vmem:[#allocation33_spill] sm:$0xff] }
 0x17b   : > { %v2775_v54 = vrot.slane %v11844_v43, 5  ;;  %v2766_v35 = vsel %vm12118_vm7, %v9853_v56, %v2765_v41  ;;  %v2769_v15 = vsel %vm12118_vm7, %v2767_v59, %v2768_v42  ;;  %v10543_v57 = vadd.f32 %v13566_v47, %v13560_v46  ;;  %v17039_v41 = vld [vmem:[#allocation32_spill] sm:$0xff]  ;;  %v2684_v46 = vld [vmem:[#allocation2 + $0x60] sm:$0xe]  ;;  %v11846_v63 = vld [vmem:[#allocation2 + $0x64] sm:$0xf] }
 0x17c   : > { %v2774_v9 = vrot.slane %v2772_v29, 4  ;;  %v2779_v33 = vrot.slane %v11845_v6, 5  ;;  %v10655_v24 = vadd.f32 %v13551_v34, %v13547_v52  ;;  %v10546_v16 = vadd.f32 %v17037_v55, %v13573_v8  ;;  %v11847_v42 = vld [vmem:[#allocation2 + $0x5c] sm:$0x1]  ;;  %v10671_v6 = vpop.f32.mrb[44].mxu1 }
 0x17d   : > { %11438 = vmatmul.mubr.bf16.vlgmr.msra.gmra.mrb[128].mxu0 %v9995_v36  ;;  %v2773_v56 = vsel %vm12118_vm7, %v9854_v60, %v2772_v29  ;;  %v10658_v48 = vadd.f32 %v17039_v41, %v17038_v58  ;;  %v2786_v30 = vrot.slane %v11846_v63, 5  ;;  %v9997_v34 = vcombine.low %v2766_v35, %v2769_v15  ;;  %v10559_v36 = vpop.f32.mrb[44].mxu0  ;;  %v11848_v60 = vld [vmem:[#allocation2 + $0x68] sm:$0x1]  ;;  %v17040_v35 = vld [vmem:[#allocation37_spill] sm:$0xff] }
 0x17e   : > { %11441 = vmatprep.mubr.bf16.mxu0 %v9996_v53  ;;  %v2776_v47 = vsel %vm12118_vm7, %v2774_v9, %v2775_v54  ;;  %v13766_v11 = vadd.f32 %v10655_v24, %v10543_v57  ;;  %v9855_v52 = vrot.slane %v2683_v0, 9  ;;  %v2782_v8 = vrot.slane %v11847_v42, 5  ;;  %v10560_v29 = vpop.f32.mrb[45].mxu0  ;;  %v11849_v58 = vld [vmem:[#allocation2 + $0x70] sm:$0xf] }
 0x17f   : > { %4546 = vmatmul.mubr.bf16.gmra.mrb[124].mxu1 %v9977_v51  ;;  %v13768_v51 = vadd.f32 %v10658_v48, %v10546_v16  ;;  %v9998_v61 = vcombine.low %v2773_v56, %v2776_v47  ;;  %v2781_v59 = vrot.slane %v2779_v33, 4  ;;  %v9856_v53 = vrot.slane %v2684_v46, 9  ;;  %v10562_v9 = vpop.f32.mrb[46].mxu0  ;;  %v10672_v16 = vpop.f32.mrb[45].mxu1  ;;  %v2685_v56 = vld [vmem:[#allocation2 + $0x6c] sm:$0xe] }
 0x180   : > { %v2789_v45 = vrot.slane %v11848_v60, 5  ;;  %v2788_v43 = vrot.slane %v2786_v30, 4  ;;  %v10549_v54 = vadd.f32 %v13633_v10, %v13628_v23  ;;  %v10661_v57 = vadd.f32 %v13667_v7, %v13661_v4  ;;  %v10563_v24 = vpop.f32.mrb[47].mxu0  ;;  %v10674_v10 = vpop.f32.mrb[46].mxu1  ;;  %v11850_v48 = vld [vmem:[#allocation2 + $0x7c] sm:$0xf] }
 0x181   : > { %v10552_v15 = vadd.f32 %v13642_v17, %v17040_v35  ;;  %v10664_v0 = vadd.f32 %v13678_v21, %v13671_v12  ;;  %v2793_v41 = vrot.slane %v11849_v58, 5  ;;  %v2780_v17 = vsel %vm12118_vm7, %v9855_v52, %v2779_v33  ;;  %v10675_v21 = vpop.f32.mrb[47].mxu1  ;;  %v2686_v52 = vld [vmem:[#allocation2 + $0x78] sm:$0xe] }
 0x182   : > { %v13778_v55 = vadd.f32 %v10661_v57, %v10549_v54  ;;  %v2783_v4 = vsel %vm12118_vm7, %v2781_v59, %v2782_v8  ;;  %v2787_v7 = vsel %vm12118_vm7, %v9856_v53, %v2786_v30  ;;  %v2790_v12 = vsel %vm12118_vm7, %v2788_v43, %v2789_v45  ;;  %v11852_v45 = vld [vmem:[#allocation2 + $0x88] sm:$0xf]  ;;  %v11854_v57 = vld [vmem:[#allocation2 + $0x94] sm:$0xf] }
 0x183   : > { %v13780_v23 = vadd.f32 %v10664_v0, %v10552_v15  ;;  %v2800_v46 = vrot.slane %v11850_v48, 5  ;;  %v10555_v47 = vadd.f32 %v13736_v39, %v13728_v62  ;;  %v10667_v63 = vadd.f32 %v13714_v26, %v13710_v49  ;;  %v11853_v26 = vld [vmem:[#allocation2 + $0x80] sm:$0x1] }
 0x184   : > { %v10558_v33 = vadd.f32 %v10557_v37, %v13748_v1  ;;  %v10670_v42 = vadd.f32 %v13738_v31, %v13730_v19  ;;  %v9999_v30 = vcombine.low %v2780_v17, %v2783_v4  ;;  %v2795_v8 = vrot.slane %v2793_v41, 4  ;;  %v2687_v37 = vld [vmem:[#allocation2 + $0x84] sm:$0xe]  ;;  %v10677_v54 = vpop.f32.mrb[48].mxu1  ;;  %v2688_v17 = vld [vmem:[#allocation2 + $0x90] sm:$0xe] }
 0x185   : > { %11442 = vmatmul.mubr.bf16.gmra.mrb[132].mxu0 %v9997_v34  ;;  %v9857_v34 = vrot.slane %v2685_v56, 9  ;;  %v13797_v53 = vadd.f32 %v10667_v63, %v10555_v47  ;;  %v10000_v60 = vcombine.low %v2787_v7, %v2790_v12  ;;  %v2807_v43 = vrot.slane %v11852_v45, 5  ;;  %v10678_v0 = vpop.f32.mrb[49].mxu1  ;;  %v11855_v63 = vld [vmem:[#allocation2 + $0x8c] sm:$0x1] }
 0x186   : > { %11445 = vmatprep.mubr.bf16.mxu0 %v9998_v61  ;;  %v11851_v61 = vld [vmem:[#allocation2 + $0x74] sm:$0x1]  ;;  %v13799_v62 = vadd.f32 %v10670_v42, %v10558_v33  ;;  %v9858_v39 = vrot.slane %v2686_v52, 9  ;;  %v2802_v49 = vrot.slane %v2800_v46, 4  ;;  %v2803_v1 = vrot.slane %v11853_v26, 5  ;;  %v10565_v7 = vpop.f32.mrb[48].mxu0 }
 0x187   : > { %v2796_v59 = vrot.slane %v11851_v61, 5  ;;  %v2814_v35 = vrot.slane %v11854_v57, 5  ;;  %v10561_v19 = vadd.f32 %v10560_v29, %v10559_v36  ;;  %v10673_v31 = vadd.f32 %v10672_v16, %v10671_v6  ;;  %v10680_v12 = vpop.f32.mrb[50].mxu1  ;;  %v10566_v29 = vpop.f32.mrb[49].mxu0  ;;  %v17041_v26 = vld [vmem:[#allocation15_spill] sm:$0xff] }
 0x188   : > { %v10564_v15 = vadd.f32 %v10563_v24, %v10562_v9  ;;  %v2794_v56 = vsel %vm12118_vm7, %v9857_v34, %v2793_v41  ;;  %v10676_v4 = vadd.f32 %v10675_v21, %v10674_v10  ;;  %v9859_v48 = vrot.slane %v2687_v37, 9  ;;  %v10681_v9 = vpop.f32.mrb[51].mxu1  ;;  %v10568_v41 = vpop.f32.mrb[50].mxu0  ;;  %v11856_v34 = vld [vmem:[#allocation2 + $0x98] sm:$0x1] }
 0x189   : > { %v2797_v58 = vsel %vm12118_vm7, %v2795_v8, %v2796_v59  ;;  %v2809_v47 = vrot.slane %v2807_v43, 4  ;;  %v2810_v33 = vrot.slane %v11855_v63, 5  ;;  %v13805_v36 = vadd.f32 %v10673_v31, %v10561_v19  ;;  %v10569_v42 = vpop.f32.mrb[51].mxu0  ;;  %v17043_v63 = vld [vmem:[#allocation11_spill] sm:$0xff] }
 0x18a   : > { %v2801_v6 = vsel %vm12118_vm7, %v9858_v39, %v2800_v46  ;;  %v2804_v24 = vsel %vm12118_vm7, %v2802_v49, %v2803_v1  ;;  %v13811_v16 = vadd.f32 %v10676_v4, %v10564_v15  ;;  %v9860_v10 = vrot.slane %v2688_v17, 9  ;;  %v2689_v39 = vld [vmem:[#allocation2 + $0x9c] sm:$0xe]  ;;  %v17042_v4 = vld [vmem:[#allocation21_spill] sm:$0xff] }
 0x18b   : > { %v2816_v21 = vrot.slane %v2814_v35, 4  ;;  %v2817_v52 = vrot.slane %v11856_v34, 5  ;;  %v10567_v8 = vadd.f32 %v10566_v29, %v10565_v7  ;;  %v10679_v61 = vadd.f32 %v10678_v0, %v10677_v54  ;;  %v17045_v29 = vld [vmem:[#allocation13_spill] sm:$0xff] }
 0x18c   : > { %v10570_v59 = vadd.f32 %v10569_v42, %v10568_v41  ;;  %v2808_v45 = vsel %vm12118_vm7, %v9859_v48, %v2807_v43  ;;  %v2811_v46 = vsel %vm12118_vm7, %v2809_v47, %v2810_v33  ;;  %v10682_v49 = vadd.f32 %v10681_v9, %v10680_v12  ;;  %v10683_v57 = vpop.f32.mrb[52].mxu1  ;;  %v17046_v9 = vld [vmem:[#allocation14_spill] sm:$0xff] }
 0x18d   : > { %11446 = vmatmul.mubr.bf16.gmra.mrb[136].mxu0 %v9999_v30  ;;  %v10001_v30 = vcombine.low %v2794_v56, %v2797_v58  ;;  %v2821_v1 = vrot.slane %v17041_v26, 5  ;;  %v13818_v37 = vadd.f32 %v10679_v61, %v10567_v8  ;;  %v2815_v19 = vsel %vm12118_vm7, %v9860_v10, %v2814_v35  ;;  %v10684_v15 = vpop.f32.mrb[53].mxu1  ;;  %v2690_v56 = vld [vmem:[#allocation2 + $0xa8] sm:$0xe]  ;;  %v17044_v35 = vld [vmem:[#allocation12_spill] sm:$0xff]  ;;  %v17048_v61 = vld [vmem:[#allocation17_spill] sm:$0xff] }
 0x18e   : > { %11449 = vmatprep.mubr.bf16.mxu0 %v10000_v60  ;;  %v10002_v60 = vcombine.low %v2801_v6, %v2804_v24  ;;  %v2818_v54 = vsel %vm12118_vm7, %v2816_v21, %v2817_v52  ;;  %v13824_v31 = vadd.f32 %v10682_v49, %v10570_v59  ;;  %v10003_v43 = vcombine.low %v2808_v45, %v2811_v46  ;;  %v10686_v17 = vpop.f32.mrb[54].mxu1  ;;  %v17047_v10 = vld [vmem:[#allocation16_spill] sm:$0xff]  ;;  %v17049_v59 = vld [vmem:[#allocation18_spill] sm:$0xff]  ;;  %v17050_v45 = vld [vmem:[#allocation19_spill] sm:$0xff] }
 0x18f   : > { %v9861_v0 = vrot.slane %v2689_v39, 9  ;;  %v10571_v58 = vpop.f32.mrb[52].mxu0  ;;  %v2828_v7 = vrot.slane %v17042_v4, 5  ;;  %v10685_v48 = vadd.f32 %v10684_v15, %v10683_v57  ;;  %v10687_v47 = vpop.f32.mrb[55].mxu1  ;;  %v13829_v33 = vadd.f32 %v17044_v35, %v17043_v63  ;;  %v17051_v46 = vld [vmem:[#allocation20_spill] sm:$0xff]  ;;  %v17052_v49 = vld [vmem:[#allocation22_spill] sm:$0xff] }
 0x190   : > { %v10572_v12 = vpop.f32.mrb[53].mxu0  ;;  %v13833_v6 = vadd.f32 %v17046_v9, %v17045_v29  ;;  %v10004_v24 = vcombine.low %v2815_v19, %v2818_v54  ;;  %v2823_v41 = vrot.slane %v2821_v1, 4  ;;  %v2824_v21 = vrot.slane %v17047_v10, 5  ;;  %v17053_v54 = vld [vmem:[#allocation23_spill] sm:$0xff]  ;;  %v17054_v15 = vld [vmem:[#allocation24_spill] sm:$0xff]  ;;  %v17055_v4 = vld [vmem:[#allocation25_spill] sm:$0xff] }
 0x191   : > { %v10573_v34 = vadd.f32 %v10572_v12, %v10571_v58  ;;  %v10574_v52 = vpop.f32.mrb[54].mxu0  ;;  %v9862_v42 = vrot.slane %v2690_v56, 9  ;;  %v10688_v8 = vadd.f32 %v10687_v47, %v10686_v17  ;;  %v13842_v39 = vadd.f32 %v17051_v46, %v17050_v45  ;;  %v17056_v17 = vld [vmem:[#allocation26_spill] sm:$0xff]  ;;  %v17057_v47 = vld [vmem:[#allocation29_spill] sm:$0xff]  ;;  %v17059_v29 = vld [vmem:[#allocation31_spill] sm:$0xff] }
 0x192   : > { %v2831_v26 = vrot.slane %v17052_v49, 5  ;;  %v13849_v58 = vadd.f32 %v17054_v15, %v17053_v54  ;;  %v2830_v56 = vrot.slane %v2828_v7, 4  ;;  %v13853_v12 = vadd.f32 %v17056_v17, %v17055_v4  ;;  %v17058_v63 = vld [vmem:[#allocation30_spill] sm:$0xff] }
 0x193   : > { %v13845_v57 = vadd.f32 %v10685_v48, %v10573_v34  ;;  %v13857_v35 = vadd.f32 %v17058_v63, %v17057_v47  ;;  %v17060_v9 = vld [vmem:[#allocation10_spill] sm:$0xff]  ;;  %v13875_v46 = vadd.f32 %v13654_v50, %v13648_v40  ;;  %v13879_v49 = vadd.f32 %v13665_v32, %v13658_v27  ;;  %v2691_v27 = vld [vmem:[#allocation2 + $0xb4] sm:$0xe]  ;;  %v17066_v47 = vld [vmem:[#allocation28_spill] sm:$0xff] }
 0x194   : > { %v13861_v10 = vadd.f32 %v17060_v9, %v17059_v29  ;;  %v17061_v34 = vld [vmem:[#allocation34_spill] sm:$0xff]  ;;  %v13891_v54 = vadd.f32 %v13726_v3, %v13722_v22  ;;  %v13895_v40 = vadd.f32 %v13746_v38, %v13742_v5  ;;  %v2822_v50 = vsel %vm12118_vm7, %v9861_v0, %v2821_v1  ;;  %v17065_v32 = vld [vmem:[#allocation27_spill] sm:$0xff]  ;;  %v2692_v1 = vld [vmem:[#allocation2 + $0xc0] sm:$0xe] }
 0x195   : > { %11450 = vmatmul.mubr.bf16.gmra.mrb[140].mxu0 %v10001_v30  ;;  %v10575_v30 = vpop.f32.mrb[55].mxu0  ;;  %v2829_v22 = vsel %vm12118_vm7, %v9862_v42, %v2828_v7  ;;  %v2832_v3 = vsel %vm12118_vm7, %v2830_v56, %v2831_v26  ;;  %v2842_v5 = vrot.slane %v13558_v13, 5  ;;  %v9863_v17 = vrot.slane %v2691_v27, 9 }
 0x196   : > { %11453 = vmatprep.mubr.bf16.mxu0 %v10002_v60  ;;  %v13838_v60 = vadd.f32 %v17049_v59, %v17048_v61  ;;  %v10576_v19 = vadd.f32 %v10575_v30, %v10574_v52  ;;  %v17062_v52 = vld [vmem:[#allocation7_spill] sm:$0xff]  ;;  %v17064_v59 = vld [vmem:[#allocation36_spill] sm:$0xff]  ;;  %v2838_v63 = vrot.slane %v17066_v47, 5  ;;  %v9864_v56 = vrot.slane %v2692_v1, 9 }
 0x197   : > { %v13867_v30 = vadd.f32 %v17062_v52, %v17061_v34  ;;  %v17063_v61 = vld [vmem:[#allocation35_spill] sm:$0xff]  ;;  %v10577_v15 = vpop.f32.mrb[56].mxu0  ;;  %v10006_v34 = vcombine.low %v2829_v22, %v2832_v3  ;;  %v2844_v13 = vrot.slane %v2842_v5, 4  ;;  %v17067_v52 = vld [vmem:[#allocation38_spill] sm:$0xff] }
 0x198   : > { %v13863_v48 = vadd.f32 %v10688_v8, %v10576_v19  ;;  %v13871_v45 = vadd.f32 %v17064_v59, %v17063_v61  ;;  %v13883_v8 = vadd.f32 %v13693_v14, %v13689_v28  ;;  %v13887_v19 = vadd.f32 %v13703_v2, %v13697_v25  ;;  %v10689_v25 = vpop.f32.mrb[56].mxu1  ;;  %v10578_v2 = vpop.f32.mrb[57].mxu0 }
 0x199   : > { %v2825_v28 = vsel %vm12118_vm7, %v2823_v41, %v2824_v21  ;;  %v2835_v14 = vrot.slane %v17065_v32, 5  ;;  %v10579_v38 = vadd.f32 %v10578_v2, %v10577_v15  ;;  %v2845_v61 = vrot.slane %v17067_v52, 5 }
 0x19a   : > { %v10005_v21 = vcombine.low %v2822_v50, %v2825_v28  ;;  %v2849_v28 = vrot.slane %v13615_v44, 5  ;;  %v2843_v27 = vsel %vm12118_vm7, %v9864_v56, %v2842_v5 }
 0x19b   : > { %v2837_v7 = vrot.slane %v2835_v14, 4  ;;  %v2836_v15 = vsel %vm12118_vm7, %v9863_v17, %v2835_v14  ;;  %v2846_v32 = vsel %vm12118_vm7, %v2844_v13, %v2845_v61 }
 0x19c   : > { %v10008_v22 = vcombine.low %v2843_v27, %v2846_v32 }
 0x19d   : > { %11454 = vmatmul.mubr.bf16.gmra.mrb[144].mxu0 %v10003_v43  ;;  %v10690_v43 = vpop.f32.mrb[57].mxu1  ;;  %v2839_v50 = vsel %vm12118_vm7, %v2837_v7, %v2838_v63 }
 0x19e   : > { %11457 = vmatprep.mubr.bf16.mxu0 %v10004_v24  ;;  %v10580_v24 = vpop.f32.mrb[58].mxu0  ;;  %v10691_v0 = vadd.f32 %v10690_v43, %v10689_v25  ;;  %v10692_v4 = vpop.f32.mrb[58].mxu1  ;;  %v2693_v25 = vld [vmem:[#allocation2 + $0xcc] sm:$0xe]  ;;  %v10007_v2 = vcombine.low %v2836_v15, %v2839_v50  ;;  %v17068_v43 = vld [vmem:[#allocation9_spill] sm:$0xff] }
 0x19f   : > { %v10581_v41 = vpop.f32.mrb[59].mxu0  ;;  %v10693_v9 = vpop.f32.mrb[59].mxu1  ;;  %v9865_v3 = vrot.slane %v2693_v25, 9 }
 0x1a0   : > { %v10582_v29 = vadd.f32 %v10581_v41, %v10580_v24  ;;  %v13908_v42 = vadd.f32 %v10691_v0, %v10579_v38  ;;  %v10694_v26 = vadd.f32 %v10693_v9, %v10692_v4  ;;  %v2851_v38 = vrot.slane %v2849_v28, 4 }
 0x1a1   : > { %v2852_v24 = vrot.slane %v17068_v43, 5  ;;  %v2850_v5 = vsel %vm12118_vm7, %v9865_v3, %v2849_v28 }
 0x1a2   : > { %v13911_v59 = vadd.f32 %v10694_v26, %v10582_v29 }
 0x1a3   : > { %v10695_v1 = vpop.f32.mrb[60].mxu1  ;;  %v2853_v17 = vsel %vm12118_vm7, %v2851_v38, %v2852_v24 }
 0x1a4   : > { %v10696_v14 = vpop.f32.mrb[61].mxu1  ;;  %v10009_v26 = vcombine.low %v2850_v5, %v2853_v17 }
 0x1a5   : > { %11458 = vmatmul.mubr.bf16.gmra.mrb[148].mxu0 %v10005_v21  ;;  %v10583_v0 = vpop.f32.mrb[60].mxu0  ;;  %v10697_v4 = vadd.f32 %v10696_v14, %v10695_v1  ;;  %v10698_v41 = vpop.f32.mrb[62].mxu1 }
 0x1a6   : > { %11461 = vmatprep.mubr.bf16.mxu0 %v10006_v34  ;;  %v10584_v44 = vpop.f32.mrb[61].mxu0  ;;  %v10699_v21 = vpop.f32.mrb[63].mxu1 }
 0x1a7   : > { %v10585_v47 = vadd.f32 %v10584_v44, %v10583_v0  ;;  %v10586_v63 = vpop.f32.mrb[62].mxu0  ;;  %v10700_v29 = vadd.f32 %v10699_v21, %v10698_v41 }
 0x1a8   : > { %v10587_v9 = vpop.f32.mrb[63].mxu0 }
 0x1a9   : > { %v13927_v34 = vadd.f32 %v10697_v4, %v10585_v47  ;;  %v10588_v7 = vadd.f32 %v10587_v9, %v10586_v63 }
 0x1ab   : > { %v13929_v56 = vadd.f32 %v10700_v29, %v10588_v7  ;;  %v10829_v13 = vpop.f32.mrb[64].mxu1 }
 0x1ac   : > { %v10830_v52 = vpop.f32.mrb[65].mxu1 }
 0x1ad   : > { %11462 = vmatmul.mubr.bf16.gmra.mrb[152].mxu0 %v10007_v2  ;;  %v10717_v61 = vpop.f32.mrb[64].mxu0  ;;  %v10831_v15 = vadd.f32 %v10830_v52, %v10829_v13  ;;  %v10832_v50 = vpop.f32.mrb[66].mxu1 }
 0x1ae   : > { %11465 = vmatprep.mubr.bf16.mxu0 %v10008_v22  ;;  %v10718_v28 = vpop.f32.mrb[65].mxu0  ;;  %v10833_v27 = vpop.f32.mrb[67].mxu1 }
 0x1af   : > { %v10719_v32 = vadd.f32 %v10718_v28, %v10717_v61  ;;  %v10720_v25 = vpop.f32.mrb[66].mxu0  ;;  %v10834_v2 = vadd.f32 %v10833_v27, %v10832_v50 }
 0x1b0   : > { %v10721_v22 = vpop.f32.mrb[67].mxu0 }
 0x1b1   : > { %v4267_v3 = vadd.f32 %v10719_v32, %v13829_v33  ;;  %v10722_v38 = vadd.f32 %v10721_v22, %v10720_v25 }
 0x1b3   : > { %v4270_v43 = vadd.f32 %v10722_v38, %v13833_v6  ;;  %v10835_v24 = vpop.f32.mrb[68].mxu1  ;;  %v13933_v1 = vadd.f32 %v10831_v15, %v4267_v3 }
 0x1b4   : > { %v10836_v14 = vpop.f32.mrb[69].mxu1 }
 0x1b5   : > { %11466 = vmatmul.mubr.bf16.gmra.mrb[156].mxu0 %v10009_v26  ;;  %v10723_v0 = vpop.f32.mrb[68].mxu0  ;;  %v10837_v4 = vadd.f32 %v10836_v14, %v10835_v24  ;;  %v10838_v41 = vpop.f32.mrb[70].mxu1  ;;  %v13935_v44 = vadd.f32 %v10834_v2, %v4270_v43 }
 0x1b6   : > { %v10724_v21 = vpop.f32.mrb[69].mxu0  ;;  %v10839_v5 = vpop.f32.mrb[71].mxu1 }
 0x1b7   : > { %v10725_v17 = vadd.f32 %v10724_v21, %v10723_v0  ;;  %v10726_v47 = vpop.f32.mrb[70].mxu0  ;;  %v10840_v63 = vadd.f32 %v10839_v5, %v10838_v41 }
 0x1b8   : > { %v10727_v29 = vpop.f32.mrb[71].mxu0 }
 0x1b9   : > { %v4275_v33 = vadd.f32 %v10725_v17, %v13838_v60  ;;  %v10728_v9 = vadd.f32 %v10727_v29, %v10726_v47 }
 0x1bb   : > { %v4278_v6 = vadd.f32 %v10728_v9, %v13842_v39  ;;  %v13939_v7 = vadd.f32 %v10837_v4, %v4275_v33 }
 0x1bd   : > { %v10729_v26 = vpop.f32.mrb[72].mxu0  ;;  %v10841_v13 = vpop.f32.mrb[72].mxu1  ;;  %v13941_v52 = vadd.f32 %v10840_v63, %v4278_v6 }
 0x1be   : > { %v10730_v61 = vpop.f32.mrb[73].mxu0  ;;  %v10842_v15 = vpop.f32.mrb[73].mxu1 }
 0x1bf   : > { %v10731_v50 = vadd.f32 %v10730_v61, %v10729_v26  ;;  %v10732_v28 = vpop.f32.mrb[74].mxu0  ;;  %v10843_v27 = vadd.f32 %v10842_v15, %v10841_v13  ;;  %v10844_v32 = vpop.f32.mrb[74].mxu1 }
 0x1c0   : > { %v10733_v25 = vpop.f32.mrb[75].mxu0  ;;  %v10845_v2 = vpop.f32.mrb[75].mxu1 }
 0x1c1   : > { %v4283_v22 = vadd.f32 %v10731_v50, %v13849_v58  ;;  %v10734_v60 = vadd.f32 %v10733_v25, %v10732_v28  ;;  %v10846_v3 = vadd.f32 %v10845_v2, %v10844_v32 }
 0x1c3   : > { %v4286_v39 = vadd.f32 %v10734_v60, %v13853_v12  ;;  %v13945_v38 = vadd.f32 %v10843_v27, %v4283_v22 }
 0x1c5   : > { %v10735_v43 = vpop.f32.mrb[76].mxu0  ;;  %v10847_v24 = vpop.f32.mrb[76].mxu1  ;;  %v13947_v14 = vadd.f32 %v10846_v3, %v4286_v39  ;;  %v11694_v39 = vld [vmem:[%s16891_s2] sm:$0xff]  }
 0x1c6   : > { %v10736_v0 = vpop.f32.mrb[77].mxu0  ;;  %v10848_v4 = vpop.f32.mrb[77].mxu1 }
 0x1c7   : > { %v10737_v41 = vadd.f32 %v10736_v0, %v10735_v43  ;;  %v10738_v21 = vpop.f32.mrb[78].mxu0  ;;  %v10849_v5 = vadd.f32 %v10848_v4, %v10847_v24  ;;  %v10850_v17 = vpop.f32.mrb[78].mxu1 }
 0x1c8   : > { %v10739_v47 = vpop.f32.mrb[79].mxu0  ;;  %v10851_v63 = vpop.f32.mrb[79].mxu1 }
 0x1c9   : > { %v4291_v58 = vadd.f32 %v10737_v41, %v13857_v35  ;;  %v10740_v29 = vadd.f32 %v10739_v47, %v10738_v21  ;;  %v10852_v33 = vadd.f32 %v10851_v63, %v10850_v17 }
 0x1cb   : > { %v4294_v12 = vadd.f32 %v10740_v29, %v13861_v10  ;;  %v13951_v9 = vadd.f32 %v10849_v5, %v4291_v58  ;;  %v11693_v10 = vld [vmem:[%s16891_s2 + $0x40] sm:$0xff]  }
 0x1cc   : > { %10949 = vmatprep.subr.bf16.mxu1 %v11693_v10 }
 0x1cd   : > { %v10741_v6 = vpop.f32.mrb[80].mxu0  ;;  %v13953_v26 = vadd.f32 %v10852_v33, %v4294_v12  ;;  %10950 = vmatpush3.bf16.msra.mxu1 %v11694_v39 }
 0x1ce   : > { %v10742_v13 = vpop.f32.mrb[81].mxu0 }
 0x1cf   : > { %v10743_v61 = vadd.f32 %v10742_v13, %v10741_v6  ;;  %v10744_v15 = vpop.f32.mrb[82].mxu0 }
 0x1d0   : > { %v10745_v28 = vpop.f32.mrb[83].mxu0 }
 0x1d1   : > { %v10853_v50 = vpop.f32.mrb[80].mxu1  ;;  %v4299_v27 = vadd.f32 %v10743_v61, %v13867_v30  ;;  %v10746_v32 = vadd.f32 %v10745_v28, %v10744_v15 }
 0x1d2   : > { %v10854_v25 = vpop.f32.mrb[81].mxu1 }
 0x1d3   : > { %v10855_v2 = vadd.f32 %v10854_v25, %v10853_v50  ;;  %v10856_v35 = vpop.f32.mrb[82].mxu1  ;;  %v4302_v22 = vadd.f32 %v10746_v32, %v13871_v45 }
 0x1d4   : > { %v10857_v60 = vpop.f32.mrb[83].mxu1 }
 0x1d5   : > { %v10858_v3 = vadd.f32 %v10857_v60, %v10856_v35  ;;  %v13963_v43 = vadd.f32 %v10855_v2, %v4299_v27  ;;  %v10747_v24 = vpop.f32.mrb[84].mxu0  ;;  %v11696_v2 = vld [vmem:[%s16891_s2 + $0x8] sm:$0xff]  }
 0x1d6   : > { %v10748_v30 = vpop.f32.mrb[85].mxu0 }
 0x1d7   : > { %v13965_v0 = vadd.f32 %v10858_v3, %v4302_v22  ;;  %v10749_v4 = vadd.f32 %v10748_v30, %v10747_v24  ;;  %v10750_v45 = vpop.f32.mrb[86].mxu0 }
 0x1d8   : > { %v10751_v41 = vpop.f32.mrb[87].mxu0 }
 0x1d9   : > { %v4307_v21 = vadd.f32 %v10749_v4, %v13875_v46  ;;  %v10752_v5 = vadd.f32 %v10751_v41, %v10750_v45 }
 0x1db   : > { %v10859_v17 = vpop.f32.mrb[84].mxu1  ;;  %v4310_v47 = vadd.f32 %v10752_v5, %v13879_v49  ;;  %v11695_v49 = vld [vmem:[%s16891_s2 + $0x48] sm:$0xff]  }
 0x1dc   : > { %v10860_v63 = vpop.f32.mrb[85].mxu1  ;;  %10951 = vmatprep.subr.bf16.mxu1 %v11695_v49 }
 0x1dd   : > { %v10861_v58 = vadd.f32 %v10860_v63, %v10859_v17  ;;  %v10862_v29 = vpop.f32.mrb[86].mxu1  ;;  %10952 = vmatpush3.bf16.msra.mxu1 %v11696_v2 }
 0x1de   : > { %v10863_v33 = vpop.f32.mrb[87].mxu1 }
 0x1df   : > { %v10864_v12 = vadd.f32 %v10863_v33, %v10862_v29  ;;  %v13969_v6 = vadd.f32 %v10861_v58, %v4307_v21 }
 0x1e1   : > { %v10753_v13 = vpop.f32.mrb[88].mxu0  ;;  %v13971_v15 = vadd.f32 %v10864_v12, %v4310_v47 }
 0x1e2   : > { %v10754_v61 = vpop.f32.mrb[89].mxu0 }
 0x1e3   : > { %v10755_v50 = vadd.f32 %v10754_v61, %v10753_v13  ;;  %v10756_v28 = vpop.f32.mrb[90].mxu0 }
 0x1e4   : > { %v10757_v27 = vpop.f32.mrb[91].mxu0 }
 0x1e5   : > { %v4315_v46 = vadd.f32 %v10755_v50, %v13883_v8  ;;  %v10758_v32 = vadd.f32 %v10757_v27, %v10756_v28  ;;  %v11697_v28 = vld [vmem:[%s16891_s2 + $0x50] sm:$0xff]  }
 0x1e6   : > { %v10865_v25 = vpop.f32.mrb[88].mxu1  ;;  %10953 = vmatprep.subr.bf16.mxu1 %v11697_v28 }
 0x1e7   : > { %v4318_v35 = vadd.f32 %v10758_v32, %v13887_v19  ;;  %v10866_v22 = vpop.f32.mrb[89].mxu1 }
 0x1e8   : > { %v10867_v60 = vadd.f32 %v10866_v22, %v10865_v25  ;;  %v10868_v10 = vpop.f32.mrb[90].mxu1 }
 0x1e9   : > { %v10869_v3 = vpop.f32.mrb[91].mxu1 }
 0x1ea   : > { %v10870_v39 = vadd.f32 %v10869_v3, %v10868_v10  ;;  %v13981_v8 = vadd.f32 %v10867_v60, %v4315_v46 }
 0x1ec   : > { %v10759_v24 = vpop.f32.mrb[92].mxu0  ;;  %v13983_v30 = vadd.f32 %v10870_v39, %v4318_v35 }
 0x1ed   : > { %v10760_v4 = vpop.f32.mrb[93].mxu0 }
 0x1ee   : > { %v10761_v45 = vadd.f32 %v10760_v4, %v10759_v24  ;;  %v10762_v41 = vpop.f32.mrb[94].mxu0 }
 0x1ef   : > { %v10763_v21 = vpop.f32.mrb[95].mxu0 }
 0x1f0   : > { %v4323_v5 = vadd.f32 %v10761_v45, %v13891_v54  ;;  %v10764_v19 = vadd.f32 %v10763_v21, %v10762_v41 }
 0x1f1   : > { %v10871_v17 = vpop.f32.mrb[92].mxu1 }
 0x1f2   : > { %v10872_v47 = vpop.f32.mrb[93].mxu1  ;;  %v4326_v63 = vadd.f32 %v10764_v19, %v13895_v40  ;;  %v11698_v40 = vld [vmem:[%s16891_s2 + $0x10] sm:$0xff]  }
 0x1f3   : > { %v10873_v58 = vadd.f32 %v10872_v47, %v10871_v17  ;;  %v10874_v29 = vpop.f32.mrb[94].mxu1  ;;  %10954 = vmatpush3.bf16.msra.mxu1 %v11698_v40 }
 0x1f4   : > { %v10875_v33 = vpop.f32.mrb[95].mxu1 }
 0x1f5   : > { %v10876_v12 = vadd.f32 %v10875_v33, %v10874_v29  ;;  %v10765_v13 = vpop.f32.mrb[96].mxu0  ;;  %v13987_v61 = vadd.f32 %v10873_v58, %v4323_v5  ;;  %v11699_v58 = vld [vmem:[%s16891_s2 + $0x58] sm:$0xff]  }
 0x1f6   : > { %v10766_v50 = vpop.f32.mrb[97].mxu0  ;;  %10955 = vmatprep.subr.bf16.mxu1 %v11699_v58 }
 0x1f7   : > { %v10767_v27 = vadd.f32 %v10766_v50, %v10765_v13  ;;  %v10768_v46 = vpop.f32.mrb[98].mxu0  ;;  %v13992_v54 = vadd.f32 %v10876_v12, %v4326_v63  ;;  %v11700_v12 = vld [vmem:[%s16891_s2 + $0x18] sm:$0xff]  }
 0x1f8   : > { %v10769_v32 = vpop.f32.mrb[99].mxu0  ;;  %10956 = vmatpush3.bf16.msra.mxu1 %v11700_v12 }
 0x1f9   : > { %v4331_v49 = vadd.f32 %v10767_v27, %v13766_v11  ;;  %v10770_v25 = vadd.f32 %v10769_v32, %v10768_v46 }
 0x1fb   : > { %v10877_v2 = vpop.f32.mrb[96].mxu1  ;;  %v4334_v35 = vadd.f32 %v10770_v25, %v13768_v51 }
 0x1fc   : > { %v10878_v22 = vpop.f32.mrb[97].mxu1 }
 0x1fd   : > { %v10879_v60 = vadd.f32 %v10878_v22, %v10877_v2  ;;  %v10880_v10 = vpop.f32.mrb[98].mxu1 }
 0x1fe   : > { %v10881_v3 = vpop.f32.mrb[99].mxu1 }
 0x1ff   : > { %v10882_v39 = vadd.f32 %v10881_v3, %v10880_v10  ;;  %v13999_v24 = vadd.f32 %v10879_v60, %v4331_v49 }
 0x200   : > { %v10771_v4 = vpop.f32.mrb[100].mxu0 }
 0x201   : > { %v10772_v45 = vpop.f32.mrb[101].mxu0  ;;  %v14001_v41 = vadd.f32 %v10882_v39, %v4334_v35 }
 0x202   : > { %v10773_v21 = vadd.f32 %v10772_v45, %v10771_v4  ;;  %v10774_v5 = vpop.f32.mrb[102].mxu0 }
 0x203   : > { %v10775_v17 = vpop.f32.mrb[103].mxu0 }
 0x204   : > { %v4339_v11 = vadd.f32 %v10773_v21, %v13778_v55  ;;  %v10776_v19 = vadd.f32 %v10775_v17, %v10774_v5 }
 0x205   : > { %v10883_v47 = vpop.f32.mrb[100].mxu1 }
 0x206   : > { %v4342_v51 = vadd.f32 %v10776_v19, %v13780_v23  ;;  %v10884_v63 = vpop.f32.mrb[101].mxu1 }
 0x207   : > { %v10885_v29 = vadd.f32 %v10884_v63, %v10883_v47  ;;  %v10886_v33 = vpop.f32.mrb[102].mxu1 }
 0x208   : > { %v10887_v13 = vpop.f32.mrb[103].mxu1 }
 0x209   : > { %v10888_v50 = vadd.f32 %v10887_v13, %v10886_v33  ;;  %v14011_v28 = vadd.f32 %v10885_v29, %v4339_v11 }
 0x20b   : > { %v10777_v55 = vpop.f32.mrb[104].mxu0  ;;  %v14013_v27 = vadd.f32 %v10888_v50, %v4342_v51 }
 0x20c   : > { %v10778_v23 = vpop.f32.mrb[105].mxu0 }
 0x20d   : > { %v10779_v46 = vadd.f32 %v10778_v23, %v10777_v55  ;;  %v10780_v40 = vpop.f32.mrb[106].mxu0 }
 0x20e   : > { %v10781_v32 = vpop.f32.mrb[107].mxu0 }
 0x20f   : > { %v4347_v49 = vadd.f32 %v10779_v46, %v13797_v53  ;;  %v10782_v2 = vadd.f32 %v10781_v32, %v10780_v40 }
 0x210   : > { %v10889_v25 = vpop.f32.mrb[104].mxu1 }
 0x211   : > { %v10890_v35 = vpop.f32.mrb[105].mxu1  ;;  %v4350_v22 = vadd.f32 %v10782_v2, %v13799_v62 }
 0x212   : > { %v10891_v60 = vadd.f32 %v10890_v35, %v10889_v25  ;;  %v10892_v10 = vpop.f32.mrb[106].mxu1 }
 0x213   : > { %v10893_v3 = vpop.f32.mrb[107].mxu1 }
 0x214   : > { %v10894_v39 = vadd.f32 %v10893_v3, %v10892_v10  ;;  %v14017_v4 = vadd.f32 %v10891_v60, %v4347_v49 }
 0x216   : > { %v14019_v45 = vadd.f32 %v10894_v39, %v4350_v22 }
 0x217   : > { %v10783_v21 = vpop.f32.mrb[108].mxu0 }
 0x218   : > { %v10784_v5 = vpop.f32.mrb[109].mxu0 }
 0x219   : > { %v10785_v17 = vadd.f32 %v10784_v5, %v10783_v21  ;;  %v10786_v11 = vpop.f32.mrb[110].mxu0 }
 0x21a   : > { %v10787_v19 = vpop.f32.mrb[111].mxu0 }
 0x21b   : > { %v4355_v53 = vadd.f32 %v10785_v17, %v13805_v36  ;;  %v10895_v47 = vpop.f32.mrb[108].mxu1  ;;  %v10788_v51 = vadd.f32 %v10787_v19, %v10786_v11 }
 0x21c   : > { %v10896_v63 = vpop.f32.mrb[109].mxu1 }
 0x21d   : > { %v4358_v62 = vadd.f32 %v10788_v51, %v13811_v16  ;;  %v10897_v58 = vadd.f32 %v10896_v63, %v10895_v47  ;;  %v10898_v29 = vpop.f32.mrb[110].mxu1 }
 0x21e   : > { %v10899_v33 = vpop.f32.mrb[111].mxu1 }
 0x21f   : > { %v10900_v12 = vadd.f32 %v10899_v33, %v10898_v29  ;;  %v14023_v13 = vadd.f32 %v10897_v58, %v4355_v53 }
 0x221   : > { %v14025_v50 = vadd.f32 %v10900_v12, %v4358_v62 }
 0x222   : > { %v10789_v55 = vpop.f32.mrb[112].mxu0 }
 0x223   : > { %v10790_v23 = vpop.f32.mrb[113].mxu0 }
 0x224   : > { %v10791_v46 = vadd.f32 %v10790_v23, %v10789_v55  ;;  %v10792_v40 = vpop.f32.mrb[114].mxu0 }
 0x225   : > { %v10793_v32 = vpop.f32.mrb[115].mxu0 }
 0x226   : > { %v4363_v36 = vadd.f32 %v10791_v46, %v13818_v37  ;;  %v10794_v25 = vadd.f32 %v10793_v32, %v10792_v40 }
 0x227   : > { %v10901_v49 = vpop.f32.mrb[112].mxu1 }
 0x228   : > { %v10902_v2 = vpop.f32.mrb[113].mxu1  ;;  %v4366_v16 = vadd.f32 %v10794_v25, %v13824_v31 }
 0x229   : > { %v10903_v35 = vadd.f32 %v10902_v2, %v10901_v49  ;;  %v10904_v22 = vpop.f32.mrb[114].mxu1 }
 0x22a   : > { %v10905_v60 = vpop.f32.mrb[115].mxu1 }
 0x22b   : > { %v10906_v10 = vadd.f32 %v10905_v60, %v10904_v22  ;;  %v14029_v3 = vadd.f32 %v10903_v35, %v4363_v36 }
 0x22d   : > { %v14031_v39 = vadd.f32 %v10906_v10, %v4366_v16 }
 0x22e   : > { %v10795_v21 = vpop.f32.mrb[116].mxu0 }
 0x22f   : > { %v10796_v5 = vpop.f32.mrb[117].mxu0 }
 0x230   : > { %v10797_v17 = vadd.f32 %v10796_v5, %v10795_v21  ;;  %v10798_v11 = vpop.f32.mrb[118].mxu0 }
 0x231   : > { %v10799_v19 = vpop.f32.mrb[119].mxu0 }
 0x232   : > { %v4371_v37 = vadd.f32 %v10797_v17, %v13845_v57  ;;  %v10907_v53 = vpop.f32.mrb[116].mxu1  ;;  %v10800_v47 = vadd.f32 %v10799_v19, %v10798_v11 }
 0x233   : > { %v10908_v51 = vpop.f32.mrb[117].mxu1 }
 0x234   : > { %v4374_v31 = vadd.f32 %v10800_v47, %v13863_v48  ;;  %v10909_v63 = vadd.f32 %v10908_v51, %v10907_v53  ;;  %v10910_v62 = vpop.f32.mrb[118].mxu1 }
 0x235   : > { %v10911_v58 = vpop.f32.mrb[119].mxu1 }
 0x236   : > { %v10912_v29 = vadd.f32 %v10911_v58, %v10910_v62  ;;  %v14035_v33 = vadd.f32 %v10909_v63, %v4371_v37 }
 0x238   : > { %v14037_v12 = vadd.f32 %v10912_v29, %v4374_v31 }
 0x239   : > { %v10801_v55 = vpop.f32.mrb[120].mxu0 }
 0x23a   : > { %v10802_v23 = vpop.f32.mrb[121].mxu0 }
 0x23b   : > { %v10803_v46 = vadd.f32 %v10802_v23, %v10801_v55  ;;  %v10804_v40 = vpop.f32.mrb[122].mxu0 }
 0x23c   : > { %v10805_v32 = vpop.f32.mrb[123].mxu0 }
 0x23d   : > { %v4379_v57 = vadd.f32 %v10803_v46, %v13908_v42  ;;  %v10806_v36 = vadd.f32 %v10805_v32, %v10804_v40 }
 0x23f   : > { %v4382_v49 = vadd.f32 %v10806_v36, %v13911_v59 }
 0x248   : > { %v10807_v25 = vpop.f32.mrb[124].mxu0 }
 0x249   : > { %v10808_v2 = vpop.f32.mrb[125].mxu0 }
 0x24a   : > { %v10913_v48 = vpop.f32.mrb[120].mxu1  ;;  %v10809_v35 = vadd.f32 %v10808_v2, %v10807_v25  ;;  %v10810_v22 = vpop.f32.mrb[126].mxu0 }
 0x24b   : > { %v10914_v16 = vpop.f32.mrb[121].mxu1  ;;  %v10811_v21 = vpop.f32.mrb[127].mxu0 }
 0x24c   : > { %v10915_v60 = vadd.f32 %v10914_v16, %v10913_v48  ;;  %v10916_v10 = vpop.f32.mrb[122].mxu1  ;;  %v4387_v17 = vadd.f32 %v10809_v35, %v13927_v34  ;;  %v10812_v11 = vadd.f32 %v10811_v21, %v10810_v22 }
 0x24d   : > { %v10917_v5 = vpop.f32.mrb[123].mxu1 }
 0x24e   : > { %v10918_v19 = vadd.f32 %v10917_v5, %v10916_v10  ;;  %v14042_v37 = vadd.f32 %v10915_v60, %v4379_v57  ;;  %v4390_v42 = vadd.f32 %v10812_v11, %v13929_v56 }
 0x250   : > { %v14045_v53 = vadd.f32 %v10918_v19, %v4382_v49  ;;  %v11439_v59 = vpop.f32.mrb[128].mxu0 }
 0x251   : > { %v14048_v51 = vadd.f32 %v11439_v59, %v13939_v7  ;;  %v4588_v31 = vpop.f32.mrb[129].mxu0 }
 0x252   : > { %v10919_v47 = vpop.f32.mrb[124].mxu1  ;;  %v14051_v62 = vadd.f32 %v4588_v31, %v13933_v1  ;;  %v11440_v58 = vpop.f32.mrb[130].mxu0 }
 0x253   : > { %v10920_v63 = vpop.f32.mrb[125].mxu1  ;;  %v14054_v55 = vadd.f32 %v11440_v58, %v13941_v52  ;;  %v4591_v23 = vpop.f32.mrb[131].mxu0  ;;  %v4818_v52 = vmul.f32 %v14048_v51, %v14048_v51 }
 0x254   : > { %v10921_v34 = vadd.f32 %v10920_v63, %v10919_v47  ;;  %v10922_v29 = vpop.f32.mrb[126].mxu1  ;;  %v14057_v46 = vadd.f32 %v4591_v23, %v13935_v44  ;;  %v4816_v7 = vmul.f32 %v14051_v62, %v14051_v62 }
 0x255   : > { %v10923_v56 = vpop.f32.mrb[127].mxu1  ;;  %v4819_v16 = vmul.f32 %v14054_v55, %v14054_v55 }
 0x256   : > { %v10924_v40 = vadd.f32 %v10923_v56, %v10922_v29  ;;  %v14059_v32 = vadd.f32 %v10921_v34, %v4387_v17  ;;  %v4779_v1 = vadd.f32 %v14057_v46, %v14051_v62  ;;  %v4817_v57 = vmul.f32 %v14057_v46, %v14057_v46 }
 0x258   : > { %v14067_v36 = vadd.f32 %v10924_v40, %v4390_v42  ;;  %v4780_v44 = vadd.f32 %v4779_v1, %v14048_v51  ;;  %v4848_v49 = vadd.f32 %v4817_v57, %v4816_v7  ;;  %v11443_v25 = vpop.f32.mrb[132].mxu0 }
 0x259   : > { %v14073_v48 = vadd.f32 %v11443_v25, %v13951_v9  ;;  %v4604_v2 = vpop.f32.mrb[133].mxu0 }
 0x25a   : > { %v4849_v35 = vadd.f32 %v4848_v49, %v4818_v52  ;;  %v14078_v22 = vadd.f32 %v4604_v2, %v13945_v38  ;;  %v4781_v60 = vadd.f32 %v4780_v44, %v14054_v55  ;;  %v11444_v10 = vpop.f32.mrb[134].mxu0 }
 0x25b   : > { %v14082_v21 = vadd.f32 %v11444_v10, %v13953_v26  ;;  %v4607_v5 = vpop.f32.mrb[135].mxu0  ;;  %v4822_v26 = vmul.f32 %v14073_v48, %v14073_v48 }
 0x25c   : > { %v4782_v17 = vadd.f32 %v4781_v60, %v14078_v22  ;;  %v4820_v9 = vmul.f32 %v14078_v22, %v14078_v22  ;;  %v4850_v11 = vadd.f32 %v4849_v35, %v4819_v16  ;;  %v14088_v19 = vadd.f32 %v4607_v5, %v13947_v14 }
 0x25d   : > { %v4823_v14 = vmul.f32 %v14082_v21, %v14082_v21 }
 0x25e   : > { %v4851_v42 = vadd.f32 %v4850_v11, %v4820_v9  ;;  %v4783_v38 = vadd.f32 %v4782_v17, %v14088_v19  ;;  %v4821_v59 = vmul.f32 %v14088_v19, %v14088_v19 }
 0x260   : > { %v4784_v47 = vadd.f32 %v4783_v38, %v14073_v48  ;;  %v4852_v31 = vadd.f32 %v4851_v42, %v4821_v59  ;;  %v11447_v63 = vpop.f32.mrb[136].mxu0 }
 0x261   : > { %v14097_v58 = vadd.f32 %v11447_v63, %v13969_v6  ;;  %v4620_v34 = vpop.f32.mrb[137].mxu0 }
 0x262   : > { %v4853_v29 = vadd.f32 %v4852_v31, %v4822_v26  ;;  %v14102_v23 = vadd.f32 %v4620_v34, %v13963_v43  ;;  %v4785_v56 = vadd.f32 %v4784_v47, %v14082_v21  ;;  %v11448_v40 = vpop.f32.mrb[138].mxu0 }
 0x263   : > { %v14106_v7 = vadd.f32 %v11448_v40, %v13971_v15  ;;  %v4623_v1 = vpop.f32.mrb[139].mxu0  ;;  %v4826_v15 = vmul.f32 %v14097_v58, %v14097_v58 }
 0x264   : > { %v4786_v57 = vadd.f32 %v4785_v56, %v14102_v23  ;;  %v4824_v6 = vmul.f32 %v14102_v23, %v14102_v23  ;;  %v4854_v52 = vadd.f32 %v4853_v29, %v4823_v14  ;;  %v14112_v44 = vadd.f32 %v4623_v1, %v13965_v0 }
 0x265   : > { %v4827_v0 = vmul.f32 %v14106_v7, %v14106_v7 }
 0x266   : > { %v4855_v49 = vadd.f32 %v4854_v52, %v4824_v6  ;;  %v4787_v43 = vadd.f32 %v4786_v57, %v14112_v44  ;;  %v4825_v25 = vmul.f32 %v14112_v44, %v14112_v44 }
 0x268   : > { %v4788_v2 = vadd.f32 %v4787_v43, %v14097_v58  ;;  %v4856_v16 = vadd.f32 %v4855_v49, %v4825_v25  ;;  %v11451_v35 = vpop.f32.mrb[140].mxu0  ;;  %v11701_v49 = vld [vmem:[%s16891_s2 + $0x60] sm:$0xff]   ;;  %v11703_v43 = vld [vmem:[%s16891_s2 + $0x68] sm:$0xff]  }
 0x269   : > { %v14121_v60 = vadd.f32 %v11451_v35, %v13987_v61  ;;  %v4636_v10 = vpop.f32.mrb[141].mxu0  ;;  %10957 = vmatprep.subr.bf16.mxu1 %v11701_v49 }
 0x26a   : > { %v4857_v5 = vadd.f32 %v4856_v16, %v4826_v15  ;;  %v14126_v17 = vadd.f32 %v4636_v10, %v13981_v8  ;;  %v4789_v9 = vadd.f32 %v4788_v2, %v14106_v7  ;;  %v11452_v11 = vpop.f32.mrb[142].mxu0  ;;  %v11705_v15 = vld [vmem:[%s16891_s2 + $0xc0] sm:$0xff]  }
 0x26b   : > { %v14130_v42 = vadd.f32 %v11452_v11, %v13992_v54  ;;  %v4639_v38 = vpop.f32.mrb[143].mxu0  ;;  %v4830_v54 = vmul.f32 %v14121_v60, %v14121_v60  ;;  %v11706_v2 = vld [vmem:[%s16891_s2 + $0x80] sm:$0xff]   ;;  %11061 = vmatprep.subr.bf16.mxu0 %v11705_v15 }
 0x26c   : > { %v4790_v59 = vadd.f32 %v4789_v9, %v14126_v17  ;;  %v4828_v61 = vmul.f32 %v14126_v17, %v14126_v17  ;;  %v4858_v26 = vadd.f32 %v4857_v5, %v4827_v0  ;;  %v14136_v47 = vadd.f32 %v4639_v38, %v13983_v30  ;;  %v11704_v5 = vld [vmem:[%s16891_s2 + $0x28] sm:$0xff]   ;;  %11062 = vmatpush3.bf16.msra.mxu0 %v11706_v2 }
 0x26d   : > { %v4831_v30 = vmul.f32 %v14130_v42, %v14130_v42 }
 0x26e   : > { %v4859_v31 = vadd.f32 %v4858_v26, %v4828_v61  ;;  %v4791_v8 = vadd.f32 %v4790_v59, %v14136_v47  ;;  %v4829_v63 = vmul.f32 %v14136_v47, %v14136_v47  ;;  %v11710_v59 = vld [vmem:[%s16891_s2 + $0x88] sm:$0xff]   ;;  %v11711_v61 = vld [vmem:[%s16891_s2 + $0xd0] sm:$0xff]  }
 0x270   : > { %v4792_v34 = vadd.f32 %v4791_v8, %v14121_v60  ;;  %v4860_v14 = vadd.f32 %v4859_v31, %v4829_v63  ;;  %v11455_v29 = vpop.f32.mrb[144].mxu0 }
 0x271   : > { %v14145_v56 = vadd.f32 %v11455_v29, %v14011_v28  ;;  %v4652_v40 = vpop.f32.mrb[145].mxu0  ;;  %v11702_v28 = vld [vmem:[%s16891_s2 + $0x20] sm:$0xff]   ;;  %v11709_v29 = vld [vmem:[%s16891_s2 + $0x30] sm:$0xff]  }
 0x272   : > { %v4861_v1 = vadd.f32 %v4860_v14, %v4830_v54  ;;  %v14150_v57 = vadd.f32 %v4652_v40, %v13999_v24  ;;  %v4793_v6 = vadd.f32 %v4792_v34, %v14130_v42  ;;  %v11456_v52 = vpop.f32.mrb[146].mxu0  ;;  %10958 = vmatpush3.bf16.msra.mxu1 %v11702_v28 }
 0x273   : > { %v14163_v25 = vadd.f32 %v11456_v52, %v14013_v27  ;;  %v4655_v24 = vpop.f32.mrb[147].mxu0  ;;  %v11708_v27 = vld [vmem:[%s16891_s2 + $0xc8] sm:$0xff]   ;;  %10959 = vmatprep.subr.bf16.mxu1 %v11703_v43  ;;  %v4834_v26 = vmul.f32 %v14145_v56, %v14145_v56  ;;  %v11717_v52 = vld [vmem:[%s16891_s2 + $0x78] sm:$0xff]  }
 0x274   : > { %v4794_v16 = vadd.f32 %v4793_v6, %v14150_v57  ;;  %v4832_v35 = vmul.f32 %v14150_v57, %v14150_v57  ;;  %v4862_v10 = vadd.f32 %v4861_v1, %v4831_v30  ;;  %v14175_v0 = vadd.f32 %v4655_v24, %v14001_v41  ;;  %v11707_v41 = vld [vmem:[%s16891_s2 + $0x70] sm:$0xff]   ;;  %11063 = vmatprep.subr.bf16.mxu0 %v11708_v27  ;;  %v11714_v27 = vld [vmem:[%s16891_s2 + $0x98] sm:$0xff]  }
 0x275   : > { %v4835_v54 = vmul.f32 %v14163_v25, %v14163_v25  ;;  %11064 = vmatpush3.bf16.msra.mxu0 %v11710_v59 }
 0x276   : > { %v4863_v9 = vadd.f32 %v4862_v10, %v4832_v35  ;;  %v4795_v11 = vadd.f32 %v4794_v16, %v14175_v0  ;;  %v4833_v38 = vmul.f32 %v14175_v0, %v14175_v0  ;;  %10960 = vmatpush3.bf16.msra.mxu1 %v11704_v5  ;;  %11065 = vmatprep.subr.bf16.mxu0 %v11711_v61 }
 0x277   : > { %10961 = vmatprep.subr.bf16.mxu1 %v11707_v41 }
 0x278   : > { %v4796_v31 = vadd.f32 %v4795_v11, %v14145_v56  ;;  %v4864_v8 = vadd.f32 %v4863_v9, %v4833_v38  ;;  %v11459_v63 = vpop.f32.mrb[148].mxu0 }
 0x279   : > { %v14201_v34 = vadd.f32 %v11459_v63, %v14023_v13  ;;  %v4668_v14 = vpop.f32.mrb[149].mxu0  ;;  %v11712_v13 = vld [vmem:[%s16891_s2 + $0x90] sm:$0xff]  }
 0x27a   : > { %v4865_v40 = vadd.f32 %v4864_v8, %v4834_v26  ;;  %v14207_v30 = vadd.f32 %v4668_v14, %v14017_v4  ;;  %v4797_v1 = vadd.f32 %v4796_v31, %v14163_v25  ;;  %v11460_v6 = vpop.f32.mrb[150].mxu0  ;;  %v11713_v4 = vld [vmem:[%s16891_s2 + $0xd8] sm:$0xff]   ;;  %10962 = vmatpush3.bf16.msra.mxu1 %v11709_v29  ;;  %11066 = vmatpush3.bf16.msra.mxu0 %v11712_v13  ;;  %v11718_v29 = vld [vmem:[%s16891_s2 + $0xe8] sm:$0xff]  }
 0x27b   : > { %v14217_v49 = vadd.f32 %v11460_v6, %v14025_v50  ;;  %v4671_v28 = vpop.f32.mrb[151].mxu0  ;;  %v11719_v50 = vld [vmem:[%s16891_s2 + $0x38] sm:$0xff]   ;;  %10963 = vmatprep.subr.bf16.mxu1 %v11717_v52  ;;  %11067 = vmatprep.subr.bf16.mxu0 %v11713_v4  ;;  %v4838_v5 = vmul.f32 %v14201_v34, %v14201_v34  ;;  %v11720_v4 = vld [vmem:[%s16891_s2 + $0xa8] sm:$0xff]  }
 0x27c   : > { %v4798_v43 = vadd.f32 %v4797_v1, %v14207_v30  ;;  %v4836_v24 = vmul.f32 %v14207_v30, %v14207_v30  ;;  %v4866_v15 = vadd.f32 %v4865_v40, %v4835_v54  ;;  %v14226_v2 = vadd.f32 %v4671_v28, %v14019_v45  ;;  %v11715_v45 = vld [vmem:[%s16891_s2 + $0xe0] sm:$0xff]  }
 0x27d   : > { %v4839_v61 = vmul.f32 %v14217_v49, %v14217_v49  ;;  %v11716_v54 = vld [vmem:[%s16891_s2 + $0xa0] sm:$0xff]  }
 0x27e   : > { %v4867_v16 = vadd.f32 %v4866_v15, %v4836_v24  ;;  %v4799_v35 = vadd.f32 %v4798_v43, %v14226_v2  ;;  %v4837_v10 = vmul.f32 %v14226_v2, %v14226_v2  ;;  %10964 = vmatpush3.bf16.msra.mxu1 %v11719_v50  ;;  %11068 = vmatpush3.bf16.msra.mxu0 %v11714_v27  ;;  %v11721_v43 = vld [vmem:[%s16891_s2 + $0xf0] sm:$0xff]  }
 0x27f   : > { %11069 = vmatprep.subr.bf16.mxu0 %v11715_v45 }
 0x280   : > { %v4800_v9 = vadd.f32 %v4799_v35, %v14201_v34  ;;  %v4868_v11 = vadd.f32 %v4867_v16, %v4837_v10  ;;  %v11463_v38 = vpop.f32.mrb[152].mxu0 }
 0x281   : > { %v14244_v41 = vadd.f32 %v11463_v38, %v14035_v33  ;;  %v4684_v59 = vpop.f32.mrb[153].mxu0 }
 0x282   : > { %v4869_v26 = vadd.f32 %v4868_v11, %v4838_v5  ;;  %v14249_v31 = vadd.f32 %v4684_v59, %v14029_v3  ;;  %v4801_v8 = vadd.f32 %v4800_v9, %v14217_v49  ;;  %v11464_v63 = vpop.f32.mrb[154].mxu0  ;;  %v11727_v3 = vld [vmem:[%s16891_s2 + $0x140] sm:$0xff]   ;;  %11070 = vmatpush3.bf16.msra.mxu0 %v11716_v54  ;;  %v11722_v11 = vld [vmem:[%s16891_s2 + $0xb0] sm:$0xff]   ;;  %v11724_v59 = vld [vmem:[%s16891_s2 + $0xf8] sm:$0xff]  }
 0x283   : > { %v14256_v33 = vadd.f32 %v11464_v63, %v14037_v12  ;;  %v4687_v14 = vpop.f32.mrb[155].mxu0  ;;  %11173 = vmatprep.subr.bf16.mxu1 %v11727_v3  ;;  %11071 = vmatprep.subr.bf16.mxu0 %v11718_v29 }
 0x284   : > { %v4802_v40 = vadd.f32 %v4801_v8, %v14249_v31  ;;  %v4840_v1 = vmul.f32 %v14249_v31, %v14249_v31  ;;  %v4870_v6 = vadd.f32 %v4869_v26, %v4839_v61  ;;  %v14268_v13 = vadd.f32 %v4687_v14, %v14031_v39  ;;  %v11725_v14 = vld [vmem:[%s16891_s2 + $0xb8] sm:$0xff]  }
 0x285   : > { %v4842_v39 = vmul.f32 %v14244_v41, %v14244_v41  ;;  %v4843_v10 = vmul.f32 %v14256_v33, %v14256_v33 }
 0x286   : > { %v4871_v12 = vadd.f32 %v4870_v6, %v4840_v1  ;;  %v4803_v52 = vadd.f32 %v4802_v40, %v14268_v13  ;;  %v4841_v28 = vmul.f32 %v14268_v13, %v14268_v13  ;;  %11072 = vmatpush3.bf16.msra.mxu0 %v11720_v4 }
 0x287   : > { %11073 = vmatprep.subr.bf16.mxu0 %v11721_v43 }
 0x288   : > { %v4804_v24 = vadd.f32 %v4803_v52, %v14244_v41  ;;  %v4872_v15 = vadd.f32 %v4871_v12, %v4841_v28  ;;  %v11467_v50 = vpop.f32.mrb[156].mxu0 }
 0x289   : > { %v14283_v16 = vadd.f32 %v11467_v50, %v14059_v32  ;;  %v4700_v35 = vpop.f32.mrb[157].mxu0 }
 0x28a   : > { %v4873_v27 = vadd.f32 %v4872_v15, %v4842_v39  ;;  %v14288_v45 = vadd.f32 %v4700_v35, %v14042_v37  ;;  %v4805_v5 = vadd.f32 %v4804_v24, %v14256_v33  ;;  %v11468_v9 = vpop.f32.mrb[158].mxu0  ;;  %11074 = vmatpush3.bf16.msra.mxu0 %v11722_v11 }
 0x28b   : > { %v14295_v38 = vadd.f32 %v11468_v9, %v14067_v36  ;;  %v4703_v32 = vpop.f32.mrb[159].mxu0  ;;  %11075 = vmatprep.subr.bf16.mxu0 %v11724_v59  ;;  %v4846_v29 = vmul.f32 %v14283_v16, %v14283_v16 }
 0x28c   : > { %v4806_v37 = vadd.f32 %v4805_v5, %v14288_v45  ;;  %v4844_v61 = vmul.f32 %v14288_v45, %v14288_v45  ;;  %v4874_v26 = vadd.f32 %v4873_v27, %v4843_v10  ;;  %v14304_v8 = vadd.f32 %v4703_v32, %v14045_v53 }
 0x28d   : > { %v4847_v53 = vmul.f32 %v14295_v38, %v14295_v38 }
 0x28e   : > { %v4875_v63 = vadd.f32 %v4874_v26, %v4844_v61  ;;  %v4807_v54 = vadd.f32 %v4806_v37, %v14304_v8  ;;  %v4845_v36 = vmul.f32 %v14304_v8, %v14304_v8  ;;  %11076 = vmatpush3.bf16.msra.mxu0 %v11725_v14 }
 0x290   : > { %v4808_v3 = vadd.f32 %v4807_v54, %v14283_v16  ;;  %v4876_v40 = vadd.f32 %v4875_v63, %v4845_v36 }
 0x292   : > { %v4809_v1 = vadd.f32 %v4808_v3, %v14295_v38  ;;  %v4877_v6 = vadd.f32 %v4876_v40, %v4846_v29 }
 0x294   : > { %v4810_v12 = vrot.slane %v4809_v1, 4  ;;  %v4878_v52 = vadd.f32 %v4877_v6, %v4847_v53 }
 0x296   : > { %v4811_v28 = vadd.f32 %v4810_v12, %v4809_v1  ;;  %v4879_v4 = vrot.slane %v4878_v52, 4 }
 0x298   : > { %v4812_v43 = vrot.slane %v4811_v28, 2  ;;  %v4880_v39 = vadd.f32 %v4879_v4, %v4878_v52 }
 0x29a   : > { %v4813_v24 = vadd.f32 %v4812_v43, %v4811_v28  ;;  %v4881_v15 = vrot.slane %v4880_v39, 2 }
 0x29c   : > { %v4814_v50 = vrot.slane %v4813_v24, 1  ;;  %v4882_v35 = vadd.f32 %v4881_v15, %v4880_v39 }
 0x29e   : > { %v4815_v10 = vadd.f32 %v4814_v50, %v4813_v24  ;;  %v4883_v27 = vrot.slane %v4882_v35, 1 }
 0x2a0   : > { %v4884_v5 = vadd.f32 %v4883_v27, %v4882_v35  ;;  %v14318_v9 = vmul.f32 0.00390625, %v4815_v10 }
 0x2a2   : > { %v4886_v11 = vmul.f32 0.00390625, %v4884_v5  ;;  %v4887_v32 = vmul.f32 %v14318_v9, %v14318_v9  ;;  %v4918_v59 = vsub.f32 %v14288_v45, %v14318_v9  ;;  %v4919_v37 = vsub.f32 %v14304_v8, %v14318_v9 }
 0x2a3   : > { %v4899_v26 = vsub.f32 %v14112_v44, %v14318_v9  ;;  %v4902_v54 = vsub.f32 %v14126_v17, %v14318_v9  ;;  %v4903_v36 = vsub.f32 %v14136_v47, %v14318_v9  ;;  %v4904_v14 = vsub.f32 %v14121_v60, %v14318_v9 }
 0x2a4   : > { %v4888_v61 = vsub.f32 %v4886_v11, %v4887_v32  ;;  %v4905_v45 = vsub.f32 %v14130_v42, %v14318_v9  ;;  %v4906_v8 = vsub.f32 %v14150_v57, %v14318_v9  ;;  %v4907_v29 = vsub.f32 %v14175_v0, %v14318_v9 }
 0x2a5   : > { %v4908_v3 = vsub.f32 %v14145_v56, %v14318_v9  ;;  %v4909_v17 = vsub.f32 %v14163_v25, %v14318_v9  ;;  %v4910_v47 = vsub.f32 %v14207_v30, %v14318_v9  ;;  %v4911_v60 = vsub.f32 %v14226_v2, %v14318_v9 }
 0x2a6   : > { %v4889_v63 = vmax.f32 %v4888_v61, 0.0  ;;  %v4912_v42 = vsub.f32 %v14201_v34, %v14318_v9  ;;  %v4913_v57 = vsub.f32 %v14217_v49, %v14318_v9  ;;  %v4914_v0 = vsub.f32 %v14249_v31, %v14318_v9 }
 0x2a7   : > { %v4915_v56 = vsub.f32 %v14268_v13, %v14318_v9  ;;  %v4916_v25 = vsub.f32 %v14244_v41, %v14318_v9  ;;  %v4917_v30 = vsub.f32 %v14256_v33, %v14318_v9  ;;  %v4920_v2 = vsub.f32 %v14283_v16, %v14318_v9 }
 0x2a8   : > { %v4922_v44 = vadd.f32 1e-05, %v4889_v63  ;;  %v4921_v34 = vsub.f32 %v14295_v38, %v14318_v9  ;;  %v4890_v49 = vsub.f32 %v14051_v62, %v14318_v9  ;;  %v4891_v31 = vsub.f32 %v14057_v46, %v14318_v9 }
 0x2a9   : > { %v4892_v13 = vsub.f32 %v14048_v51, %v14318_v9  ;;  %v4893_v41 = vsub.f32 %v14054_v55, %v14318_v9  ;;  %v4894_v33 = vsub.f32 %v14078_v22, %v14318_v9  ;;  %v4895_v16 = vsub.f32 %v14088_v19, %v14318_v9 }
 0x2aa   : > { %11813 = vrsqrt.f32 %v4922_v44  ;;  %v4896_v38 = vsub.f32 %v14073_v48, %v14318_v9  ;;  %v4897_v62 = vsub.f32 %v14082_v21, %v14318_v9  ;;  %v4898_v46 = vsub.f32 %v14102_v23, %v14318_v9 }
 0x2ab   : > { %v4900_v51 = vsub.f32 %v14097_v58, %v14318_v9  ;;  %v4901_v55 = vsub.f32 %v14106_v7, %v14318_v9 }
 0x2b4   : > { %v11814_v40 = vpop.eup %11813 }
 0x2b5   : > { %v4952_v22 = vmul.f32 %v11814_v40, %v4918_v59  ;;  %v4953_v53 = vmul.f32 %v11814_v40, %v4919_v37  ;;  %v14386_v1 = vmul.f32 %v11814_v40, %v4890_v49  ;;  %v14388_v19 = vmul.f32 %v11814_v40, %v4891_v31 }
 0x2b6   : > { %v14390_v48 = vmul.f32 %v11814_v40, %v4892_v13  ;;  %v14392_v6 = vmul.f32 %v11814_v40, %v4893_v41  ;;  %v14394_v21 = vmul.f32 %v11814_v40, %v4894_v33  ;;  %v14396_v12 = vmul.f32 %v11814_v40, %v4895_v16 }
 0x2b7   : > { %v4984_v23 = vmax.f32 %v4952_v22, 0.0  ;;  %v4985_v52 = vmax.f32 %v4953_v53, 0.0  ;;  %v14398_v58 = vmul.f32 %v11814_v40, %v4896_v38  ;;  %v14400_v28 = vmul.f32 %v11814_v40, %v4897_v62 }
 0x2b8   : > { %v14402_v7 = vmul.f32 %v11814_v40, %v4898_v46  ;;  %v14404_v4 = vmul.f32 %v11814_v40, %v4899_v26  ;;  %v14406_v43 = vmul.f32 %v11814_v40, %v4900_v51  ;;  %v14408_v39 = vmul.f32 %v11814_v40, %v4901_v55 }
 0x2b9   : > { %v5002_v24 = vpack.c.bf16 %v4985_v52, %v4984_v23  ;;  %v14410_v15 = vmul.f32 %v11814_v40, %v4902_v54  ;;  %v14412_v50 = vmul.f32 %v11814_v40, %v4903_v36  ;;  %v14414_v35 = vmul.f32 %v11814_v40, %v4904_v14 }
 0x2ba   : > { %v14416_v10 = vmul.f32 %v11814_v40, %v4905_v45  ;;  %v14418_v27 = vmul.f32 %v11814_v40, %v4906_v8  ;;  %v14420_v5 = vmul.f32 %v11814_v40, %v4907_v29  ;;  %v14422_v9 = vmul.f32 %v11814_v40, %v4908_v3 }
 0x2bb   : > { %v5047_v11 = vshrl.u32 %v5002_v24, 16  ;;  %v5125_v32 = vshll.u32 %v5002_v24, 16  ;;  %v14424_v59 = vmul.f32 %v11814_v40, %v4909_v17  ;;  %v14426_v37 = vmul.f32 %v11814_v40, %v4910_v47  ;;  %v11752_v47 = vld [vmem:[%s16891_s2 + $0x1c0] sm:$0xff]  }
 0x2bc   : > { %v14428_v61 = vmul.f32 %v11814_v40, %v4911_v60  ;;  %v14430_v26 = vmul.f32 %v11814_v40, %v4912_v42  ;;  %v14432_v63 = vmul.f32 %v11814_v40, %v4913_v57  ;;  %v14434_v54 = vmul.f32 %v11814_v40, %v4914_v0  ;;  %11285 = vmatprep.subr.bf16.mxu0 %v11752_v47 }
 0x2bd   : > { %v5124_v36 = vrot.slane %v5047_v11, 7  ;;  %v5178_v14 = vrot.slane %v5125_v32, 7  ;;  %v4949_v45 = vmul.f32 %v11814_v40, %v4915_v56  ;;  %v4950_v8 = vmul.f32 %v11814_v40, %v4916_v25 }
 0x2be   : > { %v4951_v29 = vmul.f32 %v11814_v40, %v4917_v30  ;;  %v4954_v44 = vmul.f32 %v11814_v40, %v4920_v2  ;;  %v4955_v3 = vmul.f32 %v11814_v40, %v4921_v34  ;;  %v4956_v17 = vmax.f32 %v14386_v1, 0.0 }
 0x2bf   : > { %v5127_v60 = vor.u32 %v5125_v32, %v5124_v36  ;;  %v5226_v57 = vsel %vm12040_vm2, %v5124_v36, %v5178_v14  ;;  %v4957_v0 = vmax.f32 %v14388_v19, 0.0  ;;  %v4958_v49 = vmax.f32 %v14390_v48, 0.0 }
 0x2c0   : > { %v10126_v31 = vcombine.low %v5226_v57, %v5226_v57  ;;  %v4959_v56 = vmax.f32 %v14392_v6, 0.0  ;;  %v4960_v25 = vmax.f32 %v14394_v21, 0.0  ;;  %v4961_v30 = vmax.f32 %v14396_v12, 0.0 }
 0x2c1   : > { %v5210_v2 = vsel %vm12040_vm2, %v5047_v11, %v5127_v60  ;;  %v4962_v34 = vmax.f32 %v14398_v58, 0.0  ;;  %v4963_v13 = vmax.f32 %v14400_v28, 0.0  ;;  %v4964_v41 = vmax.f32 %v14402_v7, 0.0 }
 0x2c2   : > { %v10124_v33 = vcombine.low %v5210_v2, %v5210_v2  ;;  %v10125_v16 = vcombine.high %v5210_v2, %v5210_v2  ;;  %5451 = vst [vmem:[#allocation2 + $0xbc] sm:$0x1] %v10126_v31  ;;  %5457 = vst [vmem:[#allocation2 + $0xd4] sm:$0x1] %v10126_v31  ;;  %v4965_v38 = vmax.f32 %v14404_v4, 0.0  ;;  %v4966_v40 = vmax.f32 %v14406_v43, 0.0 }
 0x2c3   : > { %v4967_v62 = vmax.f32 %v14408_v39, 0.0  ;;  %v4968_v46 = vmax.f32 %v14410_v15, 0.0  ;;  %v4969_v51 = vmax.f32 %v14412_v50, 0.0  ;;  %v4970_v55 = vmax.f32 %v14414_v35, 0.0 }
 0x2c4   : > { %5450 = vst [vmem:[#allocation2 + $0xb8] sm:$0xf] %v10125_v16  ;;  %5455 = vst [vmem:[#allocation2 + $0xcc] sm:$0xf] %v10124_v33  ;;  %v4971_v22 = vmax.f32 %v14416_v10, 0.0  ;;  %v4972_v53 = vmax.f32 %v14418_v27, 0.0  ;;  %v14468_v39 = vpack.c.bf16 %v4957_v0, %v4956_v17  ;;  %v14470_v24 = vpack.c.bf16 %v4959_v56, %v4958_v49 }
 0x2c5   : > { %5456 = vst [vmem:[#allocation2 + $0xd0] sm:$0xf] %v10125_v16  ;;  %5449 = vst [vmem:[#allocation2 + $0xb4] sm:$0xf] %v10124_v33  ;;  %v4973_v1 = vmax.f32 %v14420_v5, 0.0  ;;  %v4974_v19 = vmax.f32 %v14422_v9, 0.0  ;;  %v14472_v15 = vpack.c.bf16 %v4961_v30, %v4960_v25  ;;  %v14474_v50 = vpack.c.bf16 %v4963_v13, %v4962_v34 }
 0x2c6   : > { %v4975_v48 = vmax.f32 %v14424_v59, 0.0  ;;  %v4976_v6 = vmax.f32 %v14426_v37, 0.0  ;;  %v4977_v21 = vmax.f32 %v14428_v61, 0.0  ;;  %v4978_v12 = vmax.f32 %v14430_v26, 0.0 }
 0x2c7   : > { %v4979_v23 = vmax.f32 %v14432_v63, 0.0  ;;  %v4980_v52 = vmax.f32 %v14434_v54, 0.0  ;;  %v4981_v58 = vmax.f32 %v4949_v45, 0.0  ;;  %v4982_v28 = vmax.f32 %v4950_v8, 0.0 }
 0x2c8   : > { %v4983_v7 = vmax.f32 %v4951_v29, 0.0  ;;  %v4986_v4 = vmax.f32 %v4954_v44, 0.0  ;;  %v4987_v43 = vmax.f32 %v4955_v3, 0.0  ;;  %v14476_v35 = vpack.c.bf16 %v4965_v38, %v4964_v41 }
 0x2c9   : > { %v14478_v10 = vpack.c.bf16 %v4967_v62, %v4966_v40  ;;  %v14480_v27 = vpack.c.bf16 %v4969_v51, %v4968_v46  ;;  %v14482_v5 = vpack.c.bf16 %v4971_v22, %v4970_v55  ;;  %v14484_v9 = vpack.c.bf16 %v4973_v1, %v4972_v53 }
 0x2ca   : > { %v14486_v11 = vpack.c.bf16 %v4975_v48, %v4974_v19  ;;  %v14488_v32 = vpack.c.bf16 %v4977_v21, %v4976_v6  ;;  %v14490_v59 = vpack.c.bf16 %v4979_v23, %v4978_v12  ;;  %v14492_v37 = vpack.c.bf16 %v4981_v58, %v4980_v52 }
 0x2cb   : > { %v14494_v61 = vpack.c.bf16 %v4983_v7, %v4982_v28  ;;  %v14496_v26 = vpack.c.bf16 %v4987_v43, %v4986_v4  ;;  %v16919_v63 = vshrl.u32 %v14470_v24, 16  ;;  %v16917_v54 = vshrl.u32 %v14468_v39, 16 }
 0x2cc   : > { %17070 = vst [vmem:[#allocation33_spill] sm:$0xff] %v14488_v32  ;;  %17071 = vst [vmem:[#allocation8_spill] sm:$0xff] %v14490_v59  ;;  %v16916_v36 = vshrl.u32 %v14472_v15, 16  ;;  %v16914_v14 = vshrl.u32 %v14474_v50, 16  ;;  %v16913_v45 = vshrl.u32 %v14476_v35, 16  ;;  %v16911_v8 = vshrl.u32 %v14478_v10, 16 }
 0x2cd   : > { %17072 = vst [vmem:[#allocation32_spill] sm:$0xff] %v14492_v37  ;;  %17073 = vst [vmem:[#allocation37_spill] sm:$0xff] %v14494_v61  ;;  %v16910_v29 = vshrl.u32 %v14480_v27, 16  ;;  %v16909_v44 = vshrl.u32 %v14482_v5, 16  ;;  %v16908_v3 = vshrl.u32 %v14484_v9, 16  ;;  %v16912_v17 = vshrl.u32 %v14486_v11, 16 }
 0x2ce   : > { %17074 = vst [vmem:[#allocation15_spill] sm:$0xff] %v14496_v26  ;;  %v16915_v47 = vshrl.u32 %v14488_v32, 16  ;;  %v16918_v60 = vshrl.u32 %v14490_v59, 16  ;;  %v16926_v57 = vshrl.u32 %v14492_v37, 16  ;;  %v16932_v0 = vshrl.u32 %v14494_v61, 16 }
 0x2cf   : > { %v16938_v49 = vshrl.u32 %v14496_v26, 16  ;;  %v14515_v31 = vrot.slane %v16919_v63, 7  ;;  %v5069_v56 = vshll.u32 %v14470_v24, 16  ;;  %v14520_v25 = vrot.slane %v16917_v54, 7 }
 0x2d0   : > { %v5073_v30 = vshll.u32 %v14468_v39, 16  ;;  %v14525_v2 = vrot.slane %v16916_v36, 7  ;;  %v5077_v34 = vshll.u32 %v14472_v15, 16  ;;  %v14530_v13 = vrot.slane %v16914_v14, 7 }
 0x2d1   : > { %17075 = vst [vmem:[#allocation21_spill] sm:$0xff] %v14515_v31  ;;  %17076 = vst [vmem:[#allocation11_spill] sm:$0xff] %v14520_v25  ;;  %v5071_v41 = vor.u32 %v5069_v56, %v14515_v31  ;;  %v5081_v33 = vshll.u32 %v14474_v50, 16  ;;  %v14536_v16 = vrot.slane %v16913_v45, 7  ;;  %v5085_v38 = vshll.u32 %v14476_v35, 16 }
 0x2d2   : > { %17077 = vst [vmem:[#allocation12_spill] sm:$0xff] %v14525_v2  ;;  %17078 = vst [vmem:[#allocation13_spill] sm:$0xff] %v14530_v13  ;;  %v5075_v40 = vor.u32 %v5073_v30, %v14520_v25  ;;  %v5079_v62 = vor.u32 %v5077_v34, %v14525_v2  ;;  %v14543_v46 = vrot.slane %v16911_v8, 7  ;;  %v5089_v51 = vshll.u32 %v14478_v10, 16 }
 0x2d3   : > { %17079 = vst [vmem:[#allocation14_spill] sm:$0xff] %v14536_v16  ;;  %v5083_v55 = vor.u32 %v5081_v33, %v14530_v13  ;;  %v5087_v22 = vor.u32 %v5085_v38, %v14536_v16  ;;  %v14550_v53 = vrot.slane %v16910_v29, 7  ;;  %v5093_v1 = vshll.u32 %v14480_v27, 16 }
 0x2d4   : > { %17080 = vst [vmem:[#allocation16_spill] sm:$0xff] %v14543_v46  ;;  %v5091_v19 = vor.u32 %v5089_v51, %v14543_v46  ;;  %v14556_v48 = vrot.slane %v16909_v44, 7  ;;  %v5097_v6 = vshll.u32 %v14482_v5, 16  ;;  %v5100_v21 = vrot.slane %v16908_v3, 7 }
 0x2d5   : > { %17081 = vst [vmem:[#allocation17_spill] sm:$0xff] %v14550_v53  ;;  %v5095_v12 = vor.u32 %v5093_v1, %v14550_v53  ;;  %v5101_v23 = vshll.u32 %v14484_v9, 16  ;;  %v5104_v52 = vrot.slane %v16912_v17, 7  ;;  %v5105_v58 = vshll.u32 %v14486_v11, 16 }
 0x2d6   : > { %17082 = vst [vmem:[#allocation18_spill] sm:$0xff] %v14556_v48  ;;  %v5099_v28 = vor.u32 %v5097_v6, %v14556_v48  ;;  %v5108_v7 = vrot.slane %v16915_v47, 7  ;;  %v5109_v4 = vshll.u32 %v14488_v32, 16  ;;  %v5112_v43 = vrot.slane %v16918_v60, 7 }
 0x2d7   : > { %v5103_v3 = vor.u32 %v5101_v23, %v5100_v21  ;;  %v5107_v44 = vor.u32 %v5105_v58, %v5104_v52  ;;  %v5113_v29 = vshll.u32 %v14490_v59, 16  ;;  %v5116_v8 = vrot.slane %v16926_v57, 7 }
 0x2d8   : > { %v5111_v17 = vor.u32 %v5109_v4, %v5108_v7  ;;  %v5117_v45 = vshll.u32 %v14492_v37, 16  ;;  %v5120_v14 = vrot.slane %v16932_v0, 7  ;;  %v5121_v47 = vshll.u32 %v14494_v61, 16 }
 0x2d9   : > { %v5115_v36 = vor.u32 %v5113_v29, %v5112_v43  ;;  %v5128_v54 = vrot.slane %v16938_v49, 7  ;;  %v5129_v60 = vshll.u32 %v14496_v26, 16  ;;  %v5164_v63 = vrot.slane %v5069_v56, 7 }
 0x2da   : > { %v5119_v20 = vor.u32 %v5117_v45, %v5116_v8  ;;  %v5123_v18 = vor.u32 %v5121_v47, %v5120_v14  ;;  %v5165_v48 = vrot.slane %v5073_v30, 7  ;;  %v5166_v53 = vrot.slane %v5077_v34, 7 }
 0x2db   : > { %v5131_v57 = vor.u32 %v5129_v60, %v5128_v54  ;;  %v5167_v46 = vrot.slane %v5081_v33, 7  ;;  %v5168_v16 = vrot.slane %v5085_v38, 7  ;;  %v5169_v13 = vrot.slane %v5089_v51, 7 }
 0x2dc   : > { %v5170_v2 = vrot.slane %v5093_v1, 7  ;;  %v5171_v25 = vrot.slane %v5097_v6, 7  ;;  %v5172_v0 = vrot.slane %v5101_v23, 7  ;;  %v5173_v31 = vrot.slane %v5105_v58, 7 }
 0x2dd   : > { %v5174_v61 = vrot.slane %v5109_v4, 7  ;;  %v5175_v37 = vrot.slane %v5113_v29, 7  ;;  %v5176_v59 = vrot.slane %v5117_v45, 7  ;;  %v5177_v32 = vrot.slane %v5121_v47, 7  ;;  %v17105_v4 = vld [vmem:[#allocation12_spill] sm:$0xff] }
 0x2de   : > { %v5179_v49 = vrot.slane %v5129_v60, 7  ;;  %v17083_v26 = vshrl.u32 %v14470_v24, 16  ;;  %v17084_v30 = vshrl.u32 %v14468_v39, 16  ;;  %v17085_v33 = vshrl.u32 %v14472_v15, 16 }
 0x2df   : > { %v17086_v29 = vshrl.u32 %v14474_v50, 16  ;;  %v17087_v24 = vshrl.u32 %v14476_v35, 16  ;;  %v17088_v39 = vshrl.u32 %v14478_v10, 16  ;;  %v17089_v15 = vshrl.u32 %v14480_v27, 16 }
 0x2e0   : > { %v5196_v56 = vsel %vm12040_vm2, %v17083_v26, %v5071_v41  ;;  %v5197_v34 = vsel %vm12040_vm2, %v17084_v30, %v5075_v40  ;;  %v5198_v38 = vsel %vm12040_vm2, %v17085_v33, %v5079_v62  ;;  %v17090_v60 = vshrl.u32 %v14482_v5, 16  ;;  %v17093_v62 = vld [vmem:[#allocation33_spill] sm:$0xff] }
 0x2e1   : > { %v5199_v45 = vsel %vm12040_vm2, %v17086_v29, %v5083_v55  ;;  %v14602_v26 = vsel %vm12040_vm2, %v17087_v24, %v5087_v22  ;;  %v14608_v47 = vsel %vm12040_vm2, %v17088_v39, %v5091_v19  ;;  %v14614_v50 = vsel %vm12040_vm2, %v17089_v15, %v5095_v12  ;;  %v17095_v55 = vld [vmem:[#allocation8_spill] sm:$0xff]  ;;  %v17107_v29 = vld [vmem:[#allocation14_spill] sm:$0xff]  ;;  %v17109_v39 = vld [vmem:[#allocation17_spill] sm:$0xff] }
 0x2e2   : > { %v14620_v35 = vsel %vm12040_vm2, %v17090_v60, %v5099_v28  ;;  %v17091_v41 = vshrl.u32 %v14484_v9, 16  ;;  %v17092_v40 = vshrl.u32 %v14486_v11, 16  ;;  %v17094_v51 = vshrl.u32 %v17093_v62, 16  ;;  %v17104_v28 = vld [vmem:[#allocation11_spill] sm:$0xff]  ;;  %v17108_v24 = vld [vmem:[#allocation16_spill] sm:$0xff]  ;;  %v17110_v15 = vld [vmem:[#allocation18_spill] sm:$0xff] }
 0x2e3   : > { %v17096_v22 = vshrl.u32 %v17095_v55, 16  ;;  %v5214_v30 = vsel %vm12040_vm2, %v17105_v4, %v5166_v53  ;;  %v14688_v53 = vsel %vm12040_vm2, %v17110_v15, %v5171_v25  ;;  %v14708_v25 = vsel %vm12040_vm2, %v5116_v8, %v5176_v59 }
 0x2e4   : > { %v14626_v10 = vsel %vm12040_vm2, %v17091_v41, %v5103_v3  ;;  %v14632_v27 = vsel %vm12040_vm2, %v17092_v40, %v5107_v44  ;;  %v14638_v5 = vsel %vm12040_vm2, %v17094_v51, %v5111_v17  ;;  %v17097_v3 = vld [vmem:[#allocation32_spill] sm:$0xff]  ;;  %v17099_v44 = vld [vmem:[#allocation37_spill] sm:$0xff]  ;;  %v17101_v17 = vld [vmem:[#allocation15_spill] sm:$0xff]  ;;  %v10086_v60 = vcombine.high %v5197_v34, %v5197_v34 }
 0x2e5   : > { %v14644_v9 = vsel %vm12040_vm2, %v17096_v22, %v5115_v36  ;;  %v17098_v1 = vshrl.u32 %v17097_v3, 16  ;;  %v17100_v19 = vshrl.u32 %v17099_v44, 16  ;;  %v17102_v12 = vshrl.u32 %v17101_v17, 16  ;;  %v17103_v36 = vld [vmem:[#allocation21_spill] sm:$0xff] }
 0x2e6   : > { %v5212_v58 = vsel %vm12040_vm2, %v17103_v36, %v5164_v63  ;;  %v5217_v63 = vsel %vm12040_vm2, %v17108_v24, %v5169_v13  ;;  %v14700_v13 = vsel %vm12040_vm2, %v5108_v7, %v5174_v61  ;;  %v10085_v7 = vcombine.low %v5197_v34, %v5197_v34  ;;  %5408 = vst [vmem:[#allocation2 + $0x10] sm:$0xf] %v10086_v60 }
 0x2e7   : > { %v14650_v11 = vsel %vm12040_vm2, %v17098_v1, %v5119_v20  ;;  %v14656_v6 = vsel %vm12040_vm2, %v17100_v19, %v5123_v18  ;;  %v14662_v23 = vsel %vm12040_vm2, %v17102_v12, %v5131_v57  ;;  %v5213_v20 = vsel %vm12040_vm2, %v17104_v28, %v5165_v48  ;;  %v17106_v18 = vld [vmem:[#allocation13_spill] sm:$0xff] }
 0x2e8   : > { %v5215_v33 = vsel %vm12040_vm2, %v17106_v18, %v5167_v46  ;;  %v5216_v57 = vsel %vm12040_vm2, %v17107_v29, %v5168_v16  ;;  %v5218_v48 = vsel %vm12040_vm2, %v17109_v39, %v5170_v2  ;;  %v14692_v46 = vsel %vm12040_vm2, %v5100_v21, %v5172_v0  ;;  %5407 = vst [vmem:[#allocation2 + $0xc] sm:$0xf] %v10085_v7 }
 0x2e9   : > { %v14696_v16 = vsel %vm12040_vm2, %v5104_v52, %v5173_v31  ;;  %v14704_v2 = vsel %vm12040_vm2, %v5112_v43, %v5175_v37  ;;  %v14712_v0 = vsel %vm12040_vm2, %v5120_v14, %v5177_v32  ;;  %v14716_v31 = vsel %vm12040_vm2, %v5128_v54, %v5179_v49 }
 0x2ea   : > { %v10082_v21 = vcombine.low %v5196_v56, %v5196_v56  ;;  %v10083_v52 = vcombine.high %v5196_v56, %v5196_v56  ;;  %v10084_v61 = vcombine.low %v5212_v58, %v5212_v58  ;;  %v10087_v41 = vcombine.low %v5213_v20, %v5213_v20 }
 0x2eb   : > { %v10088_v37 = vcombine.low %v5198_v38, %v5198_v38  ;;  %v10089_v43 = vcombine.high %v5198_v38, %v5198_v38  ;;  %v10090_v40 = vcombine.low %v5214_v30, %v5214_v30  ;;  %v10091_v59 = vcombine.low %v5199_v45, %v5199_v45 }
 0x2ec   : > { %5404 = vst [vmem:[#allocation2] sm:$0xf] %v10082_v21  ;;  %5410 = vst [vmem:[#allocation2 + $0x18] sm:$0xf] %v10082_v21  ;;  %v10092_v8 = vcombine.high %v5199_v45, %v5199_v45  ;;  %v10093_v62 = vcombine.low %v5215_v33, %v5215_v33  ;;  %v10094_v32 = vcombine.low %v14602_v26, %v14602_v26 }
 0x2ed   : > { %5405 = vst [vmem:[#allocation2 + $0x4] sm:$0xf] %v10083_v52  ;;  %5406 = vst [vmem:[#allocation2 + $0x8] sm:$0x1] %v10084_v61  ;;  %v10095_v42 = vcombine.high %v14602_v26, %v14602_v26  ;;  %v10096_v54 = vcombine.low %v5216_v57, %v5216_v57  ;;  %v10097_v14 = vcombine.low %v14608_v47, %v14608_v47  ;;  %v6211_v30 = vld [vmem:[#allocation2 + $0x10] sm:$0xf] }
 0x2ee   : > { %5411 = vst [vmem:[#allocation2 + $0x1c] sm:$0xf] %v10083_v52  ;;  %5412 = vst [vmem:[#allocation2 + $0x20] sm:$0x1] %v10084_v61  ;;  %v10098_v49 = vcombine.high %v14608_v47, %v14608_v47  ;;  %v10099_v56 = vcombine.low %v5217_v63, %v5217_v63  ;;  %v10100_v34 = vcombine.low %v14614_v50, %v14614_v50  ;;  %v6268_v39 = vshll.u32 %v6211_v30, 16 }
 0x2ef   : > { %5409 = vst [vmem:[#allocation2 + $0x14] sm:$0x1] %v10087_v41  ;;  %5414 = vst [vmem:[#allocation2 + $0x28] sm:$0xf] %v10089_v43  ;;  %v10101_v38 = vcombine.high %v14614_v50, %v14614_v50  ;;  %v10102_v45 = vcombine.low %v5218_v48, %v5218_v48  ;;  %v10103_v26 = vcombine.low %v14620_v35, %v14620_v35  ;;  %v6210_v4 = vld [vmem:[#allocation2 + $0xc] sm:$0xf] }
 0x2f0   : > { %5415 = vst [vmem:[#allocation2 + $0x2c] sm:$0x1] %v10090_v40  ;;  %5413 = vst [vmem:[#allocation2 + $0x24] sm:$0xf] %v10088_v37  ;;  %v10104_v47 = vcombine.high %v14620_v35, %v14620_v35  ;;  %v10105_v51 = vcombine.low %v14688_v53, %v14688_v53  ;;  %v10106_v55 = vcombine.low %v14626_v10, %v14626_v10  ;;  %v6259_v24 = vshrl.u32 %v6210_v4, 16 }
 0x2f1   : > { %5417 = vst [vmem:[#allocation2 + $0x34] sm:$0xf] %v10092_v8  ;;  %5418 = vst [vmem:[#allocation2 + $0x38] sm:$0x1] %v10093_v62  ;;  %v10107_v50 = vcombine.high %v14626_v10, %v14626_v10  ;;  %v10108_v22 = vcombine.low %v14692_v46, %v14692_v46  ;;  %v10109_v3 = vcombine.low %v14632_v27, %v14632_v27  ;;  %v6262_v63 = vshll.u32 %v6210_v4, 16 }
 0x2f2   : > { %5416 = vst [vmem:[#allocation2 + $0x30] sm:$0xf] %v10091_v59  ;;  %5419 = vst [vmem:[#allocation2 + $0x3c] sm:$0xf] %v10094_v32  ;;  %v10110_v35 = vcombine.high %v14632_v27, %v14632_v27  ;;  %v10111_v1 = vcombine.low %v14696_v16, %v14696_v16  ;;  %v10112_v44 = vcombine.low %v14638_v5, %v14638_v5  ;;  %v6272_v48 = vshrl.u32 %v6211_v30, 16 }
 0x2f3   : > { %5420 = vst [vmem:[#allocation2 + $0x40] sm:$0xf] %v10095_v42  ;;  %5421 = vst [vmem:[#allocation2 + $0x44] sm:$0x1] %v10096_v54  ;;  %v10113_v10 = vcombine.high %v14638_v5, %v14638_v5  ;;  %v10114_v19 = vcombine.low %v14700_v13, %v14700_v13  ;;  %v10115_v27 = vcombine.low %v14644_v9, %v14644_v9  ;;  %v6034_v5 = vld [vmem:[#allocation2] sm:$0xe] }
 0x2f4   : > { %5423 = vst [vmem:[#allocation2 + $0x4c] sm:$0xf] %v10098_v49  ;;  %5422 = vst [vmem:[#allocation2 + $0x48] sm:$0xf] %v10097_v14  ;;  %v10116_v17 = vcombine.high %v14644_v9, %v14644_v9  ;;  %v10117_v12 = vcombine.low %v14704_v2, %v14704_v2  ;;  %v10118_v36 = vcombine.low %v14650_v11, %v14650_v11  ;;  %v14770_v18 = vld [vmem:[#allocation2 + $0x4] sm:$0xf] }
 0x2f5   : > { %5424 = vst [vmem:[#allocation2 + $0x50] sm:$0x1] %v10099_v56  ;;  %5426 = vst [vmem:[#allocation2 + $0x58] sm:$0xf] %v10101_v38  ;;  %v10119_v58 = vcombine.high %v14650_v11, %v14650_v11  ;;  %v10120_v28 = vcombine.low %v14708_v25, %v14708_v25  ;;  %v10121_v9 = vcombine.low %v14656_v6, %v14656_v6  ;;  %v6212_v57 = vld [vmem:[#allocation2 + $0x18] sm:$0xf] }
 0x2f6   : > { %5427 = vst [vmem:[#allocation2 + $0x5c] sm:$0x1] %v10102_v45  ;;  %5425 = vst [vmem:[#allocation2 + $0x54] sm:$0xf] %v10100_v34  ;;  %v10122_v20 = vcombine.high %v14656_v6, %v14656_v6  ;;  %v10123_v11 = vcombine.low %v14712_v0, %v14712_v0  ;;  %v10127_v33 = vcombine.low %v14662_v23, %v14662_v23  ;;  %v14780_v15 = vld [vmem:[#allocation2 + $0x8] sm:$0x1] }
 0x2f7   : > { %5429 = vst [vmem:[#allocation2 + $0x64] sm:$0xf] %v10104_v47  ;;  %5430 = vst [vmem:[#allocation2 + $0x68] sm:$0x1] %v10105_v51  ;;  %v10128_v29 = vcombine.high %v14662_v23, %v14662_v23  ;;  %v10129_v6 = vcombine.low %v14716_v31, %v14716_v31  ;;  %v10226_v23 = vcombine.low %v6210_v4, %v6211_v30  ;;  %v10130_v53 = vrot.slane %v6034_v5, 9  ;;  %v11755_v54 = vld [vmem:[%s16891_s2 + $0x180] sm:$0xff]  }
 0x2f8   : > { %5428 = vst [vmem:[#allocation2 + $0x60] sm:$0xf] %v10103_v26  ;;  %5431 = vst [vmem:[#allocation2 + $0x6c] sm:$0xf] %v10106_v55  ;;  %v6100_v46 = vrot.slane %v14770_v18, 5  ;;  %v6261_v13 = vrot.slane %v6259_v24, 4 }
 0x2f9   : > { %5432 = vst [vmem:[#allocation2 + $0x70] sm:$0xf] %v10107_v50  ;;  %5433 = vst [vmem:[#allocation2 + $0x74] sm:$0x1] %v10108_v22  ;;  %v14783_v16 = vld [vmem:[#allocation2 + $0x1c] sm:$0xf]  ;;  %8675 = vmatprep.mubr.bf16.mxu0 %v10226_v23 }
 0x2fa   : > { %5435 = vst [vmem:[#allocation2 + $0x7c] sm:$0xf] %v10110_v35  ;;  %5434 = vst [vmem:[#allocation2 + $0x78] sm:$0xf] %v10109_v3  ;;  %v6264_v2 = vrot.slane %v6262_v63, 5  ;;  %v14785_v25 = vrot.slane %v6268_v39, 5  ;;  %v6101_v43 = vsel %vm12118_vm7, %v10130_v53, %v6100_v46  ;;  %v10227_v62 = vcombine.low %v6212_v57, %v14783_v16 }
 0x2fb   : > { %5436 = vst [vmem:[#allocation2 + $0x80] sm:$0x1] %v10111_v1  ;;  %5438 = vst [vmem:[#allocation2 + $0x88] sm:$0xf] %v10113_v10  ;;  %v6274_v0 = vrot.slane %v6272_v48, 4  ;;  %v6102_v21 = vrot.slane %v6100_v46, 4 }
 0x2fc   : > { %5439 = vst [vmem:[#allocation2 + $0x8c] sm:$0x1] %v10114_v19  ;;  %5437 = vst [vmem:[#allocation2 + $0x84] sm:$0xf] %v10112_v44  ;;  %v14787_v31 = vld [vmem:[#allocation2] sm:$0xf]  ;;  %v6265_v60 = vor.u32 %v6264_v2, %v6261_v13 }
 0x2fd   : > { %5441 = vst [vmem:[#allocation2 + $0x94] sm:$0xf] %v10116_v17  ;;  %5442 = vst [vmem:[#allocation2 + $0x98] sm:$0x1] %v10117_v12  ;;  %v6103_v52 = vrot.slane %v14780_v15, 5  ;;  %v6283_v61 = vshrl.u32 %v6212_v57, 16  ;;  %v6275_v41 = vor.u32 %v6274_v0, %v14785_v25 }
 0x2fe   : > { %5440 = vst [vmem:[#allocation2 + $0x90] sm:$0xf] %v10115_v27  ;;  %5443 = vst [vmem:[#allocation2 + $0x9c] sm:$0xf] %v10118_v36  ;;  %v6286_v7 = vshll.u32 %v6212_v57, 16  ;;  %v5651_v32 = vshrl.u32 %v14787_v31, 16  ;;  %v10178_v27 = vcombine.low %v14787_v31, %v14770_v18 }
 0x2ff   : > { %5444 = vst [vmem:[#allocation2 + $0xa0] sm:$0xf] %v10119_v58  ;;  %5445 = vst [vmem:[#allocation2 + $0xa4] sm:$0x1] %v10120_v28  ;;  %v6104_v59 = vsel %vm12118_vm7, %v6102_v21, %v6103_v52  ;;  %v14796_v8 = vrot.slane %v6283_v61, 4  ;;  %v14805_v14 = vrot.slane %v6265_v60, 4 }
 0x300   : > { %5447 = vst [vmem:[#allocation2 + $0xac] sm:$0xf] %v10122_v20  ;;  %5446 = vst [vmem:[#allocation2 + $0xa8] sm:$0xf] %v10121_v9  ;;  %v14800_v42 = vld [vmem:[#allocation2 + $0xc] sm:$0xf]  ;;  %v10210_v49 = vcombine.low %v6101_v43, %v6104_v59 }
 0x301   : > { %5448 = vst [vmem:[#allocation2 + $0xb0] sm:$0x1] %v10123_v11  ;;  %5452 = vst [vmem:[#allocation2 + $0xc0] sm:$0xf] %v10127_v33  ;;  %v14807_v56 = vrot.slane %v6286_v7, 5  ;;  %v5654_v34 = vshll.u32 %v14787_v31, 16 }
 0x302   : > { %5453 = vst [vmem:[#allocation2 + $0xc4] sm:$0xf] %v10128_v29  ;;  %5454 = vst [vmem:[#allocation2 + $0xc8] sm:$0x1] %v10129_v6  ;;  %v14810_v38 = vld [vmem:[#allocation2 + $0x10] sm:$0xf]  ;;  %8676 = vmatmul.mubr.bf16.vlgmr.msra.gmra.mrb[160].mxu0 %v10210_v49 }
 0x303   : > { %v11760_v45 = vld [vmem:[%s16891_s2 + $0x1c8] sm:$0xff]   ;;  %v14815_v26 = vrot.slane %v6275_v41, 4  ;;  %v5653_v47 = vrot.slane %v5651_v32, 4  ;;  %v5660_v51 = vshll.u32 %v14770_v18, 16  ;;  %v5664_v55 = vshrl.u32 %v14770_v18, 16  ;;  %8683 = vmatprep.mubr.bf16.mxu0 %v10227_v62  ;;  %11286 = vmatpush3.bf16.msra.mxu0 %v11755_v54  ;;  %v11768_v20 = vld [vmem:[%s16891_s2 + $0x1d0] sm:$0xff]  }
 0x304   : > { %v5635_v50 = vld [vmem:[#allocation2 + $0x14] sm:$0x1]  ;;  %v5656_v22 = vrot.slane %v5654_v34, 5  ;;  %v5670_v3 = vshll.u32 %v14780_v15, 16  ;;  %v5675_v35 = vshrl.u32 %v14800_v42, 16  ;;  %v5678_v1 = vshll.u32 %v14800_v42, 16  ;;  %11287 = vmatprep.subr.bf16.mxu0 %v11760_v45 }
 0x305   : > { %v6035_v44 = vld [vmem:[#allocation2 + $0xc] sm:$0xe]  ;;  %v5662_v10 = vrot.slane %v5660_v51, 5  ;;  %v5666_v19 = vrot.slane %v5664_v55, 4  ;;  %v5684_v17 = vshll.u32 %v14810_v38, 16  ;;  %v5688_v28 = vshrl.u32 %v14810_v38, 16 }
 0x306   : > { %v11763_v12 = vld [vmem:[%s16891_s2 + $0x188] sm:$0xff]   ;;  %v5657_v36 = vor.u32 %v5656_v22, %v5653_v47  ;;  %v5677_v5 = vrot.slane %v5675_v35, 4  ;;  %v5680_v58 = vrot.slane %v5678_v1, 5  ;;  %v14829_v9 = vld [vmem:[#allocation2 + $0x24] sm:$0xf]  ;;  %v5694_v18 = vshll.u32 %v5635_v50, 16 }
 0x307   : > { %v5667_v4 = vor.u32 %v5666_v19, %v5662_v10  ;;  %v5686_v30 = vrot.slane %v5684_v17, 5  ;;  %v10131_v11 = vrot.slane %v6035_v44, 9  ;;  %v5690_v6 = vrot.slane %v5688_v28, 4  ;;  %11288 = vmatpush3.bf16.msra.mxu0 %v11763_v12  ;;  %v11771_v15 = vld [vmem:[%s16891_s2 + $0x190] sm:$0xff]   ;;  %v14841_v0 = vld [vmem:[#allocation2 + $0x28] sm:$0xf] }
 0x308   : > { %v5658_v33 = vrot.slane %v5657_v36, 4  ;;  %v5681_v29 = vor.u32 %v5680_v58, %v5677_v5  ;;  %v6107_v57 = vrot.slane %v14810_v38, 5  ;;  %v5672_v63 = vrot.slane %v5670_v3, 5  ;;  %11289 = vmatprep.subr.bf16.mxu0 %v11768_v20  ;;  %v11773_v31 = vld [vmem:[%s16891_s2 + $0x1d8] sm:$0xff]   ;;  %v11729_v52 = vld [vmem:[%s16891_s2 + $0x100] sm:$0xff]   ;;  %v11733_v1 = vld [vmem:[%s16891_s2 + $0x148] sm:$0xff]  }
 0x309   : > { %v5668_v24 = vrot.slane %v5667_v4, 4  ;;  %v5696_v39 = vrot.slane %v5694_v18, 5  ;;  %v6307_v48 = vshrl.u32 %v14829_v9, 16  ;;  %v5691_v13 = vor.u32 %v5690_v6, %v5686_v30  ;;  %v14854_v41 = vld [vmem:[#allocation2 + $0x18] sm:$0xf]  ;;  %v11735_v44 = vld [vmem:[%s16891_s2 + $0x108] sm:$0xff]  }
 0x30a   : > { %v5663_v53 = vsel %vm12124_vm8, %v5658_v33, %v5662_v10  ;;  %v5682_v46 = vrot.slane %v5681_v29, 4  ;;  %v6110_v2 = vrot.slane %v5635_v50, 5  ;;  %v6108_v61 = vsel %vm12118_vm7, %v10131_v11, %v6107_v57  ;;  %v14860_v54 = vld [vmem:[#allocation2 + $0x1c] sm:$0xf]  ;;  %v5636_v49 = vld [vmem:[#allocation2 + $0x20] sm:$0x1] }
 0x30b   : > { %v5673_v21 = vsel %vm12124_vm8, %v5668_v24, %v5672_v63  ;;  %v6109_v7 = vrot.slane %v6107_v57, 4  ;;  %v6310_v60 = vshll.u32 %v14829_v9, 16  ;;  %v5692_v62 = vrot.slane %v5691_v13, 4  ;;  %v6036_v55 = vld [vmem:[#allocation2 + $0x18] sm:$0xe]  ;;  %11290 = vmatpush3.bf16.msra.mxu0 %v11771_v15  ;;  %v11776_v58 = vld [vmem:[%s16891_s2 + $0x1e0] sm:$0xff]  }
 0x30c   : > { %v10194_v43 = vcombine.low %v5663_v53, %v5673_v21  ;;  %v5687_v59 = vsel %vm12124_vm8, %v5682_v46, %v5686_v30  ;;  %v14858_v32 = vrot.slane %v6307_v48, 4  ;;  %v10228_v51 = vcombine.low %v14829_v9, %v14841_v0  ;;  %11291 = vmatprep.subr.bf16.mxu0 %v11773_v31  ;;  %v11775_v10 = vld [vmem:[%s16891_s2 + $0x198] sm:$0xff]   ;;  %v14884_v5 = vld [vmem:[#allocation2 + $0x30] sm:$0xf]  ;;  %v14907_v46 = vld [vmem:[#allocation2 + $0x28] sm:$0xf] }
 0x30d   : > { %v6111_v34 = vsel %vm12118_vm7, %v6109_v7, %v6110_v2  ;;  %v14864_v45 = vrot.slane %v6310_v60, 5  ;;  %v5697_v50 = vsel %vm12124_vm8, %v5692_v62, %v5696_v39  ;;  %v5699_v3 = vshrl.u32 %v14854_v41, 16  ;;  %v11739_v29 = vld [vmem:[%s16891_s2 + $0x150] sm:$0xff]   ;;  %v14898_v39 = vld [vmem:[#allocation2 + $0x24] sm:$0xf]  ;;  %v11780_v2 = vld [vmem:[%s16891_s2 + $0x1e8] sm:$0xff]  }
 0x30e   : > { %8514 = vmatprep.mubr.bf16.mxu1 %v10194_v43  ;;  %v10211_v22 = vcombine.low %v6108_v61, %v6111_v34  ;;  %v5702_v35 = vshll.u32 %v14854_v41, 16  ;;  %v10195_v19 = vcombine.low %v5687_v59, %v5697_v50  ;;  %v5708_v17 = vshll.u32 %v14860_v54, 16  ;;  %v11741_v13 = vld [vmem:[%s16891_s2 + $0x110] sm:$0xff]   ;;  %v5637_v7 = vld [vmem:[#allocation2 + $0x2c] sm:$0x1]  ;;  %v11745_v34 = vld [vmem:[%s16891_s2 + $0x158] sm:$0xff]  }
 0x30f   : > { %8515 = vmatmul.mubr.bf16.vlgmr.msra.gmra.mrb[128].mxu1 %v10178_v27  ;;  %v5712_v12 = vshrl.u32 %v14860_v54, 16  ;;  %v5718_v36 = vshll.u32 %v5636_v49, 16  ;;  %v5701_v28 = vrot.slane %v5699_v3, 4  ;;  %v10132_v20 = vrot.slane %v6036_v55, 9  ;;  %v14890_v27 = vld [vmem:[#allocation2 + $0x34] sm:$0xf]  ;;  %11292 = vmatpush3.bf16.msra.mxu0 %v11775_v10 }
 0x310   : > { %11174 = vmatpush3.bf16.msra.mxu1 %v11729_v52  ;;  %8684 = vmatmul.mubr.bf16.gmra.mrb[164].mxu0 %v10211_v22  ;;  %v5704_v9 = vrot.slane %v5702_v35, 5  ;;  %v6114_v4 = vrot.slane %v14860_v54, 5  ;;  %v10179_v30 = vcombine.low %v14800_v42, %v14810_v38  ;;  %v5710_v18 = vrot.slane %v5708_v17, 5  ;;  %v11778_v42 = vld [vmem:[%s16891_s2 + $0x1a0] sm:$0xff]   ;;  %v14932_v3 = vld [vmem:[#allocation2 + $0x3c] sm:$0xf] }
 0x311   : > { %8522 = vmatprep.mubr.bf16.mxu1 %v10195_v19  ;;  %8691 = vmatprep.mubr.bf16.mxu0 %v10228_v51  ;;  %v5714_v11 = vrot.slane %v5712_v12, 4  ;;  %v5720_v33 = vrot.slane %v5718_v36, 5  ;;  %v6117_v24 = vrot.slane %v5636_v49, 5  ;;  %v6331_v63 = vshrl.u32 %v14884_v5, 16  ;;  %v6037_v60 = vld [vmem:[#allocation2 + $0x24] sm:$0xe] }
 0x312   : > { %v5705_v6 = vor.u32 %v5704_v9, %v5701_v28  ;;  %v6116_v57 = vrot.slane %v6114_v4, 4  ;;  %11175 = vmatprep.subr.bf16.mxu1 %v11733_v1  ;;  %v6115_v48 = vsel %vm12118_vm7, %v10132_v20, %v6114_v4  ;;  %v6334_v15 = vshll.u32 %v14884_v5, 16  ;;  %11293 = vmatprep.subr.bf16.mxu0 %v11776_v58  ;;  %v11783_v35 = vld [vmem:[%s16891_s2 + $0x1a8] sm:$0xff]   ;;  %v11784_v17 = vld [vmem:[%s16891_s2 + $0x1f0] sm:$0xff]   ;;  %v14942_v28 = vld [vmem:[#allocation2 + $0x40] sm:$0xf] }
 0x313   : > { %v5715_v38 = vor.u32 %v5714_v11, %v5710_v18  ;;  %v14917_v52 = vrot.slane %v6331_v63, 4  ;;  %v10229_v61 = vcombine.low %v14884_v5, %v14890_v27  ;;  %v10180_v62 = vcombine.low %v14854_v41, %v14860_v54  ;;  %11294 = vmatpush3.bf16.msra.mxu0 %v11778_v42  ;;  %v11747_v9 = vld [vmem:[%s16891_s2 + $0x118] sm:$0xff]   ;;  %v11751_v11 = vld [vmem:[%s16891_s2 + $0x160] sm:$0xff]   ;;  %v14958_v63 = vld [vmem:[#allocation2 + $0x30] sm:$0xf] }
 0x314   : > { %v5706_v31 = vrot.slane %v5705_v6, 4  ;;  %v6118_v21 = vsel %vm12118_vm7, %v6116_v57, %v6117_v24  ;;  %11176 = vmatpush3.bf16.msra.mxu1 %v11735_v44  ;;  %v5723_v49 = vshrl.u32 %v14898_v39, 16  ;;  %v5726_v55 = vshll.u32 %v14898_v39, 16  ;;  %11295 = vmatprep.subr.bf16.mxu0 %v11780_v2  ;;  %v14960_v42 = vld [vmem:[#allocation2 + $0x34] sm:$0xf]  ;;  %v11786_v2 = vld [vmem:[%s16891_s2 + $0x1f8] sm:$0xff]  }
 0x315   : > { %v5716_v43 = vrot.slane %v5715_v38, 4  ;;  %v10212_v59 = vcombine.low %v6115_v48, %v6118_v21  ;;  %11177 = vmatprep.subr.bf16.mxu1 %v11739_v29  ;;  %v5732_v50 = vshll.u32 %v14907_v46, 16  ;;  %v5736_v22 = vshrl.u32 %v14907_v46, 16  ;;  %v11767_v41 = vld [vmem:[%s16891_s2 + $0x170] sm:$0xff]  }
 0x316   : > { %v5711_v51 = vsel %vm12124_vm8, %v5706_v31, %v5710_v18  ;;  %v5725_v44 = vrot.slane %v5723_v49, 4  ;;  %v5742_v10 = vshll.u32 %v5637_v7, 16  ;;  %v10133_v19 = vrot.slane %v6037_v60, 9  ;;  %v5638_v60 = vld [vmem:[#allocation2 + $0x38] sm:$0x1] }
 0x317   : > { %8523 = vmatmul.mubr.bf16.gmra.mrb[132].mxu1 %v10179_v30  ;;  %v5721_v1 = vsel %vm12124_vm8, %v5716_v43, %v5720_v33  ;;  %v5728_v36 = vrot.slane %v5726_v55, 5  ;;  %v5734_v5 = vrot.slane %v5732_v50, 5  ;;  %v5738_v58 = vrot.slane %v5736_v22, 4  ;;  %v11785_v33 = vld [vmem:[%s16891_s2 + $0x1b0] sm:$0xff]   ;;  %11296 = vmatpush3.bf16.msra.mxu0 %v11783_v35  ;;  %v11754_v43 = vld [vmem:[%s16891_s2 + $0x120] sm:$0xff]  }
 0x318   : > { %v10196_v12 = vcombine.low %v5711_v51, %v5721_v1  ;;  %8692 = vmatmul.mubr.bf16.gmra.mrb[168].mxu0 %v10212_v59  ;;  %11178 = vmatpush3.bf16.msra.mxu1 %v11741_v13  ;;  %v14947_v20 = vrot.slane %v6334_v15, 5  ;;  %v5744_v4 = vrot.slane %v5742_v10, 5  ;;  %v6121_v30 = vrot.slane %v14907_v46, 5  ;;  %v6038_v55 = vld [vmem:[#allocation2 + $0x30] sm:$0xe]  ;;  %v11788_v10 = vld [vmem:[%s16891_s2 + $0x1b8] sm:$0xff]  }
 0x319   : > { %8699 = vmatprep.mubr.bf16.mxu0 %v10229_v61  ;;  %v6355_v18 = vshrl.u32 %v14932_v3, 16  ;;  %11179 = vmatprep.subr.bf16.mxu1 %v11745_v34  ;;  %v5729_v29 = vor.u32 %v5728_v36, %v5725_v44  ;;  %v5739_v6 = vor.u32 %v5738_v58, %v5734_v5  ;;  %v6124_v57 = vrot.slane %v5637_v7, 5  ;;  %v14987_v1 = vld [vmem:[#allocation2 + $0x48] sm:$0xf]  ;;  %v15181_v40 = vld [vmem:[#allocation2 + $0x94] sm:$0xf] }
 0x31a   : > { %8530 = vmatprep.mubr.bf16.mxu1 %v10196_v12  ;;  %v6358_v24 = vshll.u32 %v14932_v3, 16  ;;  %v6122_v38 = vsel %vm12118_vm7, %v10133_v19, %v6121_v30  ;;  %v6123_v48 = vrot.slane %v6121_v30, 4  ;;  %11297 = vmatprep.subr.bf16.mxu0 %v11784_v17  ;;  %v10230_v7 = vcombine.low %v14932_v3, %v14942_v28  ;;  %v11759_v44 = vld [vmem:[%s16891_s2 + $0x168] sm:$0xff]   ;;  %17117 = vst [vmem:[#allocation24_spill] sm:$0xff] %v15181_v40 }
 0x31b   : > { %v14964_v15 = vrot.slane %v6355_v18, 4  ;;  %v5730_v31 = vrot.slane %v5729_v29, 4  ;;  %v5740_v21 = vrot.slane %v5739_v6, 4  ;;  %v5747_v49 = vshrl.u32 %v14958_v63, 16  ;;  %11298 = vmatpush3.bf16.msra.mxu0 %v11785_v33  ;;  %v11762_v30 = vld [vmem:[%s16891_s2 + $0x128] sm:$0xff]  }
 0x31c   : > { %v14970_v61 = vrot.slane %v6358_v24, 5  ;;  %11180 = vmatpush3.bf16.msra.mxu1 %v11747_v9  ;;  %v6125_v59 = vsel %vm12118_vm7, %v6123_v48, %v6124_v57  ;;  %v5750_v34 = vshll.u32 %v14958_v63, 16  ;;  %v5756_v51 = vshll.u32 %v14960_v42, 16  ;;  %11299 = vmatprep.subr.bf16.mxu0 %v11786_v2  ;;  %v15007_v18 = vld [vmem:[#allocation2 + $0x4c] sm:$0xf] }
 0x31d   : > { %11181 = vmatprep.subr.bf16.mxu1 %v11751_v11  ;;  %v5735_v50 = vsel %vm12124_vm8, %v5730_v31, %v5734_v5  ;;  %v5745_v22 = vsel %vm12124_vm8, %v5740_v21, %v5744_v4  ;;  %v10213_v3 = vcombine.low %v6122_v38, %v6125_v59  ;;  %v5760_v35 = vshrl.u32 %v14960_v42, 16  ;;  %v15011_v29 = vld [vmem:[#allocation2 + $0x3c] sm:$0xf]  ;;  %v15013_v48 = vld [vmem:[#allocation2 + $0x40] sm:$0xf] }
 0x31e   : > { %v10197_v19 = vcombine.low %v5735_v50, %v5745_v22  ;;  %v5749_v17 = vrot.slane %v5747_v49, 4  ;;  %v5752_v12 = vrot.slane %v5750_v34, 5  ;;  %v5758_v36 = vrot.slane %v5756_v51, 5  ;;  %v5639_v21 = vld [vmem:[#allocation2 + $0x44] sm:$0x1]  ;;  %v11770_v34 = vld [vmem:[%s16891_s2 + $0x130] sm:$0xff]  }
 0x31f   : > { %8531 = vmatmul.mubr.bf16.gmra.mrb[136].mxu1 %v10180_v62  ;;  %v5762_v5 = vrot.slane %v5760_v35, 4  ;;  %v5766_v58 = vshll.u32 %v5638_v60, 16  ;;  %v10134_v9 = vrot.slane %v6038_v55, 9  ;;  %v6128_v4 = vrot.slane %v14960_v42, 5  ;;  %11300 = vmatpush3.bf16.msra.mxu0 %v11788_v10  ;;  %v6039_v49 = vld [vmem:[#allocation2 + $0x3c] sm:$0xe] }
 0x320   : > { %8700 = vmatmul.mubr.bf16.gmra.mrb[172].mxu0 %v10213_v3  ;;  %11182 = vmatpush3.bf16.msra.mxu1 %v11754_v43  ;;  %v10181_v54 = vcombine.low %v14898_v39, %v14907_v46  ;;  %v5753_v62 = vor.u32 %v5752_v12, %v5749_v17  ;;  %v6379_v11 = vshrl.u32 %v14987_v1, 16  ;;  %v6382_v33 = vshll.u32 %v14987_v1, 16  ;;  %v6222_v10 = vld [vmem:[#allocation2 + $0x54] sm:$0xf]  ;;  %v15157_v59 = vld [vmem:[#allocation2 + $0x88] sm:$0xf] }
 0x321   : > { %8538 = vmatprep.mubr.bf16.mxu1 %v10197_v19  ;;  %8707 = vmatprep.mubr.bf16.mxu0 %v10230_v7  ;;  %v5763_v6 = vor.u32 %v5762_v5, %v5758_v36  ;;  %v5768_v57 = vrot.slane %v5766_v58, 5  ;;  %v6130_v24 = vrot.slane %v6128_v4, 4  ;;  %v6131_v38 = vrot.slane %v5638_v60, 5  ;;  %v11779_v19 = vld [vmem:[%s16891_s2 + $0x178] sm:$0xff]   ;;  %17114 = vst [vmem:[#allocation20_spill] sm:$0xff] %v15157_v59 }
 0x322   : > { %11183 = vmatprep.subr.bf16.mxu1 %v11759_v44  ;;  %v5754_v2 = vrot.slane %v5753_v62, 4  ;;  %v6129_v39 = vsel %vm12118_vm7, %v10134_v9, %v6128_v4  ;;  %v15017_v46 = vrot.slane %v6379_v11, 4  ;;  %v15019_v31 = vrot.slane %v6382_v33, 5  ;;  %v11782_v62 = vld [vmem:[%s16891_s2 + $0x138] sm:$0xff]  }
 0x323   : > { %v5764_v7 = vrot.slane %v5763_v6, 4  ;;  %v6132_v43 = vsel %vm12118_vm7, %v6130_v24, %v6131_v38  ;;  %v10231_v60 = vcombine.low %v14987_v1, %v15007_v18  ;;  %v5771_v50 = vshrl.u32 %v15011_v29, 16 }
 0x324   : > { %11184 = vmatpush3.bf16.msra.mxu1 %v11762_v30  ;;  %v5759_v51 = vsel %vm12124_vm8, %v5754_v2, %v5758_v36  ;;  %v10214_v55 = vcombine.low %v6129_v39, %v6132_v43  ;;  %v5774_v22 = vshll.u32 %v15011_v29, 16  ;;  %v5780_v35 = vshll.u32 %v15013_v48, 16  ;;  %v15055_v39 = vld [vmem:[#allocation2 + $0x4c] sm:$0xf] }
 0x325   : > { %11185 = vmatprep.subr.bf16.mxu1 %v11767_v41  ;;  %v5769_v3 = vsel %vm12124_vm8, %v5764_v7, %v5768_v57  ;;  %v5784_v1 = vshrl.u32 %v15013_v48, 16  ;;  %v5790_v44 = vshll.u32 %v5639_v21, 16  ;;  %v5773_v12 = vrot.slane %v5771_v50, 4  ;;  %v15043_v41 = vld [vmem:[#allocation2 + $0x58] sm:$0xf] }
 0x326   : > { %v10198_v17 = vcombine.low %v5759_v51, %v5769_v3  ;;  %v5776_v36 = vrot.slane %v5774_v22, 5  ;;  %v10135_v5 = vrot.slane %v6039_v49, 9  ;;  %v10182_v58 = vcombine.low %v14958_v63, %v14960_v42  ;;  %v15048_v57 = vld [vmem:[#allocation2 + $0x48] sm:$0xf]  ;;  %v11790_v63 = vld [vmem:[%s16891_s2 + $0x200] sm:$0xff]  }
 0x327   : > { %8539 = vmatmul.mubr.bf16.gmra.mrb[140].mxu1 %v10181_v54  ;;  %v5782_v9 = vrot.slane %v5780_v35, 5  ;;  %v5786_v4 = vrot.slane %v5784_v1, 4  ;;  %v6135_v30 = vrot.slane %v15013_v48, 5  ;;  %v5792_v11 = vrot.slane %v5790_v44, 5 }
 0x328   : > { %8708 = vmatmul.mubr.bf16.gmra.mrb[176].mxu0 %v10214_v55  ;;  %11186 = vmatpush3.bf16.msra.mxu1 %v11770_v34  ;;  %v5777_v54 = vor.u32 %v5776_v36, %v5773_v12  ;;  %v6403_v33 = vshrl.u32 %v6222_v10, 16  ;;  %v6406_v6 = vshll.u32 %v6222_v10, 16  ;;  %v6138_v2 = vrot.slane %v5639_v21, 5  ;;  %v5640_v34 = vld [vmem:[#allocation2 + $0x50] sm:$0x1] }
 0x329   : > { %8546 = vmatprep.mubr.bf16.mxu1 %v10198_v17  ;;  %8715 = vmatprep.mubr.bf16.mxu0 %v10231_v60  ;;  %v5787_v42 = vor.u32 %v5786_v4, %v5782_v9  ;;  %v6136_v24 = vsel %vm12118_vm7, %v10135_v5, %v6135_v30  ;;  %v6137_v38 = vrot.slane %v6135_v30, 4  ;;  %v10232_v50 = vcombine.low %v6222_v10, %v15043_v41  ;;  %v6040_v21 = vld [vmem:[#allocation2 + $0x48] sm:$0xe]  ;;  %v6224_v36 = vld [vmem:[#allocation2 + $0x60] sm:$0xf] }
 0x32a   : > { %11187 = vmatprep.subr.bf16.mxu1 %v11779_v19  ;;  %v5778_v7 = vrot.slane %v5777_v54, 4  ;;  %v15057_v43 = vrot.slane %v6403_v33, 4  ;;  %v15059_v60 = vrot.slane %v6406_v6, 5  ;;  %v5795_v22 = vshrl.u32 %v15048_v57, 16 }
 0x32b   : > { %v5788_v51 = vrot.slane %v5787_v42, 4  ;;  %v6139_v55 = vsel %vm12118_vm7, %v6137_v38, %v6138_v2  ;;  %v5798_v1 = vshll.u32 %v15048_v57, 16  ;;  %v5804_v44 = vshll.u32 %v15055_v39, 16  ;;  %v15078_v38 = vld [vmem:[#allocation2 + $0x54] sm:$0xf] }
 0x32c   : > { %11188 = vmatpush3.bf16.msra.mxu1 %v11782_v62  ;;  %v5783_v3 = vsel %vm12124_vm8, %v5778_v7, %v5782_v9  ;;  %v10215_v35 = vcombine.low %v6136_v24, %v6139_v55  ;;  %v5797_v17 = vrot.slane %v5795_v22, 4  ;;  %v5808_v12 = vshrl.u32 %v15055_v39, 16  ;;  %v15073_v9 = vld [vmem:[#allocation2 + $0x64] sm:$0xf]  ;;  %v15128_v55 = vld [vmem:[#allocation2 + $0x7c] sm:$0xf] }
 0x32d   : > { %11469 = vmatprep.subr.bf16.mxu1 %v11790_v63  ;;  %v5793_v19 = vsel %vm12124_vm8, %v5788_v51, %v5792_v11  ;;  %v5814_v10 = vshll.u32 %v5640_v34, 16  ;;  %v5800_v4 = vrot.slane %v5798_v1, 5  ;;  %v5806_v30 = vrot.slane %v5804_v44, 5  ;;  %17113 = vst [vmem:[#allocation19_spill] sm:$0xff] %v15128_v55 }
 0x32e   : > { %v10199_v5 = vcombine.low %v5783_v3, %v5793_v19  ;;  %v10136_v62 = vrot.slane %v6040_v21, 9  ;;  %v10183_v54 = vcombine.low %v15011_v29, %v15013_v48  ;;  %v5810_v33 = vrot.slane %v5808_v12, 4  ;;  %v15083_v29 = vld [vmem:[#allocation2 + $0x58] sm:$0xf]  ;;  %v6041_v19 = vld [vmem:[#allocation2 + $0x54] sm:$0xe] }
 0x32f   : > { %8547 = vmatmul.mubr.bf16.gmra.mrb[144].mxu1 %v10182_v58  ;;  %v5816_v6 = vrot.slane %v5814_v10, 5  ;;  %v6142_v11 = vrot.slane %v15055_v39, 5  ;;  %v5801_v63 = vor.u32 %v5800_v4, %v5797_v17  ;;  %v6145_v42 = vrot.slane %v5640_v34, 5 }
 0x330   : > { %8716 = vmatmul.mubr.bf16.gmra.mrb[180].mxu0 %v10215_v35  ;;  %8554 = vmatprep.mubr.bf16.mxu1 %v10199_v5  ;;  %v6427_v24 = vshrl.u32 %v6224_v36, 16  ;;  %v6430_v58 = vshll.u32 %v6224_v36, 16  ;;  %v5811_v2 = vor.u32 %v5810_v33, %v5806_v30  ;;  %v10233_v34 = vcombine.low %v6224_v36, %v15073_v9 }
 0x331   : > { %8723 = vmatprep.mubr.bf16.mxu0 %v10232_v50  ;;  %v6143_v7 = vsel %vm12118_vm7, %v10136_v62, %v6142_v11  ;;  %v6144_v51 = vrot.slane %v6142_v11, 4  ;;  %v5802_v48 = vrot.slane %v5801_v63, 4  ;;  %v5641_v50 = vld [vmem:[#allocation2 + $0x5c] sm:$0x1]  ;;  %v5819_v1 = vshrl.u32 %v15078_v38, 16 }
 0x332   : > { %v15085_v22 = vrot.slane %v6427_v24, 4  ;;  %v15087_v21 = vrot.slane %v6430_v58, 5  ;;  %v5812_v3 = vrot.slane %v5811_v2, 4  ;;  %v5822_v44 = vshll.u32 %v15078_v38, 16  ;;  %v6226_v11 = vld [vmem:[#allocation2 + $0x6c] sm:$0xf] }
 0x333   : > { %v6146_v35 = vsel %vm12118_vm7, %v6144_v51, %v6145_v42  ;;  %v5807_v17 = vsel %vm12124_vm8, %v5802_v48, %v5806_v30  ;;  %v5828_v10 = vshll.u32 %v15083_v29, 16  ;;  %v5832_v5 = vshrl.u32 %v15083_v29, 16  ;;  %v15100_v2 = vld [vmem:[#allocation2 + $0x70] sm:$0xf] }
 0x334   : > { %v10216_v12 = vcombine.low %v6143_v7, %v6146_v35  ;;  %v5817_v36 = vsel %vm12124_vm8, %v5812_v3, %v5816_v6  ;;  %v5821_v4 = vrot.slane %v5819_v1, 4  ;;  %v5824_v62 = vrot.slane %v5822_v44, 5  ;;  %v15105_v1 = vld [vmem:[#allocation2 + $0x60] sm:$0xf] }
 0x335   : > { %v5838_v33 = vshll.u32 %v5641_v50, 16  ;;  %v10200_v63 = vcombine.low %v5807_v17, %v5817_v36  ;;  %v5830_v42 = vrot.slane %v5828_v10, 5  ;;  %v5834_v24 = vrot.slane %v5832_v5, 4 }
 0x336   : > { %v10137_v58 = vrot.slane %v6041_v19, 9  ;;  %v10184_v30 = vcombine.low %v15048_v57, %v15055_v39  ;;  %v5825_v7 = vor.u32 %v5824_v62, %v5821_v4  ;;  %v6149_v48 = vrot.slane %v15083_v29, 5  ;;  %v15110_v57 = vld [vmem:[#allocation2 + $0x64] sm:$0xf] }
 0x337   : > { %8555 = vmatmul.mubr.bf16.gmra.mrb[148].mxu1 %v10183_v54  ;;  %v5840_v51 = vrot.slane %v5838_v33, 5  ;;  %v5835_v6 = vor.u32 %v5834_v24, %v5830_v42  ;;  %v6152_v3 = vrot.slane %v5641_v50, 5  ;;  %v6451_v35 = vshrl.u32 %v6226_v11, 16  ;;  %v5642_v50 = vld [vmem:[#allocation2 + $0x68] sm:$0x1] }
 0x338   : > { %8724 = vmatmul.mubr.bf16.gmra.mrb[184].mxu0 %v10216_v12  ;;  %8562 = vmatprep.mubr.bf16.mxu1 %v10200_v63  ;;  %v6454_v54 = vshll.u32 %v6226_v11, 16  ;;  %v5826_v44 = vrot.slane %v5825_v7, 4  ;;  %v6150_v19 = vsel %vm12118_vm7, %v10137_v58, %v6149_v48  ;;  %v6151_v17 = vrot.slane %v6149_v48, 4  ;;  %v6042_v63 = vld [vmem:[#allocation2 + $0x60] sm:$0xe] }
 0x339   : > { %8731 = vmatprep.mubr.bf16.mxu0 %v10233_v34  ;;  %v5836_v39 = vrot.slane %v5835_v6, 4  ;;  %v15112_v10 = vrot.slane %v6451_v35, 4  ;;  %v10234_v34 = vcombine.low %v6226_v11, %v15100_v2  ;;  %v5843_v62 = vshrl.u32 %v15105_v1, 16  ;;  %v6228_v48 = vld [vmem:[#allocation2 + $0x78] sm:$0xf] }
 0x33a   : > { %v15114_v5 = vrot.slane %v6454_v54, 5  ;;  %v5831_v36 = vsel %vm12124_vm8, %v5826_v44, %v5830_v42  ;;  %v6153_v4 = vsel %vm12118_vm7, %v6151_v17, %v6152_v3  ;;  %v5846_v33 = vshll.u32 %v15105_v1, 16 }
 0x33b   : > { %v5841_v24 = vsel %vm12124_vm8, %v5836_v39, %v5840_v51  ;;  %v10217_v58 = vcombine.low %v6150_v19, %v6153_v4  ;;  %v5852_v7 = vshll.u32 %v15110_v57, 16  ;;  %v5856_v11 = vshrl.u32 %v15110_v57, 16 }
 0x33c   : > { %v10201_v6 = vcombine.low %v5831_v36, %v5841_v24  ;;  %v5845_v35 = vrot.slane %v5843_v62, 4  ;;  %v5848_v42 = vrot.slane %v5846_v33, 5  ;;  %v5862_v54 = vshll.u32 %v5642_v50, 16  ;;  %v15132_v36 = vld [vmem:[#allocation2 + $0x6c] sm:$0xf] }
 0x33d   : > { %v5854_v3 = vrot.slane %v5852_v7, 5  ;;  %v5858_v44 = vrot.slane %v5856_v11, 4  ;;  %v10138_v17 = vrot.slane %v6042_v63, 9  ;;  %v6156_v12 = vrot.slane %v15110_v57, 5  ;;  %v15134_v63 = vld [vmem:[#allocation2 + $0x70] sm:$0xf] }
 0x33e   : > { %v10185_v51 = vcombine.low %v15078_v38, %v15083_v29  ;;  %v5849_v19 = vor.u32 %v5848_v42, %v5845_v35  ;;  %v5864_v39 = vrot.slane %v5862_v54, 5  ;;  %v6475_v4 = vshrl.u32 %v6228_v48, 16  ;;  %v5643_v29 = vld [vmem:[#allocation2 + $0x74] sm:$0x1]  ;;  %v6043_v42 = vld [vmem:[#allocation2 + $0x6c] sm:$0xe] }
 0x33f   : > { %8563 = vmatmul.mubr.bf16.gmra.mrb[152].mxu1 %v10184_v30  ;;  %v5859_v62 = vor.u32 %v5858_v44, %v5854_v3  ;;  %v6158_v30 = vrot.slane %v6156_v12, 4  ;;  %v6159_v33 = vrot.slane %v5642_v50, 5  ;;  %v6478_v24 = vshll.u32 %v6228_v48, 16 }
 0x340   : > { %8570 = vmatprep.mubr.bf16.mxu1 %v10201_v6  ;;  %8732 = vmatmul.mubr.bf16.gmra.mrb[188].mxu0 %v10217_v58  ;;  %v5850_v7 = vrot.slane %v5849_v19, 4  ;;  %v6157_v11 = vsel %vm12118_vm7, %v10138_v17, %v6156_v12  ;;  %v15138_v58 = vrot.slane %v6475_v4, 4  ;;  %v10235_v50 = vcombine.low %v6228_v48, %v15128_v55 }
 0x341   : > { %8739 = vmatprep.mubr.bf16.mxu0 %v10234_v34  ;;  %v5860_v6 = vrot.slane %v5859_v62, 4  ;;  %v6160_v35 = vsel %vm12118_vm7, %v6158_v30, %v6159_v33  ;;  %v15143_v34 = vrot.slane %v6478_v24, 5  ;;  %v5867_v12 = vshrl.u32 %v15132_v36, 16  ;;  %v6230_v33 = vld [vmem:[#allocation2 + $0x84] sm:$0xf] }
 0x342   : > { %v5855_v54 = vsel %vm12124_vm8, %v5850_v7, %v5854_v3  ;;  %v10218_v44 = vcombine.low %v6157_v11, %v6160_v35  ;;  %v5870_v17 = vshll.u32 %v15132_v36, 16  ;;  %v5876_v4 = vshll.u32 %v15134_v63, 16 }
 0x343   : > { %v5865_v19 = vsel %vm12124_vm8, %v5860_v6, %v5864_v39  ;;  %v5880_v62 = vshrl.u32 %v15134_v63, 16  ;;  %v5886_v30 = vshll.u32 %v5643_v29, 16  ;;  %v5869_v48 = vrot.slane %v5867_v12, 4  ;;  %v15163_v12 = vld [vmem:[#allocation2 + $0x7c] sm:$0xf] }
 0x344   : > { %v10202_v24 = vcombine.low %v5855_v54, %v5865_v19  ;;  %v5872_v38 = vrot.slane %v5870_v17, 5  ;;  %v10139_v49 = vrot.slane %v6043_v42, 9  ;;  %v10186_v3 = vcombine.low %v15105_v1, %v15110_v57  ;;  %v15159_v54 = vld [vmem:[#allocation2 + $0x78] sm:$0xf] }
 0x345   : > { %v5878_v7 = vrot.slane %v5876_v4, 5  ;;  %v5882_v11 = vrot.slane %v5880_v62, 4  ;;  %v6163_v35 = vrot.slane %v15134_v63, 5  ;;  %v5888_v6 = vrot.slane %v5886_v30, 5 }
 0x346   : > { %v5873_v39 = vor.u32 %v5872_v38, %v5869_v48  ;;  %v6499_v13 = vshrl.u32 %v6230_v33, 16  ;;  %v6502_v53 = vshll.u32 %v6230_v33, 16  ;;  %v6166_v57 = vrot.slane %v5643_v29, 5 }
 0x347   : > { %8571 = vmatmul.mubr.bf16.gmra.mrb[156].mxu1 %v10185_v51  ;;  %v5883_v42 = vor.u32 %v5882_v11, %v5878_v7  ;;  %v6164_v51 = vsel %vm12118_vm7, %v10139_v49, %v6163_v35  ;;  %v6165_v1 = vrot.slane %v6163_v35, 4  ;;  %v10236_v30 = vcombine.low %v6230_v33, %v15157_v59 }
 0x348   : > { %8578 = vmatprep.mubr.bf16.mxu1 %v10202_v24  ;;  %8740 = vmatmul.mubr.bf16.gmra.mrb[192].mxu0 %v10218_v44  ;;  %v5874_v17 = vrot.slane %v5873_v39, 4  ;;  %v15165_v19 = vrot.slane %v6499_v13, 4  ;;  %v15167_v4 = vrot.slane %v6502_v53, 5  ;;  %v5644_v44 = vld [vmem:[#allocation2 + $0x80] sm:$0x1]  ;;  %v5891_v49 = vshrl.u32 %v15159_v54, 16 }
 0x349   : > { %8747 = vmatprep.mubr.bf16.mxu0 %v10235_v50  ;;  %v5884_v62 = vrot.slane %v5883_v42, 4  ;;  %v6167_v50 = vsel %vm12118_vm7, %v6165_v1, %v6166_v57  ;;  %v6044_v24 = vld [vmem:[#allocation2 + $0x78] sm:$0xe]  ;;  %v5894_v13 = vshll.u32 %v15159_v54, 16  ;;  %v5900_v53 = vshll.u32 %v15163_v12, 16 }
 0x34a   : > { %17115 = vst [vmem:[#allocation22_spill] sm:$0xff] %v15165_v19  ;;  %17116 = vst [vmem:[#allocation23_spill] sm:$0xff] %v15167_v4  ;;  %v5879_v29 = vsel %vm12124_vm8, %v5874_v17, %v5878_v7  ;;  %v10219_v48 = vcombine.low %v6164_v51, %v6167_v50  ;;  %v5893_v35 = vrot.slane %v5891_v49, 4  ;;  %v5904_v39 = vshrl.u32 %v15163_v12, 16  ;;  %v6232_v1 = vld [vmem:[#allocation2 + $0x90] sm:$0xf] }
 0x34b   : > { %v5889_v11 = vsel %vm12124_vm8, %v5884_v62, %v5888_v6  ;;  %v5910_v42 = vshll.u32 %v5644_v44, 16  ;;  %v5896_v57 = vrot.slane %v5894_v13, 5  ;;  %v5902_v38 = vrot.slane %v5900_v53, 5  ;;  %v15276_v4 = vld [vmem:[#allocation2 + $0xa8] sm:$0xf] }
 0x34c   : > { %v10203_v33 = vcombine.low %v5879_v29, %v5889_v11  ;;  %v10140_v47 = vrot.slane %v6044_v24, 9  ;;  %v10187_v7 = vcombine.low %v15132_v36, %v15134_v63  ;;  %v5906_v51 = vrot.slane %v5904_v39, 4  ;;  %v15186_v29 = vld [vmem:[#allocation2 + $0x84] sm:$0xf]  ;;  %v15191_v63 = vld [vmem:[#allocation2 + $0x88] sm:$0xf] }
 0x34d   : > { %v5912_v17 = vrot.slane %v5910_v42, 5  ;;  %v6170_v50 = vrot.slane %v15163_v12, 5  ;;  %v5897_v6 = vor.u32 %v5896_v57, %v5893_v35  ;;  %v6173_v62 = vrot.slane %v5644_v44, 5  ;;  %v5645_v35 = vld [vmem:[#allocation2 + $0x8c] sm:$0x1] }
 0x34e   : > { %v6523_v49 = vshrl.u32 %v6232_v1, 16  ;;  %v6526_v59 = vshll.u32 %v6232_v1, 16  ;;  %v5907_v24 = vor.u32 %v5906_v51, %v5902_v38  ;;  %v10237_v44 = vcombine.low %v6232_v1, %v15181_v40  ;;  %v6850_v19 = vld [vmem:[#allocation2 + $0x20] sm:$0x1] }
 0x34f   : > { %8579 = vmatmul.mubr.bf16.gmra.mrb[160].mxu1 %v10186_v3  ;;  %v6171_v3 = vsel %vm12118_vm7, %v10140_v47, %v6170_v50  ;;  %v6172_v13 = vrot.slane %v6170_v50, 4  ;;  %v5898_v53 = vrot.slane %v5897_v6, 4  ;;  %v5915_v42 = vshrl.u32 %v15186_v29, 16 }
 0x350   : > { %8586 = vmatprep.mubr.bf16.mxu1 %v10203_v33  ;;  %8748 = vmatmul.mubr.bf16.gmra.mrb[196].mxu0 %v10219_v48  ;;  %v15193_v11 = vrot.slane %v6523_v49, 4  ;;  %v15195_v48 = vrot.slane %v6526_v59, 5  ;;  %v5908_v39 = vrot.slane %v5907_v24, 4  ;;  %v5918_v47 = vshll.u32 %v15186_v29, 16  ;;  %v6045_v33 = vld [vmem:[#allocation2 + $0x84] sm:$0xe] }
 0x351   : > { %8755 = vmatprep.mubr.bf16.mxu0 %v10236_v30  ;;  %v6174_v30 = vsel %vm12118_vm7, %v6172_v13, %v6173_v62  ;;  %v5903_v57 = vsel %vm12124_vm8, %v5898_v53, %v5902_v38  ;;  %v5924_v50 = vshll.u32 %v15191_v63, 16  ;;  %v5928_v59 = vshrl.u32 %v15191_v63, 16  ;;  %v6234_v62 = vld [vmem:[#allocation2 + $0x9c] sm:$0xf] }
 0x352   : > { %17118 = vst [vmem:[#allocation25_spill] sm:$0xff] %v15193_v11  ;;  %17119 = vst [vmem:[#allocation26_spill] sm:$0xff] %v15195_v48  ;;  %v10220_v51 = vcombine.low %v6171_v3, %v6174_v30  ;;  %v5913_v1 = vsel %vm12124_vm8, %v5908_v39, %v5912_v17  ;;  %v5917_v6 = vrot.slane %v5915_v42, 4  ;;  %v5920_v49 = vrot.slane %v5918_v47, 5  ;;  %v15208_v11 = vld [vmem:[#allocation2 + $0xa0] sm:$0xf] }
 0x353   : > { %v5934_v24 = vshll.u32 %v5645_v35, 16  ;;  %v10204_v13 = vcombine.low %v5903_v57, %v5913_v1  ;;  %v5926_v36 = vrot.slane %v5924_v50, 5  ;;  %v5930_v40 = vrot.slane %v5928_v59, 4  ;;  %17120 = vst [vmem:[#allocation29_spill] sm:$0xff] %v15208_v11  ;;  %v15213_v57 = vld [vmem:[#allocation2 + $0x90] sm:$0xf] }
 0x354   : > { %v10141_v48 = vrot.slane %v6045_v33, 9  ;;  %v10188_v38 = vcombine.low %v15159_v54, %v15163_v12  ;;  %v5921_v3 = vor.u32 %v5920_v49, %v5917_v6  ;;  %v6177_v30 = vrot.slane %v15191_v63, 5  ;;  %v15218_v12 = vld [vmem:[#allocation2 + $0x94] sm:$0xf] }
 0x355   : > { %v5936_v53 = vrot.slane %v5934_v24, 5  ;;  %v5931_v17 = vor.u32 %v5930_v40, %v5926_v36  ;;  %v6180_v39 = vrot.slane %v5645_v35, 5  ;;  %v6547_v42 = vshrl.u32 %v6234_v62, 16  ;;  %v5646_v35 = vld [vmem:[#allocation2 + $0x98] sm:$0x1] }
 0x356   : > { %v6550_v47 = vshll.u32 %v6234_v62, 16  ;;  %v5922_v33 = vrot.slane %v5921_v3, 4  ;;  %v6179_v50 = vrot.slane %v6177_v30, 4  ;;  %v10238_v40 = vcombine.low %v6234_v62, %v15208_v11  ;;  %v6046_v24 = vld [vmem:[#allocation2 + $0x90] sm:$0xe] }
 0x357   : > { %8587 = vmatmul.mubr.bf16.gmra.mrb[164].mxu1 %v10187_v7  ;;  %v6178_v7 = vsel %vm12118_vm7, %v10141_v48, %v6177_v30  ;;  %v5932_v59 = vrot.slane %v5931_v17, 4  ;;  %v15220_v1 = vrot.slane %v6547_v42, 4  ;;  %v5939_v48 = vshrl.u32 %v15213_v57, 16  ;;  %v15235_v17 = vld [vmem:[#allocation2 + $0xa8] sm:$0xf] }
 0x358   : > { %8594 = vmatprep.mubr.bf16.mxu1 %v10204_v13  ;;  %8756 = vmatmul.mubr.bf16.gmra.mrb[200].mxu0 %v10220_v51  ;;  %v15222_v51 = vrot.slane %v6550_v47, 5  ;;  %v6181_v6 = vsel %vm12118_vm7, %v6179_v50, %v6180_v39  ;;  %v5942_v49 = vshll.u32 %v15213_v57, 16  ;;  %v5948_v30 = vshll.u32 %v15218_v12, 16 }
 0x359   : > { %8763 = vmatprep.mubr.bf16.mxu0 %v10237_v44  ;;  %17121 = vst [vmem:[#allocation30_spill] sm:$0xff] %v15220_v1  ;;  %v5927_v44 = vsel %vm12124_vm8, %v5922_v33, %v5926_v36  ;;  %v5937_v13 = vsel %vm12124_vm8, %v5932_v59, %v5936_v53  ;;  %v10221_v3 = vcombine.low %v6178_v7, %v6181_v6  ;;  %v5952_v62 = vshrl.u32 %v15218_v12, 16  ;;  %v15243_v1 = vld [vmem:[#allocation2 + $0x9c] sm:$0xf] }
 0x35a   : > { %17122 = vst [vmem:[#allocation31_spill] sm:$0xff] %v15222_v51  ;;  %v10205_v42 = vcombine.low %v5927_v44, %v5937_v13  ;;  %v5941_v36 = vrot.slane %v5939_v48, 4  ;;  %v5944_v47 = vrot.slane %v5942_v49, 5  ;;  %v5958_v33 = vshll.u32 %v5646_v35, 16  ;;  %v15238_v51 = vld [vmem:[#allocation2 + $0xac] sm:$0xf] }
 0x35b   : > { %v5950_v39 = vrot.slane %v5948_v30, 5  ;;  %v5954_v50 = vrot.slane %v5952_v62, 4  ;;  %v10142_v54 = vrot.slane %v6046_v24, 9  ;;  %v6184_v11 = vrot.slane %v15218_v12, 5  ;;  %17123 = vst [vmem:[#allocation10_spill] sm:$0xff] %v15238_v51 }
 0x35c   : > { %v10189_v53 = vcombine.low %v15186_v29, %v15191_v63  ;;  %v5945_v7 = vor.u32 %v5944_v47, %v5941_v36  ;;  %v5960_v59 = vrot.slane %v5958_v33, 5  ;;  %v6571_v6 = vshrl.u32 %v15235_v17, 16  ;;  %v15246_v13 = vld [vmem:[#allocation2 + $0xa0] sm:$0xf]  ;;  %v5647_v62 = vld [vmem:[#allocation2 + $0xa4] sm:$0x1] }
 0x35d   : > { %v5955_v44 = vor.u32 %v5954_v50, %v5950_v39  ;;  %v6186_v48 = vrot.slane %v6184_v11, 4  ;;  %v6187_v49 = vrot.slane %v5646_v35, 5  ;;  %v6574_v24 = vshll.u32 %v15235_v17, 16  ;;  %v6047_v47 = vld [vmem:[#allocation2 + $0x9c] sm:$0xe] }
 0x35e   : > { %v6185_v29 = vsel %vm12118_vm7, %v10142_v54, %v6184_v11  ;;  %v15250_v63 = vrot.slane %v6571_v6, 4  ;;  %v10239_v35 = vcombine.low %v15235_v17, %v15238_v51  ;;  %v10190_v11 = vcombine.low %v15213_v57, %v15218_v12  ;;  %v15269_v17 = vld [vmem:[#allocation2 + $0xb4] sm:$0xf]  ;;  %v15272_v51 = vld [vmem:[#allocation2 + $0xb8] sm:$0xf] }
 0x35f   : > { %8595 = vmatmul.mubr.bf16.gmra.mrb[168].mxu1 %v10188_v38  ;;  %v5946_v38 = vrot.slane %v5945_v7, 4  ;;  %v5956_v36 = vrot.slane %v5955_v44, 4  ;;  %v5963_v54 = vshrl.u32 %v15243_v1, 16  ;;  %v5966_v33 = vshll.u32 %v15243_v1, 16  ;;  %17126 = vst [vmem:[#allocation35_spill] sm:$0xff] %v15272_v51 }
 0x360   : > { %8602 = vmatprep.mubr.bf16.mxu1 %v10205_v42  ;;  %8764 = vmatmul.mubr.bf16.gmra.mrb[204].mxu0 %v10221_v3  ;;  %17124 = vst [vmem:[#allocation34_spill] sm:$0xff] %v15250_v63  ;;  %v6188_v3 = vsel %vm12118_vm7, %v6186_v48, %v6187_v49  ;;  %v15255_v42 = vrot.slane %v6574_v24, 5  ;;  %v5972_v7 = vshll.u32 %v15246_v13, 16  ;;  %v5976_v6 = vshrl.u32 %v15246_v13, 16 }
 0x361   : > { %8771 = vmatprep.mubr.bf16.mxu0 %v10238_v40  ;;  %v5951_v40 = vsel %vm12124_vm8, %v5946_v38, %v5950_v39  ;;  %v5961_v50 = vsel %vm12124_vm8, %v5956_v36, %v5960_v59  ;;  %v5982_v44 = vshll.u32 %v5647_v62, 16  ;;  %v10222_v48 = vcombine.low %v6185_v29, %v6188_v3 }
 0x362   : > { %17125 = vst [vmem:[#allocation7_spill] sm:$0xff] %v15255_v42  ;;  %v5965_v49 = vrot.slane %v5963_v54, 4  ;;  %v5968_v39 = vrot.slane %v5966_v33, 5  ;;  %v10143_v24 = vrot.slane %v6047_v47, 9  ;;  %v10206_v38 = vcombine.low %v5951_v40, %v5961_v50  ;;  %v15280_v54 = vld [vmem:[#allocation2 + $0xac] sm:$0xf] }
 0x363   : > { %v5974_v57 = vrot.slane %v5972_v7, 5  ;;  %v5978_v12 = vrot.slane %v5976_v6, 4  ;;  %v6191_v30 = vrot.slane %v15246_v13, 5  ;;  %v5984_v36 = vrot.slane %v5982_v44, 5  ;;  %v5648_v6 = vld [vmem:[#allocation2 + $0xb0] sm:$0x1] }
 0x364   : > { %v5969_v59 = vor.u32 %v5968_v39, %v5965_v49  ;;  %v6595_v42 = vshrl.u32 %v15269_v17, 16  ;;  %v6598_v63 = vshll.u32 %v15269_v17, 16  ;;  %v6194_v40 = vrot.slane %v5647_v62, 5  ;;  %v6048_v62 = vld [vmem:[#allocation2 + $0xa8] sm:$0xe] }
 0x365   : > { %v5979_v29 = vor.u32 %v5978_v12, %v5974_v57  ;;  %v6192_v3 = vsel %vm12118_vm7, %v10143_v24, %v6191_v30  ;;  %v6193_v47 = vrot.slane %v6191_v30, 4  ;;  %v10240_v49 = vcombine.low %v15269_v17, %v15272_v51 }
 0x366   : > { %v15282_v33 = vrot.slane %v6595_v42, 4  ;;  %v15284_v50 = vrot.slane %v6598_v63, 5  ;;  %v5987_v30 = vshrl.u32 %v15276_v4, 16  ;;  %v10191_v63 = vcombine.low %v15243_v1, %v15246_v13 }
 0x367   : > { %8603 = vmatmul.mubr.bf16.gmra.mrb[172].mxu1 %v10189_v53  ;;  %v5970_v53 = vrot.slane %v5969_v59, 4  ;;  %v5980_v44 = vrot.slane %v5979_v29, 4  ;;  %v5990_v42 = vshll.u32 %v15276_v4, 16  ;;  %v5996_v39 = vshll.u32 %v15280_v54, 16  ;;  %v15301_v59 = vld [vmem:[#allocation2 + $0xc0] sm:$0xf] }
 0x368   : > { %8610 = vmatprep.mubr.bf16.mxu1 %v10206_v38  ;;  %8772 = vmatmul.mubr.bf16.gmra.mrb[208].mxu0 %v10222_v48  ;;  %17127 = vst [vmem:[#allocation36_spill] sm:$0xff] %v15282_v33  ;;  %17128 = vst [vmem:[#allocation27_spill] sm:$0xff] %v15284_v50  ;;  %v6195_v48 = vsel %vm12118_vm7, %v6193_v47, %v6194_v40  ;;  %v5989_v38 = vrot.slane %v5987_v30, 4  ;;  %v6000_v12 = vshrl.u32 %v15280_v54, 16  ;;  %v6006_v17 = vshll.u32 %v5648_v6, 16 }
 0x369   : > { %8779 = vmatprep.mubr.bf16.mxu0 %v10239_v35  ;;  %v5975_v35 = vsel %vm12124_vm8, %v5970_v53, %v5974_v57  ;;  %v5985_v24 = vsel %vm12124_vm8, %v5980_v44, %v5984_v36  ;;  %v10223_v29 = vcombine.low %v6192_v3, %v6195_v48  ;;  %v5992_v47 = vrot.slane %v5990_v42, 5  ;;  %v15303_v53 = vld [vmem:[#allocation2 + $0xc4] sm:$0xf]  ;;  %v15308_v33 = vld [vmem:[#allocation2 + $0xb4] sm:$0xf] }
 0x36a   : > { %v5998_v40 = vrot.slane %v5996_v39, 5  ;;  %v10144_v57 = vrot.slane %v6048_v62, 9  ;;  %17129 = vst [vmem:[#allocation28_spill] sm:$0xff] %v15303_v53  ;;  %v10207_v1 = vcombine.low %v5975_v35, %v5985_v24  ;;  %v6002_v13 = vrot.slane %v6000_v12, 4  ;;  %v15313_v42 = vld [vmem:[#allocation2 + $0xb8] sm:$0xf] }
 0x36b   : > { %v6008_v7 = vrot.slane %v6006_v17, 5  ;;  %v6198_v51 = vrot.slane %v15280_v54, 5  ;;  %v5993_v50 = vor.u32 %v5992_v47, %v5989_v38  ;;  %v6201_v36 = vrot.slane %v5648_v6, 5  ;;  %v5649_v38 = vld [vmem:[#allocation2 + $0xbc] sm:$0x1] }
 0x36c   : > { %v6619_v44 = vshrl.u32 %v15301_v59, 16  ;;  %v6622_v30 = vshll.u32 %v15301_v59, 16  ;;  %v6003_v3 = vor.u32 %v6002_v13, %v5998_v40  ;;  %v10241_v24 = vcombine.low %v15301_v59, %v15303_v53  ;;  %v6049_v47 = vld [vmem:[#allocation2 + $0xb4] sm:$0xe]  ;;  %v15329_v13 = vld [vmem:[#allocation2 + $0x18] sm:$0xf] }
 0x36d   : > { %v6199_v48 = vsel %vm12118_vm7, %v10144_v57, %v6198_v51  ;;  %v6200_v62 = vrot.slane %v6198_v51, 4  ;;  %v6011_v51 = vshrl.u32 %v15308_v33, 16  ;;  %v6020_v57 = vshll.u32 %v15313_v42, 16 }
 0x36e   : > { %v15315_v6 = vrot.slane %v6619_v44, 4  ;;  %v15317_v39 = vrot.slane %v6622_v30, 5  ;;  %v6004_v12 = vrot.slane %v6003_v3, 4  ;;  %v6030_v30 = vshll.u32 %v5649_v38, 16  ;;  %v15333_v3 = vld [vmem:[#allocation2 + $0x1c] sm:$0xf] }
 0x36f   : > { %8611 = vmatmul.mubr.bf16.gmra.mrb[176].mxu1 %v10190_v11  ;;  %v5994_v11 = vrot.slane %v5993_v50, 4  ;;  %v6202_v17 = vsel %vm12118_vm7, %v6200_v62, %v6201_v36  ;;  %v6013_v44 = vrot.slane %v6011_v51, 4  ;;  %v6022_v35 = vrot.slane %v6020_v57, 5 }
 0x370   : > { %8618 = vmatprep.mubr.bf16.mxu1 %v10207_v1  ;;  %8780 = vmatmul.mubr.bf16.gmra.mrb[212].mxu0 %v10223_v29  ;;  %17130 = vst [vmem:[#allocation38_spill] sm:$0xff] %v15315_v6  ;;  %17131 = vst [vmem:[#allocation9_spill] sm:$0xff] %v15317_v39  ;;  %v6014_v29 = vshll.u32 %v15308_v33, 16  ;;  %v6024_v1 = vshrl.u32 %v15313_v42, 16  ;;  %v6009_v59 = vsel %vm12124_vm8, %v6004_v12, %v6008_v7  ;;  %v10145_v39 = vrot.slane %v6049_v47, 9 }
 0x371   : > { %8787 = vmatprep.mubr.bf16.mxu0 %v10240_v49  ;;  %v5999_v50 = vsel %vm12124_vm8, %v5994_v11, %v5998_v40  ;;  %v10224_v49 = vcombine.low %v6199_v48, %v6202_v17  ;;  %v6032_v48 = vrot.slane %v6030_v30, 5  ;;  %v6205_v11 = vrot.slane %v15313_v42, 5  ;;  %v6642_v30 = vld [vmem:[#allocation2 + $0xc] sm:$0xe] }
 0x372   : > { %v6016_v36 = vrot.slane %v6014_v29, 5  ;;  %v10208_v62 = vcombine.low %v5999_v50, %v6009_v59  ;;  %v6026_v53 = vrot.slane %v6024_v1, 4  ;;  %v6208_v17 = vrot.slane %v5649_v38, 5  ;;  %v6242_v1 = vld [vmem:[#allocation2 + $0x14] sm:$0x1] }
 0x373   : > { %v6867_v55 = vshrl.u32 %v15329_v13, 16  ;;  %v6870_v7 = vshll.u32 %v15329_v13, 16  ;;  %v6876_v12 = vshll.u32 %v15333_v3, 16  ;;  %v6206_v29 = vsel %vm12118_vm7, %v10145_v39, %v6205_v11 }
 0x374   : > { %v6017_v40 = vor.u32 %v6016_v36, %v6013_v44  ;;  %v6027_v6 = vor.u32 %v6026_v53, %v6022_v35  ;;  %v6207_v47 = vrot.slane %v6205_v11, 4  ;;  %v6880_v50 = vshrl.u32 %v15333_v3, 16 }
 0x375   : > { %v6872_v53 = vrot.slane %v6870_v7, 5  ;;  %v6878_v57 = vrot.slane %v6876_v12, 5  ;;  %v6886_v36 = vshll.u32 %v6850_v19, 16  ;;  %v10192_v39 = vcombine.low %v15276_v4, %v15280_v54 }
 0x376   : > { %v6018_v51 = vrot.slane %v6017_v40, 4  ;;  %v6028_v38 = vrot.slane %v6027_v6, 4  ;;  %v6209_v44 = vsel %vm12118_vm7, %v6207_v47, %v6208_v17  ;;  %v6278_v7 = vshll.u32 %v6242_v1, 16 }
 0x377   : > { %8619 = vmatmul.mubr.bf16.gmra.mrb[180].mxu1 %v10191_v63  ;;  %v6869_v63 = vrot.slane %v6867_v55, 4  ;;  %v10225_v6 = vcombine.low %v6206_v29, %v6209_v44  ;;  %v6888_v12 = vrot.slane %v6886_v36, 5  ;;  %v10146_v19 = vrot.slane %v6642_v30, 9  ;;  %v6851_v29 = vld [vmem:[#allocation2 + $0x2c] sm:$0x1] }
 0x378   : > { %8626 = vmatprep.mubr.bf16.mxu1 %v10208_v62  ;;  %8788 = vmatmul.mubr.bf16.gmra.mrb[216].mxu0 %v10224_v49  ;;  %v6023_v59 = vsel %vm12124_vm8, %v6018_v51, %v6022_v35  ;;  %v6882_v49 = vrot.slane %v6880_v50, 4  ;;  %v15350_v62 = vld [vmem:[#allocation2 + $0x24] sm:$0xf]  ;;  %v10193_v35 = vcombine.low %v15308_v33, %v15313_v42  ;;  %v11857_v51 = vld [vmem:[#allocation2 + $0x10] sm:$0xf]  ;;  %v6280_v54 = vrot.slane %v6278_v7, 5 }
 0x379   : > { %8795 = vmatprep.mubr.bf16.mxu0 %v10241_v24  ;;  %v6033_v24 = vsel %vm12124_vm8, %v6028_v38, %v6032_v48  ;;  %v6873_v55 = vor.u32 %v6872_v53, %v6869_v63  ;;  %v6708_v47 = vrot.slane %v11857_v51, 5  ;;  %v15354_v50 = vld [vmem:[#allocation2 + $0x28] sm:$0xf]  ;;  %v6711_v48 = vrot.slane %v6242_v1, 5  ;;  %v15371_v51 = vld [vmem:[#allocation2 + $0x20] sm:$0x1] }
 0x37a   : > { %v10209_v40 = vcombine.low %v6023_v59, %v6033_v24  ;;  %v6883_v11 = vor.u32 %v6882_v49, %v6878_v57  ;;  %v6891_v38 = vshrl.u32 %v15350_v62, 16  ;;  %v10274_v33 = vcombine.low %v15329_v13, %v15333_v3  ;;  %v7251_v59 = vld [vmem:[#allocation2 + $0x24] sm:$0xe] }
 0x37b   : > { %v6874_v17 = vrot.slane %v6873_v55, 4  ;;  %v6710_v53 = vrot.slane %v6708_v47, 4  ;;  %v6894_v42 = vshll.u32 %v15350_v62, 16  ;;  %v6900_v49 = vshll.u32 %v15354_v50, 16 }
 0x37c   : > { %v6884_v4 = vrot.slane %v6883_v11, 4  ;;  %v6893_v1 = vrot.slane %v6891_v38, 4  ;;  %v6904_v36 = vshrl.u32 %v15354_v50, 16  ;;  %v6910_v24 = vshll.u32 %v6851_v29, 16 }
 0x37d   : > { %v6879_v63 = vsel %vm12124_vm8, %v6874_v17, %v6878_v57  ;;  %v6712_v57 = vsel %vm12118_vm7, %v6710_v53, %v6711_v48  ;;  %v6709_v13 = vsel %vm12118_vm7, %v10146_v19, %v6708_v47  ;;  %v6902_v3 = vrot.slane %v6900_v49, 5  ;;  %v15380_v47 = vld [vmem:[#allocation2 + $0x30] sm:$0xf] }
 0x37e   : > { %v6889_v44 = vsel %vm12124_vm8, %v6884_v4, %v6888_v12  ;;  %v6906_v55 = vrot.slane %v6904_v36, 4  ;;  %v10258_v11 = vcombine.low %v6709_v13, %v6712_v57  ;;  %v6912_v17 = vrot.slane %v6910_v24, 5 }
 0x37f   : > { %8627 = vmatmul.mubr.bf16.gmra.mrb[184].mxu1 %v10192_v39  ;;  %v10290_v30 = vcombine.low %v6879_v63, %v6889_v44  ;;  %v6896_v39 = vrot.slane %v6894_v42, 5  ;;  %v7323_v12 = vrot.slane %v15354_v50, 5  ;;  %v7326_v38 = vrot.slane %v6851_v29, 5 }
 0x380   : > { %8634 = vmatprep.mubr.bf16.mxu1 %v10209_v40  ;;  %8796 = vmatmul.mubr.bf16.gmra.mrb[220].mxu0 %v10225_v6  ;;  %v10163_v6 = vrot.slane %v7251_v59, 9  ;;  %v6643_v40 = vld [vmem:[#allocation2 + $0x18] sm:$0xe]  ;;  %v6907_v4 = vor.u32 %v6906_v55, %v6902_v3  ;;  %v6271_v48 = vsel %vm12124_vm8, %v14805_v14, %v14785_v25  ;;  %v6281_v19 = vsel %vm12124_vm8, %v14815_v26, %v6280_v54  ;;  %v15387_v25 = vld [vmem:[#allocation2 + $0x34] sm:$0xf] }
 0x381   : > { %8997 = vmatprep.mubr.bf16.mxu0 %v10290_v30  ;;  %v6897_v7 = vor.u32 %v6896_v39, %v6893_v1  ;;  %v7325_v42 = vrot.slane %v7323_v12, 4  ;;  %v10147_v59 = vrot.slane %v6643_v40, 9  ;;  %v10242_v29 = vcombine.low %v6271_v48, %v6281_v19  ;;  %v11858_v1 = vld [vmem:[#allocation2 + $0x1c] sm:$0xf]  ;;  %v6852_v54 = vld [vmem:[#allocation2 + $0x38] sm:$0x1] }
 0x382   : > { %v15384_v53 = vsel %vm12118_vm7, %v10163_v6, %v7323_v12  ;;  %v6908_v44 = vrot.slane %v6907_v4, 4  ;;  %v6715_v49 = vrot.slane %v11858_v1, 5  ;;  %v6718_v36 = vrot.slane %v15371_v51, 5  ;;  %v6644_v48 = vld [vmem:[#allocation2 + $0x24] sm:$0xe] }
 0x383   : > { %v6898_v63 = vrot.slane %v6897_v7, 4  ;;  %v15393_v26 = vsel %vm12118_vm7, %v7325_v42, %v7326_v38  ;;  %v6915_v30 = vshrl.u32 %v15380_v47, 16  ;;  %v6918_v57 = vshll.u32 %v15380_v47, 16  ;;  %v15411_v38 = vld [vmem:[#allocation2 + $0x2c] sm:$0x1] }
 0x384   : > { %v6913_v39 = vsel %vm12124_vm8, %v6908_v44, %v6912_v17  ;;  %v6717_v24 = vrot.slane %v6715_v49, 4  ;;  %v10275_v13 = vcombine.low %v15350_v62, %v15354_v50  ;;  %v6924_v40 = vshll.u32 %v15387_v25, 16 }
 0x385   : > { %v6903_v14 = vsel %vm12124_vm8, %v6898_v63, %v6902_v3  ;;  %v6917_v55 = vrot.slane %v6915_v30, 4  ;;  %v6920_v6 = vrot.slane %v6918_v57, 5  ;;  %v6289_v17 = vor.u32 %v14807_v56, %v14796_v8  ;;  %v11793_v8 = vld [vmem:[%s16891_s2 + $0x208] sm:$0xff]  }
 0x386   : > { %v10291_v3 = vcombine.low %v6903_v14, %v6913_v39  ;;  %v6719_v7 = vsel %vm12118_vm7, %v6717_v24, %v6718_v36  ;;  %v6716_v12 = vsel %vm12118_vm7, %v10147_v59, %v6715_v49  ;;  %v6926_v62 = vrot.slane %v6924_v40, 5  ;;  %v15419_v49 = vld [vmem:[#allocation2 + $0x3c] sm:$0xf]  ;;  %v11859_v57 = vld [vmem:[#allocation2 + $0x28] sm:$0xf] }
 0x387   : > { %8635 = vmatmul.mubr.bf16.gmra.mrb[188].mxu1 %v10193_v35  ;;  %v6921_v4 = vor.u32 %v6920_v6, %v6917_v55  ;;  %v6292_v50 = vshll.u32 %v11858_v1, 16  ;;  %v10259_v19 = vcombine.low %v6716_v12, %v6719_v7  ;;  %v6290_v42 = vrot.slane %v6289_v17, 4  ;;  %v6853_v40 = vld [vmem:[#allocation2 + $0x44] sm:$0x1] }
 0x388   : > { %8836 = vmatprep.mubr.bf16.mxu1 %v10258_v11  ;;  %8998 = vmatmul.mubr.bf16.vlgmr.msra.gmra.mrb[224].mxu0 %v10274_v33  ;;  %v6928_v33 = vshrl.u32 %v15387_v25, 16  ;;  %v6934_v11 = vshll.u32 %v6852_v54, 16  ;;  %v17132_v44 = vshrl.u32 %v14783_v16, 16  ;;  %v6302_v59 = vshll.u32 %v15371_v51, 16  ;;  %v11860_v7 = vld [vmem:[%s16891_s2 + $0x200] sm:$0xff]  }
 0x389   : > { %9005 = vmatprep.mubr.bf16.mxu0 %v10291_v3  ;;  %v6922_v56 = vrot.slane %v6921_v4, 4  ;;  %v6294_v54 = vrot.slane %v6292_v50, 5  ;;  %v10148_v30 = vrot.slane %v6644_v48, 9  ;;  %v6722_v39 = vrot.slane %v11859_v57, 5  ;;  %v15422_v3 = vld [vmem:[#allocation2 + $0x40] sm:$0xf] }
 0x38a   : > { %v6930_v63 = vrot.slane %v6928_v33, 4  ;;  %v6298_v36 = vrot.slane %v17132_v44, 4  ;;  %v6936_v14 = vrot.slane %v6934_v11, 5  ;;  %v6725_v24 = vrot.slane %v15411_v38, 5 }
 0x38b   : > { %v6927_v16 = vsel %vm12124_vm8, %v6922_v56, %v6926_v62  ;;  %v6295_v55 = vsel %vm12124_vm8, %v6290_v42, %v6294_v54  ;;  %v10276_v51 = vcombine.low %v15380_v47, %v15387_v25  ;;  %v6304_v11 = vrot.slane %v6302_v59, 5  ;;  %v11796_v25 = vld [vmem:[%s16891_s2 + $0x210] sm:$0xff]  }
 0x38c   : > { %v6931_v1 = vor.u32 %v6930_v63, %v6926_v62  ;;  %v6299_v6 = vor.u32 %v6298_v36, %v6294_v54  ;;  %v6939_v17 = vshrl.u32 %v15419_v49, 16  ;;  %v6942_v4 = vshll.u32 %v15419_v49, 16  ;;  %v7253_v63 = vld [vmem:[#allocation2 + $0x3c] sm:$0xe] }
 0x38d   : > { %v6948_v62 = vshll.u32 %v15422_v3, 16  ;;  %v6952_v47 = vshrl.u32 %v15422_v3, 16  ;;  %v6723_v36 = vsel %vm12118_vm7, %v10148_v30, %v6722_v39  ;;  %v6313_v30 = vor.u32 %v14864_v45, %v14858_v32 }
 0x38e   : > { %v6932_v33 = vrot.slane %v6931_v1, 4  ;;  %v6300_v12 = vrot.slane %v6299_v6, 4  ;;  %v6944_v56 = vrot.slane %v6942_v4, 5  ;;  %v7340_v4 = vrot.slane %v6853_v40, 5 }
 0x38f   : > { %8837 = vmatmul.mubr.bf16.vlgmr.msra.gmra.mrb[192].mxu1 %v10242_v29  ;;  %v6724_v29 = vrot.slane %v6722_v39, 4  ;;  %v6950_v1 = vrot.slane %v6948_v62, 5  ;;  %v6954_v6 = vrot.slane %v6952_v47, 4  ;;  %v6316_v39 = vshll.u32 %v11859_v57, 16 }
 0x390   : > { %11470 = vmatpush3.bf16.msra.mxu1 %v11860_v7  ;;  %8844 = vmatprep.mubr.bf16.mxu1 %v10259_v19  ;;  %v6937_v50 = vsel %vm12124_vm8, %v6932_v33, %v6936_v14  ;;  %v6941_v19 = vrot.slane %v6939_v17, 4  ;;  %v6305_v44 = vsel %vm12124_vm8, %v6300_v12, %v6304_v11  ;;  %v7337_v33 = vrot.slane %v15422_v3, 5 }
 0x391   : > { %9006 = vmatmul.mubr.bf16.gmra.mrb[228].mxu0 %v10275_v13  ;;  %11471 = vmatprep.subr.bf16.mxu1 %v11793_v8  ;;  %v6726_v48 = vsel %vm12118_vm7, %v6724_v29, %v6725_v24  ;;  %v6958_v13 = vshll.u32 %v6853_v40, 16  ;;  %v10292_v42 = vcombine.low %v6927_v16, %v6937_v50  ;;  %v10243_v54 = vcombine.low %v6295_v55, %v6305_v44  ;;  %v6645_v29 = vld [vmem:[#allocation2 + $0x30] sm:$0xe]  ;;  %v11799_v16 = vld [vmem:[%s16891_s2 + $0x218] sm:$0xff]   ;;  %v15469_v40 = vld [vmem:[#allocation2 + $0x48] sm:$0xf] }
 0x392   : > { %v10260_v59 = vcombine.low %v6723_v36, %v6726_v48  ;;  %v6945_v14 = vor.u32 %v6944_v56, %v6941_v19  ;;  %v10165_v24 = vrot.slane %v7253_v63, 9  ;;  %v6955_v11 = vor.u32 %v6954_v6, %v6950_v1  ;;  %v15457_v19 = vld [vmem:[#allocation2 + $0x38] sm:$0x1]  ;;  %v15478_v36 = vld [vmem:[#allocation2 + $0x4c] sm:$0xf] }
 0x393   : > { %9013 = vmatprep.mubr.bf16.mxu0 %v10292_v42  ;;  %v6960_v7 = vrot.slane %v6958_v13, 5  ;;  %v17133_v55 = vshrl.u32 %v14841_v0, 16  ;;  %v7339_v12 = vrot.slane %v7337_v33, 4  ;;  %v6326_v62 = vshll.u32 %v15411_v38, 16  ;;  %v11861_v38 = vld [vmem:[#allocation2 + $0x34] sm:$0xf] }
 0x394   : > { %11472 = vmatpush3.bf16.msra.mxu1 %v11793_v8  ;;  %v6946_v17 = vrot.slane %v6945_v14, 4  ;;  %v6956_v47 = vrot.slane %v6955_v11, 4  ;;  %v6314_v50 = vrot.slane %v6313_v30, 4  ;;  %v6318_v48 = vrot.slane %v6316_v39, 5  ;;  %v6854_v6 = vld [vmem:[#allocation2 + $0x50] sm:$0x1] }
 0x395   : > { %11473 = vmatprep.subr.bf16.mxu1 %v11796_v25  ;;  %v6322_v8 = vrot.slane %v17133_v55, 4  ;;  %v10149_v13 = vrot.slane %v6645_v29, 9  ;;  %v15463_v0 = vsel %vm12118_vm7, %v10165_v24, %v7337_v33  ;;  %v15467_v45 = vsel %vm12118_vm7, %v7339_v12, %v7340_v4  ;;  %v6646_v4 = vld [vmem:[#allocation2 + $0x3c] sm:$0xe] }
 0x396   : > { %v6951_v32 = vsel %vm12124_vm8, %v6946_v17, %v6950_v1  ;;  %v6729_v57 = vrot.slane %v11861_v38, 5  ;;  %v6328_v44 = vrot.slane %v6326_v62, 5  ;;  %v6732_v1 = vrot.slane %v15457_v19, 5 }
 0x397   : > { %8845 = vmatmul.mubr.bf16.gmra.mrb[196].mxu1 %v10243_v54  ;;  %v6323_v42 = vor.u32 %v6322_v8, %v6318_v48  ;;  %v6319_v54 = vsel %vm12124_vm8, %v6314_v50, %v6318_v48  ;;  %v6966_v33 = vshll.u32 %v15469_v40, 16  ;;  %v10277_v11 = vcombine.low %v15419_v49, %v15422_v3 }
 0x398   : > { %8852 = vmatprep.mubr.bf16.mxu1 %v10260_v59  ;;  %11474 = vmatpush3.bf16.msra.mxu1 %v11796_v25  ;;  %v6961_v25 = vsel %vm12124_vm8, %v6956_v47, %v6960_v7  ;;  %v6731_v59 = vrot.slane %v6729_v57, 4  ;;  %v6730_v24 = vsel %vm12118_vm7, %v10149_v13, %v6729_v57  ;;  %v6963_v7 = vshrl.u32 %v15469_v40, 16 }
 0x399   : > { %9014 = vmatmul.mubr.bf16.gmra.mrb[232].mxu0 %v10276_v51  ;;  %11475 = vmatprep.subr.bf16.mxu1 %v11799_v16  ;;  %v11803_v51 = vld [vmem:[%s16891_s2 + $0x220] sm:$0xff]   ;;  %v10293_v56 = vcombine.low %v6951_v32, %v6961_v25  ;;  %v6324_v14 = vrot.slane %v6323_v42, 4  ;;  %v6972_v30 = vshll.u32 %v15478_v36, 16  ;;  %v6976_v39 = vshrl.u32 %v15478_v36, 16 }
 0x39a   : > { %v6733_v29 = vsel %vm12118_vm7, %v6731_v59, %v6732_v1  ;;  %v6965_v8 = vrot.slane %v6963_v7, 4  ;;  %v6968_v17 = vrot.slane %v6966_v33, 5  ;;  %v6982_v12 = vshll.u32 %v6854_v6, 16  ;;  %v15502_v25 = vld [vmem:[#allocation2 + $0x44] sm:$0x1] }
 0x39b   : > { %9021 = vmatprep.mubr.bf16.mxu0 %v10293_v56  ;;  %v6329_v55 = vsel %vm12124_vm8, %v6324_v14, %v6328_v44  ;;  %v10261_v47 = vcombine.low %v6730_v24, %v6733_v29  ;;  %v6974_v50 = vrot.slane %v6972_v30, 5  ;;  %v6978_v49 = vrot.slane %v6976_v39, 4  ;;  %v15514_v7 = vld [vmem:[#allocation2 + $0x58] sm:$0xf]  ;;  %v6855_v39 = vld [vmem:[#allocation2 + $0x5c] sm:$0x1] }
 0x39c   : > { %11476 = vmatpush3.bf16.msra.mxu1 %v11799_v16  ;;  %v11806_v16 = vld [vmem:[%s16891_s2 + $0x228] sm:$0xff]   ;;  %v10244_v62 = vcombine.low %v6319_v54, %v6329_v55  ;;  %v6969_v3 = vor.u32 %v6968_v17, %v6965_v8  ;;  %v6337_v48 = vor.u32 %v14947_v20, %v14917_v52  ;;  %v6340_v13 = vshll.u32 %v11861_v38, 16  ;;  %v15505_v54 = vld [vmem:[#allocation2 + $0x40] sm:$0xf]  ;;  %v11809_v52 = vld [vmem:[%s16891_s2 + $0x230] sm:$0xff]  }
 0x39d   : > { %11477 = vmatprep.subr.bf16.mxu1 %v11803_v51  ;;  %v17134_v32 = vshrl.u32 %v14890_v27, 16  ;;  %v6979_v42 = vor.u32 %v6978_v49, %v6974_v50  ;;  %v6350_v44 = vshll.u32 %v15457_v19, 16  ;;  %v10150_v56 = vrot.slane %v6646_v4, 9  ;;  %v7255_v4 = vld [vmem:[#allocation2 + $0x54] sm:$0xe] }
 0x39e   : > { %v6736_v59 = vrot.slane %v15505_v54, 5  ;;  %v6970_v27 = vrot.slane %v6969_v3, 4  ;;  %v6984_v20 = vrot.slane %v6982_v12, 5  ;;  %v6338_v38 = vrot.slane %v6337_v48, 4 }
 0x39f   : > { %v6346_v57 = vrot.slane %v17134_v32, 4  ;;  %8853 = vmatmul.mubr.bf16.gmra.mrb[200].mxu1 %v10244_v62  ;;  %v6342_v1 = vrot.slane %v6340_v13, 5  ;;  %v6980_v6 = vrot.slane %v6979_v42, 4  ;;  %v6352_v14 = vrot.slane %v6350_v44, 5  ;;  %v11812_v62 = vld [vmem:[%s16891_s2 + $0x238] sm:$0xff]  }
 0x3a0   : > { %11478 = vmatpush3.bf16.msra.mxu1 %v11803_v51  ;;  %8860 = vmatprep.mubr.bf16.mxu1 %v10261_v47  ;;  %v15511_v51 = vld [vmem:[#allocation2 + $0x54] sm:$0xf]  ;;  %v6738_v19 = vrot.slane %v6736_v59, 4  ;;  %v6739_v24 = vrot.slane %v15502_v25, 5  ;;  %v6975_v33 = vsel %vm12124_vm8, %v6970_v27, %v6974_v50  ;;  %v6737_v30 = vsel %vm12118_vm7, %v10150_v56, %v6736_v59 }
 0x3a1   : > { %9022 = vmatmul.mubr.bf16.gmra.mrb[236].mxu0 %v10277_v11  ;;  %11479 = vmatprep.subr.bf16.mxu1 %v11806_v16  ;;  %v6343_v29 = vsel %vm12124_vm8, %v6338_v38, %v6342_v1  ;;  %v6347_v11 = vor.u32 %v6346_v57, %v6342_v1  ;;  %v6985_v55 = vsel %vm12124_vm8, %v6980_v6, %v6984_v20  ;;  %v6987_v17 = vshrl.u32 %v15511_v51, 16 }
 0x3a2   : > { %v10278_v8 = vcombine.low %v15469_v40, %v15478_v36  ;;  %v6990_v12 = vshll.u32 %v15511_v51, 16  ;;  %v10294_v47 = vcombine.low %v6975_v33, %v6985_v55  ;;  %v6996_v49 = vshll.u32 %v15514_v7, 16  ;;  %v15554_v55 = vld [vmem:[#allocation2 + $0x60] sm:$0xf] }
 0x3a3   : > { %v6348_v50 = vrot.slane %v6347_v11, 4  ;;  %v6989_v3 = vrot.slane %v6987_v17, 4  ;;  %v7000_v40 = vshrl.u32 %v15514_v7, 16  ;;  %v7006_v36 = vshll.u32 %v6855_v39, 16  ;;  %v6647_v11 = vld [vmem:[#allocation2 + $0x48] sm:$0xe] }
 0x3a4   : > { %11480 = vmatpush3.bf16.msra.mxu1 %v11806_v16  ;;  %v6740_v16 = vsel %vm12118_vm7, %v6738_v19, %v6739_v24  ;;  %v6992_v48 = vrot.slane %v6990_v12, 5  ;;  %9029 = vmatprep.mubr.bf16.mxu0 %v10294_v47  ;;  %v6998_v32 = vrot.slane %v6996_v49, 5  ;;  %v10167_v57 = vrot.slane %v7255_v4, 9  ;;  %v15540_v19 = vld [vmem:[#allocation2 + $0x50] sm:$0x1] }
 0x3a5   : > { %11481 = vmatprep.subr.bf16.mxu1 %v11809_v52  ;;  %v6353_v13 = vsel %vm12124_vm8, %v6348_v50, %v6352_v14  ;;  %v7351_v42 = vrot.slane %v15514_v7, 5  ;;  %v10262_v56 = vcombine.low %v6737_v30, %v6740_v16  ;;  %v7002_v27 = vrot.slane %v7000_v40, 4  ;;  %v11863_v47 = vld [vmem:[#allocation2 + $0x4c] sm:$0xf]  ;;  %v15561_v49 = vld [vmem:[#allocation2 + $0x64] sm:$0xf] }
 0x3a6   : > { %v10245_v44 = vcombine.low %v6343_v29, %v6353_v13  ;;  %v6993_v59 = vor.u32 %v6992_v48, %v6989_v3  ;;  %v7008_v20 = vrot.slane %v7006_v36, 5  ;;  %v7354_v1 = vrot.slane %v6855_v39, 5  ;;  %v6856_v48 = vld [vmem:[#allocation2 + $0x68] sm:$0x1] }
 0x3a7   : > { %v7353_v38 = vrot.slane %v7351_v42, 4  ;;  %v6361_v6 = vor.u32 %v14970_v61, %v14964_v15  ;;  %v7003_v24 = vor.u32 %v7002_v27, %v6998_v32  ;;  %v6364_v33 = vshll.u32 %v15505_v54, 16 }
 0x3a8   : > { %11482 = vmatpush3.bf16.msra.mxu1 %v11809_v52  ;;  %v6994_v14 = vrot.slane %v6993_v59, 4  ;;  %v17135_v52 = vshrl.u32 %v14942_v28, 16  ;;  %v15547_v30 = vsel %vm12118_vm7, %v10167_v57, %v7351_v42  ;;  %v6374_v61 = vshll.u32 %v15502_v25, 16 }
 0x3a9   : > { %9030 = vmatmul.mubr.bf16.gmra.mrb[240].mxu0 %v10278_v8  ;;  %11483 = vmatprep.subr.bf16.mxu1 %v11812_v62  ;;  %v15551_v39 = vsel %vm12118_vm7, %v7353_v38, %v7354_v1  ;;  %v6362_v15 = vrot.slane %v6361_v6, 4  ;;  %v7004_v54 = vrot.slane %v7003_v24, 4  ;;  %v6366_v17 = vrot.slane %v6364_v33, 5  ;;  %v6648_v24 = vld [vmem:[#allocation2 + $0x54] sm:$0xe] }
 0x3aa   : > { %8861 = vmatmul.mubr.bf16.gmra.mrb[204].mxu1 %v10245_v44  ;;  %v6370_v29 = vrot.slane %v17135_v52, 4  ;;  %v6999_v28 = vsel %vm12124_vm8, %v6994_v14, %v6998_v32  ;;  %v6376_v12 = vrot.slane %v6374_v61, 5  ;;  %v10151_v4 = vrot.slane %v6647_v11, 9 }
 0x3ab   : > { %8868 = vmatprep.mubr.bf16.mxu1 %v10262_v56  ;;  %v6743_v50 = vrot.slane %v11863_v47, 5  ;;  %v6746_v16 = vrot.slane %v15540_v19, 5  ;;  %v7009_v25 = vsel %vm12124_vm8, %v7004_v54, %v7008_v20  ;;  %v10279_v3 = vcombine.low %v15511_v51, %v15514_v7 }
 0x3ac   : > { %11484 = vmatpush3.bf16.msra.mxu1 %v11812_v62  ;;  %v6371_v62 = vor.u32 %v6370_v29, %v6366_v17  ;;  %v7011_v40 = vshrl.u32 %v15554_v55, 16  ;;  %v10295_v36 = vcombine.low %v6999_v28, %v7009_v25  ;;  %v6367_v13 = vsel %vm12124_vm8, %v6362_v15, %v6366_v17  ;;  %v15581_v15 = vld [vmem:[#allocation2 + $0x5c] sm:$0x1]  ;;  %v15586_v17 = vld [vmem:[#allocation2 + $0x6c] sm:$0xf] }
 0x3ad   : > { %v6745_v32 = vrot.slane %v6743_v50, 4  ;;  %v7014_v57 = vshll.u32 %v15554_v55, 16  ;;  %v7020_v56 = vshll.u32 %v15561_v49, 16  ;;  %v7024_v59 = vshrl.u32 %v15561_v49, 16 }
 0x3ae   : > { %v6372_v42 = vrot.slane %v6371_v62, 4  ;;  %v7013_v44 = vrot.slane %v7011_v40, 4  ;;  %9037 = vmatprep.mubr.bf16.mxu0 %v10295_v36  ;;  %v7030_v27 = vshll.u32 %v6856_v48, 16  ;;  %v6385_v20 = vor.u32 %v15019_v31, %v15017_v46 }
 0x3af   : > { %v6747_v51 = vsel %vm12118_vm7, %v6745_v32, %v6746_v16  ;;  %v7016_v7 = vrot.slane %v7014_v57, 5  ;;  %v6744_v1 = vsel %vm12118_vm7, %v10151_v4, %v6743_v50  ;;  %v7022_v6 = vrot.slane %v7020_v56, 5  ;;  %v11864_v16 = vld [vmem:[#allocation2 + $0x58] sm:$0xf] }
 0x3b0   : > { %v6377_v38 = vsel %vm12124_vm8, %v6372_v42, %v6376_v12  ;;  %v7026_v14 = vrot.slane %v7024_v59, 4  ;;  %v10263_v52 = vcombine.low %v6744_v1, %v6747_v51  ;;  %v7032_v11 = vrot.slane %v7030_v27, 5  ;;  %v7257_v59 = vld [vmem:[#allocation2 + $0x6c] sm:$0xe] }
 0x3b1   : > { %9038 = vmatmul.mubr.bf16.gmra.mrb[244].mxu0 %v10279_v3  ;;  %v10246_v33 = vcombine.low %v6367_v13, %v6377_v38  ;;  %v7017_v29 = vor.u32 %v7016_v7, %v7013_v44  ;;  %v6388_v28 = vshll.u32 %v11863_v47, 16  ;;  %v17136_v46 = vshrl.u32 %v15007_v18, 16  ;;  %v15589_v47 = vld [vmem:[#allocation2 + $0x70] sm:$0xf]  ;;  %v6857_v44 = vld [vmem:[#allocation2 + $0x74] sm:$0x1] }
 0x3b2   : > { %v7027_v61 = vor.u32 %v7026_v14, %v7022_v6  ;;  %v6398_v54 = vshll.u32 %v15540_v19, 16  ;;  %v6386_v4 = vrot.slane %v6385_v20, 4  ;;  %v10152_v50 = vrot.slane %v6648_v24, 9 }
 0x3b3   : > { %v6394_v31 = vrot.slane %v17136_v46, 4  ;;  %8869 = vmatmul.mubr.bf16.gmra.mrb[208].mxu1 %v10246_v33  ;;  %v7018_v12 = vrot.slane %v7017_v29, 4  ;;  %v6750_v25 = vrot.slane %v11864_v16, 5  ;;  %v6390_v3 = vrot.slane %v6388_v28, 5 }
 0x3b4   : > { %8876 = vmatprep.mubr.bf16.mxu1 %v10263_v52  ;;  %v7028_v62 = vrot.slane %v7027_v61, 4  ;;  %v6400_v48 = vrot.slane %v6398_v54, 5  ;;  %v6753_v40 = vrot.slane %v15581_v15, 5  ;;  %v10280_v36 = vcombine.low %v15554_v55, %v15561_v49 }
 0x3b5   : > { %v7023_v18 = vsel %vm12124_vm8, %v7018_v12, %v7022_v6  ;;  %v6752_v19 = vrot.slane %v6750_v25, 4  ;;  %v7035_v13 = vshrl.u32 %v15586_v17, 16  ;;  %v6395_v57 = vor.u32 %v6394_v31, %v6390_v3 }
 0x3b6   : > { %v7033_v32 = vsel %vm12124_vm8, %v7028_v62, %v7032_v11  ;;  %v6751_v42 = vsel %vm12118_vm7, %v10152_v50, %v6750_v25  ;;  %v7038_v56 = vshll.u32 %v15586_v17, 16  ;;  %v7044_v55 = vshll.u32 %v15589_v47, 16  ;;  %v6649_v62 = vld [vmem:[#allocation2 + $0x60] sm:$0xe] }
 0x3b7   : > { %v10296_v51 = vcombine.low %v7023_v18, %v7033_v32  ;;  %v6754_v7 = vsel %vm12118_vm7, %v6752_v19, %v6753_v40  ;;  %v7037_v27 = vrot.slane %v7035_v13, 4  ;;  %v6391_v49 = vsel %vm12124_vm8, %v6386_v4, %v6390_v3  ;;  %v15625_v13 = vld [vmem:[#allocation2 + $0x78] sm:$0xf] }
 0x3b8   : > { %v6396_v20 = vrot.slane %v6395_v57, 4  ;;  %v7040_v38 = vrot.slane %v7038_v56, 5  ;;  %v7048_v1 = vshrl.u32 %v15589_v47, 16  ;;  %v7046_v6 = vrot.slane %v7044_v55, 5 }
 0x3b9   : > { %9045 = vmatprep.mubr.bf16.mxu0 %v10296_v51  ;;  %v7054_v14 = vshll.u32 %v6857_v44, 16  ;;  %v10169_v24 = vrot.slane %v7257_v59, 9  ;;  %v7365_v33 = vrot.slane %v15589_v47, 5  ;;  %v10264_v29 = vcombine.low %v6751_v42, %v6754_v7  ;;  %v15631_v59 = vld [vmem:[#allocation2 + $0x7c] sm:$0xf] }
 0x3ba   : > { %v6401_v52 = vsel %vm12124_vm8, %v6396_v20, %v6400_v48  ;;  %9046 = vmatmul.mubr.bf16.gmra.mrb[248].mxu0 %v10280_v36  ;;  %v7041_v11 = vor.u32 %v7040_v38, %v7037_v27  ;;  %v7050_v61 = vrot.slane %v7048_v1, 4  ;;  %v7368_v54 = vrot.slane %v6857_v44, 5  ;;  %v15623_v36 = vld [vmem:[#allocation2 + $0x68] sm:$0x1]  ;;  %v6858_v7 = vld [vmem:[#allocation2 + $0x80] sm:$0x1] }
 0x3bb   : > { %v10247_v28 = vcombine.low %v6391_v49, %v6401_v52  ;;  %v7056_v46 = vrot.slane %v7054_v14, 5  ;;  %v7367_v31 = vrot.slane %v7365_v33, 4  ;;  %v6409_v50 = vor.u32 %v15059_v60, %v15057_v43 }
 0x3bc   : > { %v7042_v12 = vrot.slane %v7041_v11, 4  ;;  %v7051_v4 = vor.u32 %v7050_v61, %v7046_v6  ;;  %v6412_v25 = vshll.u32 %v11864_v16, 16  ;;  %v15614_v3 = vsel %vm12118_vm7, %v10169_v24, %v7365_v33 }
 0x3bd   : > { %8877 = vmatmul.mubr.bf16.gmra.mrb[212].mxu1 %v10247_v28  ;;  %17137 = vst [vmem:[#allocation4_spill] sm:$0xff] %v15614_v3  ;;  %v15618_v48 = vsel %vm12118_vm7, %v7367_v31, %v7368_v54  ;;  %v17139_v40 = vshrl.u32 %v15043_v41, 16  ;;  %v6422_v19 = vshll.u32 %v15581_v15, 16  ;;  %v6410_v32 = vrot.slane %v6409_v50, 4  ;;  %v11865_v41 = vld [vmem:[#allocation2 + $0x64] sm:$0xf] }
 0x3be   : > { %17138 = vst [vmem:[#allocation33_spill] sm:$0xff] %v15618_v48  ;;  %8884 = vmatprep.mubr.bf16.mxu1 %v10264_v29  ;;  %v7047_v43 = vsel %vm12124_vm8, %v7042_v12, %v7046_v6  ;;  %v7052_v60 = vrot.slane %v7051_v4, 4  ;;  %v6414_v57 = vrot.slane %v6412_v25, 5  ;;  %v10153_v44 = vrot.slane %v6649_v62, 9  ;;  %v15654_v50 = vld [vmem:[#allocation2 + $0x74] sm:$0x1] }
 0x3bf   : > { %v6418_v18 = vrot.slane %v17139_v40, 4  ;;  %v6424_v42 = vrot.slane %v6422_v19, 5  ;;  %v6757_v56 = vrot.slane %v11865_v41, 5  ;;  %v6760_v51 = vrot.slane %v15623_v36, 5  ;;  %v6650_v25 = vld [vmem:[#allocation2 + $0x6c] sm:$0xe] }
 0x3c0   : > { %v7057_v15 = vsel %vm12124_vm8, %v7052_v60, %v7056_v46  ;;  %v7059_v27 = vshrl.u32 %v15625_v13, 16  ;;  %v7062_v55 = vshll.u32 %v15625_v13, 16  ;;  %v6415_v20 = vsel %vm12124_vm8, %v6410_v32, %v6414_v57 }
 0x3c1   : > { %v10297_v49 = vcombine.low %v7047_v43, %v7057_v15  ;;  %v6419_v38 = vor.u32 %v6418_v18, %v6414_v57  ;;  %v10281_v1 = vcombine.low %v15586_v17, %v15589_v47  ;;  %v6759_v6 = vrot.slane %v6757_v56, 4  ;;  %v15656_v43 = vld [vmem:[#allocation2 + $0x84] sm:$0xf]  ;;  %v15663_v15 = vld [vmem:[#allocation2 + $0x88] sm:$0xf] }
 0x3c2   : > { %v7061_v14 = vrot.slane %v7059_v27, 4  ;;  %v7064_v24 = vrot.slane %v7062_v55, 5  ;;  %v7068_v33 = vshll.u32 %v15631_v59, 16  ;;  %v6758_v29 = vsel %vm12118_vm7, %v10153_v44, %v6757_v56  ;;  %v11866_v56 = vld [vmem:[#allocation2 + $0x70] sm:$0xf] }
 0x3c3   : > { %9053 = vmatprep.mubr.bf16.mxu0 %v10297_v49  ;;  %v6420_v52 = vrot.slane %v6419_v38, 4  ;;  %v7072_v11 = vshrl.u32 %v15631_v59, 16  ;;  %v7078_v61 = vshll.u32 %v6858_v7, 16  ;;  %v6761_v28 = vsel %vm12118_vm7, %v6759_v6, %v6760_v51 }
 0x3c4   : > { %9054 = vmatmul.mubr.bf16.gmra.mrb[252].mxu0 %v10281_v1  ;;  %v7065_v46 = vor.u32 %v7064_v24, %v7061_v14  ;;  %v7070_v31 = vrot.slane %v7068_v33, 5  ;;  %v6433_v17 = vor.u32 %v15087_v21, %v15085_v22  ;;  %v10265_v54 = vcombine.low %v6758_v29, %v6761_v28  ;;  %v7259_v24 = vld [vmem:[#allocation2 + $0x84] sm:$0xe] }
 0x3c5   : > { %v6425_v47 = vsel %vm12124_vm8, %v6420_v52, %v6424_v42  ;;  %v7074_v12 = vrot.slane %v7072_v11, 4  ;;  %v10282_v4 = vcombine.low %v15625_v13, %v15631_v59  ;;  %v6436_v19 = vshll.u32 %v11865_v41, 16 }
 0x3c6   : > { %v10248_v62 = vcombine.low %v6415_v20, %v6425_v47  ;;  %v7066_v40 = vrot.slane %v7065_v46, 4  ;;  %v6434_v18 = vrot.slane %v6433_v17, 4  ;;  %v7080_v32 = vrot.slane %v7078_v61, 5  ;;  %v6859_v20 = vld [vmem:[#allocation2 + $0x8c] sm:$0x1] }
 0x3c7   : > { %v7075_v60 = vor.u32 %v7074_v12, %v7070_v31  ;;  %v17140_v22 = vshrl.u32 %v15073_v9, 16  ;;  %v6446_v57 = vshll.u32 %v15623_v36, 16  ;;  %v6438_v42 = vrot.slane %v6436_v19, 5  ;;  %v6651_v19 = vld [vmem:[#allocation2 + $0x78] sm:$0xe] }
 0x3c8   : > { %8885 = vmatmul.mubr.bf16.gmra.mrb[216].mxu1 %v10248_v62  ;;  %v7071_v13 = vsel %vm12124_vm8, %v7066_v40, %v7070_v31  ;;  %v10154_v44 = vrot.slane %v6650_v25, 9  ;;  %v6764_v59 = vrot.slane %v11866_v56, 5  ;;  %v6767_v51 = vrot.slane %v15654_v50, 5 }
 0x3c9   : > { %v6442_v21 = vrot.slane %v17140_v22, 4  ;;  %8892 = vmatprep.mubr.bf16.mxu1 %v10265_v54  ;;  %v7076_v41 = vrot.slane %v7075_v60, 4  ;;  %v7083_v7 = vshrl.u32 %v15656_v43, 16  ;;  %v7086_v9 = vshll.u32 %v15656_v43, 16 }
 0x3ca   : > { %v6439_v36 = vsel %vm12124_vm8, %v6434_v18, %v6438_v42  ;;  %v6448_v55 = vrot.slane %v6446_v57, 5  ;;  %v6766_v49 = vrot.slane %v6764_v59, 4  ;;  %v7092_v14 = vshll.u32 %v15663_v15, 16 }
 0x3cb   : > { %v6443_v27 = vor.u32 %v6442_v21, %v6438_v42  ;;  %v7081_v38 = vsel %vm12124_vm8, %v7076_v41, %v7080_v32  ;;  %v7085_v1 = vrot.slane %v7083_v7, 4  ;;  %v7088_v6 = vrot.slane %v7086_v9, 5  ;;  %v15698_v9 = vld [vmem:[#allocation2 + $0x80] sm:$0x1] }
 0x3cc   : > { %v10298_v33 = vcombine.low %v7071_v13, %v7081_v38  ;;  %v6768_v29 = vsel %vm12118_vm7, %v6766_v49, %v6767_v51  ;;  %v7096_v11 = vshrl.u32 %v15663_v15, 16  ;;  %v6765_v61 = vsel %vm12118_vm7, %v10154_v44, %v6764_v59  ;;  %v15691_v59 = vld [vmem:[#allocation2 + $0x90] sm:$0xf] }
 0x3cd   : > { %v6444_v52 = vrot.slane %v6443_v27, 4  ;;  %v7089_v28 = vor.u32 %v7088_v6, %v7085_v1  ;;  %v7094_v46 = vrot.slane %v7092_v14, 5  ;;  %v7102_v31 = vshll.u32 %v6859_v20, 16 }
 0x3ce   : > { %9061 = vmatprep.mubr.bf16.mxu0 %v10298_v33  ;;  %v7098_v47 = vrot.slane %v7096_v11, 4  ;;  %v10171_v54 = vrot.slane %v7259_v24, 9  ;;  %v7379_v12 = vrot.slane %v15663_v15, 5  ;;  %v10266_v62 = vcombine.low %v6765_v61, %v6768_v29 }
 0x3cf   : > { %v6449_v17 = vsel %vm12124_vm8, %v6444_v52, %v6448_v55  ;;  %9062 = vmatmul.mubr.bf16.gmra.mrb[0].mxu0 %v10282_v4  ;;  %v7090_v40 = vrot.slane %v7089_v28, 4  ;;  %v7104_v18 = vrot.slane %v7102_v31, 5  ;;  %v7382_v21 = vrot.slane %v6859_v20, 5  ;;  %v15702_v55 = vld [vmem:[#allocation2 + $0x94] sm:$0xf] }
 0x3d0   : > { %v10249_v25 = vcombine.low %v6439_v36, %v6449_v17  ;;  %v7099_v60 = vor.u32 %v7098_v47, %v7094_v46  ;;  %v15683_v32 = vsel %vm12118_vm7, %v10171_v54, %v7379_v12  ;;  %v7381_v22 = vrot.slane %v7379_v12, 4 }
 0x3d1   : > { %17141 = vst [vmem:[#allocation8_spill] sm:$0xff] %v15683_v32  ;;  %v7095_v57 = vsel %vm12124_vm8, %v7090_v40, %v7094_v46  ;;  %v6457_v13 = vor.u32 %v15114_v5, %v15112_v10  ;;  %v6460_v42 = vshll.u32 %v11866_v56, 16  ;;  %v17142_v4 = vshrl.u32 %v15100_v2, 16  ;;  %v11867_v2 = vld [vmem:[#allocation2 + $0x7c] sm:$0xf] }
 0x3d2   : > { %8893 = vmatmul.mubr.bf16.gmra.mrb[220].mxu1 %v10249_v25  ;;  %v7100_v41 = vrot.slane %v7099_v60, 4  ;;  %v15695_v51 = vsel %vm12118_vm7, %v7381_v22, %v7382_v21  ;;  %v6470_v7 = vshll.u32 %v15654_v50, 16  ;;  %v10155_v36 = vrot.slane %v6651_v19, 9  ;;  %v6860_v50 = vld [vmem:[#allocation2 + $0x98] sm:$0x1] }
 0x3d3   : > { %v6466_v44 = vrot.slane %v17142_v4, 4  ;;  %8900 = vmatprep.mubr.bf16.mxu1 %v10266_v62  ;;  %17143 = vst [vmem:[#allocation32_spill] sm:$0xff] %v15695_v51  ;;  %v6458_v5 = vrot.slane %v6457_v13, 4  ;;  %v6462_v56 = vrot.slane %v6460_v42, 5  ;;  %v6771_v27 = vrot.slane %v11867_v2, 5 }
 0x3d4   : > { %v7105_v49 = vsel %vm12124_vm8, %v7100_v41, %v7104_v18  ;;  %v10283_v20 = vcombine.low %v15656_v43, %v15663_v15  ;;  %v6472_v38 = vrot.slane %v6470_v7, 5  ;;  %v7107_v1 = vshrl.u32 %v15691_v59, 16  ;;  %v6652_v21 = vld [vmem:[#allocation2 + $0x84] sm:$0xe]  ;;  %v15735_v41 = vld [vmem:[#allocation2 + $0x9c] sm:$0xf] }
 0x3d5   : > { %v15709_v6 = vpop.f32.mrb[160].mxu0  ;;  %v10299_v14 = vcombine.low %v7095_v57, %v7105_v49  ;;  %v6463_v24 = vsel %vm12124_vm8, %v6458_v5, %v6462_v56  ;;  %v6467_v33 = vor.u32 %v6466_v44, %v6462_v56  ;;  %v6774_v52 = vrot.slane %v15698_v9, 5  ;;  %v15733_v44 = vld [vmem:[#allocation2 + $0x8c] sm:$0x1] }
 0x3d6   : > { %v15714_v29 = vpop.f32.mrb[161].mxu0  ;;  %v6773_v11 = vrot.slane %v6771_v27, 4  ;;  %v7109_v61 = vrot.slane %v7107_v1, 4  ;;  %v7110_v28 = vshll.u32 %v15691_v59, 16  ;;  %v7116_v43 = vshll.u32 %v15702_v55, 16 }
 0x3d7   : > { %v15718_v15 = vpop.f32.mrb[162].mxu0  ;;  %9069 = vmatprep.mubr.bf16.mxu0 %v10299_v14  ;;  %v6468_v46 = vrot.slane %v6467_v33, 4  ;;  %v6772_v31 = vsel %vm12118_vm7, %v10155_v36, %v6771_v27  ;;  %v7120_v17 = vshrl.u32 %v15702_v55, 16  ;;  %v7126_v47 = vshll.u32 %v6860_v50, 16  ;;  %v15744_v50 = vld [vmem:[#allocation2 + $0xa0] sm:$0xf] }
 0x3d8   : > { %v15723_v54 = vpop.f32.mrb[163].mxu0  ;;  %v6775_v12 = vsel %vm12118_vm7, %v6773_v11, %v6774_v52  ;;  %9070 = vmatmul.mubr.bf16.gmra.mrb[4].mxu0 %v10283_v20  ;;  %v7112_v25 = vrot.slane %v7110_v28, 5  ;;  %v7118_v62 = vrot.slane %v7116_v43, 5  ;;  %v6481_v40 = vor.u32 %v15143_v34, %v15138_v58  ;;  %v17144_v58 = vld [vmem:[#allocation19_spill] sm:$0xff]  ;;  %v6861_v11 = vld [vmem:[#allocation2 + $0xa4] sm:$0x1] }
 0x3d9   : > { %v6473_v18 = vsel %vm12124_vm8, %v6468_v46, %v6472_v38  ;;  %v10267_v19 = vcombine.low %v6772_v31, %v6775_v12  ;;  %v7122_v60 = vrot.slane %v7120_v17, 4  ;;  %v10284_v22 = vcombine.low %v15691_v59, %v15702_v55  ;;  %v15740_v55 = vld [vmem:[#allocation2 + $0x88] sm:$0xf]  ;;  %v7261_v31 = vld [vmem:[#allocation2 + $0x9c] sm:$0xe] }
 0x3da   : > { %v10250_v57 = vcombine.low %v6463_v24, %v6473_v18  ;;  %v7113_v13 = vor.u32 %v7112_v25, %v7109_v61  ;;  %v6482_v42 = vrot.slane %v6481_v40, 4  ;;  %v6484_v4 = vshll.u32 %v11867_v2, 16 }
 0x3db   : > { %v7123_v7 = vor.u32 %v7122_v60, %v7118_v62  ;;  %v7128_v36 = vrot.slane %v7126_v47, 5  ;;  %v17145_v34 = vshrl.u32 %v17144_v58, 16  ;;  %v6494_v56 = vshll.u32 %v15698_v9, 16 }
 0x3dc   : > { %8901 = vmatmul.mubr.bf16.gmra.mrb[224].mxu1 %v10250_v57  ;;  %v7114_v27 = vrot.slane %v7113_v13, 4  ;;  %v6486_v49 = vrot.slane %v6484_v4, 5  ;;  %v10156_v59 = vrot.slane %v6652_v21, 9  ;;  %v6778_v20 = vrot.slane %v15740_v55, 5 }
 0x3dd   : > { %v6490_v5 = vrot.slane %v17145_v34, 4  ;;  %8908 = vmatprep.mubr.bf16.mxu1 %v10267_v19  ;;  %v7124_v2 = vrot.slane %v7123_v7, 4  ;;  %v6781_v38 = vrot.slane %v15733_v44, 5  ;;  %v7131_v1 = vshrl.u32 %v15735_v41, 16 }
 0x3de   : > { %v7134_v14 = vshll.u32 %v15735_v41, 16  ;;  %v7119_v9 = vsel %vm12124_vm8, %v7114_v27, %v7118_v62  ;;  %v6487_v24 = vsel %vm12124_vm8, %v6482_v42, %v6486_v49  ;;  %v6496_v52 = vrot.slane %v6494_v56, 5 }
 0x3df   : > { %v6491_v33 = vor.u32 %v6490_v5, %v6486_v49  ;;  %v7129_v61 = vsel %vm12124_vm8, %v7124_v2, %v7128_v36  ;;  %v6780_v28 = vrot.slane %v6778_v20, 4  ;;  %v7133_v43 = vrot.slane %v7131_v1, 4 }
 0x3e0   : > { %v7136_v46 = vrot.slane %v7134_v14, 5  ;;  %v10300_v47 = vcombine.low %v7119_v9, %v7129_v61  ;;  %v7140_v25 = vshll.u32 %v15744_v50, 16  ;;  %v7144_v62 = vshrl.u32 %v15744_v50, 16 }
 0x3e1   : > { %v6492_v12 = vrot.slane %v6491_v33, 4  ;;  %v6779_v19 = vsel %vm12118_vm7, %v10156_v59, %v6778_v20  ;;  %v6782_v60 = vsel %vm12118_vm7, %v6780_v28, %v6781_v38  ;;  %v7150_v57 = vshll.u32 %v6861_v11, 16  ;;  %v6653_v28 = vld [vmem:[#allocation2 + $0x90] sm:$0xe] }
 0x3e2   : > { %v10965_v17 = vpop.f32.mrb[128].mxu1  ;;  %v7137_v21 = vor.u32 %v7136_v46, %v7133_v43  ;;  %9077 = vmatprep.mubr.bf16.mxu0 %v10300_v47  ;;  %v7142_v7 = vrot.slane %v7140_v25, 5  ;;  %v7146_v36 = vrot.slane %v7144_v62, 4  ;;  %v10173_v58 = vrot.slane %v7261_v31, 9  ;;  %v15797_v25 = vld [vmem:[#allocation2 + $0x98] sm:$0x1] }
 0x3e3   : > { %v10966_v40 = vpop.f32.mrb[129].mxu1  ;;  %v15756_v18 = vpop.f32.mrb[164].mxu0  ;;  %v6497_v4 = vsel %vm12124_vm8, %v6492_v12, %v6496_v52  ;;  %v10268_v27 = vcombine.low %v6779_v19, %v6782_v60  ;;  %9078 = vmatmul.mubr.bf16.gmra.mrb[8].mxu0 %v10284_v22  ;;  %v7393_v59 = vrot.slane %v15744_v50, 5  ;;  %v7152_v38 = vrot.slane %v7150_v57, 5  ;;  %v17146_v22 = vld [vmem:[#allocation22_spill] sm:$0xff]  ;;  %v17147_v52 = vld [vmem:[#allocation23_spill] sm:$0xff] }
 0x3e4   : > { %v15762_v13 = vpop.f32.mrb[130].mxu1  ;;  %v15764_v42 = vpop.f32.mrb[165].mxu0  ;;  %v10251_v56 = vcombine.low %v6487_v24, %v6497_v4  ;;  %v7138_v49 = vrot.slane %v7137_v21, 4  ;;  %v7147_v2 = vor.u32 %v7146_v36, %v7142_v7  ;;  %v7396_v1 = vrot.slane %v6861_v11, 5  ;;  %v17148_v11 = vld [vmem:[#allocation20_spill] sm:$0xff]  ;;  %v17156_v19 = vld [vmem:[#allocation26_spill] sm:$0xff] }
 0x3e5   : > { %v15768_v34 = vpop.f32.mrb[131].mxu1  ;;  %v15770_v5 = vpop.f32.mrb[166].mxu0  ;;  %v11079_v14 = vadd.f32 %v15714_v29, %v15709_v6  ;;  %v7395_v33 = vrot.slane %v7393_v59, 4  ;;  %v10285_v24 = vcombine.low %v15735_v41, %v15744_v50  ;;  %v6505_v61 = vor.u32 %v17147_v52, %v17146_v22  ;;  %v15807_v57 = vld [vmem:[#allocation2 + $0xac] sm:$0xf] }
 0x3e6   : > { %v15773_v20 = vpop.f32.mrb[167].mxu0  ;;  %8909 = vmatmul.mubr.bf16.gmra.mrb[228].mxu1 %v10251_v56  ;;  %v7143_v9 = vsel %vm12124_vm8, %v7138_v49, %v7142_v7  ;;  %v7148_v43 = vrot.slane %v7147_v2, 4  ;;  %v6508_v46 = vshll.u32 %v15740_v55, 16  ;;  %v17149_v31 = vshrl.u32 %v17148_v11, 16  ;;  %v15799_v55 = vld [vmem:[#allocation2 + $0xa8] sm:$0xf] }
 0x3e7   : > { %8916 = vmatprep.mubr.bf16.mxu1 %v10268_v27  ;;  %v6518_v6 = vshll.u32 %v15733_v44, 16  ;;  %v15789_v29 = vsel %vm12118_vm7, %v10173_v58, %v7393_v59  ;;  %v15793_v41 = vsel %vm12118_vm7, %v7395_v33, %v7396_v1  ;;  %v6506_v50 = vrot.slane %v6505_v61, 4  ;;  %17152 = vst [vmem:[#allocation21_spill] sm:$0xff] %v15807_v57  ;;  %v11869_v36 = vld [vmem:[#allocation2 + $0x94] sm:$0xf] }
 0x3e8   : > { %v6514_v47 = vrot.slane %v17149_v31, 4  ;;  %17150 = vst [vmem:[#allocation37_spill] sm:$0xff] %v15789_v29  ;;  %17151 = vst [vmem:[#allocation15_spill] sm:$0xff] %v15793_v41  ;;  %v11082_v12 = vadd.f32 %v15723_v54, %v15718_v15  ;;  %v7153_v44 = vsel %vm12124_vm8, %v7148_v43, %v7152_v38  ;;  %v6510_v60 = vrot.slane %v6508_v46, 5  ;;  %v15813_v27 = vld [vmem:[#allocation2 + $0xb0] sm:$0x1] }
 0x3e9   : > { %v10157_v21 = vrot.slane %v6653_v28, 9  ;;  %v10301_v15 = vcombine.low %v7143_v9, %v7153_v44  ;;  %v6520_v54 = vrot.slane %v6518_v6, 5  ;;  %v6785_v58 = vrot.slane %v11869_v36, 5  ;;  %17153 = vst [vmem:[#allocation11_spill] sm:$0xff] %v15813_v27 }
 0x3ea   : > { %v15801_v62 = vpop.f32.mrb[132].mxu1  ;;  %v10967_v56 = vadd.f32 %v10966_v40, %v10965_v17  ;;  %v6515_v2 = vor.u32 %v6514_v47, %v6510_v60  ;;  %v6788_v38 = vrot.slane %v15797_v25, 5  ;;  %v7155_v1 = vshrl.u32 %v15799_v55, 16 }
 0x3eb   : > { %v15809_v4 = vpop.f32.mrb[133].mxu1  ;;  %v15811_v7 = vpop.f32.mrb[168].mxu0  ;;  %v7158_v33 = vshll.u32 %v15799_v55, 16  ;;  %9085 = vmatprep.mubr.bf16.mxu0 %v10301_v15  ;;  %v6511_v17 = vsel %vm12124_vm8, %v6506_v50, %v6510_v60  ;;  %v6787_v40 = vrot.slane %v6785_v58, 4  ;;  %v7164_v61 = vshll.u32 %v15807_v57, 16 }
 0x3ec   : > { %v15815_v49 = vpop.f32.mrb[134].mxu1  ;;  %v15817_v59 = vpop.f32.mrb[169].mxu0  ;;  %v15828_v52 = vadd.f32 %v11079_v14, %v10967_v56  ;;  %v6516_v43 = vrot.slane %v6515_v2, 4  ;;  %9086 = vmatmul.mubr.bf16.gmra.mrb[12].mxu0 %v10285_v24  ;;  %v7157_v46 = vrot.slane %v7155_v1, 4  ;;  %v7168_v31 = vshrl.u32 %v15807_v57, 16 }
 0x3ed   : > { %v15822_v22 = vpop.f32.mrb[135].mxu1  ;;  %v15824_v9 = vpop.f32.mrb[170].mxu0  ;;  %v7160_v11 = vrot.slane %v7158_v33, 5  ;;  %v6786_v47 = vsel %vm12118_vm7, %v10157_v21, %v6785_v58  ;;  %v6789_v6 = vsel %vm12118_vm7, %v6787_v40, %v6788_v38  ;;  %v7166_v50 = vrot.slane %v7164_v61, 5  ;;  %v15845_v58 = vld [vmem:[#allocation2 + $0xa4] sm:$0x1] }
 0x3ee   : > { %17154 = vst [vmem:[#allocation12_spill] sm:$0xff] %v15828_v52  ;;  %v15831_v28 = vpop.f32.mrb[171].mxu0  ;;  %v7174_v14 = vshll.u32 %v15813_v27, 16  ;;  %v6521_v44 = vsel %vm12124_vm8, %v6516_v43, %v6520_v54  ;;  %v10269_v60 = vcombine.low %v6786_v47, %v6789_v6  ;;  %v7170_v56 = vrot.slane %v7168_v31, 4  ;;  %v17155_v61 = vld [vmem:[#allocation25_spill] sm:$0xff] }
 0x3ef   : > { %v7161_v15 = vor.u32 %v7160_v11, %v7157_v46  ;;  %v10252_v24 = vcombine.low %v6511_v17, %v6521_v44  ;;  %v10970_v1 = vadd.f32 %v15768_v34, %v15762_v13  ;;  %v11085_v21 = vadd.f32 %v15764_v42, %v15756_v18  ;;  %v6654_v46 = vld [vmem:[#allocation2 + $0x9c] sm:$0xe]  ;;  %v15864_v6 = vld [vmem:[#allocation2 + $0xb4] sm:$0xf] }
 0x3f0   : > { %v7176_v2 = vrot.slane %v7174_v14, 5  ;;  %v7171_v40 = vor.u32 %v7170_v56, %v7166_v50  ;;  %v6529_v54 = vor.u32 %v17156_v19, %v17155_v61  ;;  %v6532_v43 = vshll.u32 %v11869_v36, 16  ;;  %v17158_v34 = vld [vmem:[#allocation24_spill] sm:$0xff] }
 0x3f1   : > { %v7162_v33 = vrot.slane %v7161_v15, 4  ;;  %8917 = vmatmul.mubr.bf16.gmra.mrb[232].mxu1 %v10252_v24  ;;  %v15855_v13 = vadd.f32 %v11082_v12, %v10970_v1  ;;  %v17159_v18 = vshrl.u32 %v17158_v34, 16  ;;  %v6542_v31 = vshll.u32 %v15797_v25, 16  ;;  %v11870_v1 = vld [vmem:[#allocation2 + $0xa0] sm:$0xf] }
 0x3f2   : > { %v15847_v38 = vpop.f32.mrb[136].mxu1  ;;  %v15862_v47 = vadd.f32 %v15773_v20, %v15770_v5  ;;  %8924 = vmatprep.mubr.bf16.mxu1 %v10269_v60  ;;  %v7172_v14 = vrot.slane %v7171_v40, 4  ;;  %v6530_v44 = vrot.slane %v6529_v54, 4  ;;  %v6534_v15 = vrot.slane %v6532_v43, 5  ;;  %v15878_v34 = vld [vmem:[#allocation2 + $0xb8] sm:$0xf] }
 0x3f3   : > { %v15851_v11 = vpop.f32.mrb[137].mxu1  ;;  %v15853_v17 = vpop.f32.mrb[172].mxu0  ;;  %17157 = vst [vmem:[#allocation13_spill] sm:$0xff] %v15855_v13  ;;  %v6538_v42 = vrot.slane %v17159_v18, 4  ;;  %v7167_v12 = vsel %vm12124_vm8, %v7162_v33, %v7166_v50  ;;  %v10286_v5 = vcombine.low %v15799_v55, %v15807_v57  ;;  %v6544_v20 = vrot.slane %v6542_v31, 5 }
 0x3f4   : > { %v15866_v19 = vpop.f32.mrb[138].mxu1  ;;  %v15868_v36 = vpop.f32.mrb[173].mxu0  ;;  %v10158_v24 = vrot.slane %v6654_v46, 9  ;;  %v6792_v61 = vrot.slane %v11870_v1, 5  ;;  %v7177_v50 = vsel %vm12124_vm8, %v7172_v14, %v7176_v2  ;;  %v6795_v40 = vrot.slane %v15845_v58, 5 }
 0x3f5   : > { %v15872_v56 = vpop.f32.mrb[139].mxu1  ;;  %v15874_v25 = vpop.f32.mrb[174].mxu0  ;;  %v6539_v33 = vor.u32 %v6538_v42, %v6534_v15  ;;  %v10973_v54 = vadd.f32 %v15809_v4, %v15801_v62  ;;  %v6863_v43 = vld [vmem:[#allocation2 + $0xbc] sm:$0x1]  ;;  %v10302_v18 = vcombine.low %v7167_v12, %v7177_v50  ;;  %v6535_v55 = vsel %vm12124_vm8, %v6530_v44, %v6534_v15  ;;  %v7263_v42 = vld [vmem:[#allocation2 + $0xb4] sm:$0xe] }
 0x3f6   : > { %v15880_v60 = vpop.f32.mrb[175].mxu0  ;;  %v6794_v46 = vrot.slane %v6792_v61, 4  ;;  %v7179_v31 = vshrl.u32 %v15864_v6, 16  ;;  %v7182_v8 = vshll.u32 %v15864_v6, 16  ;;  %v7188_v2 = vshll.u32 %v15878_v34, 16 }
 0x3f7   : > { %v6540_v10 = vrot.slane %v6539_v33, 4  ;;  %v15890_v16 = vadd.f32 %v11085_v21, %v10973_v54  ;;  %9093 = vmatprep.mubr.bf16.mxu0 %v10302_v18  ;;  %v7192_v12 = vshrl.u32 %v15878_v34, 16  ;;  %v7198_v14 = vshll.u32 %v6863_v43, 16 }
 0x3f8   : > { %v6796_v62 = vsel %vm12118_vm7, %v6794_v46, %v6795_v40  ;;  %v7181_v4 = vrot.slane %v7179_v31, 4  ;;  %v6793_v21 = vsel %vm12118_vm7, %v10158_v24, %v6792_v61  ;;  %9094 = vmatmul.mubr.bf16.gmra.mrb[16].mxu0 %v10286_v5  ;;  %v7184_v50 = vrot.slane %v7182_v8, 5 }
 0x3f9   : > { %17160 = vst [vmem:[#allocation14_spill] sm:$0xff] %v15890_v16  ;;  %v6545_v15 = vsel %vm12124_vm8, %v6540_v10, %v6544_v20  ;;  %v7190_v33 = vrot.slane %v7188_v2, 5  ;;  %v10270_v46 = vcombine.low %v6793_v21, %v6796_v62  ;;  %v7194_v31 = vrot.slane %v7192_v12, 4  ;;  %v17162_v62 = vld [vmem:[#allocation31_spill] sm:$0xff] }
 0x3fa   : > { %v15897_v44 = vpop.f32.mrb[140].mxu1  ;;  %v10253_v40 = vcombine.low %v6535_v55, %v6545_v15  ;;  %v10175_v63 = vrot.slane %v7263_v42, 9  ;;  %v7185_v13 = vor.u32 %v7184_v50, %v7181_v4  ;;  %v7200_v10 = vrot.slane %v7198_v14, 5  ;;  %v17161_v42 = vld [vmem:[#allocation30_spill] sm:$0xff] }
 0x3fb   : > { %v15903_v54 = vpop.f32.mrb[141].mxu1  ;;  %v15905_v18 = vpop.f32.mrb[176].mxu0  ;;  %v7407_v20 = vrot.slane %v15878_v34, 5  ;;  %v7410_v24 = vrot.slane %v6863_v43, 5  ;;  %v7195_v61 = vor.u32 %v7194_v31, %v7190_v33  ;;  %v10976_v55 = vadd.f32 %v15822_v22, %v15815_v49  ;;  %v17165_v22 = vld [vmem:[#allocation29_spill] sm:$0xff] }
 0x3fc   : > { %v15907_v35 = vpop.f32.mrb[142].mxu1  ;;  %v15909_v16 = vpop.f32.mrb[177].mxu0  ;;  %8925 = vmatmul.mubr.bf16.gmra.mrb[236].mxu1 %v10253_v40  ;;  %v11091_v2 = vadd.f32 %v15817_v59, %v15811_v7  ;;  %v6553_v12 = vor.u32 %v17162_v62, %v17161_v42  ;;  %v7186_v14 = vrot.slane %v7185_v13, 4  ;;  %v6556_v21 = vshll.u32 %v11870_v1, 16  ;;  %v6655_v31 = vld [vmem:[#allocation2 + $0xa8] sm:$0xe] }
 0x3fd   : > { %v15912_v5 = vpop.f32.mrb[143].mxu1  ;;  %v15914_v8 = vpop.f32.mrb[178].mxu0  ;;  %8932 = vmatprep.mubr.bf16.mxu1 %v10270_v46  ;;  %v15926_v43 = vsel %vm12118_vm7, %v10175_v63, %v7407_v20  ;;  %v7409_v15 = vrot.slane %v7407_v20, 4  ;;  %v7196_v50 = vrot.slane %v7195_v61, 4  ;;  %v15929_v40 = vadd.f32 %v15862_v47, %v10976_v55  ;;  %v15940_v1 = vld [vmem:[#allocation2 + $0xc0] sm:$0xf] }
 0x3fe   : > { %v15922_v4 = vpop.f32.mrb[179].mxu0  ;;  %17163 = vst [vmem:[#allocation16_spill] sm:$0xff] %v15926_v43  ;;  %v6554_v49 = vrot.slane %v6553_v12, 4  ;;  %v17166_v7 = vshrl.u32 %v17165_v22, 16  ;;  %v7191_v42 = vsel %vm12124_vm8, %v7186_v14, %v7190_v33  ;;  %v6558_v63 = vrot.slane %v6556_v21, 5 }
 0x3ff   : > { %17164 = vst [vmem:[#allocation17_spill] sm:$0xff] %v15929_v40  ;;  %v15937_v13 = vsel %vm12118_vm7, %v7409_v15, %v7410_v24  ;;  %v6566_v46 = vshll.u32 %v15845_v58, 16  ;;  %v7201_v47 = vsel %vm12124_vm8, %v7196_v50, %v7200_v10  ;;  %v10287_v20 = vcombine.low %v15864_v6, %v15878_v34  ;;  %v15950_v55 = vld [vmem:[#allocation2 + $0xb0] sm:$0x1]  ;;  %v15952_v24 = vld [vmem:[#allocation2 + $0xc4] sm:$0xf] }
 0x400   : > { %v6562_v59 = vrot.slane %v17166_v7, 4  ;;  %17167 = vst [vmem:[#allocation18_spill] sm:$0xff] %v15937_v13  ;;  %v11094_v33 = vadd.f32 %v15831_v28, %v15824_v9  ;;  %v10303_v58 = vcombine.low %v7191_v42, %v7201_v47  ;;  %v6559_v12 = vsel %vm12124_vm8, %v6554_v49, %v6558_v63  ;;  %v15958_v15 = vld [vmem:[#allocation2 + $0xc8] sm:$0x1]  ;;  %v11871_v9 = vld [vmem:[#allocation2 + $0xac] sm:$0xf] }
 0x401   : > { %v10159_v14 = vrot.slane %v6655_v31, 9  ;;  %v6568_v21 = vrot.slane %v6566_v46, 5  ;;  %v6799_v28 = vrot.slane %v11871_v9, 5  ;;  %v10979_v50 = vadd.f32 %v15851_v11, %v15847_v38 }
 0x402   : > { %v15954_v62 = vpop.f32.mrb[144].mxu1  ;;  %v6563_v10 = vor.u32 %v6562_v59, %v6558_v63  ;;  %v7203_v22 = vshrl.u32 %v15940_v1, 16  ;;  %9101 = vmatprep.mubr.bf16.mxu0 %v10303_v58  ;;  %v7206_v59 = vshll.u32 %v15940_v1, 16  ;;  %v7212_v31 = vshll.u32 %v15952_v24, 16 }
 0x403   : > { %v15960_v6 = vpop.f32.mrb[145].mxu1  ;;  %v15962_v34 = vpop.f32.mrb[180].mxu0  ;;  %v7216_v63 = vshrl.u32 %v15952_v24, 16  ;;  %v6801_v61 = vrot.slane %v6799_v28, 4  ;;  %v6802_v38 = vrot.slane %v15950_v55, 5  ;;  %9102 = vmatmul.mubr.bf16.gmra.mrb[20].mxu0 %v10287_v20  ;;  %v15979_v11 = vadd.f32 %v11091_v2, %v10979_v50 }
 0x404   : > { %v15967_v7 = vpop.f32.mrb[146].mxu1  ;;  %v15969_v42 = vpop.f32.mrb[181].mxu0  ;;  %v6564_v49 = vrot.slane %v6563_v10, 4  ;;  %v7205_v40 = vrot.slane %v7203_v22, 4  ;;  %v7208_v10 = vrot.slane %v7206_v59, 5  ;;  %v7214_v13 = vrot.slane %v7212_v31, 5 }
 0x405   : > { %v15974_v46 = vpop.f32.mrb[147].mxu1  ;;  %v15976_v47 = vpop.f32.mrb[182].mxu0  ;;  %17168 = vst [vmem:[#allocation5_spill] sm:$0xff] %v15979_v11  ;;  %v7218_v43 = vrot.slane %v7216_v63, 4  ;;  %v6800_v29 = vsel %vm12118_vm7, %v10159_v14, %v6799_v28  ;;  %v6803_v27 = vsel %vm12118_vm7, %v6801_v61, %v6802_v38  ;;  %v7222_v20 = vshll.u32 %v15958_v15, 16  ;;  %v17170_v59 = vld [vmem:[#allocation7_spill] sm:$0xff] }
 0x406   : > { %v15981_v52 = vpop.f32.mrb[183].mxu0  ;;  %v6569_v58 = vsel %vm12124_vm8, %v6564_v49, %v6568_v21  ;;  %v10271_v2 = vcombine.low %v6800_v29, %v6803_v27  ;;  %v7209_v50 = vor.u32 %v7208_v10, %v7205_v40  ;;  %v10982_v11 = vadd.f32 %v15872_v56, %v15866_v19  ;;  %v15996_v28 = vld [vmem:[#allocation2 + $0xbc] sm:$0x1]  ;;  %v6656_v61 = vld [vmem:[#allocation2 + $0xb4] sm:$0xe]  ;;  %v17172_v19 = vld [vmem:[#allocation10_spill] sm:$0xff] }
 0x407   : > { %v10254_v41 = vcombine.low %v6559_v12, %v6569_v58  ;;  %v7219_v22 = vor.u32 %v7218_v43, %v7214_v13  ;;  %v7224_v21 = vrot.slane %v7222_v20, 5  ;;  %v11097_v49 = vadd.f32 %v15868_v36, %v15853_v17  ;;  %v17169_v12 = vld [vmem:[#allocation34_spill] sm:$0xff] }
 0x408   : > { %v6577_v31 = vor.u32 %v17170_v59, %v17169_v12  ;;  %v6580_v14 = vshll.u32 %v11871_v9, 16  ;;  %v7210_v29 = vrot.slane %v7209_v50, 4  ;;  %v16000_v43 = vadd.f32 %v11094_v33, %v10982_v11  ;;  %v16004_v40 = vld [vmem:[#allocation2 + $0xcc] sm:$0xf]  ;;  %v16028_v12 = vld [vmem:[#allocation2 + $0xd0] sm:$0xf] }
 0x409   : > { %8933 = vmatmul.mubr.bf16.gmra.mrb[240].mxu1 %v10254_v41  ;;  %v7220_v27 = vrot.slane %v7219_v22, 4  ;;  %v17173_v41 = vshrl.u32 %v17172_v19, 16  ;;  %v6590_v58 = vshll.u32 %v15950_v55, 16  ;;  %v16013_v10 = vadd.f32 %v15880_v60, %v15874_v25  ;;  %v16025_v22 = vld [vmem:[#allocation2 + $0xb8] sm:$0xf] }
 0x40a   : > { %v15998_v63 = vpop.f32.mrb[148].mxu1  ;;  %8940 = vmatprep.mubr.bf16.mxu1 %v10271_v2  ;;  %17171 = vst [vmem:[#allocation6_spill] sm:$0xff] %v16000_v43  ;;  %v6578_v9 = vrot.slane %v6577_v31, 4  ;;  %v6582_v38 = vrot.slane %v6580_v14, 5  ;;  %v7215_v11 = vsel %vm12124_vm8, %v7210_v29, %v7214_v13  ;;  %v10288_v50 = vcombine.low %v15940_v1, %v15952_v24 }
 0x40b   : > { %v6586_v56 = vrot.slane %v17173_v41, 4  ;;  %v16006_v17 = vpop.f32.mrb[149].mxu1  ;;  %v16008_v36 = vpop.f32.mrb[184].mxu0  ;;  %v7225_v2 = vsel %vm12124_vm8, %v7220_v27, %v7224_v21  ;;  %v6806_v55 = vrot.slane %v16025_v22, 5  ;;  %v10160_v14 = vrot.slane %v6656_v61, 9 }
 0x40c   : > { %v16015_v20 = vpop.f32.mrb[150].mxu1  ;;  %v16017_v33 = vpop.f32.mrb[185].mxu0  ;;  %v10304_v59 = vcombine.low %v7215_v11, %v7225_v2  ;;  %v6583_v13 = vsel %vm12124_vm8, %v6578_v9, %v6582_v38  ;;  %v6865_v21 = vld [vmem:[#allocation2 + $0xd4] sm:$0x1]  ;;  %v6592_v1 = vrot.slane %v6590_v58, 5  ;;  %v6809_v19 = vrot.slane %v15996_v28, 5 }
 0x40d   : > { %v16030_v25 = vpop.f32.mrb[151].mxu1  ;;  %v16032_v60 = vpop.f32.mrb[186].mxu0  ;;  %v6587_v31 = vor.u32 %v6586_v56, %v6582_v38  ;;  %v6808_v27 = vrot.slane %v6806_v55, 4  ;;  %v10985_v41 = vadd.f32 %v15903_v54, %v15897_v44  ;;  %v7227_v51 = vshrl.u32 %v16004_v40, 16  ;;  %v7265_v2 = vld [vmem:[#allocation2 + $0xcc] sm:$0xe] }
 0x40e   : > { %v16036_v29 = vpop.f32.mrb[187].mxu0  ;;  %9109 = vmatprep.mubr.bf16.mxu0 %v10304_v59  ;;  %v7230_v11 = vshll.u32 %v16004_v40, 16  ;;  %v7236_v9 = vshll.u32 %v16028_v12, 16  ;;  %v7240_v38 = vshrl.u32 %v16028_v12, 16  ;;  %v7246_v58 = vshll.u32 %v6865_v21, 16 }
 0x40f   : > { %v6588_v43 = vrot.slane %v6587_v31, 4  ;;  %v6810_v61 = vsel %vm12118_vm7, %v6808_v27, %v6809_v19  ;;  %9110 = vmatmul.mubr.bf16.gmra.mrb[24].mxu0 %v10288_v50  ;;  %v16046_v56 = vadd.f32 %v11097_v49, %v10985_v41  ;;  %v6807_v54 = vsel %vm12118_vm7, %v10160_v14, %v6806_v55 }
 0x410   : > { %v7229_v59 = vrot.slane %v7227_v51, 4  ;;  %v7232_v31 = vrot.slane %v7230_v11, 5  ;;  %v10272_v48 = vcombine.low %v6807_v54, %v6810_v61  ;;  %v7238_v27 = vrot.slane %v7236_v9, 5 }
 0x411   : > { %17174 = vst [vmem:[#allocation19_spill] sm:$0xff] %v16046_v56  ;;  %v6593_v44 = vsel %vm12124_vm8, %v6588_v43, %v6592_v1  ;;  %v7242_v50 = vrot.slane %v7240_v38, 4  ;;  %v7248_v56 = vrot.slane %v7246_v58, 5  ;;  %v10177_v3 = vrot.slane %v7265_v2, 9 }
 0x412   : > { %v16053_v32 = vpop.f32.mrb[152].mxu1  ;;  %v10255_v57 = vcombine.low %v6583_v13, %v6593_v44  ;;  %v7233_v41 = vor.u32 %v7232_v31, %v7229_v59  ;;  %v7421_v43 = vrot.slane %v16028_v12, 5  ;;  %v7424_v14 = vrot.slane %v6865_v21, 5  ;;  %v17176_v44 = vld [vmem:[#allocation27_spill] sm:$0xff] }
 0x413   : > { %v16055_v49 = vpop.f32.mrb[153].mxu1  ;;  %v16057_v19 = vpop.f32.mrb[188].mxu0  ;;  %v7243_v51 = vor.u32 %v7242_v50, %v7238_v27  ;;  %v10988_v13 = vadd.f32 %v15912_v5, %v15907_v35  ;;  %v11103_v11 = vadd.f32 %v15909_v16, %v15905_v18  ;;  %v6604_v16 = vshll.u32 %v16025_v22, 16  ;;  %v17178_v18 = vld [vmem:[#allocation35_spill] sm:$0xff] }
 0x414   : > { %v16060_v1 = vpop.f32.mrb[154].mxu1  ;;  %v16062_v55 = vpop.f32.mrb[189].mxu0  ;;  %8941 = vmatmul.mubr.bf16.gmra.mrb[244].mxu1 %v10255_v57  ;;  %v7234_v38 = vrot.slane %v7233_v41, 4  ;;  %v16074_v58 = vsel %vm12118_vm7, %v10177_v3, %v7421_v43  ;;  %v7423_v2 = vrot.slane %v7421_v43, 4  ;;  %v17175_v57 = vld [vmem:[#allocation36_spill] sm:$0xff]  ;;  %v17179_v59 = vshrl.u32 %v17178_v18, 16 }
 0x415   : > { %v16068_v9 = vpop.f32.mrb[155].mxu1  ;;  %v16070_v61 = vpop.f32.mrb[190].mxu0  ;;  %8948 = vmatprep.mubr.bf16.mxu1 %v10272_v48  ;;  %v6601_v21 = vor.u32 %v17176_v44, %v17175_v57  ;;  %v7244_v35 = vrot.slane %v7243_v51, 4  ;;  %v16081_v5 = vadd.f32 %v16013_v10, %v10988_v13  ;;  %v6614_v41 = vshll.u32 %v15996_v28, 16  ;;  %v6657_v43 = vld [vmem:[#allocation2 + $0xc0] sm:$0xe] }
 0x416   : > { %v16078_v54 = vpop.f32.mrb[191].mxu0  ;;  %v6610_v48 = vrot.slane %v17179_v59, 4  ;;  %v7239_v31 = vsel %vm12124_vm8, %v7234_v38, %v7238_v27  ;;  %v16090_v3 = vsel %vm12118_vm7, %v7423_v2, %v7424_v14  ;;  %v6606_v51 = vrot.slane %v6604_v16, 5  ;;  %v6257_v57 = vld [vmem:[#allocation2 + $0xc8] sm:$0x1] }
 0x417   : > { %17177 = vst [vmem:[#allocation22_spill] sm:$0xff] %v16081_v5  ;;  %v6602_v50 = vrot.slane %v6601_v21, 4  ;;  %v7249_v10 = vsel %vm12124_vm8, %v7244_v35, %v7248_v56  ;;  %v11106_v13 = vadd.f32 %v15922_v4, %v15914_v8  ;;  %v10289_v27 = vcombine.low %v16004_v40, %v16028_v12  ;;  %v11873_v2 = vld [vmem:[#allocation2 + $0xc4] sm:$0xf] }
 0x418   : > { %v10305_v14 = vcombine.low %v7239_v31, %v7249_v10  ;;  %v6616_v38 = vrot.slane %v6614_v41, 5  ;;  %v6813_v44 = vrot.slane %v11873_v2, 5  ;;  %v6611_v21 = vor.u32 %v6610_v48, %v6606_v51  ;;  %v17181_v41 = vld [vmem:[#allocation9_spill] sm:$0xff] }
 0x419   : > { %v6607_v56 = vsel %vm12124_vm8, %v6602_v50, %v6606_v51  ;;  %v10161_v35 = vrot.slane %v6657_v43, 9  ;;  %v10991_v16 = vadd.f32 %v15960_v6, %v15954_v62  ;;  %v6816_v40 = vrot.slane %v6257_v57, 5  ;;  %v17180_v6 = vld [vmem:[#allocation38_spill] sm:$0xff] }
 0x41a   : > { %v16101_v28 = vpop.f32.mrb[156].mxu1  ;;  %9117 = vmatprep.mubr.bf16.mxu0 %v10305_v14  ;;  %v6815_v4 = vrot.slane %v6813_v44, 4  ;;  %v10994_v12 = vadd.f32 %v15974_v46, %v15967_v7  ;;  %v11109_v59 = vadd.f32 %v15969_v42, %v15962_v34  ;;  %v6612_v50 = vrot.slane %v6611_v21, 4  ;;  %v17182_v34 = vld [vmem:[#allocation28_spill] sm:$0xff] }
 0x41b   : > { %v16107_v18 = vpop.f32.mrb[157].mxu1  ;;  %v16109_v8 = vpop.f32.mrb[192].mxu0  ;;  %9118 = vmatmul.mubr.bf16.gmra.mrb[28].mxu0 %v10289_v27  ;;  %v16119_v62 = vadd.f32 %v11103_v11, %v10991_v16  ;;  %v6625_v43 = vor.u32 %v17181_v41, %v17180_v6  ;;  %v6628_v10 = vshll.u32 %v11873_v2, 16  ;;  %v17183_v42 = vshrl.u32 %v17182_v34, 16 }
 0x41c   : > { %v16115_v31 = vpop.f32.mrb[158].mxu1  ;;  %v16117_v48 = vpop.f32.mrb[193].mxu0  ;;  %v6817_v7 = vsel %vm12118_vm7, %v6815_v4, %v6816_v40  ;;  %v16125_v46 = vadd.f32 %v11106_v13, %v10994_v12  ;;  %v6617_v27 = vsel %vm12124_vm8, %v6612_v50, %v6616_v38  ;;  %v6638_v21 = vshll.u32 %v6257_v57, 16  ;;  %v7250_v40 = vld [vmem:[#allocation2 + $0x18] sm:$0xe] }
 0x41d   : > { %v11011_v51 = vpop.f32.mrb[159].mxu1  ;;  %v11128_v14 = vpop.f32.mrb[194].mxu0  ;;  %v6634_v22 = vrot.slane %v17183_v42, 4  ;;  %v6630_v11 = vrot.slane %v6628_v10, 5  ;;  %v10256_v16 = vcombine.low %v6607_v56, %v6617_v27  ;;  %v6814_v2 = vsel %vm12118_vm7, %v10161_v35, %v6813_v44  ;;  %v11874_v12 = vld [vmem:[#allocation2 + $0x1c] sm:$0xf] }
 0x41e   : > { %v11129_v5 = vpop.f32.mrb[195].mxu0  ;;  %v11112_v6 = vadd.f32 %v15981_v52, %v15976_v47  ;;  %v10273_v41 = vcombine.low %v6814_v2, %v6817_v7  ;;  %v6626_v4 = vrot.slane %v6625_v43, 4  ;;  %v7316_v34 = vrot.slane %v11874_v12, 5  ;;  %v11875_v10 = vld [vmem:[#allocation2 + $0x20] sm:$0x1] }
 0x41f   : > { %v6635_v13 = vor.u32 %v6634_v22, %v6630_v11  ;;  %8949 = vmatmul.mubr.bf16.gmra.mrb[248].mxu1 %v10256_v16  ;;  %v10997_v42 = vadd.f32 %v16006_v17, %v15998_v63  ;;  %v11000_v57 = vadd.f32 %v16030_v25, %v16015_v20  ;;  %v11115_v38 = vadd.f32 %v16017_v33, %v16008_v36  ;;  %v11876_v16 = vld [vmem:[#allocation2 + $0x34] sm:$0xf] }
 0x420   : > { %v11118_v44 = vadd.f32 %v16036_v29, %v16032_v60  ;;  %8956 = vmatprep.mubr.bf16.mxu1 %v10273_v41  ;;  %v6640_v22 = vrot.slane %v6638_v21, 5  ;;  %v7318_v56 = vrot.slane %v7316_v34, 4  ;;  %v10162_v43 = vrot.slane %v7250_v40, 9 }
 0x421   : > { %v6636_v47 = vrot.slane %v6635_v13, 4  ;;  %v7319_v7 = vrot.slane %v11875_v10, 5  ;;  %v16143_v63 = vadd.f32 %v11109_v59, %v10997_v42  ;;  %v16145_v17 = vadd.f32 %v11112_v6, %v11000_v57 }
 0x422   : > { %v11013_v52 = vpop.f32.mrb[160].mxu1  ;;  %v6631_v36 = vsel %vm12124_vm8, %v6626_v4, %v6630_v11  ;;  %v11003_v60 = vadd.f32 %v16055_v49, %v16053_v32  ;;  %v11006_v29 = vadd.f32 %v16068_v9, %v16060_v1  ;;  %v7330_v2 = vrot.slane %v11876_v16, 5  ;;  %v7252_v9 = vld [vmem:[#allocation2 + $0x30] sm:$0xe] }
 0x423   : > { %v11014_v35 = vpop.f32.mrb[161].mxu1  ;;  %v11131_v50 = vpop.f32.mrb[196].mxu0  ;;  %v6641_v33 = vsel %vm12124_vm8, %v6636_v47, %v6640_v22  ;;  %v7320_v59 = vsel %vm12118_vm7, %v7318_v56, %v7319_v7  ;;  %v11121_v23 = vadd.f32 %v16062_v55, %v16057_v19  ;;  %v11124_v32 = vadd.f32 %v16078_v54, %v16070_v61 }
 0x424   : > { %v11016_v20 = vpop.f32.mrb[162].mxu1  ;;  %v11132_v25 = vpop.f32.mrb[197].mxu0  ;;  %v16157_v41 = vadd.f32 %v11115_v38, %v11003_v60  ;;  %v16159_v11 = vadd.f32 %v11118_v44, %v11006_v29  ;;  %v10257_v49 = vcombine.low %v6631_v36, %v6641_v33  ;;  %v7317_v1 = vsel %vm12118_vm7, %v10162_v43, %v7316_v34  ;;  %v11877_v44 = vld [vmem:[#allocation2 + $0x38] sm:$0x1] }
 0x425   : > { %v11017_v27 = vpop.f32.mrb[163].mxu1  ;;  %v11134_v21 = vpop.f32.mrb[198].mxu0  ;;  %v10306_v4 = vcombine.low %v7317_v1, %v7320_v59  ;;  %v11009_v13 = vadd.f32 %v16107_v18, %v16101_v28  ;;  %v11012_v40 = vadd.f32 %v11011_v51, %v16115_v31  ;;  %v11127_v12 = vadd.f32 %v16117_v48, %v16109_v8 }
 0x426   : > { %v11135_v6 = vpop.f32.mrb[199].mxu0  ;;  %v7332_v42 = vrot.slane %v7330_v2, 4  ;;  %v11130_v19 = vadd.f32 %v11129_v5, %v11128_v14  ;;  %v10164_v61 = vrot.slane %v7252_v9, 9  ;;  %v7333_v47 = vrot.slane %v11877_v44, 5  ;;  %v11878_v14 = vld [vmem:[#allocation2 + $0x4c] sm:$0xf] }
 0x427   : > { %8957 = vmatmul.mubr.bf16.gmra.mrb[252].mxu1 %v10257_v49  ;;  %v16172_v54 = vadd.f32 %v11121_v23, %v11009_v13  ;;  %v16174_v57 = vadd.f32 %v11124_v32, %v11012_v40  ;;  %v11015_v28 = vadd.f32 %v11014_v35, %v11013_v52  ;;  %v11018_v18 = vadd.f32 %v11017_v27, %v11016_v20  ;;  %v7254_v20 = vld [vmem:[#allocation2 + $0x48] sm:$0xe] }
 0x428   : > { %11485 = vmatprep.mubr.bf16.mxu1 %v10306_v4  ;;  %v11133_v31 = vadd.f32 %v11132_v25, %v11131_v50  ;;  %v11136_v8 = vadd.f32 %v11135_v6, %v11134_v21  ;;  %v7334_v5 = vsel %vm12118_vm7, %v7332_v42, %v7333_v47  ;;  %v7344_v43 = vrot.slane %v11878_v14, 5  ;;  %v7264_v6 = vld [vmem:[#allocation2 + $0xc0] sm:$0xe] }
 0x429   : > { %v16178_v10 = vadd.f32 %v11127_v12, %v11015_v28  ;;  %v16180_v7 = vadd.f32 %v11130_v19, %v11018_v18  ;;  %v7331_v52 = vsel %vm12118_vm7, %v10164_v61, %v7330_v2  ;;  %v17184_v21 = vcombine.low %v15384_v53, %v15393_v26  ;;  %v11879_v2 = vld [vmem:[#allocation2 + $0x50] sm:$0x1]  ;;  %v11880_v26 = vld [vmem:[#allocation2 + $0x64] sm:$0xf] }
 0x42a   : > { %v11019_v55 = vpop.f32.mrb[164].mxu1  ;;  %v10308_v50 = vcombine.low %v7331_v52, %v7334_v5  ;;  %v7346_v59 = vrot.slane %v7344_v43, 4  ;;  %v10166_v49 = vrot.slane %v7254_v20, 9  ;;  %v7347_v1 = vrot.slane %v11879_v2, 5 }
 0x42b   : > { %v11020_v34 = vpop.f32.mrb[165].mxu1  ;;  %v11137_v38 = vpop.f32.mrb[200].mxu0  ;;  %v7414_v40 = vrot.slane %v15952_v24, 5  ;;  %v7358_v61 = vrot.slane %v11880_v26, 5  ;;  %v7417_v18 = vrot.slane %v15958_v15, 5 }
 0x42c   : > { %v11022_v51 = vpop.f32.mrb[166].mxu1  ;;  %v11138_v22 = vpop.f32.mrb[201].mxu0  ;;  %v11021_v33 = vadd.f32 %v11020_v34, %v11019_v55  ;;  %v10176_v55 = vrot.slane %v7264_v6, 9  ;;  %v7348_v53 = vsel %vm12118_vm7, %v7346_v59, %v7347_v1  ;;  %v7345_v24 = vsel %vm12118_vm7, %v10166_v49, %v7344_v43 }
 0x42d   : > { %v11023_v48 = vpop.f32.mrb[167].mxu1  ;;  %v11140_v56 = vpop.f32.mrb[202].mxu0  ;;  %v11139_v35 = vadd.f32 %v11138_v22, %v11137_v38  ;;  %v7416_v28 = vrot.slane %v7414_v40, 4  ;;  %v7256_v22 = vld [vmem:[#allocation2 + $0x60] sm:$0xe]  ;;  %v7360_v15 = vrot.slane %v7358_v61, 4 }
 0x42e   : > { %v11141_v36 = vpop.f32.mrb[203].mxu0  ;;  %v11024_v60 = vadd.f32 %v11023_v48, %v11022_v51  ;;  %v16184_v25 = vadd.f32 %v11133_v31, %v11021_v33  ;;  %v10310_v51 = vcombine.low %v7345_v24, %v7348_v53  ;;  %v10168_v33 = vrot.slane %v7256_v22, 9  ;;  %v11883_v53 = vld [vmem:[#allocation2 + $0x80] sm:$0x1] }
 0x42f   : > { %v11142_v27 = vadd.f32 %v11141_v36, %v11140_v56  ;;  %11486 = vmatmul.mubr.bf16.vlgmr.msra.gmra.mrb[0].mxu1 %v17184_v21  ;;  %v16207_v48 = vsel %vm12118_vm7, %v7416_v28, %v7417_v18  ;;  %v17185_v56 = vcombine.low %v15463_v0, %v15467_v45  ;;  %v11882_v45 = vld [vmem:[#allocation2 + $0x7c] sm:$0xf]  ;;  %v7375_v26 = vrot.slane %v11883_v53, 5 }
 0x430   : > { %v16186_v29 = vadd.f32 %v11136_v8, %v11024_v60  ;;  %11489 = vmatprep.mubr.bf16.mxu1 %v10308_v50  ;;  %v16203_v8 = vsel %vm12118_vm7, %v10176_v55, %v7414_v40  ;;  %v11881_v60 = vld [vmem:[#allocation2 + $0x68] sm:$0x1]  ;;  %v7359_v2 = vsel %vm12118_vm7, %v10168_v33, %v7358_v61  ;;  %v7260_v33 = vld [vmem:[#allocation2 + $0x90] sm:$0xe] }
 0x431   : > { %v10320_v14 = vcombine.low %v16203_v8, %v16207_v48  ;;  %v7361_v52 = vrot.slane %v11881_v60, 5  ;;  %v17187_v60 = vld [vmem:[#allocation4_spill] sm:$0xff] }
 0x432   : > { %v11025_v16 = vpop.f32.mrb[168].mxu1 }
 0x433   : > { %v11026_v23 = vpop.f32.mrb[169].mxu1  ;;  %v11143_v32 = vpop.f32.mrb[204].mxu0  ;;  %v7362_v0 = vsel %vm12118_vm7, %v7360_v15, %v7361_v52  ;;  %v17188_v52 = vld [vmem:[#allocation33_spill] sm:$0xff] }
 0x434   : > { %v11027_v9 = vadd.f32 %v11026_v23, %v11025_v16  ;;  %v11028_v4 = vpop.f32.mrb[170].mxu1  ;;  %v11144_v13 = vpop.f32.mrb[205].mxu0  ;;  %v7372_v16 = vrot.slane %v11882_v45, 5 }
 0x435   : > { %v11029_v12 = vpop.f32.mrb[171].mxu1  ;;  %v11145_v42 = vadd.f32 %v11144_v13, %v11143_v32  ;;  %v11146_v19 = vpop.f32.mrb[206].mxu0  ;;  %v17186_v13 = vcombine.low %v15547_v30, %v15551_v39 }
 0x436   : > { %v16194_v34 = vadd.f32 %v11139_v35, %v11027_v9  ;;  %v11030_v38 = vadd.f32 %v11029_v12, %v11028_v4  ;;  %v11147_v44 = vpop.f32.mrb[207].mxu0  ;;  %v10312_v9 = vcombine.low %v7359_v2, %v7362_v0  ;;  %v7258_v4 = vld [vmem:[#allocation2 + $0x78] sm:$0xe]  ;;  %v7374_v40 = vrot.slane %v7372_v16, 4  ;;  %v11885_v0 = vld [vmem:[#allocation2 + $0x98] sm:$0x1] }
 0x437   : > { %v11148_v47 = vadd.f32 %v11147_v44, %v11146_v19  ;;  %11490 = vmatmul.mubr.bf16.gmra.mrb[4].mxu1 %v17185_v56  ;;  %v10170_v55 = vrot.slane %v7258_v4, 9  ;;  %v7389_v45 = vrot.slane %v11885_v0, 5 }
 0x438   : > { %v16199_v31 = vadd.f32 %v11142_v27, %v11030_v38  ;;  %11493 = vmatprep.mubr.bf16.mxu1 %v10310_v51  ;;  %v7376_v24 = vsel %vm12118_vm7, %v7374_v40, %v7375_v26  ;;  %v11884_v51 = vld [vmem:[#allocation2 + $0x94] sm:$0xf] }
 0x439   : > { %v7386_v30 = vrot.slane %v11884_v51, 5 }
 0x43a   : > { %v11031_v5 = vpop.f32.mrb[172].mxu1 }
 0x43b   : > { %v11032_v43 = vpop.f32.mrb[173].mxu1  ;;  %v11149_v36 = vpop.f32.mrb[208].mxu0 }
 0x43c   : > { %v11033_v35 = vadd.f32 %v11032_v43, %v11031_v5  ;;  %v11034_v50 = vpop.f32.mrb[174].mxu1  ;;  %v11150_v20 = vpop.f32.mrb[209].mxu0  ;;  %v7373_v5 = vsel %vm12118_vm7, %v10170_v55, %v7372_v16 }
 0x43d   : > { %v11035_v27 = vpop.f32.mrb[175].mxu1  ;;  %v11151_v21 = vadd.f32 %v11150_v20, %v11149_v36  ;;  %v11152_v59 = vpop.f32.mrb[210].mxu0  ;;  %v10314_v36 = vcombine.low %v7373_v5, %v7376_v24  ;;  %v17194_v5 = vld [vmem:[#allocation11_spill] sm:$0xff] }
 0x43e   : > { %v16216_v6 = vadd.f32 %v11145_v42, %v11033_v35  ;;  %v11036_v23 = vadd.f32 %v11035_v27, %v11034_v50  ;;  %v11153_v32 = vpop.f32.mrb[211].mxu0  ;;  %v17189_v35 = vcombine.low %v17187_v60, %v17188_v52  ;;  %v7388_v50 = vrot.slane %v7386_v30, 4 }
 0x43f   : > { %v11154_v49 = vadd.f32 %v11153_v32, %v11152_v59  ;;  %11494 = vmatmul.mubr.bf16.gmra.mrb[8].mxu1 %v17186_v13  ;;  %v10172_v59 = vrot.slane %v7260_v33, 9  ;;  %v17190_v13 = vld [vmem:[#allocation21_spill] sm:$0xff] }
 0x440   : > { %v16220_v1 = vadd.f32 %v11148_v47, %v11036_v23  ;;  %11497 = vmatprep.mubr.bf16.mxu1 %v10312_v9  ;;  %v7390_v4 = vsel %vm12118_vm7, %v7388_v50, %v7389_v45  ;;  %v7400_v40 = vrot.slane %v17190_v13, 5 }
 0x441   : > { %v7387_v53 = vsel %vm12118_vm7, %v10172_v59, %v7386_v30 }
 0x442   : > { %v11037_v12 = vpop.f32.mrb[176].mxu1  ;;  %v7402_v24 = vrot.slane %v7400_v40, 4 }
 0x443   : > { %v11038_v19 = vpop.f32.mrb[177].mxu1  ;;  %v11155_v42 = vpop.f32.mrb[212].mxu0 }
 0x444   : > { %v11039_v38 = vadd.f32 %v11038_v19, %v11037_v12  ;;  %v11040_v44 = vpop.f32.mrb[178].mxu1  ;;  %v11156_v28 = vpop.f32.mrb[213].mxu0 }
 0x445   : > { %v11041_v61 = vpop.f32.mrb[179].mxu1  ;;  %v11157_v47 = vadd.f32 %v11156_v28, %v11155_v42  ;;  %v11158_v18 = vpop.f32.mrb[214].mxu0  ;;  %v17191_v28 = vld [vmem:[#allocation8_spill] sm:$0xff] }
 0x446   : > { %v16227_v39 = vadd.f32 %v11151_v21, %v11039_v38  ;;  %v11042_v22 = vadd.f32 %v11041_v61, %v11040_v44  ;;  %v11159_v56 = vpop.f32.mrb[215].mxu0  ;;  %v10316_v38 = vcombine.low %v7387_v53, %v7390_v4  ;;  %v7262_v44 = vld [vmem:[#allocation2 + $0xa8] sm:$0xe]  ;;  %v17192_v61 = vld [vmem:[#allocation32_spill] sm:$0xff] }
 0x447   : > { %v11160_v15 = vadd.f32 %v11159_v56, %v11158_v18  ;;  %11498 = vmatmul.mubr.bf16.gmra.mrb[12].mxu1 %v17189_v35  ;;  %v17193_v18 = vcombine.low %v17191_v28, %v17192_v61  ;;  %v10174_v56 = vrot.slane %v7262_v44, 9 }
 0x448   : > { %v16231_v43 = vadd.f32 %v11154_v49, %v11042_v22  ;;  %11501 = vmatprep.mubr.bf16.mxu1 %v10314_v36  ;;  %v7403_v36 = vrot.slane %v17194_v5, 5 }
 0x449   : > { %v7401_v0 = vsel %vm12118_vm7, %v10174_v56, %v7400_v40 }
 0x44a   : > { %v11043_v20 = vpop.f32.mrb[180].mxu1  ;;  %v7404_v50 = vsel %vm12118_vm7, %v7402_v24, %v7403_v36  ;;  %v17199_v24 = vld [vmem:[#allocation18_spill] sm:$0xff] }
 0x44b   : > { %v11044_v27 = vpop.f32.mrb[181].mxu1  ;;  %v11161_v21 = vpop.f32.mrb[216].mxu0 }
 0x44c   : > { %v11045_v23 = vadd.f32 %v11044_v27, %v11043_v20  ;;  %v11046_v32 = vpop.f32.mrb[182].mxu1  ;;  %v11162_v2 = vpop.f32.mrb[217].mxu0 }
 0x44d   : > { %v11047_v16 = vpop.f32.mrb[183].mxu1  ;;  %v11163_v49 = vadd.f32 %v11162_v2, %v11161_v21  ;;  %v11164_v9 = vpop.f32.mrb[218].mxu0  ;;  %v17196_v2 = vld [vmem:[#allocation15_spill] sm:$0xff] }
 0x44e   : > { %v16239_v12 = vadd.f32 %v11157_v47, %v11045_v23  ;;  %v11048_v19 = vadd.f32 %v11047_v16, %v11046_v32  ;;  %v11165_v42 = vpop.f32.mrb[219].mxu0  ;;  %v10318_v23 = vcombine.low %v7401_v0, %v7404_v50  ;;  %v17195_v32 = vld [vmem:[#allocation37_spill] sm:$0xff] }
 0x44f   : > { %v11166_v55 = vadd.f32 %v11165_v42, %v11164_v9  ;;  %11502 = vmatmul.mubr.bf16.gmra.mrb[16].mxu1 %v17193_v18  ;;  %v17197_v16 = vcombine.low %v17195_v32, %v17196_v2  ;;  %v17198_v18 = vld [vmem:[#allocation16_spill] sm:$0xff] }
 0x450   : > { %v16243_v26 = vadd.f32 %v11160_v15, %v11048_v19  ;;  %11505 = vmatprep.mubr.bf16.mxu1 %v10316_v38 }
 0x452   : > { %v11049_v51 = vpop.f32.mrb[184].mxu1 }
 0x453   : > { %v11050_v22 = vpop.f32.mrb[185].mxu1  ;;  %v11167_v47 = vpop.f32.mrb[220].mxu0 }
 0x454   : > { %v11051_v33 = vadd.f32 %v11050_v22, %v11049_v51  ;;  %v11052_v60 = vpop.f32.mrb[186].mxu1  ;;  %v11168_v52 = vpop.f32.mrb[221].mxu0  ;;  %v17200_v51 = vcombine.low %v17198_v18, %v17199_v24 }
 0x455   : > { %v11053_v30 = vpop.f32.mrb[187].mxu1  ;;  %v11169_v15 = vadd.f32 %v11168_v52, %v11167_v47  ;;  %v11170_v35 = vpop.f32.mrb[222].mxu0  ;;  %v17201_v52 = vld [vmem:[#allocation12_spill] sm:$0xff] }
 0x456   : > { %v16251_v20 = vadd.f32 %v11163_v49, %v11051_v33  ;;  %v11054_v27 = vadd.f32 %v11053_v30, %v11052_v60  ;;  %v11171_v21 = vpop.f32.mrb[223].mxu0 }
 0x457   : > { %v11172_v59 = vadd.f32 %v11171_v21, %v11170_v35  ;;  %11506 = vmatmul.mubr.bf16.gmra.mrb[20].mxu1 %v17197_v16  ;;  %v17202_v21 = vld [vmem:[#allocation13_spill] sm:$0xff] }
 0x458   : > { %v16255_v45 = vadd.f32 %v11166_v55, %v11054_v27  ;;  %11509 = vmatprep.mubr.bf16.mxu1 %v10318_v23  ;;  %v17203_v23 = vcombine.low %v16074_v58, %v16090_v3 }
 0x45a   : > { %v11055_v9 = vpop.f32.mrb[188].mxu1 }
 0x45b   : > { %v11056_v4 = vpop.f32.mrb[189].mxu1  ;;  %v11301_v13 = vpop.f32.mrb[224].mxu0 }
 0x45c   : > { %v11057_v19 = vadd.f32 %v11056_v4, %v11055_v9  ;;  %v11058_v49 = vpop.f32.mrb[190].mxu1  ;;  %v11302_v42 = vpop.f32.mrb[225].mxu0  ;;  %v17204_v4 = vld [vmem:[#allocation14_spill] sm:$0xff] }
 0x45d   : > { %v11059_v53 = vpop.f32.mrb[191].mxu1  ;;  %v16260_v38 = vadd.f32 %v11302_v42, %v11301_v13  ;;  %v11304_v44 = vpop.f32.mrb[226].mxu0 }
 0x45e   : > { %v16262_v37 = vadd.f32 %v11169_v15, %v11057_v19  ;;  %v11060_v40 = vadd.f32 %v11059_v53, %v11058_v49  ;;  %v11305_v55 = vpop.f32.mrb[227].mxu0 }
 0x45f   : > { %v16264_v28 = vadd.f32 %v11305_v55, %v11304_v44  ;;  %11510 = vmatmul.mubr.bf16.gmra.mrb[24].mxu1 %v17200_v51  ;;  %v17205_v44 = vld [vmem:[#allocation17_spill] sm:$0xff] }
 0x460   : > { %v16266_v61 = vadd.f32 %v11172_v59, %v11060_v40  ;;  %11513 = vmatprep.mubr.bf16.mxu1 %v10320_v14 }
 0x462   : > { %v11189_v22 = vpop.f32.mrb[192].mxu1 }
 0x463   : > { %v11190_v47 = vpop.f32.mrb[193].mxu1 }
 0x464   : > { %v11191_v56 = vadd.f32 %v11190_v47, %v11189_v22  ;;  %v11192_v5 = vpop.f32.mrb[194].mxu1  ;;  %v11307_v36 = vpop.f32.mrb[228].mxu0 }
 0x465   : > { %v11193_v33 = vpop.f32.mrb[195].mxu1  ;;  %v11308_v60 = vpop.f32.mrb[229].mxu0 }
 0x466   : > { %v8839_v30 = vadd.f32 %v11191_v56, %v17201_v52  ;;  %v11194_v15 = vadd.f32 %v11193_v33, %v11192_v5  ;;  %v11309_v35 = vadd.f32 %v11308_v60, %v11307_v36  ;;  %v11310_v50 = vpop.f32.mrb[230].mxu0  ;;  %v17206_v33 = vld [vmem:[#allocation5_spill] sm:$0xff] }
 0x467   : > { %v11311_v27 = vpop.f32.mrb[231].mxu0  ;;  %11514 = vmatmul.mubr.bf16.gmra.mrb[28].mxu1 %v17203_v23 }
 0x468   : > { %v8842_v59 = vadd.f32 %v11194_v15, %v17202_v21  ;;  %v11312_v0 = vadd.f32 %v11311_v27, %v11310_v50  ;;  %v17207_v50 = vld [vmem:[#allocation6_spill] sm:$0xff] }
 0x46a   : > { %v11195_v8 = vpop.f32.mrb[196].mxu1 }
 0x46b   : > { %v11196_v48 = vpop.f32.mrb[197].mxu1 }
 0x46c   : > { %v11197_v14 = vadd.f32 %v11196_v48, %v11195_v8  ;;  %v11198_v32 = vpop.f32.mrb[198].mxu1  ;;  %v11313_v2 = vpop.f32.mrb[232].mxu0 }
 0x46d   : > { %v11199_v16 = vpop.f32.mrb[199].mxu1  ;;  %v11314_v9 = vpop.f32.mrb[233].mxu0 }
 0x46e   : > { %v8847_v13 = vadd.f32 %v11197_v14, %v17204_v4  ;;  %v11200_v19 = vadd.f32 %v11199_v16, %v11198_v32  ;;  %v11315_v49 = vadd.f32 %v11314_v9, %v11313_v2  ;;  %v11316_v42 = vpop.f32.mrb[234].mxu0 }
 0x46f   : > { %v11317_v53 = vpop.f32.mrb[235].mxu0 }
 0x470   : > { %v8850_v40 = vadd.f32 %v11200_v19, %v17205_v44  ;;  %v11318_v55 = vadd.f32 %v11317_v53, %v11316_v42  ;;  %v17208_v42 = vld [vmem:[#allocation19_spill] sm:$0xff] }
 0x472   : > { %v11201_v18 = vpop.f32.mrb[200].mxu1 }
 0x473   : > { %v11202_v58 = vpop.f32.mrb[201].mxu1 }
 0x474   : > { %v11319_v24 = vpop.f32.mrb[236].mxu0  ;;  %v11203_v51 = vadd.f32 %v11202_v58, %v11201_v18  ;;  %v11204_v22 = vpop.f32.mrb[202].mxu1  ;;  %v16284_v18 = vadd.f32 %v11309_v35, %v8847_v13 }
 0x475   : > { %v11320_v3 = vpop.f32.mrb[237].mxu0  ;;  %v11205_v5 = vpop.f32.mrb[203].mxu1 }
 0x476   : > { %v11321_v47 = vadd.f32 %v11320_v3, %v11319_v24  ;;  %v11322_v56 = vpop.f32.mrb[238].mxu0  ;;  %v8855_v60 = vadd.f32 %v11203_v51, %v17206_v33  ;;  %v11206_v52 = vadd.f32 %v11205_v5, %v11204_v22  ;;  %v17209_v24 = vld [vmem:[#allocation22_spill] sm:$0xff]  ;;  %v16288_v5 = vadd.f32 %v16260_v38, %v8839_v30 }
 0x477   : > { %v11323_v36 = vpop.f32.mrb[239].mxu0 }
 0x478   : > { %v11324_v15 = vadd.f32 %v11323_v36, %v11322_v56  ;;  %v8858_v27 = vadd.f32 %v11206_v52, %v17207_v50  ;;  %v16290_v52 = vadd.f32 %v11312_v0, %v8850_v40  ;;  %v16299_v30 = vadd.f32 %v11315_v49, %v8855_v60 }
 0x47c   : > { %v11325_v21 = vpop.f32.mrb[240].mxu0 }
 0x47d   : > { %v11326_v23 = vpop.f32.mrb[241].mxu0  ;;  %v11207_v8 = vpop.f32.mrb[204].mxu1 }
 0x47e   : > { %v11327_v48 = vadd.f32 %v11326_v23, %v11325_v21  ;;  %v11328_v14 = vpop.f32.mrb[242].mxu0  ;;  %v11208_v32 = vpop.f32.mrb[205].mxu1  ;;  %v16293_v23 = vadd.f32 %v16264_v28, %v8842_v59  ;;  %v16303_v59 = vadd.f32 %v11318_v55, %v8858_v27 }
 0x47f   : > { %v11329_v2 = vpop.f32.mrb[243].mxu0  ;;  %v11209_v16 = vadd.f32 %v11208_v32, %v11207_v8  ;;  %v11210_v9 = vpop.f32.mrb[206].mxu1 }
 0x480   : > { %v11330_v4 = vadd.f32 %v11329_v2, %v11328_v14  ;;  %v11211_v19 = vpop.f32.mrb[207].mxu1 }
 0x481   : > { %v8863_v53 = vadd.f32 %v11209_v16, %v17208_v42  ;;  %v11212_v44 = vadd.f32 %v11211_v19, %v11210_v9 }
 0x483   : > { %v8866_v58 = vadd.f32 %v11212_v44, %v17209_v24  ;;  %v16297_v16 = vadd.f32 %v11321_v47, %v8863_v53 }
 0x484   : > { %v11331_v3 = vpop.f32.mrb[244].mxu0 }
 0x485   : > { %v11332_v51 = vpop.f32.mrb[245].mxu0  ;;  %v16301_v28 = vadd.f32 %v11324_v15, %v8866_v58 }
 0x486   : > { %v11333_v22 = vadd.f32 %v11332_v51, %v11331_v3  ;;  %v11334_v56 = vpop.f32.mrb[246].mxu0  ;;  %v11213_v36 = vpop.f32.mrb[208].mxu1 }
 0x487   : > { %v11335_v33 = vpop.f32.mrb[247].mxu0  ;;  %v11214_v50 = vpop.f32.mrb[209].mxu1 }
 0x488   : > { %v11336_v21 = vadd.f32 %v11335_v33, %v11334_v56  ;;  %v11215_v35 = vadd.f32 %v11214_v50, %v11213_v36  ;;  %v11216_v13 = vpop.f32.mrb[210].mxu1 }
 0x489   : > { %v11217_v8 = vpop.f32.mrb[211].mxu1 }
 0x48a   : > { %v8871_v14 = vadd.f32 %v11215_v35, %v16119_v62  ;;  %v11218_v32 = vadd.f32 %v11217_v8, %v11216_v13 }
 0x48c   : > { %v8874_v2 = vadd.f32 %v11218_v32, %v16125_v46  ;;  %v16306_v53 = vadd.f32 %v11327_v48, %v8871_v14 }
 0x48d   : > { %v11337_v38 = vpop.f32.mrb[248].mxu0 }
 0x48e   : > { %v11338_v0 = vpop.f32.mrb[249].mxu0  ;;  %v16313_v55 = vadd.f32 %v11330_v4, %v8874_v2 }
 0x48f   : > { %v11339_v40 = vadd.f32 %v11338_v0, %v11337_v38  ;;  %v11340_v9 = vpop.f32.mrb[250].mxu0 }
 0x490   : > { %v11219_v19 = vpop.f32.mrb[212].mxu1  ;;  %v11341_v42 = vpop.f32.mrb[251].mxu0 }
 0x491   : > { %v11220_v44 = vpop.f32.mrb[213].mxu1  ;;  %v11342_v24 = vadd.f32 %v11341_v42, %v11340_v9 }
 0x492   : > { %v11221_v62 = vadd.f32 %v11220_v44, %v11219_v19  ;;  %v11222_v3 = vpop.f32.mrb[214].mxu1 }
 0x493   : > { %v11223_v51 = vpop.f32.mrb[215].mxu1 }
 0x494   : > { %v8879_v46 = vadd.f32 %v11221_v62, %v16143_v63  ;;  %v11224_v47 = vadd.f32 %v11223_v51, %v11222_v3 }
 0x496   : > { %v8882_v49 = vadd.f32 %v11224_v47, %v16145_v17  ;;  %v16309_v60 = vadd.f32 %v11333_v22, %v8879_v46 }
 0x497   : > { %v11343_v56 = vpop.f32.mrb[252].mxu0 }
 0x498   : > { %v11344_v36 = vpop.f32.mrb[253].mxu0  ;;  %v16311_v15 = vadd.f32 %v11336_v21, %v8882_v49 }
 0x499   : > { %v11345_v27 = vadd.f32 %v11344_v36, %v11343_v56  ;;  %v11346_v58 = vpop.f32.mrb[254].mxu0 }
 0x49a   : > { %v11347_v33 = vpop.f32.mrb[255].mxu0 }
 0x49b   : > { %v11225_v50 = vpop.f32.mrb[216].mxu1  ;;  %v11348_v35 = vadd.f32 %v11347_v33, %v11346_v58 }
 0x49c   : > { %v11226_v13 = vpop.f32.mrb[217].mxu1 }
 0x49d   : > { %v11227_v63 = vadd.f32 %v11226_v13, %v11225_v50  ;;  %v11228_v8 = vpop.f32.mrb[218].mxu1 }
 0x49e   : > { %v11229_v48 = vpop.f32.mrb[219].mxu1 }
 0x49f   : > { %v8887_v14 = vadd.f32 %v11227_v63, %v16157_v41  ;;  %v11230_v17 = vadd.f32 %v11229_v48, %v11228_v8 }
 0x4a1   : > { %v8890_v22 = vadd.f32 %v11230_v17, %v16159_v11  ;;  %v16317_v32 = vadd.f32 %v11339_v40, %v8887_v14 }
 0x4a2   : > { %v11349_v21 = vpop.f32.mrb[0].mxu0 }
 0x4a3   : > { %v11350_v38 = vpop.f32.mrb[1].mxu0  ;;  %v16319_v4 = vadd.f32 %v11342_v24, %v8890_v22 }
 0x4a4   : > { %v11351_v0 = vadd.f32 %v11350_v38, %v11349_v21  ;;  %v11352_v9 = vpop.f32.mrb[2].mxu0 }
 0x4a5   : > { %v11231_v2 = vpop.f32.mrb[220].mxu1  ;;  %v11353_v42 = vpop.f32.mrb[3].mxu0 }
 0x4a6   : > { %v11232_v19 = vpop.f32.mrb[221].mxu1  ;;  %v11354_v3 = vadd.f32 %v11353_v42, %v11352_v9 }
 0x4a7   : > { %v11233_v44 = vadd.f32 %v11232_v19, %v11231_v2  ;;  %v11234_v62 = vpop.f32.mrb[222].mxu1 }
 0x4a8   : > { %v11235_v51 = vpop.f32.mrb[223].mxu1 }
 0x4a9   : > { %v8895_v41 = vadd.f32 %v11233_v44, %v16172_v54  ;;  %v11236_v46 = vadd.f32 %v11235_v51, %v11234_v62 }
 0x4ab   : > { %v8898_v11 = vadd.f32 %v11236_v46, %v16174_v57  ;;  %v16323_v40 = vadd.f32 %v11345_v27, %v8895_v41  ;;  %v11355_v47 = vpop.f32.mrb[4].mxu0 }
 0x4ac   : > { %v11356_v49 = vpop.f32.mrb[5].mxu0 }
 0x4ad   : > { %v16325_v24 = vadd.f32 %v11348_v35, %v8898_v11  ;;  %v11357_v56 = vadd.f32 %v11356_v49, %v11355_v47  ;;  %v11358_v36 = vpop.f32.mrb[6].mxu0 }
 0x4ae   : > { %v11359_v58 = vpop.f32.mrb[7].mxu0 }
 0x4af   : > { %v11237_v33 = vpop.f32.mrb[224].mxu1  ;;  %v11360_v50 = vadd.f32 %v11359_v58, %v11358_v36 }
 0x4b0   : > { %v11238_v13 = vpop.f32.mrb[225].mxu1 }
 0x4b1   : > { %v11239_v63 = vadd.f32 %v11238_v13, %v11237_v33  ;;  %v11240_v8 = vpop.f32.mrb[226].mxu1 }
 0x4b2   : > { %v11241_v48 = vpop.f32.mrb[227].mxu1 }
 0x4b3   : > { %v8903_v54 = vadd.f32 %v11239_v63, %v16178_v10  ;;  %v11242_v14 = vadd.f32 %v11241_v48, %v11240_v8 }
 0x4b5   : > { %v8906_v57 = vadd.f32 %v11242_v14, %v16180_v7  ;;  %v16329_v27 = vadd.f32 %v11351_v0, %v8903_v54 }
 0x4b6   : > { %v11361_v17 = vpop.f32.mrb[8].mxu0 }
 0x4b7   : > { %v11362_v22 = vpop.f32.mrb[9].mxu0  ;;  %v16331_v35 = vadd.f32 %v11354_v3, %v8906_v57 }
 0x4b8   : > { %v11363_v38 = vadd.f32 %v11362_v22, %v11361_v17  ;;  %v11364_v2 = vpop.f32.mrb[10].mxu0 }
 0x4b9   : > { %v11243_v21 = vpop.f32.mrb[228].mxu1  ;;  %v11365_v19 = vpop.f32.mrb[11].mxu0 }
 0x4ba   : > { %v11244_v9 = vpop.f32.mrb[229].mxu1  ;;  %v11366_v62 = vadd.f32 %v11365_v19, %v11364_v2 }
 0x4bb   : > { %v11245_v42 = vadd.f32 %v11244_v9, %v11243_v21  ;;  %v11246_v44 = vpop.f32.mrb[230].mxu1 }
 0x4bc   : > { %v11247_v51 = vpop.f32.mrb[231].mxu1 }
 0x4bd   : > { %v8911_v10 = vadd.f32 %v11245_v42, %v16184_v25  ;;  %v11248_v41 = vadd.f32 %v11247_v51, %v11246_v44 }
 0x4bf   : > { %v8914_v7 = vadd.f32 %v11248_v41, %v16186_v29  ;;  %v16335_v0 = vadd.f32 %v11357_v56, %v8911_v10  ;;  %v11367_v46 = vpop.f32.mrb[12].mxu0 }
 0x4c0   : > { %v11368_v11 = vpop.f32.mrb[13].mxu0 }
 0x4c1   : > { %v16337_v3 = vadd.f32 %v11360_v50, %v8914_v7  ;;  %v11369_v47 = vadd.f32 %v11368_v11, %v11367_v46  ;;  %v11370_v49 = vpop.f32.mrb[14].mxu0 }
 0x4c2   : > { %v11371_v36 = vpop.f32.mrb[15].mxu0 }
 0x4c3   : > { %v11372_v58 = vadd.f32 %v11371_v36, %v11370_v49 }
 0x4c4   : > { %v11249_v33 = vpop.f32.mrb[232].mxu1 }
 0x4c5   : > { %v11250_v13 = vpop.f32.mrb[233].mxu1 }
 0x4c6   : > { %v11251_v63 = vadd.f32 %v11250_v13, %v11249_v33  ;;  %v11252_v8 = vpop.f32.mrb[234].mxu1 }
 0x4c7   : > { %v11253_v48 = vpop.f32.mrb[235].mxu1 }
 0x4c8   : > { %v8919_v25 = vadd.f32 %v11251_v63, %v16194_v34  ;;  %v11254_v54 = vadd.f32 %v11253_v48, %v11252_v8 }
 0x4ca   : > { %v8922_v29 = vadd.f32 %v11254_v54, %v16199_v31  ;;  %v16341_v56 = vadd.f32 %v11363_v38, %v8919_v25 }
 0x4cb   : > { %v11373_v14 = vpop.f32.mrb[16].mxu0 }
 0x4cc   : > { %v11374_v57 = vpop.f32.mrb[17].mxu0  ;;  %v16343_v50 = vadd.f32 %v11366_v62, %v8922_v29 }
 0x4cd   : > { %v11375_v17 = vadd.f32 %v11374_v57, %v11373_v14  ;;  %v11376_v22 = vpop.f32.mrb[18].mxu0 }
 0x4ce   : > { %v11377_v2 = vpop.f32.mrb[19].mxu0 }
 0x4cf   : > { %v11255_v21 = vpop.f32.mrb[236].mxu1  ;;  %v11378_v19 = vadd.f32 %v11377_v2, %v11376_v22 }
 0x4d0   : > { %v11256_v9 = vpop.f32.mrb[237].mxu1 }
 0x4d1   : > { %v11257_v42 = vadd.f32 %v11256_v9, %v11255_v21  ;;  %v11258_v44 = vpop.f32.mrb[238].mxu1 }
 0x4d2   : > { %v11259_v51 = vpop.f32.mrb[239].mxu1 }
 0x4d3   : > { %v8927_v34 = vadd.f32 %v11257_v42, %v16216_v6  ;;  %v11260_v10 = vadd.f32 %v11259_v51, %v11258_v44 }
 0x4d5   : > { %v8930_v31 = vadd.f32 %v11260_v10, %v16220_v1  ;;  %v16347_v38 = vadd.f32 %v11369_v47, %v8927_v34 }
 0x4d6   : > { %v11379_v41 = vpop.f32.mrb[20].mxu0 }
 0x4d7   : > { %v16349_v7 = vadd.f32 %v11372_v58, %v8930_v31  ;;  %v11380_v62 = vpop.f32.mrb[21].mxu0 }
 0x4d8   : > { %v11381_v46 = vadd.f32 %v11380_v62, %v11379_v41  ;;  %v11382_v11 = vpop.f32.mrb[22].mxu0 }
 0x4d9   : > { %v11383_v49 = vpop.f32.mrb[23].mxu0 }
 0x4da   : > { %v11384_v33 = vadd.f32 %v11383_v49, %v11382_v11 }
 0x4dc   : > { %v11261_v36 = vpop.f32.mrb[240].mxu1 }
 0x4dd   : > { %v11262_v13 = vpop.f32.mrb[241].mxu1 }
 0x4de   : > { %v11263_v63 = vadd.f32 %v11262_v13, %v11261_v36  ;;  %v11264_v8 = vpop.f32.mrb[242].mxu1 }
 0x4df   : > { %v11265_v48 = vpop.f32.mrb[243].mxu1 }
 0x4e0   : > { %v8935_v6 = vadd.f32 %v11263_v63, %v16227_v39  ;;  %v11266_v25 = vadd.f32 %v11265_v48, %v11264_v8 }
 0x4e2   : > { %v8938_v1 = vadd.f32 %v11266_v25, %v16231_v43  ;;  %v16353_v47 = vadd.f32 %v11375_v17, %v8935_v6  ;;  %v11385_v54 = vpop.f32.mrb[24].mxu0 }
 0x4e3   : > { %v11386_v58 = vpop.f32.mrb[25].mxu0 }
 0x4e4   : > { %v16355_v29 = vadd.f32 %v11378_v19, %v8938_v1  ;;  %v11387_v14 = vadd.f32 %v11386_v58, %v11385_v54  ;;  %v11388_v57 = vpop.f32.mrb[26].mxu0 }
 0x4e5   : > { %v11389_v22 = vpop.f32.mrb[27].mxu0 }
 0x4e6   : > { %v11390_v2 = vadd.f32 %v11389_v22, %v11388_v57 }
 0x4e7   : > { %v11267_v21 = vpop.f32.mrb[244].mxu1 }
 0x4e8   : > { %v11268_v9 = vpop.f32.mrb[245].mxu1 }
 0x4e9   : > { %v11269_v42 = vadd.f32 %v11268_v9, %v11267_v21  ;;  %v11270_v44 = vpop.f32.mrb[246].mxu1 }
 0x4ea   : > { %v11271_v51 = vpop.f32.mrb[247].mxu1 }
 0x4eb   : > { %v8943_v39 = vadd.f32 %v11269_v42, %v16239_v12  ;;  %v11272_v34 = vadd.f32 %v11271_v51, %v11270_v44 }
 0x4ed   : > { %v8946_v43 = vadd.f32 %v11272_v34, %v16243_v26  ;;  %v16359_v17 = vadd.f32 %v11381_v46, %v8943_v39 }
 0x4ee   : > { %v11391_v10 = vpop.f32.mrb[28].mxu0 }
 0x4ef   : > { %v16361_v31 = vadd.f32 %v11384_v33, %v8946_v43  ;;  %v11392_v19 = vpop.f32.mrb[29].mxu0 }
 0x4f0   : > { %v11393_v41 = vadd.f32 %v11392_v19, %v11391_v10  ;;  %v11394_v62 = vpop.f32.mrb[30].mxu0 }
 0x4f1   : > { %v11395_v11 = vpop.f32.mrb[31].mxu0 }
 0x4f2   : > { %v11396_v49 = vadd.f32 %v11395_v11, %v11394_v62  ;;  %v11273_v36 = vpop.f32.mrb[248].mxu1 }
 0x4f3   : > { %v11274_v13 = vpop.f32.mrb[249].mxu1 }
 0x4f4   : > { %v11275_v63 = vadd.f32 %v11274_v13, %v11273_v36  ;;  %v11276_v8 = vpop.f32.mrb[250].mxu1 }
 0x4f5   : > { %v11277_v48 = vpop.f32.mrb[251].mxu1 }
 0x4f6   : > { %v8951_v12 = vadd.f32 %v11275_v63, %v16251_v20  ;;  %v11278_v6 = vadd.f32 %v11277_v48, %v11276_v8 }
 0x4f8   : > { %v8954_v26 = vadd.f32 %v11278_v6, %v16255_v45  ;;  %v16365_v46 = vadd.f32 %v11387_v14, %v8951_v12 }
 0x4fa   : > { %v11279_v25 = vpop.f32.mrb[252].mxu1  ;;  %v16367_v33 = vadd.f32 %v11390_v2, %v8954_v26 }
 0x4fb   : > { %v11280_v1 = vpop.f32.mrb[253].mxu1 }
 0x4fc   : > { %v11281_v54 = vadd.f32 %v11280_v1, %v11279_v25  ;;  %v11282_v58 = vpop.f32.mrb[254].mxu1 }
 0x4fd   : > { %v11283_v57 = vpop.f32.mrb[255].mxu1 }
 0x4fe   : > { %v8959_v22 = vadd.f32 %v11281_v54, %v16262_v37  ;;  %v11284_v21 = vadd.f32 %v11283_v57, %v11282_v58 }
 0x500   : > { %v8962_v9 = vadd.f32 %v11284_v21, %v16266_v61  ;;  %v16371_v42 = vadd.f32 %v11393_v41, %v8959_v22 }
 0x502   : > { %v11487_v20 = vpop.f32.mrb[0].mxu1  ;;  %v16373_v44 = vadd.f32 %v11396_v49, %v8962_v9 }
 0x503   : > { %v16376_v45 = vadd.f32 %v11487_v20, %v16284_v18  ;;  %v9160_v14 = vpop.f32.mrb[1].mxu1 }
 0x504   : > { %v16379_v2 = vadd.f32 %v9160_v14, %v16288_v5  ;;  %v11488_v51 = vpop.f32.mrb[2].mxu1 }
 0x505   : > { %v16382_v39 = vadd.f32 %v11488_v51, %v16290_v52  ;;  %v9163_v37 = vpop.f32.mrb[3].mxu1  ;;  %v9390_v5 = vmul.f32 %v16376_v45, %v16376_v45 }
 0x506   : > { %v16385_v34 = vadd.f32 %v9163_v37, %v16293_v23  ;;  %v9388_v61 = vmul.f32 %v16379_v2, %v16379_v2 }
 0x507   : > { %v9391_v62 = vmul.f32 %v16382_v39, %v16382_v39 }
 0x508   : > { %v9351_v43 = vadd.f32 %v16385_v34, %v16379_v2  ;;  %v9389_v18 = vmul.f32 %v16385_v34, %v16385_v34 }
 0x50a   : > { %v9352_v10 = vadd.f32 %v9351_v43, %v16376_v45  ;;  %v9420_v52 = vadd.f32 %v9389_v18, %v9388_v61  ;;  %v11491_v19 = vpop.f32.mrb[4].mxu1 }
 0x50b   : > { %v16397_v41 = vadd.f32 %v11491_v19, %v16297_v16  ;;  %v9176_v23 = vpop.f32.mrb[5].mxu1 }
 0x50c   : > { %v9421_v11 = vadd.f32 %v9420_v52, %v9390_v5  ;;  %v16402_v49 = vadd.f32 %v9176_v23, %v16299_v30  ;;  %v9353_v36 = vadd.f32 %v9352_v10, %v16382_v39  ;;  %v11492_v13 = vpop.f32.mrb[6].mxu1 }
 0x50d   : > { %v16406_v63 = vadd.f32 %v11492_v13, %v16301_v28  ;;  %v9179_v8 = vpop.f32.mrb[7].mxu1  ;;  %v9394_v28 = vmul.f32 %v16397_v41, %v16397_v41 }
 0x50e   : > { %v9354_v48 = vadd.f32 %v9353_v36, %v16402_v49  ;;  %v9392_v16 = vmul.f32 %v16402_v49, %v16402_v49  ;;  %v9422_v12 = vadd.f32 %v9421_v11, %v9391_v62  ;;  %v16412_v6 = vadd.f32 %v9179_v8, %v16303_v59 }
 0x50f   : > { %v9395_v59 = vmul.f32 %v16406_v63, %v16406_v63 }
 0x510   : > { %v9423_v26 = vadd.f32 %v9422_v12, %v9392_v16  ;;  %v9355_v30 = vadd.f32 %v9354_v48, %v16412_v6  ;;  %v9393_v25 = vmul.f32 %v16412_v6, %v16412_v6 }
 0x512   : > { %v9356_v1 = vadd.f32 %v9355_v30, %v16397_v41  ;;  %v9424_v54 = vadd.f32 %v9423_v26, %v9393_v25  ;;  %v11495_v58 = vpop.f32.mrb[8].mxu1 }
 0x513   : > { %v16421_v57 = vadd.f32 %v11495_v58, %v16309_v60  ;;  %v9192_v22 = vpop.f32.mrb[9].mxu1 }
 0x514   : > { %v9425_v21 = vadd.f32 %v9424_v54, %v9394_v28  ;;  %v16426_v9 = vadd.f32 %v9192_v22, %v16306_v53  ;;  %v9357_v20 = vadd.f32 %v9356_v1, %v16406_v63  ;;  %v11496_v14 = vpop.f32.mrb[10].mxu1 }
 0x515   : > { %v16430_v51 = vadd.f32 %v11496_v14, %v16311_v15  ;;  %v9195_v37 = vpop.f32.mrb[11].mxu1  ;;  %v9398_v15 = vmul.f32 %v16421_v57, %v16421_v57 }
 0x516   : > { %v9358_v61 = vadd.f32 %v9357_v20, %v16426_v9  ;;  %v9396_v60 = vmul.f32 %v16426_v9, %v16426_v9  ;;  %v9426_v43 = vadd.f32 %v9425_v21, %v9395_v59  ;;  %v16436_v18 = vadd.f32 %v9195_v37, %v16313_v55 }
 0x517   : > { %v9399_v55 = vmul.f32 %v16430_v51, %v16430_v51 }
 0x518   : > { %v9427_v5 = vadd.f32 %v9426_v43, %v9396_v60  ;;  %v9359_v53 = vadd.f32 %v9358_v61, %v16436_v18  ;;  %v9397_v10 = vmul.f32 %v16436_v18, %v16436_v18 }
 0x51a   : > { %v9360_v52 = vadd.f32 %v9359_v53, %v16421_v57  ;;  %v9428_v19 = vadd.f32 %v9427_v5, %v9397_v10  ;;  %v11499_v23 = vpop.f32.mrb[12].mxu1 }
 0x51b   : > { %v16445_v62 = vadd.f32 %v11499_v23, %v16323_v40  ;;  %v9208_v11 = vpop.f32.mrb[13].mxu1 }
 0x51c   : > { %v9429_v36 = vadd.f32 %v9428_v19, %v9398_v15  ;;  %v16450_v13 = vadd.f32 %v9208_v11, %v16317_v32  ;;  %v9361_v8 = vadd.f32 %v9360_v52, %v16430_v51  ;;  %v11500_v48 = vpop.f32.mrb[14].mxu1 }
 0x51d   : > { %v16454_v16 = vadd.f32 %v11500_v48, %v16325_v24  ;;  %v9211_v12 = vpop.f32.mrb[15].mxu1  ;;  %v9402_v24 = vmul.f32 %v16445_v62, %v16445_v62 }
 0x51e   : > { %v9362_v26 = vadd.f32 %v9361_v8, %v16450_v13  ;;  %v9400_v40 = vmul.f32 %v16450_v13, %v16450_v13  ;;  %v9430_v30 = vadd.f32 %v9429_v36, %v9399_v55  ;;  %v16460_v25 = vadd.f32 %v9211_v12, %v16319_v4 }
 0x51f   : > { %v9403_v4 = vmul.f32 %v16454_v16, %v16454_v16 }
 0x520   : > { %v9431_v28 = vadd.f32 %v9430_v30, %v9400_v40  ;;  %v9363_v32 = vadd.f32 %v9362_v26, %v16460_v25  ;;  %v9401_v1 = vmul.f32 %v16460_v25, %v16460_v25 }
 0x522   : > { %v9364_v54 = vadd.f32 %v9363_v32, %v16445_v62  ;;  %v9432_v58 = vadd.f32 %v9431_v28, %v9401_v1  ;;  %v11503_v22 = vpop.f32.mrb[16].mxu1 }
 0x523   : > { %v16469_v59 = vadd.f32 %v11503_v22, %v16335_v0  ;;  %v9224_v21 = vpop.f32.mrb[17].mxu1 }
 0x524   : > { %v9433_v20 = vadd.f32 %v9432_v58, %v9402_v24  ;;  %v16474_v14 = vadd.f32 %v9224_v21, %v16329_v27  ;;  %v9365_v37 = vadd.f32 %v9364_v54, %v16454_v16  ;;  %v11504_v61 = vpop.f32.mrb[18].mxu1 }
 0x525   : > { %v16478_v60 = vadd.f32 %v11504_v61, %v16337_v3  ;;  %v9227_v43 = vpop.f32.mrb[19].mxu1  ;;  %v9406_v3 = vmul.f32 %v16469_v59, %v16469_v59 }
 0x526   : > { %v9366_v5 = vadd.f32 %v9365_v37, %v16474_v14  ;;  %v9404_v0 = vmul.f32 %v16474_v14, %v16474_v14  ;;  %v9434_v53 = vadd.f32 %v9433_v20, %v9403_v4  ;;  %v16484_v10 = vadd.f32 %v9227_v43, %v16331_v35 }
 0x527   : > { %v9407_v35 = vmul.f32 %v16478_v60, %v16478_v60 }
 0x528   : > { %v9435_v15 = vadd.f32 %v9434_v53, %v9404_v0  ;;  %v9367_v27 = vadd.f32 %v9366_v5, %v16484_v10  ;;  %v9405_v52 = vmul.f32 %v16484_v10, %v16484_v10 }
 0x52a   : > { %v9368_v19 = vadd.f32 %v9367_v27, %v16469_v59  ;;  %v9436_v23 = vadd.f32 %v9435_v15, %v9405_v52  ;;  %v11507_v11 = vpop.f32.mrb[20].mxu1 }
 0x52b   : > { %v16493_v55 = vadd.f32 %v11507_v11, %v16347_v38  ;;  %v9240_v36 = vpop.f32.mrb[21].mxu1 }
 0x52c   : > { %v9437_v8 = vadd.f32 %v9436_v23, %v9406_v3  ;;  %v16498_v48 = vadd.f32 %v9240_v36, %v16341_v56  ;;  %v9369_v12 = vadd.f32 %v9368_v19, %v16478_v60  ;;  %v11508_v26 = vpop.f32.mrb[22].mxu1 }
 0x52d   : > { %v16502_v40 = vadd.f32 %v11508_v26, %v16349_v7  ;;  %v9243_v30 = vpop.f32.mrb[23].mxu1  ;;  %v9410_v7 = vmul.f32 %v16493_v55, %v16493_v55 }
 0x52e   : > { %v9370_v28 = vadd.f32 %v9369_v12, %v16498_v48  ;;  %v9408_v38 = vmul.f32 %v16498_v48, %v16498_v48  ;;  %v9438_v32 = vadd.f32 %v9437_v8, %v9407_v35  ;;  %v16508_v1 = vadd.f32 %v9243_v30, %v16343_v50 }
 0x52f   : > { %v9411_v50 = vmul.f32 %v16502_v40, %v16502_v40 }
 0x530   : > { %v9439_v24 = vadd.f32 %v9438_v32, %v9408_v38  ;;  %v9371_v56 = vadd.f32 %v9370_v28, %v16508_v1  ;;  %v9409_v54 = vmul.f32 %v16508_v1, %v16508_v1 }
 0x532   : > { %v9372_v58 = vadd.f32 %v9371_v56, %v16493_v55  ;;  %v9440_v22 = vadd.f32 %v9439_v24, %v9409_v54  ;;  %v11511_v21 = vpop.f32.mrb[24].mxu1 }
 0x533   : > { %v16517_v4 = vadd.f32 %v11511_v21, %v16359_v17  ;;  %v9256_v20 = vpop.f32.mrb[25].mxu1 }
 0x534   : > { %v9441_v37 = vadd.f32 %v9440_v22, %v9410_v7  ;;  %v16522_v61 = vadd.f32 %v9256_v20, %v16353_v47  ;;  %v9373_v43 = vadd.f32 %v9372_v58, %v16502_v40  ;;  %v11512_v5 = vpop.f32.mrb[26].mxu1 }
 0x535   : > { %v16526_v0 = vadd.f32 %v11512_v5, %v16361_v31  ;;  %v9259_v53 = vpop.f32.mrb[27].mxu1  ;;  %v9414_v31 = vmul.f32 %v16517_v4, %v16517_v4 }
 0x536   : > { %v9374_v15 = vadd.f32 %v9373_v43, %v16522_v61  ;;  %v9412_v17 = vmul.f32 %v16522_v61, %v16522_v61  ;;  %v9442_v27 = vadd.f32 %v9441_v37, %v9411_v50  ;;  %v16532_v52 = vadd.f32 %v9259_v53, %v16355_v29 }
 0x537   : > { %v9415_v29 = vmul.f32 %v16526_v0, %v16526_v0 }
 0x538   : > { %v9443_v3 = vadd.f32 %v9442_v27, %v9412_v17  ;;  %v9375_v47 = vadd.f32 %v9374_v15, %v16532_v52  ;;  %v9413_v19 = vmul.f32 %v16532_v52, %v16532_v52 }
 0x53a   : > { %v9376_v23 = vadd.f32 %v9375_v47, %v16517_v4  ;;  %v9444_v11 = vadd.f32 %v9443_v3, %v9413_v19  ;;  %v11515_v36 = vpop.f32.mrb[28].mxu1 }
 0x53b   : > { %v16541_v35 = vadd.f32 %v11515_v36, %v16371_v42  ;;  %v9272_v8 = vpop.f32.mrb[29].mxu1 }
 0x53c   : > { %v9445_v12 = vadd.f32 %v9444_v11, %v9414_v31  ;;  %v16546_v26 = vadd.f32 %v9272_v8, %v16365_v46  ;;  %v9377_v30 = vadd.f32 %v9376_v23, %v16526_v0  ;;  %v11516_v28 = vpop.f32.mrb[30].mxu1 }
 0x53d   : > { %v16550_v38 = vadd.f32 %v11516_v28, %v16373_v44  ;;  %v9275_v32 = vpop.f32.mrb[31].mxu1  ;;  %v9418_v44 = vmul.f32 %v16541_v35, %v16541_v35 }
 0x53e   : > { %v9378_v24 = vadd.f32 %v9377_v30, %v16546_v26  ;;  %v9416_v42 = vmul.f32 %v16546_v26, %v16546_v26  ;;  %v9446_v56 = vadd.f32 %v9445_v12, %v9415_v29  ;;  %v16556_v54 = vadd.f32 %v9275_v32, %v16367_v33 }
 0x53f   : > { %v9419_v20 = vmul.f32 %v16550_v38, %v16550_v38 }
 0x540   : > { %v9447_v7 = vadd.f32 %v9446_v56, %v9416_v42  ;;  %v9379_v46 = vadd.f32 %v9378_v24, %v16556_v54  ;;  %v9417_v58 = vmul.f32 %v16556_v54, %v16556_v54 }
 0x542   : > { %v9380_v22 = vadd.f32 %v9379_v46, %v16541_v35  ;;  %v9448_v21 = vadd.f32 %v9447_v7, %v9417_v58  ;;  %v16684_v58 = vld [vmem:[%s12022_s27 + $0x78] sm:$0xff]  }
 0x544   : > { %v9381_v50 = vadd.f32 %v9380_v22, %v16550_v38  ;;  %v9449_v37 = vadd.f32 %v9448_v21, %v9418_v44  ;;  %v16677_v22 = vld [vmem:[%s12022_s27 + $0x70] sm:$0xff]  }
 0x546   : > { %v9382_v33 = vrot.slane %v9381_v50, 4  ;;  %v9450_v43 = vadd.f32 %v9449_v37, %v9419_v20 }
 0x548   : > { %v9383_v5 = vadd.f32 %v9382_v33, %v9381_v50  ;;  %v9451_v53 = vrot.slane %v9450_v43, 4  ;;  %v16657_v33 = vld [vmem:[%s12022_s27 + $0x50] sm:$0xff]   ;;  %v16664_v50 = vld [vmem:[%s12022_s27 + $0x58] sm:$0xff]  }
 0x54a   : > { %v9384_v15 = vrot.slane %v9383_v5, 2  ;;  %v9452_v17 = vadd.f32 %v9451_v53, %v9450_v43  ;;  %v16644_v53 = vld [vmem:[%s12022_s27 + $0x38] sm:$0xff]  }
 0x54c   : > { %v9385_v27 = vadd.f32 %v9384_v15, %v9383_v5  ;;  %v9453_v3 = vrot.slane %v9452_v17, 2  ;;  %v16647_v5 = vld [vmem:[%s12022_s27 + $0x40] sm:$0xff]   ;;  %v16674_v15 = vld [vmem:[%s12022_s27 + $0x68] sm:$0xff]  }
 0x54e   : > { %v9386_v47 = vrot.slane %v9385_v27, 1  ;;  %v9454_v19 = vadd.f32 %v9453_v3, %v9452_v17  ;;  %v16634_v3 = vld [vmem:[%s12022_s27 + $0x28] sm:$0xff]  }
 0x550   : > { %v9387_v31 = vadd.f32 %v9386_v47, %v9385_v27  ;;  %v9455_v23 = vrot.slane %v9454_v19, 1  ;;  %v16637_v47 = vld [vmem:[%s12022_s27 + $0x30] sm:$0xff]  }
 0x552   : > { %v9456_v11 = vadd.f32 %v9455_v23, %v9454_v19  ;;  %v16567_v36 = vmul.f32 0.00390625, %v9387_v31  ;;  %v16618_v19 = vld [vmem:[%s12022_s27] sm:$0xff]   ;;  %v16621_v23 = vld [vmem:[%s12022_s27 + $0x8] sm:$0xff]  }
 0x554   : > { %v9458_v8 = vmul.f32 0.00390625, %v9456_v11  ;;  %v9459_v29 = vmul.f32 %v16567_v36, %v16567_v36  ;;  %v9470_v30 = vsub.f32 %v16426_v9, %v16567_v36  ;;  %v9471_v28 = vsub.f32 %v16436_v18, %v16567_v36  ;;  %v16624_v11 = vld [vmem:[%s12022_s27 + $0x10] sm:$0xff]  }
 0x555   : > { %v9462_v44 = vsub.f32 %v16379_v2, %v16567_v36  ;;  %v9463_v27 = vsub.f32 %v16385_v34, %v16567_v36  ;;  %v9464_v46 = vsub.f32 %v16376_v45, %v16567_v36  ;;  %v9466_v17 = vsub.f32 %v16402_v49, %v16567_v36 }
 0x556   : > { %v9460_v12 = vsub.f32 %v9458_v8, %v9459_v29  ;;  %v16627_v8 = vld [vmem:[%s12022_s27 + $0x18] sm:$0xff]   ;;  %v16630_v29 = vld [vmem:[%s12022_s27 + $0x20] sm:$0xff]   ;;  %v9467_v2 = vsub.f32 %v16412_v6, %v16567_v36  ;;  %v9468_v43 = vsub.f32 %v16397_v41, %v16567_v36  ;;  %v9469_v20 = vsub.f32 %v16406_v63, %v16567_v36 }
 0x557   : > { %v9472_v34 = vsub.f32 %v16421_v57, %v16567_v36  ;;  %v17210_v57 = vsub.f32 %v16430_v51, %v16567_v36  ;;  %v17213_v9 = vsub.f32 %v16445_v62, %v16567_v36  ;;  %v17214_v18 = vsub.f32 %v16454_v16, %v16567_v36 }
 0x558   : > { %v9461_v42 = vmax.f32 %v9460_v12, 0.0  ;;  %v16667_v12 = vld [vmem:[%s12022_s27 + $0x60] sm:$0xff]   ;;  %v17215_v51 = vsub.f32 %v16474_v14, %v16567_v36  ;;  %v17218_v62 = vsub.f32 %v16478_v60, %v16567_v36  ;;  %v17219_v16 = vsub.f32 %v16498_v48, %v16567_v36 }
 0x559   : > { %v17220_v14 = vsub.f32 %v16508_v1, %v16567_v36  ;;  %v17223_v60 = vsub.f32 %v16522_v61, %v16567_v36  ;;  %v17224_v48 = vsub.f32 %v16532_v52, %v16567_v36  ;;  %v17225_v1 = vsub.f32 %v16517_v4, %v16567_v36 }
 0x55a   : > { %v9494_v31 = vadd.f32 1e-05, %v9461_v42  ;;  %v16654_v42 = vld [vmem:[%s12022_s27 + $0x48] sm:$0xff]   ;;  %s10397_s27 = sshll.u32 %s17264_s13, 8  ;;  %v17228_v52 = vsub.f32 %v16556_v54, %v16567_v36  ;;  %v17229_v4 = vsub.f32 %v16541_v35, %v16567_v36  ;;  %v17233_v54 = vunpack.c.l.bf16 %v16621_v23 }
 0x55b   : > { %s16776_s20 = scalar_lea.vmem %s16892_s3, %s10397_s27 }
 0x55c   : > { %11815 = vrsqrt.f32 %v9494_v31  ;;  %v9465_v31 = vsub.f32 %v16382_v39, %v16567_v36 }
 0x566   : > { %v11816_v37 = vpop.eup %11815 }
 0x567   : > { %v9496_v45 = vmul.f32 %v11816_v37, %v9462_v44  ;;  %v9497_v7 = vmul.f32 %v11816_v37, %v9463_v27  ;;  %v9498_v39 = vmul.f32 %v11816_v37, %v9464_v46  ;;  %v9499_v21 = vmul.f32 %v11816_v37, %v9465_v31 }
 0x568   : > { %v9500_v56 = vmul.f32 %v11816_v37, %v9466_v17  ;;  %v9501_v49 = vmul.f32 %v11816_v37, %v9467_v2  ;;  %v9502_v24 = vmul.f32 %v11816_v37, %v9468_v43  ;;  %v9503_v32 = vmul.f32 %v11816_v37, %v9469_v20 }
 0x569   : > { %v9504_v6 = vmul.f32 %v11816_v37, %v9470_v30  ;;  %v9505_v41 = vmul.f32 %v11816_v37, %v9471_v28  ;;  %v9506_v63 = vmul.f32 %v11816_v37, %v9472_v34  ;;  %v9507_v44 = vmul.f32 %v11816_v37, %v17210_v57 }
 0x56a   : > { %v17211_v46 = vsub.f32 %v16450_v13, %v16567_v36  ;;  %v17212_v20 = vsub.f32 %v16460_v25, %v16567_v36  ;;  %v9510_v30 = vmul.f32 %v11816_v37, %v17213_v9  ;;  %v9511_v28 = vmul.f32 %v11816_v37, %v17214_v18 }
 0x56b   : > { %v9512_v27 = vmul.f32 %v11816_v37, %v17215_v51  ;;  %v17216_v13 = vsub.f32 %v16484_v10, %v16567_v36  ;;  %v17217_v25 = vsub.f32 %v16469_v59, %v16567_v36  ;;  %v9515_v34 = vmul.f32 %v11816_v37, %v17218_v62 }
 0x56c   : > { %v9508_v17 = vmul.f32 %v11816_v37, %v17211_v46  ;;  %v9509_v43 = vmul.f32 %v11816_v37, %v17212_v20  ;;  %v9516_v57 = vmul.f32 %v11816_v37, %v17219_v16  ;;  %v9517_v46 = vmul.f32 %v11816_v37, %v17220_v14 }
 0x56d   : > { %v9513_v31 = vmul.f32 %v11816_v37, %v17216_v13  ;;  %v9514_v2 = vmul.f32 %v11816_v37, %v17217_v25  ;;  %v17221_v10 = vsub.f32 %v16493_v55, %v16567_v36  ;;  %v17222_v59 = vsub.f32 %v16502_v40, %v16567_v36 }
 0x56e   : > { %v9520_v18 = vmul.f32 %v11816_v37, %v17223_v60  ;;  %v9521_v51 = vmul.f32 %v11816_v37, %v17224_v48  ;;  %v9522_v13 = vmul.f32 %v11816_v37, %v17225_v1  ;;  %v17226_v55 = vsub.f32 %v16526_v0, %v16567_v36 }
 0x56f   : > { %v9518_v20 = vmul.f32 %v11816_v37, %v17221_v10  ;;  %v9519_v9 = vmul.f32 %v11816_v37, %v17222_v59  ;;  %v17227_v40 = vsub.f32 %v16546_v26, %v16567_v36  ;;  %v9525_v62 = vmul.f32 %v11816_v37, %v17228_v52 }
 0x570   : > { %v9523_v25 = vmul.f32 %v11816_v37, %v17226_v55  ;;  %v9526_v0 = vmul.f32 %v11816_v37, %v17229_v4  ;;  %v17230_v16 = vsub.f32 %v16550_v38, %v16567_v36  ;;  %v17231_v10 = vunpack.c.l.bf16 %v16618_v19 }
 0x571   : > { %v9524_v61 = vmul.f32 %v11816_v37, %v17227_v40  ;;  %v17232_v59 = vunpack.c.h.bf16 %v16618_v19  ;;  %v9594_v48 = vadd.f32 %v17233_v54, %v9498_v39  ;;  %v17234_v1 = vunpack.c.h.bf16 %v16621_v23 }
 0x572   : > { %v9527_v14 = vmul.f32 %v11816_v37, %v17230_v16  ;;  %v9592_v26 = vadd.f32 %v17231_v10, %v9496_v45  ;;  %v17235_v55 = vunpack.c.l.bf16 %v16624_v11  ;;  %v17236_v38 = vunpack.c.h.bf16 %v16624_v11 }
 0x573   : > { %v9593_v60 = vadd.f32 %v17232_v59, %v9497_v7  ;;  %v9595_v35 = vadd.f32 %v17234_v1, %v9499_v21  ;;  %v17237_v37 = vunpack.c.l.bf16 %v16627_v8  ;;  %v17238_v19 = vunpack.c.h.bf16 %v16627_v8  ;;  %9626 = vst [vmem:[%s16776_s20 + $0x10] sm:$0xff] %v9594_v48 }
 0x574   : > { %v9596_v40 = vadd.f32 %v17235_v55, %v9500_v56  ;;  %v9597_v36 = vadd.f32 %v17236_v38, %v9501_v49  ;;  %v17239_v39 = vunpack.c.l.bf16 %v16630_v29  ;;  %v17240_v21 = vunpack.c.h.bf16 %v16630_v29  ;;  %9624 = vst [vmem:[%s16776_s20] sm:$0xff] %v9592_v26 }
 0x575   : > { %v9598_v45 = vadd.f32 %v17237_v37, %v9502_v24  ;;  %v9599_v7 = vadd.f32 %v17238_v19, %v9503_v32  ;;  %v17241_v56 = vunpack.c.l.bf16 %v16634_v3  ;;  %v17242_v49 = vunpack.c.h.bf16 %v16634_v3  ;;  %9625 = vst [vmem:[%s16776_s20 + $0x8] sm:$0xff] %v9593_v60  ;;  %9627 = vst [vmem:[%s16776_s20 + $0x18] sm:$0xff] %v9595_v35 }
 0x576   : > { %v9600_v23 = vadd.f32 %v17239_v39, %v9504_v6  ;;  %v9601_v52 = vadd.f32 %v17240_v21, %v9505_v41  ;;  %v17243_v32 = vunpack.c.l.bf16 %v16637_v47  ;;  %v17244_v8 = vunpack.c.h.bf16 %v16637_v47  ;;  %9628 = vst [vmem:[%s16776_s20 + $0x20] sm:$0xff] %v9596_v40  ;;  %9629 = vst [vmem:[%s16776_s20 + $0x28] sm:$0xff] %v9597_v36 }
 0x577   : > { %v9602_v11 = vadd.f32 %v17241_v56, %v9506_v63  ;;  %v9603_v4 = vadd.f32 %v17242_v49, %v9507_v44  ;;  %v17245_v6 = vunpack.c.l.bf16 %v16644_v53  ;;  %v17246_v3 = vunpack.c.h.bf16 %v16644_v53  ;;  %9630 = vst [vmem:[%s16776_s20 + $0x30] sm:$0xff] %v9598_v45  ;;  %9631 = vst [vmem:[%s16776_s20 + $0x38] sm:$0xff] %v9599_v7 }
 0x578   : > { %v9604_v24 = vadd.f32 %v17243_v32, %v9508_v17  ;;  %v9605_v29 = vadd.f32 %v17244_v8, %v9509_v43  ;;  %v17247_v44 = vunpack.c.l.bf16 %v16647_v5  ;;  %v17248_v47 = vunpack.c.h.bf16 %v16647_v5  ;;  %9632 = vst [vmem:[%s16776_s20 + $0x40] sm:$0xff] %v9600_v23  ;;  %9633 = vst [vmem:[%s16776_s20 + $0x48] sm:$0xff] %v9601_v52 }
 0x579   : > { %v9606_v41 = vadd.f32 %v17245_v6, %v9510_v30  ;;  %v9607_v63 = vadd.f32 %v17246_v3, %v9511_v28  ;;  %v17249_v16 = vunpack.c.l.bf16 %v16654_v42  ;;  %v17250_v53 = vunpack.c.h.bf16 %v16654_v42  ;;  %9634 = vst [vmem:[%s16776_s20 + $0x50] sm:$0xff] %v9602_v11  ;;  %9635 = vst [vmem:[%s16776_s20 + $0x58] sm:$0xff] %v9603_v4 }
 0x57a   : > { %v9608_v17 = vadd.f32 %v17247_v44, %v9512_v27  ;;  %v9609_v43 = vadd.f32 %v17248_v47, %v9513_v31  ;;  %v17251_v10 = vunpack.c.l.bf16 %v16657_v33  ;;  %v17252_v5 = vunpack.c.h.bf16 %v16657_v33  ;;  %9636 = vst [vmem:[%s16776_s20 + $0x60] sm:$0xff] %v9604_v24  ;;  %9637 = vst [vmem:[%s16776_s20 + $0x68] sm:$0xff] %v9605_v29 }
 0x57b   : > { %v9610_v30 = vadd.f32 %v17249_v16, %v9514_v2  ;;  %v9611_v28 = vadd.f32 %v17250_v53, %v9515_v34  ;;  %v17253_v26 = vunpack.c.l.bf16 %v16664_v50  ;;  %v17254_v42 = vunpack.c.h.bf16 %v16664_v50  ;;  %9638 = vst [vmem:[%s16776_s20 + $0x70] sm:$0xff] %v9606_v41  ;;  %9639 = vst [vmem:[%s16776_s20 + $0x78] sm:$0xff] %v9607_v63 }
 0x57c   : > { %v9612_v27 = vadd.f32 %v17251_v10, %v9516_v57  ;;  %v9613_v31 = vadd.f32 %v17252_v5, %v9517_v46  ;;  %v17255_v59 = vunpack.c.l.bf16 %v16667_v12  ;;  %v17256_v33 = vunpack.c.h.bf16 %v16667_v12  ;;  %9640 = vst [vmem:[%s16776_s20 + $0x80] sm:$0xff] %v9608_v17  ;;  %9641 = vst [vmem:[%s16776_s20 + $0x88] sm:$0xff] %v9609_v43 }
 0x57d   : > { %v9614_v2 = vadd.f32 %v17253_v26, %v9518_v20  ;;  %v9615_v34 = vadd.f32 %v17254_v42, %v9519_v9  ;;  %v17257_v20 = vunpack.c.l.bf16 %v16674_v15  ;;  %v17258_v9 = vunpack.c.h.bf16 %v16674_v15  ;;  %9642 = vst [vmem:[%s16776_s20 + $0x90] sm:$0xff] %v9610_v30  ;;  %9643 = vst [vmem:[%s16776_s20 + $0x98] sm:$0xff] %v9611_v28 }
 0x57e   : > { %v9616_v57 = vadd.f32 %v17255_v59, %v9520_v18  ;;  %v9617_v46 = vadd.f32 %v17256_v33, %v9521_v51  ;;  %v17259_v12 = vunpack.c.l.bf16 %v16677_v22  ;;  %v17260_v51 = vunpack.c.h.bf16 %v16677_v22  ;;  %9644 = vst [vmem:[%s16776_s20 + $0xa0] sm:$0xff] %v9612_v27  ;;  %9645 = vst [vmem:[%s16776_s20 + $0xa8] sm:$0xff] %v9613_v31 }
 0x57f   : > { %v9618_v50 = vadd.f32 %v17257_v20, %v9522_v13  ;;  %v9619_v60 = vadd.f32 %v17258_v9, %v9523_v25  ;;  %v17261_v13 = vunpack.c.l.bf16 %v16684_v58  ;;  %v17262_v25 = vunpack.c.h.bf16 %v16684_v58  ;;  %9646 = vst [vmem:[%s16776_s20 + $0xb0] sm:$0xff] %v9614_v2  ;;  %9647 = vst [vmem:[%s16776_s20 + $0xb8] sm:$0xff] %v9615_v34 }
 0x580   : > { %v9620_v18 = vadd.f32 %v17259_v12, %v9524_v61  ;;  %v9621_v54 = vadd.f32 %v17260_v51, %v9525_v62  ;;  %9648 = vst [vmem:[%s16776_s20 + $0xc0] sm:$0xff] %v9616_v57  ;;  %9649 = vst [vmem:[%s16776_s20 + $0xc8] sm:$0xff] %v9617_v46 }
 0x581   : > { %v9622_v15 = vadd.f32 %v17261_v13, %v9526_v0  ;;  %v9623_v48 = vadd.f32 %v17262_v25, %v9527_v14  ;;  %9650 = vst [vmem:[%s16776_s20 + $0xd0] sm:$0xff] %v9618_v50  ;;  %9651 = vst [vmem:[%s16776_s20 + $0xd8] sm:$0xff] %v9619_v60 }
 0x582   : > { %9652 = vst [vmem:[%s16776_s20 + $0xe0] sm:$0xff] %v9620_v18  ;;  %9653 = vst [vmem:[%s16776_s20 + $0xe8] sm:$0xff] %v9621_v54 }
 0x583   : > { %9654 = vst [vmem:[%s16776_s20 + $0xf0] sm:$0xff] %v9622_v15  ;;  %9655 = vst [vmem:[%s16776_s20 + $0xf8] sm:$0xff] %v9623_v48 }
 0x584 PF: > { %s13_s12 = sadd.s32 1, %s11892_s12  }
 0x585   : > { %p10_p4 = scmp.ge.s32.totalorder %s13_s12, 4  }
 0x587   :  { %12 = sbr.rel (!%p10_p4) target bundleno = 1 (0x1), region = 65 }

</bundles_post_ra>
